<compile_context>
chip_gen: v7x
topology: tpu7x:2x2x1
jax: 0.10.0
libtpu: 0.0.40
codegen_flags: <defaults>
</compile_context>

<pallas_src>
import functools

import jax
import jax.numpy as jnp
from jax.experimental import pallas as pl
from jax.experimental.pallas import tpu as pltpu

# ---------------------------------------------------------------------------
# Problem sizes (small, consistent with the module's forward)
# ---------------------------------------------------------------------------
N_NODES = 16
N_EDGES = 512
TE = 128                        # edges per tile (grid over edge tiles)
CORE_SPLITS = 2                 # leading core-parallel grid axis (v7x: 2 TCs)

S_IN_NODE = 16                  # node scalar dim
V_IN_NODE = 4                   # node vector channels
S_EDGE = 8                      # edge scalar dim
V_EDGE = 2                      # edge vector channels
S_OUT = 16                      # output scalar dim
V_OUT = 4                       # output vector channels

S_MSG_IN = 2 * S_IN_NODE + S_EDGE      # 40  (scalars_in_dim)
V_MSG_IN = 2 * V_IN_NODE + V_EDGE      # 10  (vectors_in_dim)

NUM_MESSAGE_LAYERS = 3
# bottleneck = default_bottleneck = 1  ->  hidden = max(vector_in, vector_out)
HIDDEN0 = max(V_MSG_IN, V_OUT)         # 10 (first GCP layer)
HIDDEN = max(V_OUT, V_OUT)             # 4  (later GCP layers)

D_OUT = S_OUT + 3 * V_OUT              # 28 aggregated columns per node
D_PAD = 128                            # lane-dense padded output width
LANE = 128                             # weight-slab lane width

EPS = 1e-8  # TODO(synk): eps-inside-sqrt mirrors the in-file JAX reference; verify
            # against gcpnet's actual safe_norm before trusting near-zero vectors.


def _silu(x):
    return x * jax.nn.sigmoid(x)


# ---------------------------------------------------------------------------
# Pallas kernel
# ---------------------------------------------------------------------------
def gcp_mp_kernel(s_ref, v_ref, fr_ref, oh_ref, w_ref, out_ref,
                  *, layer_layouts, attn_layout):
    j = pl.program_id(1)

    def wslice(entry):
        off, r, c = entry
        return w_ref[off:off + r, 0:c]

    s = s_ref[...]                     # [TE, S_in]
    v = v_ref[...]                     # [3*TE, V_in]  (x | y | z stacked on sublanes)
    frb = fr_ref[...]                  # [3*TE, 9]     frames broadcast, col 3*o+i

    def gcp_layer(s_in, v_stack, lay):
        # fused vector_down + vector_down_frames (frame cols first): [Vin, 9+HID]
        wdf = wslice(lay["wdf"])
        down = jnp.dot(v_stack, wdf, preferred_element_type=jnp.float32)   # [3TE, 9+HID]
        dx = down[0:TE]
        dy = down[TE:2 * TE]
        dz = down[2 * TE:3 * TE]
        # safe_norm over xyz (the 9 frame columns get zero scalar_out rows -> harmless)
        vnorm_full = jnp.sqrt(dx * dx + dy * dy + dz * dz + EPS)           # [TE, 9+HID]
        # scalarize: sh[e, 3o+i] = sum_c frames[e, i, c] * vdf[e, c, o]
        shp = frb * down[:, 0:9]                                           # [3TE, 9]
        sh = shp[0:TE] + shp[TE:2 * TE] + shp[2 * TE:3 * TE]               # [TE, 9]
        # scalar_out with row-split weights (no lane concat of merged features)
        spre = (jnp.dot(s_in, wslice(lay["ws_s"]), preferred_element_type=jnp.float32)
                + jnp.dot(vnorm_full, wslice(lay["ws_v"]), preferred_element_type=jnp.float32)
                + jnp.dot(sh, wslice(lay["ws_h"]), preferred_element_type=jnp.float32)
                + wslice(lay["bs"]))                                        # [TE, S_OUT]
        s_act = _silu(spre)
        # vector_up on the full stacked slab (zero rows blank the frame columns)
        vu = jnp.dot(down, wslice(lay["wu"]), preferred_element_type=jnp.float32)  # [3TE, Vout]
        # vector gate
        gate = (jnp.dot(s_act, wslice(lay["wg"]), preferred_element_type=jnp.float32)
                + wslice(lay["bg"]))                                        # [TE, Vout]
        sg = jax.nn.sigmoid(gate)
        sg3 = jnp.concatenate([sg, sg, sg], axis=0)                         # [3TE, Vout]
        return s_act, vu * sg3

    # message_fusion[0] + residual stack of remaining GCP layers
    rs, rv = gcp_layer(s, v, layer_layouts[0])
    for lay in layer_layouts[1:]:
        ns, nv = gcp_layer(rs, rv, lay)
        rs = rs + ns
        rv = rv + nv

    # scalar message attention: sigmoid(Linear(scalar -> 1)) * scalar, with the
    # 1-wide linear pre-replicated across S_OUT lanes (no lane broadcast needed).
    attn = jax.nn.sigmoid(
        jnp.dot(rs, wslice(attn_layout["wa"]), preferred_element_type=jnp.float32)
        + wslice(attn_layout["ba"]))                                        # [TE, S_OUT]
    rs = rs * attn

    # lane-dense message [TE, 128]: [scalar(16) | vx(4) | vy(4) | vz(4) | zeros]
    pad = jnp.zeros((TE, D_PAD - D_OUT), jnp.float32)
    msg = jnp.concatenate([rs, rv[0:TE], rv[TE:2 * TE], rv[2 * TE:3 * TE], pad],
                          axis=-1)                                          # [TE, D_PAD]

    # scatter-sum by destination node as a one-hot matmul on the MXU
    contrib = jax.lax.dot_general(oh_ref[...], msg, (((0,), (0,)), ((), ())),
                                  preferred_element_type=jnp.float32)       # [N, D_PAD]

    @pl.when(j == 0)
    def _():
        out_ref[...] = contrib

    @pl.when(j != 0)
    def _():
        out_ref[...] += contrib


# ---------------------------------------------------------------------------
# Parameter construction (deterministic, synthetic)
# ---------------------------------------------------------------------------
def init_params(key):
    keys = jax.random.split(key, 24)
    kit = iter(keys)

    def lin(k, out_d, in_d):
        return (1.0 / jnp.sqrt(in_d)) * jax.random.normal(k, (out_d, in_d), jnp.float32)

    dims = [(S_MSG_IN, V_MSG_IN, HIDDEN0, S_OUT, V_OUT)]
    for _ in range(NUM_MESSAGE_LAYERS - 1):
        dims.append((S_OUT, V_OUT, HIDDEN, S_OUT, V_OUT))

    layer_params = []
    for (sin, vin, hid, sout, vout) in dims:
        wd = lin(next(kit), hid, vin)                       # vector_down
        wf = lin(next(kit), 3, vin)                         # vector_down_frames
        ws = lin(next(kit), sout, sin + hid + 9)            # scalar_out
        bs = 0.01 * jax.random.normal(next(kit), (sout,), jnp.float32)
        wu = lin(next(kit), vout, hid)                      # vector_up
        wg = lin(next(kit), vout, sout)                     # vector_out_scale
        bg = 0.01 * jax.random.normal(next(kit), (vout,), jnp.float32)
        layer_params.append((wd, wf, ws, bs, wu, wg, bg))

    wa = lin(next(kit), 1, S_OUT)                           # scalar_message_attention
    ba = 0.01 * jax.random.normal(next(kit), (1,), jnp.float32)
    return layer_params, (wa, ba)


def pack_weight_slab(layer_params, attn_params):
    """Pack all weights/biases into one zero-padded [rows, 128] f32 slab.

    Returns (slab, layer_layouts, attn_layout); layouts hold static
    (row_offset, n_rows, n_cols) tuples used for in-kernel slicing.
    """
    blocks = []
    offset = 0

    def add(mat):
        nonlocal offset
        mat = mat.astype(jnp.float32)
        r, c = mat.shape
        r_pad = ((r + 7) // 8) * 8
        blk = jnp.zeros((r_pad, LANE), jnp.float32).at[:r, :c].set(mat)
        blocks.append(blk)
        entry = (offset, r, c)
        offset += r_pad
        return entry

    layer_layouts = []
    for (wd, wf, ws, bs, wu, wg, bg) in layer_params:
        hid, vin = wd.shape
        sout = ws.shape[0]
        sin = ws.shape[1] - hid - 9
        vout = wu.shape[0]
        # fused down weight: 9 replicated frame columns first (col 3*o+i = wf.T[:, o]),
        # then the hidden (vector_down) columns.
        wf_rep = jnp.repeat(wf.T, 3, axis=1)                  # [vin, 9]
        wdf = jnp.concatenate([wf_rep, wd.T], axis=1)         # [vin, 9+hid]
        ws_t = ws.T                                           # [sin+hid+9, sout]
        ws_v = jnp.concatenate(
            [jnp.zeros((9, sout), jnp.float32), ws_t[sin:sin + hid]], axis=0)   # [9+hid, sout]
        wu_e = jnp.concatenate(
            [jnp.zeros((9, vout), jnp.float32), wu.T], axis=0)                  # [9+hid, vout]
        lay = {
            "wdf": add(wdf),
            "ws_s": add(ws_t[:sin]),
            "ws_v": add(ws_v),
            "ws_h": add(ws_t[sin + hid:]),
            "bs": add(bs.reshape(1, -1)),
            "wu": add(wu_e),
            "wg": add(wg.T),
            "bg": add(bg.reshape(1, -1)),
        }
        layer_layouts.append(lay)

    wa, ba = attn_params
    sout = wa.shape[1]
    attn_layout = {
        "wa": add(jnp.tile(wa.T, (1, sout))),                 # replicate 1-wide linear
        "ba": add(jnp.tile(ba.reshape(1, 1), (1, sout))),
    }
    slab = jnp.concatenate(blocks, axis=0)
    return slab, layer_layouts, attn_layout


# ---------------------------------------------------------------------------
# Wrapper around pallas_call
# ---------------------------------------------------------------------------
@jax.jit
def gcp_message_passing_pallas(node_s, node_v, edge_s, edge_v, edge_index, frames,
                               layer_params, attn_params):
    row = edge_index[0]
    col = edge_index[1]
    E = row.shape[0]
    assert E % TE == 0
    num_tiles = E // TE
    assert num_tiles % CORE_SPLITS == 0
    tiles_per_core = num_tiles // CORE_SPLITS

    # Gather + concat (plain-JAX glue):
    # ScalarVector(s_row, v_row).concat((edge, (s_col, v_col)))
    # TODO(synk): at realistic E, fuse this gather into the kernel (scalar-prefetch
    # row/col indices + manual DMA) instead of materializing [E,40]/[E,10,3] in HBM.
    s_msg = jnp.concatenate([node_s[row], edge_s, node_s[col]], axis=-1)    # [E, 40]
    v_msg = jnp.concatenate([node_v[row], edge_v, node_v[col]], axis=-2)    # [E, 10, 3]

    # Stack x/y/z on the sublane axis, grouped per edge tile:
    # rows of tile t = [x(t) ; y(t) ; z(t)], each TE tall.
    v_cxe = jnp.transpose(v_msg, (2, 0, 1))                                 # [3, E, Vin]
    v_tiles = (v_cxe.reshape(3, num_tiles, TE, V_MSG_IN)
               .transpose(1, 0, 2, 3)
               .reshape(num_tiles * 3 * TE, V_MSG_IN))

    # Frames pre-broadcast to 9 lanes: fr_b[c][:, 3*o+i] = frames[:, i, c]
    fr_b = jnp.tile(jnp.transpose(frames, (2, 0, 1)), (1, 1, 3))            # [3, E, 9]
    fr_tiles = (fr_b.reshape(3, num_tiles, TE, 9)
                .transpose(1, 0, 2, 3)
                .reshape(num_tiles * 3 * TE, 9))

    # Scatter matrix for the segment-sum aggregation (reduce_function='sum')
    onehot = jax.nn.one_hot(row, N_NODES, dtype=jnp.float32)                # [E, N]

    wslab, layer_layouts, attn_layout = pack_weight_slab(layer_params, attn_params)

    kernel = functools.partial(gcp_mp_kernel,
                               layer_layouts=layer_layouts,
                               attn_layout=attn_layout)

    tile_idx = lambda c, j: (c * tiles_per_core + j, 0)

    agg = pl.pallas_call(
        kernel,
        out_shape=jax.ShapeDtypeStruct((CORE_SPLITS * N_NODES, D_PAD), jnp.float32),
        grid_spec=pltpu.PrefetchScalarGridSpec(
            num_scalar_prefetch=0,
            grid=(CORE_SPLITS, tiles_per_core),
            in_specs=[
                pl.BlockSpec((TE, S_MSG_IN), tile_idx),          # scalar message
                pl.BlockSpec((3 * TE, V_MSG_IN), tile_idx),      # stacked xyz vectors
                pl.BlockSpec((3 * TE, 9), tile_idx),             # broadcast frames
                pl.BlockSpec((TE, N_NODES), tile_idx),           # one-hot scatter
                pl.BlockSpec(wslab.shape, lambda c, j: (0, 0)),  # packed weights
            ],
            out_specs=pl.BlockSpec((N_NODES, D_PAD), lambda c, j: (c, 0)),
        ),
        compiler_params=pltpu.CompilerParams(
            dimension_semantics=("parallel", "arbitrary"),
            vmem_limit_bytes=32 * 1024 * 1024),
    )(s_msg, v_tiles, fr_tiles, onehot, wslab)

    # Reduce per-core partials, drop lane padding, recover ScalarVector.
    agg = agg.reshape(CORE_SPLITS, N_NODES, D_PAD).sum(axis=0)
    scalar = agg[:, :S_OUT]
    vector = jnp.stack([agg[:, S_OUT:S_OUT + V_OUT],
                        agg[:, S_OUT + V_OUT:S_OUT + 2 * V_OUT],
                        agg[:, S_OUT + 2 * V_OUT:S_OUT + 3 * V_OUT]], axis=-1)
    return scalar, vector


# ---------------------------------------------------------------------------
# Pure-JAX reference (mirrors the PyTorch semantics)
# ---------------------------------------------------------------------------
def _gcp_layer_ref(s, v, frames, prm):
    wd, wf, ws, bs, wu, wg, bg = prm
    v_pre = jnp.swapaxes(v, -1, -2)                      # [E, 3, Vin]
    vh = jnp.einsum('eci,hi->ech', v_pre, wd)            # vector_down
    vnorm = jnp.sqrt(jnp.sum(vh * vh, axis=-2) + EPS)    # safe_norm over xyz
    vdf = jnp.einsum('eci,oi->eco', v_pre, wf)           # vector_down_frames
    R = jnp.einsum('eic,eco->eio', frames, vdf)          # frames @ vdf
    sh = jnp.swapaxes(R, -1, -2).reshape(R.shape[0], 9)
    merged = jnp.concatenate([s, vnorm, sh], axis=-1)
    spre = merged @ ws.T + bs
    vu = jnp.swapaxes(jnp.einsum('ech,oh->eco', vh, wu), -1, -2)   # [E, Vout, 3]
    gate = _silu(spre) @ wg.T + bg
    vout = vu * jax.nn.sigmoid(gate)[..., None]
    return _silu(spre), vout


def gcp_message_passing_ref(node_s, node_v, edge_s, edge_v, edge_index, frames,
                            layer_params, attn_params):
    row, col = edge_index[0], edge_index[1]
    s_msg = jnp.concatenate([node_s[row], edge_s, node_s[col]], axis=-1)
    v_msg = jnp.concatenate([node_v[row], edge_v, node_v[col]], axis=-2)
    rs, rv = _gcp_layer_ref(s_msg, v_msg, frames, layer_params[0])
    for prm in layer_params[1:]:
        ns, nv = _gcp_layer_ref(rs, rv, frames, prm)
        rs, rv = rs + ns, rv + nv
    wa, ba = attn_params
    rs = rs * jax.nn.sigmoid(rs @ wa.T + ba)
    flat = jnp.concatenate([rs, rv.reshape(rv.shape[0], -1)], axis=-1)
    agg = jax.ops.segment_sum(flat, row, num_segments=N_NODES)
    return agg[:, :S_OUT], agg[:, S_OUT:].reshape(N_NODES, V_OUT, 3)


# ---------------------------------------------------------------------------
if __name__ == "__main__":
    key = jax.random.PRNGKey(0)
    k = jax.random.split(key, 8)
    node_s = jax.random.normal(k[0], (N_NODES, S_IN_NODE), jnp.float32)
    node_v = jax.random.normal(k[1], (N_NODES, V_IN_NODE, 3), jnp.float32)
    edge_s = jax.random.normal(k[2], (N_EDGES, S_EDGE), jnp.float32)
    edge_v = jax.random.normal(k[3], (N_EDGES, V_EDGE, 3), jnp.float32)
    edge_index = jax.random.randint(k[4], (2, N_EDGES), 0, N_NODES, jnp.int32)
    raw_frames = jax.random.normal(k[5], (N_EDGES, 3, 3), jnp.float32)
    frames = raw_frames / jnp.linalg.norm(raw_frames, axis=-1, keepdims=True)

    layer_params, attn_params = init_params(k[6])

    out_s, out_v = gcp_message_passing_pallas(node_s, node_v, edge_s, edge_v,
                                              edge_index, frames,
                                              layer_params, attn_params)
    jax.block_until_ready((out_s, out_v))

    ref_s, ref_v = gcp_message_passing_ref(node_s, node_v, edge_s, edge_v,
                                           edge_index, frames,
                                           layer_params, attn_params)

    assert out_s.shape == (N_NODES, S_OUT)
    assert out_v.shape == (N_NODES, V_OUT, 3)
    assert jnp.allclose(out_s, ref_s, rtol=3e-3, atol=3e-3), \
        f"scalar mismatch, max abs diff = {float(jnp.max(jnp.abs(out_s - ref_s)))}"
    assert jnp.allclose(out_v, ref_v, rtol=3e-3, atol=3e-3), \
        f"vector mismatch, max abs diff = {float(jnp.max(jnp.abs(out_v - ref_v)))}"
    print("KERNEL_OK")
</pallas_src>

<mosaic_0001>
module attributes {stable_mosaic.version = 11 : i64} {
  func.func @gcp_mp_kernel(%arg0: i32, %arg1: i32, %arg2: memref<128x40xf32, #tpu.memory_space<vmem>>, %arg3: memref<384x10xf32, #tpu.memory_space<vmem>>, %arg4: memref<384x9xf32, #tpu.memory_space<vmem>>, %arg5: memref<128x16xf32, #tpu.memory_space<vmem>>, %arg6: memref<384x128xf32, #tpu.memory_space<vmem>>, %arg7: memref<16x128xf32, #tpu.memory_space<vmem>>) attributes {dimension_semantics = [#tpu.dimension_semantics<parallel>, #tpu.dimension_semantics<arbitrary>], iteration_bounds = array<i64: 2, 2>, scalar_prefetch = 0 : i64, scratch_operands = 0 : i64, tpu.core_type = #tpu.core_type<tc>, window_params = [{transform_indices = @transform_0, window_bounds = array<i64: 128, 40>}, {transform_indices = @transform_1, window_bounds = array<i64: 384, 10>}, {transform_indices = @transform_2, window_bounds = array<i64: 384, 9>}, {transform_indices = @transform_3, window_bounds = array<i64: 128, 16>}, {pipeline_mode = #tpu.pipeline_mode<synchronous>, transform_indices = @transform_4, window_bounds = array<i64: 384, 128>}, {transform_indices = @transform_5, window_bounds = array<i64: 16, 128>}]} {
    %c0 = arith.constant 0 : index
    %c0_0 = arith.constant 0 : index
    %0 = vector.load %arg2[%c0, %c0_0] : memref<128x40xf32, #tpu.memory_space<vmem>>, vector<128x40xf32>
    %c0_1 = arith.constant 0 : index
    %c0_2 = arith.constant 0 : index
    %1 = vector.load %arg3[%c0_1, %c0_2] : memref<384x10xf32, #tpu.memory_space<vmem>>, vector<384x10xf32>
    %c0_3 = arith.constant 0 : index
    %c0_4 = arith.constant 0 : index
    %2 = vector.load %arg4[%c0_3, %c0_4] : memref<384x9xf32, #tpu.memory_space<vmem>>, vector<384x9xf32>
    %c0_5 = arith.constant 0 : index
    %c0_6 = arith.constant 0 : index
    %3 = vector.load %arg6[%c0_5, %c0_6] : memref<384x128xf32, #tpu.memory_space<vmem>>, vector<10x19xf32>
    %cst = arith.constant dense<0.000000e+00> : vector<384x19xf32>
    %4 = tpu.matmul %1, %3, %cst {dimension_numbers = #tpu.dot_dimension_numbers<[1], [0], [0], [1], [0, 0, 1, 1], [], []>} : vector<384x10xf32>, vector<10x19xf32>, vector<384x19xf32> -> vector<384x19xf32>
    %5 = vector.extract_strided_slice %4 {offsets = [0, 0], sizes = [128, 19], strides = [1, 1]} : vector<384x19xf32> to vector<128x19xf32>
    %6 = vector.extract_strided_slice %4 {offsets = [128, 0], sizes = [128, 19], strides = [1, 1]} : vector<384x19xf32> to vector<128x19xf32>
    %7 = vector.extract_strided_slice %4 {offsets = [256, 0], sizes = [128, 19], strides = [1, 1]} : vector<384x19xf32> to vector<128x19xf32>
    %8 = arith.mulf %5, %5 : vector<128x19xf32>
    %9 = arith.mulf %6, %6 : vector<128x19xf32>
    %10 = arith.addf %8, %9 : vector<128x19xf32>
    %11 = arith.mulf %7, %7 : vector<128x19xf32>
    %12 = arith.addf %10, %11 : vector<128x19xf32>
    %cst_7 = arith.constant 9.99999993E-9 : f32
    %13 = vector.broadcast %cst_7 : f32 to vector<128x19xf32>
    %14 = arith.addf %12, %13 : vector<128x19xf32>
    %15 = math.sqrt %14 : vector<128x19xf32>
    %16 = vector.extract_strided_slice %4 {offsets = [0, 0], sizes = [384, 9], strides = [1, 1]} : vector<384x19xf32> to vector<384x9xf32>
    %17 = arith.mulf %2, %16 : vector<384x9xf32>
    %18 = vector.extract_strided_slice %17 {offsets = [0, 0], sizes = [128, 9], strides = [1, 1]} : vector<384x9xf32> to vector<128x9xf32>
    %19 = vector.extract_strided_slice %17 {offsets = [128, 0], sizes = [128, 9], strides = [1, 1]} : vector<384x9xf32> to vector<128x9xf32>
    %20 = arith.addf %18, %19 : vector<128x9xf32>
    %21 = vector.extract_strided_slice %17 {offsets = [256, 0], sizes = [128, 9], strides = [1, 1]} : vector<384x9xf32> to vector<128x9xf32>
    %22 = arith.addf %20, %21 : vector<128x9xf32>
    %c16 = arith.constant 16 : index
    %c0_8 = arith.constant 0 : index
    %23 = vector.load %arg6[%c16, %c0_8] : memref<384x128xf32, #tpu.memory_space<vmem>>, vector<40x16xf32>
    %cst_9 = arith.constant dense<0.000000e+00> : vector<128x16xf32>
    %24 = tpu.matmul %0, %23, %cst_9 {dimension_numbers = #tpu.dot_dimension_numbers<[1], [0], [0], [1], [0, 0, 1, 1], [], []>} : vector<128x40xf32>, vector<40x16xf32>, vector<128x16xf32> -> vector<128x16xf32>
    %c56 = arith.constant 56 : index
    %c0_10 = arith.constant 0 : index
    %25 = vector.load %arg6[%c56, %c0_10] : memref<384x128xf32, #tpu.memory_space<vmem>>, vector<19x16xf32>
    %cst_11 = arith.constant dense<0.000000e+00> : vector<128x16xf32>
    %26 = tpu.matmul %15, %25, %cst_11 {dimension_numbers = #tpu.dot_dimension_numbers<[1], [0], [0], [1], [0, 0, 1, 1], [], []>} : vector<128x19xf32>, vector<19x16xf32>, vector<128x16xf32> -> vector<128x16xf32>
    %27 = arith.addf %24, %26 : vector<128x16xf32>
    %c80 = arith.constant 80 : index
    %c0_12 = arith.constant 0 : index
    %28 = vector.load %arg6[%c80, %c0_12] : memref<384x128xf32, #tpu.memory_space<vmem>>, vector<9x16xf32>
    %cst_13 = arith.constant dense<0.000000e+00> : vector<128x16xf32>
    %29 = tpu.matmul %22, %28, %cst_13 {dimension_numbers = #tpu.dot_dimension_numbers<[1], [0], [0], [1], [0, 0, 1, 1], [], []>} : vector<128x9xf32>, vector<9x16xf32>, vector<128x16xf32> -> vector<128x16xf32>
    %30 = arith.addf %27, %29 : vector<128x16xf32>
    %c96 = arith.constant 96 : index
    %c0_14 = arith.constant 0 : index
    %31 = vector.load %arg6[%c96, %c0_14] : memref<384x128xf32, #tpu.memory_space<vmem>>, vector<1x16xf32>
    %32 = vector.broadcast %31 : vector<1x16xf32> to vector<128x16xf32>
    %33 = arith.addf %30, %32 : vector<128x16xf32>
    %34 = arith.negf %33 : vector<128x16xf32>
    %35 = math.exp %34 : vector<128x16xf32>
    %cst_15 = arith.constant 1.000000e+00 : f32
    %36 = vector.broadcast %cst_15 : f32 to vector<128x16xf32>
    %37 = arith.addf %36, %35 : vector<128x16xf32>
    %38 = arith.divf %36, %37 : vector<128x16xf32>
    %39 = arith.mulf %33, %38 : vector<128x16xf32>
    %c104 = arith.constant 104 : index
    %c0_16 = arith.constant 0 : index
    %40 = vector.load %arg6[%c104, %c0_16] : memref<384x128xf32, #tpu.memory_space<vmem>>, vector<19x4xf32>
    %cst_17 = arith.constant dense<0.000000e+00> : vector<384x4xf32>
    %41 = tpu.matmul %4, %40, %cst_17 {dimension_numbers = #tpu.dot_dimension_numbers<[1], [0], [0], [1], [0, 0, 1, 1], [], []>} : vector<384x19xf32>, vector<19x4xf32>, vector<384x4xf32> -> vector<384x4xf32>
    %c128 = arith.constant 128 : index
    %c0_18 = arith.constant 0 : index
    %42 = vector.load %arg6[%c128, %c0_18] : memref<384x128xf32, #tpu.memory_space<vmem>>, vector<16x4xf32>
    %cst_19 = arith.constant dense<0.000000e+00> : vector<128x4xf32>
    %43 = tpu.matmul %39, %42, %cst_19 {dimension_numbers = #tpu.dot_dimension_numbers<[1], [0], [0], [1], [0, 0, 1, 1], [], []>} : vector<128x16xf32>, vector<16x4xf32>, vector<128x4xf32> -> vector<128x4xf32>
    %c144 = arith.constant 144 : index
    %c0_20 = arith.constant 0 : index
    %44 = vector.load %arg6[%c144, %c0_20] : memref<384x128xf32, #tpu.memory_space<vmem>>, vector<1x4xf32>
    %45 = vector.broadcast %44 : vector<1x4xf32> to vector<128x4xf32>
    %46 = arith.addf %43, %45 : vector<128x4xf32>
    %47 = arith.negf %46 : vector<128x4xf32>
    %48 = math.exp %47 : vector<128x4xf32>
    %cst_21 = arith.constant 1.000000e+00 : f32
    %49 = vector.broadcast %cst_21 : f32 to vector<128x4xf32>
    %50 = arith.addf %49, %48 : vector<128x4xf32>
    %51 = arith.divf %49, %50 : vector<128x4xf32>
    %52 = tpu.concatenate %51, %51, %51 in 0 : vector<128x4xf32>, vector<128x4xf32>, vector<128x4xf32> -> vector<384x4xf32>
    %53 = arith.mulf %41, %52 : vector<384x4xf32>
    %c152 = arith.constant 152 : index
    %c0_22 = arith.constant 0 : index
    %54 = vector.load %arg6[%c152, %c0_22] : memref<384x128xf32, #tpu.memory_space<vmem>>, vector<4x13xf32>
    %cst_23 = arith.constant dense<0.000000e+00> : vector<384x13xf32>
    %55 = tpu.matmul %53, %54, %cst_23 {dimension_numbers = #tpu.dot_dimension_numbers<[1], [0], [0], [1], [0, 0, 1, 1], [], []>} : vector<384x4xf32>, vector<4x13xf32>, vector<384x13xf32> -> vector<384x13xf32>
    %56 = vector.extract_strided_slice %55 {offsets = [0, 0], sizes = [128, 13], strides = [1, 1]} : vector<384x13xf32> to vector<128x13xf32>
    %57 = vector.extract_strided_slice %55 {offsets = [128, 0], sizes = [128, 13], strides = [1, 1]} : vector<384x13xf32> to vector<128x13xf32>
    %58 = vector.extract_strided_slice %55 {offsets = [256, 0], sizes = [128, 13], strides = [1, 1]} : vector<384x13xf32> to vector<128x13xf32>
    %59 = arith.mulf %56, %56 : vector<128x13xf32>
    %60 = arith.mulf %57, %57 : vector<128x13xf32>
    %61 = arith.addf %59, %60 : vector<128x13xf32>
    %62 = arith.mulf %58, %58 : vector<128x13xf32>
    %63 = arith.addf %61, %62 : vector<128x13xf32>
    %cst_24 = arith.constant 9.99999993E-9 : f32
    %64 = vector.broadcast %cst_24 : f32 to vector<128x13xf32>
    %65 = arith.addf %63, %64 : vector<128x13xf32>
    %66 = math.sqrt %65 : vector<128x13xf32>
    %67 = vector.extract_strided_slice %55 {offsets = [0, 0], sizes = [384, 9], strides = [1, 1]} : vector<384x13xf32> to vector<384x9xf32>
    %68 = arith.mulf %2, %67 : vector<384x9xf32>
    %69 = vector.extract_strided_slice %68 {offsets = [0, 0], sizes = [128, 9], strides = [1, 1]} : vector<384x9xf32> to vector<128x9xf32>
    %70 = vector.extract_strided_slice %68 {offsets = [128, 0], sizes = [128, 9], strides = [1, 1]} : vector<384x9xf32> to vector<128x9xf32>
    %71 = arith.addf %69, %70 : vector<128x9xf32>
    %72 = vector.extract_strided_slice %68 {offsets = [256, 0], sizes = [128, 9], strides = [1, 1]} : vector<384x9xf32> to vector<128x9xf32>
    %73 = arith.addf %71, %72 : vector<128x9xf32>
    %c160 = arith.constant 160 : index
    %c0_25 = arith.constant 0 : index
    %74 = vector.load %arg6[%c160, %c0_25] : memref<384x128xf32, #tpu.memory_space<vmem>>, vector<16x16xf32>
    %cst_26 = arith.constant dense<0.000000e+00> : vector<128x16xf32>
    %75 = tpu.matmul %39, %74, %cst_26 {dimension_numbers = #tpu.dot_dimension_numbers<[1], [0], [0], [1], [0, 0, 1, 1], [], []>} : vector<128x16xf32>, vector<16x16xf32>, vector<128x16xf32> -> vector<128x16xf32>
    %c176 = arith.constant 176 : index
    %c0_27 = arith.constant 0 : index
    %76 = vector.load %arg6[%c176, %c0_27] : memref<384x128xf32, #tpu.memory_space<vmem>>, vector<13x16xf32>
    %cst_28 = arith.constant dense<0.000000e+00> : vector<128x16xf32>
    %77 = tpu.matmul %66, %76, %cst_28 {dimension_numbers = #tpu.dot_dimension_numbers<[1], [0], [0], [1], [0, 0, 1, 1], [], []>} : vector<128x13xf32>, vector<13x16xf32>, vector<128x16xf32> -> vector<128x16xf32>
    %78 = arith.addf %75, %77 : vector<128x16xf32>
    %c192 = arith.constant 192 : index
    %c0_29 = arith.constant 0 : index
    %79 = vector.load %arg6[%c192, %c0_29] : memref<384x128xf32, #tpu.memory_space<vmem>>, vector<9x16xf32>
    %cst_30 = arith.constant dense<0.000000e+00> : vector<128x16xf32>
    %80 = tpu.matmul %73, %79, %cst_30 {dimension_numbers = #tpu.dot_dimension_numbers<[1], [0], [0], [1], [0, 0, 1, 1], [], []>} : vector<128x9xf32>, vector<9x16xf32>, vector<128x16xf32> -> vector<128x16xf32>
    %81 = arith.addf %78, %80 : vector<128x16xf32>
    %c208 = arith.constant 208 : index
    %c0_31 = arith.constant 0 : index
    %82 = vector.load %arg6[%c208, %c0_31] : memref<384x128xf32, #tpu.memory_space<vmem>>, vector<1x16xf32>
    %83 = vector.broadcast %82 : vector<1x16xf32> to vector<128x16xf32>
    %84 = arith.addf %81, %83 : vector<128x16xf32>
    %85 = arith.negf %84 : vector<128x16xf32>
    %86 = math.exp %85 : vector<128x16xf32>
    %cst_32 = arith.constant 1.000000e+00 : f32
    %87 = vector.broadcast %cst_32 : f32 to vector<128x16xf32>
    %88 = arith.addf %87, %86 : vector<128x16xf32>
    %89 = arith.divf %87, %88 : vector<128x16xf32>
    %90 = arith.mulf %84, %89 : vector<128x16xf32>
    %c216 = arith.constant 216 : index
    %c0_33 = arith.constant 0 : index
    %91 = vector.load %arg6[%c216, %c0_33] : memref<384x128xf32, #tpu.memory_space<vmem>>, vector<13x4xf32>
    %cst_34 = arith.constant dense<0.000000e+00> : vector<384x4xf32>
    %92 = tpu.matmul %55, %91, %cst_34 {dimension_numbers = #tpu.dot_dimension_numbers<[1], [0], [0], [1], [0, 0, 1, 1], [], []>} : vector<384x13xf32>, vector<13x4xf32>, vector<384x4xf32> -> vector<384x4xf32>
    %c232 = arith.constant 232 : index
    %c0_35 = arith.constant 0 : index
    %93 = vector.load %arg6[%c232, %c0_35] : memref<384x128xf32, #tpu.memory_space<vmem>>, vector<16x4xf32>
    %cst_36 = arith.constant dense<0.000000e+00> : vector<128x4xf32>
    %94 = tpu.matmul %90, %93, %cst_36 {dimension_numbers = #tpu.dot_dimension_numbers<[1], [0], [0], [1], [0, 0, 1, 1], [], []>} : vector<128x16xf32>, vector<16x4xf32>, vector<128x4xf32> -> vector<128x4xf32>
    %c248 = arith.constant 248 : index
    %c0_37 = arith.constant 0 : index
    %95 = vector.load %arg6[%c248, %c0_37] : memref<384x128xf32, #tpu.memory_space<vmem>>, vector<1x4xf32>
    %96 = vector.broadcast %95 : vector<1x4xf32> to vector<128x4xf32>
    %97 = arith.addf %94, %96 : vector<128x4xf32>
    %98 = arith.negf %97 : vector<128x4xf32>
    %99 = math.exp %98 : vector<128x4xf32>
    %cst_38 = arith.constant 1.000000e+00 : f32
    %100 = vector.broadcast %cst_38 : f32 to vector<128x4xf32>
    %101 = arith.addf %100, %99 : vector<128x4xf32>
    %102 = arith.divf %100, %101 : vector<128x4xf32>
    %103 = tpu.concatenate %102, %102, %102 in 0 : vector<128x4xf32>, vector<128x4xf32>, vector<128x4xf32> -> vector<384x4xf32>
    %104 = arith.mulf %92, %103 : vector<384x4xf32>
    %105 = arith.addf %39, %90 : vector<128x16xf32>
    %106 = arith.addf %53, %104 : vector<384x4xf32>
    %c256 = arith.constant 256 : index
    %c0_39 = arith.constant 0 : index
    %107 = vector.load %arg6[%c256, %c0_39] : memref<384x128xf32, #tpu.memory_space<vmem>>, vector<4x13xf32>
    %cst_40 = arith.constant dense<0.000000e+00> : vector<384x13xf32>
    %108 = tpu.matmul %106, %107, %cst_40 {dimension_numbers = #tpu.dot_dimension_numbers<[1], [0], [0], [1], [0, 0, 1, 1], [], []>} : vector<384x4xf32>, vector<4x13xf32>, vector<384x13xf32> -> vector<384x13xf32>
    %109 = vector.extract_strided_slice %108 {offsets = [0, 0], sizes = [128, 13], strides = [1, 1]} : vector<384x13xf32> to vector<128x13xf32>
    %110 = vector.extract_strided_slice %108 {offsets = [128, 0], sizes = [128, 13], strides = [1, 1]} : vector<384x13xf32> to vector<128x13xf32>
    %111 = vector.extract_strided_slice %108 {offsets = [256, 0], sizes = [128, 13], strides = [1, 1]} : vector<384x13xf32> to vector<128x13xf32>
    %112 = arith.mulf %109, %109 : vector<128x13xf32>
    %113 = arith.mulf %110, %110 : vector<128x13xf32>
    %114 = arith.addf %112, %113 : vector<128x13xf32>
    %115 = arith.mulf %111, %111 : vector<128x13xf32>
    %116 = arith.addf %114, %115 : vector<128x13xf32>
    %cst_41 = arith.constant 9.99999993E-9 : f32
    %117 = vector.broadcast %cst_41 : f32 to vector<128x13xf32>
    %118 = arith.addf %116, %117 : vector<128x13xf32>
    %119 = math.sqrt %118 : vector<128x13xf32>
    %120 = vector.extract_strided_slice %108 {offsets = [0, 0], sizes = [384, 9], strides = [1, 1]} : vector<384x13xf32> to vector<384x9xf32>
    %121 = arith.mulf %2, %120 : vector<384x9xf32>
    %122 = vector.extract_strided_slice %121 {offsets = [0, 0], sizes = [128, 9], strides = [1, 1]} : vector<384x9xf32> to vector<128x9xf32>
    %123 = vector.extract_strided_slice %121 {offsets = [128, 0], sizes = [128, 9], strides = [1, 1]} : vector<384x9xf32> to vector<128x9xf32>
    %124 = arith.addf %122, %123 : vector<128x9xf32>
    %125 = vector.extract_strided_slice %121 {offsets = [256, 0], sizes = [128, 9], strides = [1, 1]} : vector<384x9xf32> to vector<128x9xf32>
    %126 = arith.addf %124, %125 : vector<128x9xf32>
    %c264 = arith.constant 264 : index
    %c0_42 = arith.constant 0 : index
    %127 = vector.load %arg6[%c264, %c0_42] : memref<384x128xf32, #tpu.memory_space<vmem>>, vector<16x16xf32>
    %cst_43 = arith.constant dense<0.000000e+00> : vector<128x16xf32>
    %128 = tpu.matmul %105, %127, %cst_43 {dimension_numbers = #tpu.dot_dimension_numbers<[1], [0], [0], [1], [0, 0, 1, 1], [], []>} : vector<128x16xf32>, vector<16x16xf32>, vector<128x16xf32> -> vector<128x16xf32>
    %c280 = arith.constant 280 : index
    %c0_44 = arith.constant 0 : index
    %129 = vector.load %arg6[%c280, %c0_44] : memref<384x128xf32, #tpu.memory_space<vmem>>, vector<13x16xf32>
    %cst_45 = arith.constant dense<0.000000e+00> : vector<128x16xf32>
    %130 = tpu.matmul %119, %129, %cst_45 {dimension_numbers = #tpu.dot_dimension_numbers<[1], [0], [0], [1], [0, 0, 1, 1], [], []>} : vector<128x13xf32>, vector<13x16xf32>, vector<128x16xf32> -> vector<128x16xf32>
    %131 = arith.addf %128, %130 : vector<128x16xf32>
    %c296 = arith.constant 296 : index
    %c0_46 = arith.constant 0 : index
    %132 = vector.load %arg6[%c296, %c0_46] : memref<384x128xf32, #tpu.memory_space<vmem>>, vector<9x16xf32>
    %cst_47 = arith.constant dense<0.000000e+00> : vector<128x16xf32>
    %133 = tpu.matmul %126, %132, %cst_47 {dimension_numbers = #tpu.dot_dimension_numbers<[1], [0], [0], [1], [0, 0, 1, 1], [], []>} : vector<128x9xf32>, vector<9x16xf32>, vector<128x16xf32> -> vector<128x16xf32>
    %134 = arith.addf %131, %133 : vector<128x16xf32>
    %c312 = arith.constant 312 : index
    %c0_48 = arith.constant 0 : index
    %135 = vector.load %arg6[%c312, %c0_48] : memref<384x128xf32, #tpu.memory_space<vmem>>, vector<1x16xf32>
    %136 = vector.broadcast %135 : vector<1x16xf32> to vector<128x16xf32>
    %137 = arith.addf %134, %136 : vector<128x16xf32>
    %138 = arith.negf %137 : vector<128x16xf32>
    %139 = math.exp %138 : vector<128x16xf32>
    %cst_49 = arith.constant 1.000000e+00 : f32
    %140 = vector.broadcast %cst_49 : f32 to vector<128x16xf32>
    %141 = arith.addf %140, %139 : vector<128x16xf32>
    %142 = arith.divf %140, %141 : vector<128x16xf32>
    %143 = arith.mulf %137, %142 : vector<128x16xf32>
    %c320 = arith.constant 320 : index
    %c0_50 = arith.constant 0 : index
    %144 = vector.load %arg6[%c320, %c0_50] : memref<384x128xf32, #tpu.memory_space<vmem>>, vector<13x4xf32>
    %cst_51 = arith.constant dense<0.000000e+00> : vector<384x4xf32>
    %145 = tpu.matmul %108, %144, %cst_51 {dimension_numbers = #tpu.dot_dimension_numbers<[1], [0], [0], [1], [0, 0, 1, 1], [], []>} : vector<384x13xf32>, vector<13x4xf32>, vector<384x4xf32> -> vector<384x4xf32>
    %c336 = arith.constant 336 : index
    %c0_52 = arith.constant 0 : index
    %146 = vector.load %arg6[%c336, %c0_52] : memref<384x128xf32, #tpu.memory_space<vmem>>, vector<16x4xf32>
    %cst_53 = arith.constant dense<0.000000e+00> : vector<128x4xf32>
    %147 = tpu.matmul %143, %146, %cst_53 {dimension_numbers = #tpu.dot_dimension_numbers<[1], [0], [0], [1], [0, 0, 1, 1], [], []>} : vector<128x16xf32>, vector<16x4xf32>, vector<128x4xf32> -> vector<128x4xf32>
    %c352 = arith.constant 352 : index
    %c0_54 = arith.constant 0 : index
    %148 = vector.load %arg6[%c352, %c0_54] : memref<384x128xf32, #tpu.memory_space<vmem>>, vector<1x4xf32>
    %149 = vector.broadcast %148 : vector<1x4xf32> to vector<128x4xf32>
    %150 = arith.addf %147, %149 : vector<128x4xf32>
    %151 = arith.negf %150 : vector<128x4xf32>
    %152 = math.exp %151 : vector<128x4xf32>
    %cst_55 = arith.constant 1.000000e+00 : f32
    %153 = vector.broadcast %cst_55 : f32 to vector<128x4xf32>
    %154 = arith.addf %153, %152 : vector<128x4xf32>
    %155 = arith.divf %153, %154 : vector<128x4xf32>
    %156 = tpu.concatenate %155, %155, %155 in 0 : vector<128x4xf32>, vector<128x4xf32>, vector<128x4xf32> -> vector<384x4xf32>
    %157 = arith.mulf %145, %156 : vector<384x4xf32>
    %158 = arith.addf %105, %143 : vector<128x16xf32>
    %159 = arith.addf %106, %157 : vector<384x4xf32>
    %c360 = arith.constant 360 : index
    %c0_56 = arith.constant 0 : index
    %160 = vector.load %arg6[%c360, %c0_56] : memref<384x128xf32, #tpu.memory_space<vmem>>, vector<16x16xf32>
    %cst_57 = arith.constant dense<0.000000e+00> : vector<128x16xf32>
    %161 = tpu.matmul %158, %160, %cst_57 {dimension_numbers = #tpu.dot_dimension_numbers<[1], [0], [0], [1], [0, 0, 1, 1], [], []>} : vector<128x16xf32>, vector<16x16xf32>, vector<128x16xf32> -> vector<128x16xf32>
    %c376 = arith.constant 376 : index
    %c0_58 = arith.constant 0 : index
    %162 = vector.load %arg6[%c376, %c0_58] : memref<384x128xf32, #tpu.memory_space<vmem>>, vector<1x16xf32>
    %163 = vector.broadcast %162 : vector<1x16xf32> to vector<128x16xf32>
    %164 = arith.addf %161, %163 : vector<128x16xf32>
    %165 = arith.negf %164 : vector<128x16xf32>
    %166 = math.exp %165 : vector<128x16xf32>
    %cst_59 = arith.constant 1.000000e+00 : f32
    %167 = vector.broadcast %cst_59 : f32 to vector<128x16xf32>
    %168 = arith.addf %167, %166 : vector<128x16xf32>
    %169 = arith.divf %167, %168 : vector<128x16xf32>
    %170 = arith.mulf %158, %169 : vector<128x16xf32>
    %cst_60 = arith.constant 0.000000e+00 : f32
    %171 = vector.broadcast %cst_60 : f32 to vector<128x100xf32>
    %172 = vector.extract_strided_slice %159 {offsets = [0, 0], sizes = [128, 4], strides = [1, 1]} : vector<384x4xf32> to vector<128x4xf32>
    %173 = vector.extract_strided_slice %159 {offsets = [128, 0], sizes = [128, 4], strides = [1, 1]} : vector<384x4xf32> to vector<128x4xf32>
    %174 = vector.extract_strided_slice %159 {offsets = [256, 0], sizes = [128, 4], strides = [1, 1]} : vector<384x4xf32> to vector<128x4xf32>
    %175 = tpu.concatenate %170, %172, %173, %174, %171 in 1 : vector<128x16xf32>, vector<128x4xf32>, vector<128x4xf32>, vector<128x4xf32>, vector<128x100xf32> -> vector<128x128xf32>
    %c0_61 = arith.constant 0 : index
    %c0_62 = arith.constant 0 : index
    %176 = vector.load %arg5[%c0_61, %c0_62] : memref<128x16xf32, #tpu.memory_space<vmem>>, vector<128x16xf32>
    %cst_63 = arith.constant dense<0.000000e+00> : vector<16x128xf32>
    %177 = tpu.matmul %176, %175, %cst_63 {dimension_numbers = #tpu.dot_dimension_numbers<[0], [0], [1], [1], [0, 1, 1, 1], [], []>} : vector<128x16xf32>, vector<128x128xf32>, vector<16x128xf32> -> vector<16x128xf32>
    %c0_i32 = arith.constant 0 : i32
    %178 = arith.cmpi eq, %arg1, %c0_i32 : i32
    %179 = arith.extui %178 : i1 to i32
    %c0_i32_64 = arith.constant 0 : i32
    %180 = arith.cmpi ne, %179, %c0_i32_64 : i32
    scf.if %180 {
      %c0_67 = arith.constant 0 : index
      %c0_68 = arith.constant 0 : index
      %184 = vector.load %arg7[%c0_67, %c0_68] : memref<16x128xf32, #tpu.memory_space<vmem>>, vector<16x128xf32>
      tpu.vector_store %arg7[%c0_67, %c0_68], %177 {strides = array<i32>} : memref<16x128xf32, #tpu.memory_space<vmem>>, vector<16x128xf32>,
    } else {
    }
    %c0_i32_65 = arith.constant 0 : i32
    %181 = arith.cmpi ne, %arg1, %c0_i32_65 : i32
    %182 = arith.extui %181 : i1 to i32
    %c0_i32_66 = arith.constant 0 : i32
    %183 = arith.cmpi ne, %182, %c0_i32_66 : i32
    scf.if %183 {
      %c0_67 = arith.constant 0 : index
      %c0_68 = arith.constant 0 : index
      %184 = vector.load %arg7[%c0_67, %c0_68] : memref<16x128xf32, #tpu.memory_space<vmem>>, vector<16x128xf32>
      %185 = arith.addf %184, %177 : vector<16x128xf32>
      %c0_69 = arith.constant 0 : index
      %c0_70 = arith.constant 0 : index
      %186 = vector.load %arg7[%c0_69, %c0_70] : memref<16x128xf32, #tpu.memory_space<vmem>>, vector<16x128xf32>
      tpu.vector_store %arg7[%c0_69, %c0_70], %185 {strides = array<i32>} : memref<16x128xf32, #tpu.memory_space<vmem>>, vector<16x128xf32>,
    } else {
    }
    return
  }
  func.func @transform_0(%arg0: i32, %arg1: i32) -> (i32, i32) {
    %c2_i32 = arith.constant 2 : i32
    %0 = arith.muli %arg0, %c2_i32 : i32
    %1 = arith.addi %0, %arg1 : i32
    %c0_i32 = arith.constant 0 : i32
    %c0_i32_0 = arith.constant 0 : i32
    return %1, %c0_i32 : i32, i32
  }
  func.func @transform_1(%arg0: i32, %arg1: i32) -> (i32, i32) {
    %c2_i32 = arith.constant 2 : i32
    %0 = arith.muli %arg0, %c2_i32 : i32
    %1 = arith.addi %0, %arg1 : i32
    %c0_i32 = arith.constant 0 : i32
    %c0_i32_0 = arith.constant 0 : i32
    return %1, %c0_i32 : i32, i32
  }
  func.func @transform_2(%arg0: i32, %arg1: i32) -> (i32, i32) {
    %c2_i32 = arith.constant 2 : i32
    %0 = arith.muli %arg0, %c2_i32 : i32
    %1 = arith.addi %0, %arg1 : i32
    %c0_i32 = arith.constant 0 : i32
    %c0_i32_0 = arith.constant 0 : i32
    return %1, %c0_i32 : i32, i32
  }
  func.func @transform_3(%arg0: i32, %arg1: i32) -> (i32, i32) {
    %c2_i32 = arith.constant 2 : i32
    %0 = arith.muli %arg0, %c2_i32 : i32
    %1 = arith.addi %0, %arg1 : i32
    %c0_i32 = arith.constant 0 : i32
    %c0_i32_0 = arith.constant 0 : i32
    return %1, %c0_i32 : i32, i32
  }
  func.func @transform_4(%arg0: i32, %arg1: i32) -> (i32, i32) {
    %c0_i32 = arith.constant 0 : i32
    %c0_i32_0 = arith.constant 0 : i32
    %c0_i32_1 = arith.constant 0 : i32
    return %c0_i32, %c0_i32_0 : i32, i32
  }
  func.func @transform_5(%arg0: i32, %arg1: i32) -> (i32, i32) {
    %c0_i32 = arith.constant 0 : i32
    %c0_i32_0 = arith.constant 0 : i32
    return %arg0, %c0_i32 : i32, i32
  }
}

</mosaic_0001>

<bundles_post_ra>
// kernel: tile.17
= control target key start
LH: loop header
LB: loop body
LE: loop exit
PB: predicated region body
PF: predicated region fallthrough
CT: control target
= control target key end

     0   :  { %s802_s0 = inlined_call_operand.vmem [shape: f32[3,512,3,3], index: 0, kind: input, shape index: {}]   ;;  %s803_s1 = inlined_call_operand.vmem [shape: f32[3,4,128,9], index: 1, kind: output, shape index: {}]  }
   0x1   :  { %v542_v0 = vld [vmem:[%s802_s0 + $0x8c] sm:$0xf]  ;;  %v543_v1 = vld [vmem:[%s802_s0 + $0x88] sm:$0xf]  ;;  %v544_v2 = vld [vmem:[%s802_s0 + $0x84] sm:$0xf] }
   0x2   :  { %8 = vst [vmem:[#allocation1 + $0x118] sm:$0xf] %v542_v0  ;;  %13 = vst [vmem:[#allocation1 + $0x110] sm:$0xf] %v543_v1  ;;  %v545_v3 = vld [vmem:[%s802_s0 + $0x80] sm:$0xf] }
   0x3   :  { %18 = vst [vmem:[#allocation1 + $0x108] sm:$0xf] %v544_v2  ;;  %v546_v4 = vld [vmem:[%s802_s0 + $0x7c] sm:$0xf]  ;;  %v547_v5 = vld [vmem:[%s802_s0 + $0x78] sm:$0xf] }
   0x4   :  { %23 = vst [vmem:[#allocation1 + $0x100] sm:$0xf] %v545_v3  ;;  %28 = vst [vmem:[#allocation1 + $0xf8] sm:$0xf] %v546_v4  ;;  %v548_v6 = vld [vmem:[%s802_s0 + $0x74] sm:$0xf] }
   0x5   :  { %33 = vst [vmem:[#allocation1 + $0xf0] sm:$0xf] %v547_v5  ;;  %v549_v7 = vld [vmem:[%s802_s0 + $0x70] sm:$0xf]  ;;  %v550_v8 = vld [vmem:[%s802_s0 + $0x6c] sm:$0xf] }
   0x6   :  { %38 = vst [vmem:[#allocation1 + $0xe8] sm:$0xf] %v548_v6  ;;  %43 = vst [vmem:[#allocation1 + $0xe0] sm:$0xf] %v549_v7  ;;  %v551_v9 = vld [vmem:[%s802_s0 + $0x68] sm:$0xf] }
   0x7   :  { %48 = vst [vmem:[#allocation1 + $0xd8] sm:$0xf] %v550_v8  ;;  %v552_v10 = vld [vmem:[%s802_s0 + $0x64] sm:$0xf]  ;;  %v553_v11 = vld [vmem:[%s802_s0 + $0x60] sm:$0xf] }
   0x8   :  { %53 = vst [vmem:[#allocation1 + $0xd0] sm:$0xf] %v551_v9  ;;  %58 = vst [vmem:[#allocation1 + $0xc8] sm:$0xf] %v552_v10  ;;  %v554_v12 = vld [vmem:[%s802_s0 + $0x5c] sm:$0xf] }
   0x9   :  { %63 = vst [vmem:[#allocation1 + $0xc0] sm:$0xf] %v553_v11  ;;  %v555_v13 = vld [vmem:[%s802_s0 + $0x58] sm:$0xf]  ;;  %v556_v14 = vld [vmem:[%s802_s0 + $0x54] sm:$0xf] }
   0xa   :  { %68 = vst [vmem:[#allocation1 + $0xb8] sm:$0xf] %v554_v12  ;;  %73 = vst [vmem:[#allocation1 + $0xb0] sm:$0xf] %v555_v13  ;;  %v557_v15 = vld [vmem:[%s802_s0 + $0x50] sm:$0xf] }
   0xb   :  { %78 = vst [vmem:[#allocation1 + $0xa8] sm:$0xf] %v556_v14  ;;  %v558_v16 = vld [vmem:[%s802_s0 + $0x4c] sm:$0xf]  ;;  %v559_v17 = vld [vmem:[%s802_s0 + $0x48] sm:$0xf] }
   0xc   :  { %83 = vst [vmem:[#allocation1 + $0xa0] sm:$0xf] %v557_v15  ;;  %88 = vst [vmem:[#allocation1 + $0x98] sm:$0xf] %v558_v16  ;;  %v560_v18 = vld [vmem:[%s802_s0 + $0x44] sm:$0xf] }
   0xd   :  { %93 = vst [vmem:[#allocation1 + $0x90] sm:$0xf] %v559_v17  ;;  %v561_v19 = vld [vmem:[%s802_s0 + $0x40] sm:$0xf]  ;;  %v562_v20 = vld [vmem:[%s802_s0 + $0x3c] sm:$0xf] }
   0xe   :  { %98 = vst [vmem:[#allocation1 + $0x88] sm:$0xf] %v560_v18  ;;  %103 = vst [vmem:[#allocation1 + $0x80] sm:$0xf] %v561_v19  ;;  %v563_v21 = vld [vmem:[%s802_s0 + $0x38] sm:$0xf] }
   0xf   :  { %108 = vst [vmem:[#allocation1 + $0x78] sm:$0xf] %v562_v20  ;;  %v564_v22 = vld [vmem:[%s802_s0 + $0x34] sm:$0xf]  ;;  %v565_v23 = vld [vmem:[%s802_s0 + $0x30] sm:$0xf] }
  0x10   :  { %113 = vst [vmem:[#allocation1 + $0x70] sm:$0xf] %v563_v21  ;;  %118 = vst [vmem:[#allocation1 + $0x68] sm:$0xf] %v564_v22  ;;  %v566_v24 = vld [vmem:[%s802_s0 + $0x2c] sm:$0xf] }
  0x11   :  { %123 = vst [vmem:[#allocation1 + $0x60] sm:$0xf] %v565_v23  ;;  %v567_v25 = vld [vmem:[%s802_s0 + $0x28] sm:$0xf]  ;;  %v568_v26 = vld [vmem:[%s802_s0 + $0x24] sm:$0xf] }
  0x12   :  { %128 = vst [vmem:[#allocation1 + $0x58] sm:$0xf] %v566_v24  ;;  %133 = vst [vmem:[#allocation1 + $0x50] sm:$0xf] %v567_v25  ;;  %v569_v27 = vld [vmem:[%s802_s0 + $0x20] sm:$0xf] }
  0x13   :  { %138 = vst [vmem:[#allocation1 + $0x48] sm:$0xf] %v568_v26  ;;  %v570_v28 = vld [vmem:[%s802_s0 + $0x1c] sm:$0xf]  ;;  %v571_v29 = vld [vmem:[%s802_s0 + $0x18] sm:$0xf] }
  0x14   :  { %143 = vst [vmem:[#allocation1 + $0x40] sm:$0xf] %v569_v27  ;;  %148 = vst [vmem:[#allocation1 + $0x38] sm:$0xf] %v570_v28  ;;  %v572_v30 = vld [vmem:[%s802_s0 + $0x14] sm:$0xf] }
  0x15   :  { %153 = vst [vmem:[#allocation1 + $0x30] sm:$0xf] %v571_v29  ;;  %v573_v31 = vld [vmem:[%s802_s0 + $0x10] sm:$0xf]  ;;  %v574_v32 = vld [vmem:[%s802_s0 + $0xc] sm:$0xf] }
  0x16   :  { %158 = vst [vmem:[#allocation1 + $0x28] sm:$0xf] %v572_v30  ;;  %163 = vst [vmem:[#allocation1 + $0x20] sm:$0xf] %v573_v31  ;;  %v575_v33 = vld [vmem:[%s802_s0 + $0x8] sm:$0xf] }
  0x17   :  { %168 = vst [vmem:[#allocation1 + $0x18] sm:$0xf] %v574_v32  ;;  %v576_v34 = vld [vmem:[%s802_s0 + $0x4] sm:$0xf]  ;;  %v178_v35 = vld [vmem:[%s802_s0] sm:$0xf] }
  0x18   :  { %173 = vst [vmem:[#allocation1 + $0x10] sm:$0xf] %v575_v33  ;;  %177 = vst [vmem:[#allocation1 + $0x8] sm:$0xf] %v576_v34  ;;  %v263_v36 = vld [vmem:[#allocation1 + $0xa8] sm:$0x7]  }
  0x19   :  { %179 = vst [vmem:[#allocation1] sm:$0xf] %v178_v35  ;;  %v267_v37 = vld [vmem:[#allocation1 + $0xb0] sm:$0x7]   ;;  %v271_v38 = vld [vmem:[#allocation1 + $0xb8] sm:$0x7]  }
  0x1a   :  { %v251_v39 = vld [vmem:[#allocation1 + $0x90] sm:$0x7]   ;;  %v255_v40 = vld [vmem:[#allocation1 + $0x98] sm:$0x7]   ;;  %v259_v41 = vld [vmem:[#allocation1 + $0xa0] sm:$0x7]  }
  0x1b   :  { %265 = vst [vmem:[#allocation0 + $0x79] ss:$8 sm:$0x7] %v263_v36   ;;  %269 = vst [vmem:[#allocation0 + $0x7a] ss:$8 sm:$0x7] %v267_v37  }
  0x1c   :  { %273 = vst [vmem:[#allocation0 + $0x7b] ss:$8 sm:$0x7] %v271_v38   ;;  %v239_v42 = vld [vmem:[#allocation1 + $0x78] sm:$0x7]  }
  0x1d   :  { %v243_v43 = vld [vmem:[#allocation1 + $0x80] sm:$0x7]   ;;  %v247_v44 = vld [vmem:[#allocation1 + $0x88] sm:$0x7]   ;;  %v235_v47 = vld [vmem:[#allocation1 + $0x70] sm:$0x7]  }
  0x1e   :  { %253 = vst [vmem:[#allocation0 + $0x62] ss:$8 sm:$0x7] %v251_v39   ;;  %257 = vst [vmem:[#allocation0 + $0x63] ss:$8 sm:$0x7] %v255_v40  }
  0x1f   :  { %261 = vst [vmem:[#allocation0 + $0x78] ss:$8 sm:$0x7] %v259_v41   ;;  %v227_v45 = vld [vmem:[#allocation1 + $0x60] sm:$0x7]  }
  0x20   :  { %v231_v46 = vld [vmem:[#allocation1 + $0x68] sm:$0x7]   ;;  %241 = vst [vmem:[#allocation0 + $0x4b] ss:$8 sm:$0x7] %v239_v42  }
  0x21   :  { %245 = vst [vmem:[#allocation0 + $0x60] ss:$8 sm:$0x7] %v243_v43   ;;  %249 = vst [vmem:[#allocation0 + $0x61] ss:$8 sm:$0x7] %v247_v44  }
  0x22   :  { %v215_v48 = vld [vmem:[#allocation1 + $0x48] sm:$0x7]   ;;  %v219_v49 = vld [vmem:[#allocation1 + $0x50] sm:$0x7]   ;;  %v223_v50 = vld [vmem:[#allocation1 + $0x58] sm:$0x7]  }
  0x23   :  { %229 = vst [vmem:[#allocation0 + $0x48] ss:$8 sm:$0x7] %v227_v45   ;;  %233 = vst [vmem:[#allocation0 + $0x49] ss:$8 sm:$0x7] %v231_v46  }
  0x24   :  { %237 = vst [vmem:[#allocation0 + $0x4a] ss:$8 sm:$0x7] %v235_v47   ;;  %v203_v51 = vld [vmem:[#allocation1 + $0x30] sm:$0x7]  }
  0x25   :  { %v207_v52 = vld [vmem:[#allocation1 + $0x38] sm:$0x7]   ;;  %v211_v53 = vld [vmem:[#allocation1 + $0x40] sm:$0x7]   ;;  %v199_v56 = vld [vmem:[#allocation1 + $0x28] sm:$0x7]  }
  0x26   :  { %217 = vst [vmem:[#allocation0 + $0x31] ss:$8 sm:$0x7] %v215_v48   ;;  %221 = vst [vmem:[#allocation0 + $0x32] ss:$8 sm:$0x7] %v219_v49  }
  0x27   :  { %225 = vst [vmem:[#allocation0 + $0x33] ss:$8 sm:$0x7] %v223_v50   ;;  %v191_v54 = vld [vmem:[#allocation1 + $0x18] sm:$0x7]  }
  0x28   :  { %v195_v55 = vld [vmem:[#allocation1 + $0x20] sm:$0x7]   ;;  %205 = vst [vmem:[#allocation0 + $0x1a] ss:$8 sm:$0x7] %v203_v51  }
  0x29   :  { %209 = vst [vmem:[#allocation0 + $0x1b] ss:$8 sm:$0x7] %v207_v52   ;;  %213 = vst [vmem:[#allocation0 + $0x30] ss:$8 sm:$0x7] %v211_v53  }
  0x2a   :  { %v180_v57 = vld [vmem:[#allocation1] sm:$0x7]   ;;  %v183_v58 = vld [vmem:[#allocation1 + $0x8] sm:$0x7]   ;;  %v187_v59 = vld [vmem:[#allocation1 + $0x10] sm:$0x7]  }
  0x2b   :  { %193 = vst [vmem:[#allocation0 + $0x3] ss:$8 sm:$0x7] %v191_v54   ;;  %197 = vst [vmem:[#allocation0 + $0x18] ss:$8 sm:$0x7] %v195_v55  }
  0x2c   :  { %201 = vst [vmem:[#allocation0 + $0x19] ss:$8 sm:$0x7] %v199_v56   ;;  %181 = vst [vmem:[#allocation0] ss:$8 sm:$0x7] %v180_v57  }
  0x2d   :  { %185 = vst [vmem:[#allocation0 + $0x1] ss:$8 sm:$0x7] %v183_v58   ;;  %189 = vst [vmem:[#allocation0 + $0x2] ss:$8 sm:$0x7] %v187_v59  }
  0x2e   :  { %v275_v60 = vld [vmem:[#allocation1 + $0xc0] sm:$0x7]   ;;  %v279_v61 = vld [vmem:[#allocation1 + $0xc8] sm:$0x7]   ;;  %v283_v62 = vld [vmem:[#allocation1 + $0xd0] sm:$0x7]  }
  0x2f   :  { %277 = vst [vmem:[#allocation0 + $0x90] ss:$8 sm:$0x7] %v275_v60   ;;  %281 = vst [vmem:[#allocation0 + $0x91] ss:$8 sm:$0x7] %v279_v61  }
  0x30   :  { %285 = vst [vmem:[#allocation0 + $0x92] ss:$8 sm:$0x7] %v283_v62   ;;  %v287_v63 = vld [vmem:[#allocation1 + $0xd8] sm:$0x7]  }
  0x31   :  { %v291_v0 = vld [vmem:[#allocation1 + $0xe0] sm:$0x7]   ;;  %v295_v1 = vld [vmem:[#allocation1 + $0xe8] sm:$0x7]   ;;  %v299_v2 = vld [vmem:[#allocation1 + $0xf0] sm:$0x7]  }
  0x32   :  { %289 = vst [vmem:[#allocation0 + $0x93] ss:$8 sm:$0x7] %v287_v63   ;;  %293 = vst [vmem:[#allocation0 + $0xa8] ss:$8 sm:$0x7] %v291_v0  }
  0x33   :  { %297 = vst [vmem:[#allocation0 + $0xa9] ss:$8 sm:$0x7] %v295_v1   ;;  %v303_v3 = vld [vmem:[#allocation1 + $0xf8] sm:$0x7]  }
  0x34   :  { %v307_v4 = vld [vmem:[#allocation1 + $0x100] sm:$0x7]   ;;  %301 = vst [vmem:[#allocation0 + $0xaa] ss:$8 sm:$0x7] %v299_v2  }
  0x35   :  { %305 = vst [vmem:[#allocation0 + $0xab] ss:$8 sm:$0x7] %v303_v3   ;;  %309 = vst [vmem:[#allocation0 + $0xc0] ss:$8 sm:$0x7] %v307_v4  }
  0x36   :  { %v311_v5 = vld [vmem:[#allocation1 + $0x108] sm:$0x7]   ;;  %v315_v6 = vld [vmem:[#allocation1 + $0x110] sm:$0x7]   ;;  %v319_v7 = vld [vmem:[#allocation1 + $0x118] sm:$0x7]  }
  0x37   :  { %313 = vst [vmem:[#allocation0 + $0xc1] ss:$8 sm:$0x7] %v311_v5   ;;  %317 = vst [vmem:[#allocation0 + $0xc2] ss:$8 sm:$0x7] %v315_v6  }
  0x38   :  { %321 = vst [vmem:[#allocation0 + $0xc3] ss:$8 sm:$0x7] %v319_v7   ;;  %v376_v8 = vld [vmem:[#allocation0 + $0x48] sm:$0xf] }
  0x39   :  { %v382_v9 = vld [vmem:[#allocation0 + $0x50] sm:$0xf]  ;;  %v388_v10 = vld [vmem:[#allocation0 + $0x58] sm:$0xf]  ;;  %v370_v13 = vld [vmem:[#allocation0 + $0x40] sm:$0xf] }
  0x3a   :  { %v358_v11 = vld [vmem:[#allocation0 + $0x30] sm:$0xf]  ;;  %v364_v12 = vld [vmem:[#allocation0 + $0x38] sm:$0xf]  ;;  %585 = vst [vmem:[%s803_s1 + $0x24] sm:$0xf] %v376_v8 }
  0x3b   :  { %586 = vst [vmem:[%s803_s1 + $0x28] sm:$0xf] %v382_v9  ;;  %587 = vst [vmem:[%s803_s1 + $0x2c] sm:$0xf] %v388_v10  ;;  %v340_v14 = vld [vmem:[#allocation0 + $0x18] sm:$0xf] }
  0x3c   :  { %v346_v15 = vld [vmem:[#allocation0 + $0x20] sm:$0xf]  ;;  %v352_v16 = vld [vmem:[#allocation0 + $0x28] sm:$0xf]  ;;  %582 = vst [vmem:[%s803_s1 + $0x18] sm:$0xf] %v358_v11 }
  0x3d   :  { %583 = vst [vmem:[%s803_s1 + $0x1c] sm:$0xf] %v364_v12  ;;  %584 = vst [vmem:[%s803_s1 + $0x20] sm:$0xf] %v370_v13  ;;  %v325_v17 = vld [vmem:[#allocation0] sm:$0xf] }
  0x3e   :  { %v329_v18 = vld [vmem:[#allocation0 + $0x8] sm:$0xf]  ;;  %v334_v19 = vld [vmem:[#allocation0 + $0x10] sm:$0xf]  ;;  %579 = vst [vmem:[%s803_s1 + $0xc] sm:$0xf] %v340_v14 }
  0x3f   :  { %580 = vst [vmem:[%s803_s1 + $0x10] sm:$0xf] %v346_v15  ;;  %581 = vst [vmem:[%s803_s1 + $0x14] sm:$0xf] %v352_v16  ;;  %v394_v20 = vld [vmem:[#allocation0 + $0x60] sm:$0xf] }
  0x40   :  { %327 = vst [vmem:[%s803_s1] sm:$0xf] %v325_v17  ;;  %577 = vst [vmem:[%s803_s1 + $0x4] sm:$0xf] %v329_v18  ;;  %v400_v21 = vld [vmem:[#allocation0 + $0x68] sm:$0xf] }
  0x41   :  { %578 = vst [vmem:[%s803_s1 + $0x8] sm:$0xf] %v334_v19  ;;  %v406_v22 = vld [vmem:[#allocation0 + $0x70] sm:$0xf]  ;;  %588 = vst [vmem:[%s803_s1 + $0x30] sm:$0xf] %v394_v20 }
  0x42   :  { %589 = vst [vmem:[%s803_s1 + $0x34] sm:$0xf] %v400_v21  ;;  %590 = vst [vmem:[%s803_s1 + $0x38] sm:$0xf] %v406_v22  ;;  %v412_v23 = vld [vmem:[#allocation0 + $0x78] sm:$0xf] }
  0x43   :  { %v418_v24 = vld [vmem:[#allocation0 + $0x80] sm:$0xf]  ;;  %v424_v25 = vld [vmem:[#allocation0 + $0x88] sm:$0xf]  ;;  %591 = vst [vmem:[%s803_s1 + $0x3c] sm:$0xf] %v412_v23 }
  0x44   :  { %592 = vst [vmem:[%s803_s1 + $0x40] sm:$0xf] %v418_v24  ;;  %593 = vst [vmem:[%s803_s1 + $0x44] sm:$0xf] %v424_v25  ;;  %v430_v26 = vld [vmem:[#allocation0 + $0x90] sm:$0xf] }
  0x45   :  { %v436_v27 = vld [vmem:[#allocation0 + $0x98] sm:$0xf]  ;;  %v442_v28 = vld [vmem:[#allocation0 + $0xa0] sm:$0xf]  ;;  %594 = vst [vmem:[%s803_s1 + $0x48] sm:$0xf] %v430_v26 }
  0x46   :  { %595 = vst [vmem:[%s803_s1 + $0x4c] sm:$0xf] %v436_v27  ;;  %596 = vst [vmem:[%s803_s1 + $0x50] sm:$0xf] %v442_v28  ;;  %v448_v29 = vld [vmem:[#allocation0 + $0xa8] sm:$0xf] }
  0x47   :  { %v454_v30 = vld [vmem:[#allocation0 + $0xb0] sm:$0xf]  ;;  %v460_v31 = vld [vmem:[#allocation0 + $0xb8] sm:$0xf]  ;;  %597 = vst [vmem:[%s803_s1 + $0x54] sm:$0xf] %v448_v29 }
  0x48   :  { %598 = vst [vmem:[%s803_s1 + $0x58] sm:$0xf] %v454_v30  ;;  %599 = vst [vmem:[%s803_s1 + $0x5c] sm:$0xf] %v460_v31  ;;  %v466_v32 = vld [vmem:[#allocation0 + $0xc0] sm:$0xf] }
  0x49   :  { %v472_v33 = vld [vmem:[#allocation0 + $0xc8] sm:$0xf]  ;;  %v478_v34 = vld [vmem:[#allocation0 + $0xd0] sm:$0xf]  ;;  %600 = vst [vmem:[%s803_s1 + $0x60] sm:$0xf] %v466_v32 }
  0x4a   :  { %601 = vst [vmem:[%s803_s1 + $0x64] sm:$0xf] %v472_v33  ;;  %602 = vst [vmem:[%s803_s1 + $0x68] sm:$0xf] %v478_v34 }

// kernel: gcp_message_passing_pallas.1
= control target key start
LH: loop header
LB: loop body
LE: loop exit
PB: predicated region body
PF: predicated region fallthrough
CT: control target
= control target key end

     0   :  { %s11423_s18 = smov 0   ;;  %s11425_s19 = smov 0   ;;  %s15279_s0 = inlined_call_operand.vmem [shape: f32[512,40], index: 0, kind: input, shape index: {}]   ;;  %s15280_s1 = inlined_call_operand.vmem [shape: f32[1536,10], index: 1, kind: input, shape index: {}]   ;;  %s15281_s2 = inlined_call_operand.vmem [shape: f32[1536,9], index: 2, kind: input, shape index: {}]   ;;  %s15282_s3 = inlined_call_operand.vmem [shape: f32[512,16], index: 3, kind: input, shape index: {}]   ;;  %s15283_s4 = inlined_call_operand.vmem [shape: f32[384,128], index: 4, kind: input, shape index: {}]   ;;  %s15284_s5 = inlined_call_operand.vmem [shape: f32[32,128], index: 5, kind: output, shape index: {}]  }
   0x1   :  { %s11427_s20 = smov 0   ;;  %s11429_s21 = smov 0  }
   0x2   :  { %s11431_s22 = smov 0  }
   0x3 LB: > { %s24_s23 = sadd.s32 1, %s11379_s20  ;;  %s27_s24 = sadd.s32 1, %s11383_s21  ;;  %s11387_s22 = sphi %s11431_s22, %s15_s22   ;;  %s11383_s21 = sphi %s11429_s21, %s15798_s21   ;;  %s11379_s20 = sphi %s11427_s20, %s15797_s20   ;;  %s11375_s19 = sphi %s11425_s19, %s15796_s19   ;;  %s11371_s18 = sphi %s11423_s18, %s15795_s18  }
   0x4   : > { %p25_p0 = scmp.ge.s32.totalorder %s24_s23, 2  ;;  %p8235_p1 = scmp.ge.s32.totalorder %s11387_s22, 1 }
   0x5   : > { %p265_p2 = scmp.lt.s32.totalorder %s11387_s22, 5 }
   0x6   : > { %s15800_s23 = smov (%p25_p0, %s24_s23), 0  ;;  %s15802_s24 = smov (!%p25_p0, %s27_s24), %s11383_s21 }
   0x7   : > { %p266_p3 = pnand %p8235_p1, %p265_p2  ;;  %p29_p4 = scmp.ge.s32.totalorder %s15802_s24, 2 }
   0x9   : > { %s15804_s24 = smov (%p29_p4, %s15802_s24), 0  ;;  %269 = sbr.rel (%p266_p3) target bundleno = 3041 (0xbe1), region = 40 }
  0x10   : > { %v474_v0 = vld [vmem:[%s15283_s4] sm:$0xff]  ;;  %v475_v1 = vld [vmem:[%s15283_s4 + $0x8] sm:$0x3]  ;;  %vm621_vm0 = vcmask 1041408   ;;  %vm11389_vm1 = vmmov 1   ;;  %s8236_s29 = sshll.u32 %s11375_s19, 1 }
  0x11   : > { %v10311_v2 = vpack.c.bf16 %v475_v1, %v474_v0  ;;  %vm10312_vm2 = vmpackc.low %vm621_vm0, %vm11389_vm1  ;;  %v1967_v3 = vld [vmem:[%s15283_s4 + $0x68] sm:$0xff]  ;;  %v1968_v4 = vld [vmem:[%s15283_s4 + $0x70] sm:$0xff]  ;;  %s11469_s9 = sadd.s32 %s11371_s18, %s8236_s29  ;;  %p357_p5 = scmp.lt.s32.totalorder %s8236_s29, 3  ;;  %vm476_vm3 = vcmask 80896   ;;  %vm1275_vm4 = vcmask 1042432   ;;  %vm1226_vm5 = vcmask 154624  }
  0x12   : > { %v10335_v5 = vpack.c.bf16 %v1968_v4, %v1967_v3  ;;  %s328_s10 = smul.u32 48, %s11469_s9  ;;  %v1969_v54 = vld [vmem:[%s15283_s4 + $0x78] sm:$0x7]  ;;  %v1224_v56 = vld [vmem:[%s15283_s4 + $0x40] sm:$0xff]  ;;  %v1225_v58 = vld [vmem:[%s15283_s4 + $0x48] sm:$0x7] }
  0x13   : > { %10313 = vmatprep.subr.msk.bf16.mxu0 %vm10312_vm2, %v10311_v2  ;;  %10447 = vmatprep.subr.msk.bf16.mxu1 %vm10312_vm2, %v10311_v2  ;;  %s15806_s29 = smov (!%p357_p5, %s8236_s29), 3  ;;  %v1223_v55 = vld [vmem:[%s15283_s4 + $0x38] sm:$0xff]  ;;  %v1218_v59 = vld [vmem:[%s15283_s4 + $0x10] sm:$0xff]  ;;  %vm1669_vm11 = vcmask 1040384   ;;  %s8237_s8 = sshll.u32 %s11469_s9, 4 }
  0x14   : > { %10316 = vmatpush3.bf16.msk.msra.mxu0 %vm10312_vm2, %v10311_v2  ;;  %10448 = vmatpush3.bf16.msk.msra.mxu1 %vm10312_vm2, %v10311_v2  ;;  %p329_p6 = scmp.lt.s32.totalorder %s328_s10, 191  ;;  %s8247_s11 = sshll.u32 %s15806_s29, 3  ;;  %v10317_v57 = vpack.c.bf16 %v1224_v56, %v1223_v55  ;;  %v1219_v60 = vld [vmem:[%s15283_s4 + $0x18] sm:$0xff]  ;;  %vm12064_vm2 = vmpackc.low %vm1669_vm11, %vm11389_vm1 }
  0x15   : > { %10336 = vmatprep.subr.bf16.mxu0 %v10335_v5  ;;  %s11477_s14 = scalar_lea.vmem %s15284_s5, %s8247_s11  ;;  %v11601_v61 = vpack.c.bf16 %v1219_v60, %v1218_v59  ;;  %p12110_p7 = scmp.lt.s32.totalorder %s8237_s8, 63 }
  0x16   : > { %s15808_s10 = smov (!%p329_p6, %s328_s10), 191  ;;  %10318 = vmatprep.subr.bf16.mxu1 %v10317_v57  ;;  %s11390_s25 = smov 24  }
  0x17   : > { %s8240_s15 = sshll.u32 %s15808_s10, 3  ;;  %15411 = vst [vmem:[#allocation2_spill] sm:$0xff] %v11601_v61  ;;  %s15810_s8 = smov (!%p12110_p7, %s8237_s8), 63 }
  0x18   : > { %s11485_s19 = scalar_lea.vmem %s15280_s1, %s8240_s15  ;;  %s8238_s11 = sshll.u32 %s15810_s8, 3 }
  0x19   : > { %v378_v6 = vld [vmem:[%s11485_s19] sm:$0xff]  ;;  %v379_v7 = vld [vmem:[%s11485_s19 + $0x8] sm:$0xff]  ;;  %v380_v8 = vld [vmem:[%s11485_s19 + $0x10] sm:$0xff]  ;;  %s12155_s16 = scalar_lea.vmem %s15279_s0, %s8238_s11  ;;  %s11391_s26 = smov 16  }
  0x1a   : > { %9454 = vmatprep.mubr.msk.f32.mxu0 %vm476_vm3, %v378_v6  ;;  %v381_v9 = vld [vmem:[%s11485_s19 + $0x18] sm:$0xff]  ;;  %v382_v10 = vld [vmem:[%s11485_s19 + $0x20] sm:$0xff]  ;;  %v383_v11 = vld [vmem:[%s11485_s19 + $0x28] sm:$0xff]  ;;  %s11392_s27 = smov 20   ;;  %s15104_s6 = scalar_lea.vmem %s15282_s3, %s8238_s11 }
  0x1b   : > { %9455 = vmatmul.mubr.msk.f32.vlgmr.msra.gmra.mrb[0].mxu0 %vm476_vm3, %v379_v7  ;;  %v384_v12 = vld [vmem:[%s11485_s19 + $0x30] sm:$0xff]  ;;  %v421_v14 = vld [vmem:[%s11485_s19 + $0x158] sm:$0xff]  ;;  %v422_v15 = vld [vmem:[%s11485_s19 + $0x160] sm:$0xff]  ;;  %p8891_p8 = scmp.ne.s32.totalorder %s11371_s18, 0 }
  0x1c   : > { %9457 = vmatprep.mubr.msk.f32.mxu0 %vm476_vm3, %v380_v8  ;;  %10338 = vmatpush3.bf16.msra.mxu0 %v10335_v5  ;;  %v420_v13 = vld [vmem:[%s11485_s19 + $0x150] sm:$0xff]  ;;  %v385_v16 = vld [vmem:[%s11485_s19 + $0x38] sm:$0xff]  ;;  %v386_v17 = vld [vmem:[%s11485_s19 + $0x40] sm:$0xff] }
  0x1d   : > { %9517 = vmatprep.mubr.msk.f32.mxu1 %vm476_vm3, %v420_v13  ;;  %v423_v18 = vld [vmem:[%s11485_s19 + $0x168] sm:$0xff]  ;;  %v424_v19 = vld [vmem:[%s11485_s19 + $0x170] sm:$0xff]  ;;  %v425_v22 = vld [vmem:[%s11485_s19 + $0x178] sm:$0xff]  ;;  %9622 = vmatprep.subr.msk.mxu0 %vm1275_vm4, %v1969_v54 }
  0x1e   : > { %9518 = vmatmul.mubr.msk.f32.vlgmr.msra.gmra.mrb[0].mxu1 %vm476_vm3, %v421_v14  ;;  %v387_v20 = vld [vmem:[%s11485_s19 + $0x48] sm:$0xff]  ;;  %v388_v21 = vld [vmem:[%s11485_s19 + $0x50] sm:$0xff]  ;;  %v389_v23 = vld [vmem:[%s11485_s19 + $0x58] sm:$0xff] }
  0x1f   : > { %9458 = vmatmul.mubr.msk.f32.gmra.mrb[2].mxu0 %vm476_vm3, %v381_v9  ;;  %9520 = vmatprep.mubr.msk.f32.mxu1 %vm476_vm3, %v422_v15  ;;  %v390_v24 = vld [vmem:[%s11485_s19 + $0x60] sm:$0xff]  ;;  %v391_v25 = vld [vmem:[%s11485_s19 + $0x68] sm:$0xff]  ;;  %v392_v26 = vld [vmem:[%s11485_s19 + $0x70] sm:$0xff] }
  0x20   : > { %9460 = vmatprep.mubr.msk.f32.mxu0 %vm476_vm3, %v382_v10  ;;  %v393_v27 = vld [vmem:[%s11485_s19 + $0x78] sm:$0xff]  ;;  %v394_v28 = vld [vmem:[%s11485_s19 + $0x80] sm:$0xff]  ;;  %v395_v29 = vld [vmem:[%s11485_s19 + $0x88] sm:$0xff]  ;;  %9623 = vmatpush3.msk.msra.mxu0 %vm1275_vm4, %v1969_v54 }
  0x21   : > { %v396_v30 = vld [vmem:[%s11485_s19 + $0x90] sm:$0xff]  ;;  %v397_v31 = vld [vmem:[%s11485_s19 + $0x98] sm:$0xff]  ;;  %v398_v32 = vld [vmem:[%s11485_s19 + $0xa0] sm:$0xff]  ;;  %10320 = vmatpush3.bf16.msra.mxu1 %v10317_v57 }
  0x22   : > { %9521 = vmatmul.mubr.msk.f32.gmra.mrb[2].mxu1 %vm476_vm3, %v423_v18  ;;  %v399_v33 = vld [vmem:[%s11485_s19 + $0xa8] sm:$0xff]  ;;  %v400_v34 = vld [vmem:[%s11485_s19 + $0xb0] sm:$0xff]  ;;  %v401_v35 = vld [vmem:[%s11485_s19 + $0xb8] sm:$0xff]  ;;  %9530 = vmatprep.subr.msk.mxu1 %vm1275_vm4, %v1225_v58 }
  0x23   : > { %9461 = vmatmul.mubr.msk.f32.gmra.mrb[4].mxu0 %vm476_vm3, %v383_v11  ;;  %9523 = vmatprep.mubr.msk.f32.mxu1 %vm476_vm3, %v424_v19  ;;  %v402_v36 = vld [vmem:[%s11485_s19 + $0xc0] sm:$0xff]  ;;  %v403_v37 = vld [vmem:[%s11485_s19 + $0xc8] sm:$0xff]  ;;  %v404_v38 = vld [vmem:[%s11485_s19 + $0xd0] sm:$0xff] }
  0x24   : > { %9463 = vmatprep.mubr.msk.f32.mxu0 %vm476_vm3, %v384_v12  ;;  %v405_v39 = vld [vmem:[%s11485_s19 + $0xd8] sm:$0xff]  ;;  %v406_v40 = vld [vmem:[%s11485_s19 + $0xe0] sm:$0xff]  ;;  %v407_v41 = vld [vmem:[%s11485_s19 + $0xe8] sm:$0xff] }
  0x25   : > { %v408_v42 = vld [vmem:[%s11485_s19 + $0xf0] sm:$0xff]  ;;  %v409_v43 = vld [vmem:[%s11485_s19 + $0xf8] sm:$0xff]  ;;  %v410_v44 = vld [vmem:[%s11485_s19 + $0x100] sm:$0xff]  ;;  %9531 = vmatpush3.msk.msra.mxu1 %vm1275_vm4, %v1225_v58 }
  0x26   : > { %9524 = vmatmul.mubr.msk.f32.gmra.mrb[4].mxu1 %vm476_vm3, %v425_v22  ;;  %v411_v45 = vld [vmem:[%s11485_s19 + $0x108] sm:$0xff]  ;;  %v412_v46 = vld [vmem:[%s11485_s19 + $0x110] sm:$0xff]  ;;  %v413_v47 = vld [vmem:[%s11485_s19 + $0x118] sm:$0xff]  ;;  %10322 = vmatprep.subr.bf16.mxu1 %v11601_v61 }
  0x27   : > { %9464 = vmatmul.mubr.msk.f32.gmra.mrb[6].mxu0 %vm476_vm3, %v385_v16  ;;  %v414_v48 = vld [vmem:[%s11485_s19 + $0x120] sm:$0xff]  ;;  %v415_v49 = vld [vmem:[%s11485_s19 + $0x128] sm:$0xff]  ;;  %v416_v50 = vld [vmem:[%s11485_s19 + $0x130] sm:$0xff] }
  0x28   : > { %9466 = vmatprep.mubr.msk.f32.mxu0 %vm476_vm3, %v386_v17  ;;  %v417_v51 = vld [vmem:[%s11485_s19 + $0x138] sm:$0xff]  ;;  %v418_v52 = vld [vmem:[%s11485_s19 + $0x140] sm:$0xff]  ;;  %v419_v53 = vld [vmem:[%s11485_s19 + $0x148] sm:$0xff]  ;;  %s11666_s19 = scalar_lea.vmem %s15281_s2, %s8240_s15 }
  0x29   : > { %v426_v22 = vld [vmem:[%s11666_s19] sm:$0xff] }
  0x2a   : > { %v430_v54 = vld [vmem:[%s11666_s19 + $0x20] sm:$0xff] }
  0x2b   : > { %9467 = vmatmul.mubr.msk.f32.gmra.mrb[8].mxu0 %vm476_vm3, %v387_v20  ;;  %v427_v20 = vld [vmem:[%s11666_s19 + $0x8] sm:$0xff]  ;;  %v446_v57 = vld [vmem:[%s11666_s19 + $0xa0] sm:$0xff] }
  0x2c   : > { %9469 = vmatprep.mubr.msk.f32.mxu0 %vm476_vm3, %v388_v21  ;;  %v443_v21 = vld [vmem:[%s11666_s19 + $0x88] sm:$0xff] }
  0x2f   : > { %9470 = vmatmul.mubr.msk.f32.gmra.mrb[10].mxu0 %vm476_vm3, %v389_v23  ;;  %v442_v23 = vld [vmem:[%s11666_s19 + $0x80] sm:$0xff] }
  0x30   : > { %9472 = vmatprep.mubr.msk.f32.mxu0 %vm476_vm3, %v390_v24 }
  0x33   : > { %9473 = vmatmul.mubr.msk.f32.gmra.mrb[12].mxu0 %vm476_vm3, %v391_v25 }
  0x34   : > { %9475 = vmatprep.mubr.msk.f32.mxu0 %vm476_vm3, %v392_v26 }
  0x37   : > { %9476 = vmatmul.mubr.msk.f32.gmra.mrb[14].mxu0 %vm476_vm3, %v393_v27 }
  0x38   : > { %9478 = vmatprep.mubr.msk.f32.mxu0 %vm476_vm3, %v394_v28 }
  0x3b   : > { %9479 = vmatmul.mubr.msk.f32.gmra.mrb[16].mxu0 %vm476_vm3, %v395_v29 }
  0x3c   : > { %9481 = vmatprep.mubr.msk.f32.mxu0 %vm476_vm3, %v396_v30 }
  0x3f   : > { %9482 = vmatmul.mubr.msk.f32.gmra.mrb[18].mxu0 %vm476_vm3, %v397_v31 }
  0x40   : > { %9484 = vmatprep.mubr.msk.f32.mxu0 %vm476_vm3, %v398_v32  ;;  %v429_v32 = vld [vmem:[%s11666_s19 + $0x18] sm:$0xff] }
  0x43   : > { %9485 = vmatmul.mubr.msk.f32.gmra.mrb[20].mxu0 %vm476_vm3, %v399_v33 }
  0x44   : > { %9487 = vmatprep.mubr.msk.f32.mxu0 %vm476_vm3, %v400_v34 }
  0x47   : > { %9488 = vmatmul.mubr.msk.f32.gmra.mrb[22].mxu0 %vm476_vm3, %v401_v35  ;;  %v445_v35 = vld [vmem:[%s11666_s19 + $0x98] sm:$0xff] }
  0x48   : > { %9490 = vmatprep.mubr.msk.f32.mxu0 %vm476_vm3, %v402_v36  ;;  %v428_v36 = vld [vmem:[%s11666_s19 + $0x10] sm:$0xff] }
  0x4b   : > { %9491 = vmatmul.mubr.msk.f32.gmra.mrb[24].mxu0 %vm476_vm3, %v403_v37 }
  0x4c   : > { %9493 = vmatprep.mubr.msk.f32.mxu0 %vm476_vm3, %v404_v38 }
  0x4f   : > { %9494 = vmatmul.mubr.msk.f32.gmra.mrb[26].mxu0 %vm476_vm3, %v405_v39  ;;  %v444_v39 = vld [vmem:[%s11666_s19 + $0x90] sm:$0xff] }
  0x50   : > { %9496 = vmatprep.mubr.msk.f32.mxu0 %vm476_vm3, %v406_v40 }
  0x53   : > { %9497 = vmatmul.mubr.msk.f32.gmra.mrb[28].mxu0 %vm476_vm3, %v407_v41 }
  0x54   : > { %9499 = vmatprep.mubr.msk.f32.mxu0 %vm476_vm3, %v408_v42 }
  0x57   : > { %9500 = vmatmul.mubr.msk.f32.gmra.mrb[30].mxu0 %vm476_vm3, %v409_v43 }
  0x58   : > { %9502 = vmatprep.mubr.msk.f32.mxu0 %vm476_vm3, %v410_v44 }
  0x5b   : > { %9503 = vmatmul.mubr.msk.f32.gmra.mrb[32].mxu0 %vm476_vm3, %v411_v45 }
  0x5c   : > { %9505 = vmatprep.mubr.msk.f32.mxu0 %vm476_vm3, %v412_v46 }
  0x5f   : > { %9506 = vmatmul.mubr.msk.f32.gmra.mrb[34].mxu0 %vm476_vm3, %v413_v47 }
  0x60   : > { %9508 = vmatprep.mubr.msk.f32.mxu0 %vm476_vm3, %v414_v48 }
  0x63   : > { %9509 = vmatmul.mubr.msk.f32.gmra.mrb[36].mxu0 %vm476_vm3, %v415_v49 }
  0x64   : > { %9511 = vmatprep.mubr.msk.f32.mxu0 %vm476_vm3, %v416_v50  ;;  %v431_v50 = vld [vmem:[%s11666_s19 + $0x28] sm:$0xff] }
  0x67   : > { %9512 = vmatmul.mubr.msk.f32.gmra.mrb[38].mxu0 %vm476_vm3, %v417_v51 }
  0x68   : > { %9514 = vmatprep.mubr.msk.f32.mxu0 %vm476_vm3, %v418_v52 }
  0x6b   : > { %9515 = vmatmul.mubr.msk.f32.gmra.mrb[40].mxu0 %vm476_vm3, %v419_v53  ;;  %v447_v53 = vld [vmem:[%s11666_s19 + $0xa8] sm:$0xff] }
  0xee   : > { %v9456_v62 = vpop.f32.mrb[0].mxu0 }
  0xef   : > { %v691_v63 = vpop.f32.mrb[1].mxu0  ;;  %v931_v25 = vmul.f32 %v9456_v62, %v9456_v62  ;;  %v1139_v26 = vmul.f32 %v9456_v62, %v427_v20 }
  0xf0   : > { %9624 = vmatprep.mubr.msk.f32.mxu0 %vm1226_vm5, %v691_v63  ;;  %v930_v30 = vmul.f32 %v691_v63, %v691_v63  ;;  %v1138_v31 = vmul.f32 %v691_v63, %v426_v22  ;;  %v468_v22 = vld [vmem:[%s11666_s19 + $0x150] sm:$0xff] }
  0xf1   : > { %9625 = vmatmul.mubr.msk.f32.vlgmr.msra.gmra.mrb[42].mxu0 %vm1226_vm5, %v9456_v62  ;;  %v11615_v4 = vpop.f32.mrb[0].mxu1  ;;  %v469_v62 = vld [vmem:[%s11666_s19 + $0x158] sm:$0xff] }
  0xf2   : > { %v9459_v0 = vpop.f32.mrb[2].mxu0  ;;  %v11619_v5 = vpop.f32.mrb[1].mxu1 }
  0xf3   : > { %v11606_v1 = vpop.f32.mrb[3].mxu0  ;;  %v933_v43 = vmul.f32 %v9459_v0, %v9459_v0  ;;  %v1141_v44 = vmul.f32 %v9459_v0, %v429_v32  ;;  %v11733_v32 = vmul.f32 %v11615_v4, %v11615_v4 }
  0xf4   : > { %9627 = vmatprep.mubr.msk.f32.mxu0 %vm1226_vm5, %v11606_v1  ;;  %v932_v48 = vmul.f32 %v11606_v1, %v11606_v1  ;;  %v1140_v49 = vmul.f32 %v11606_v1, %v428_v36  ;;  %v11744_v36 = vmul.f32 %v11619_v5, %v11619_v5 }
  0xf5   : > { %9628 = vmatmul.mubr.msk.f32.gmra.mrb[44].mxu0 %vm1226_vm5, %v9459_v0  ;;  %v11627_v8 = vpop.f32.mrb[2].mxu1 }
  0xf6   : > { %v11611_v2 = vpop.f32.mrb[4].mxu0  ;;  %15412 = vst [vmem:[#allocation3_spill] sm:$0xff] %v11627_v8  ;;  %v11631_v9 = vpop.f32.mrb[3].mxu1 }
  0xf7   : > { %v11613_v3 = vpop.f32.mrb[5].mxu0  ;;  %v935_v63 = vmul.f32 %v11611_v2, %v11611_v2  ;;  %v1143_v0 = vmul.f32 %v11611_v2, %v431_v50 }
  0xf8   : > { %9630 = vmatprep.mubr.msk.f32.mxu0 %vm1226_vm5, %v11613_v3 }
  0xf9   : > { %9631 = vmatmul.mubr.msk.f32.gmra.mrb[46].mxu0 %vm1226_vm5, %v11611_v2  ;;  %v11639_v12 = vpop.f32.mrb[4].mxu1 }
  0xfa   : > { %v11623_v6 = vpop.f32.mrb[6].mxu0  ;;  %15413 = vst [vmem:[#allocation4_spill] sm:$0xff] %v11639_v12  ;;  %v11643_v13 = vpop.f32.mrb[5].mxu1 }
  0xfb   : > { %v11625_v7 = vpop.f32.mrb[7].mxu0  ;;  %15414 = vst [vmem:[#allocation5_spill] sm:$0xff] %v11643_v13 }
  0xfc   : > { %9633 = vmatprep.mubr.msk.f32.mxu0 %vm1226_vm5, %v11625_v7 }
  0xfd   : > { %9634 = vmatmul.mubr.msk.f32.gmra.mrb[48].mxu0 %vm1226_vm5, %v11623_v6 }
  0xfe   : > { %v11635_v10 = vpop.f32.mrb[8].mxu0 }
  0xff   : > { %v11637_v11 = vpop.f32.mrb[9].mxu0 }
 0x100   : > { %9636 = vmatprep.mubr.msk.f32.mxu0 %vm1226_vm5, %v11637_v11 }
 0x101   : > { %9637 = vmatmul.mubr.msk.f32.gmra.mrb[50].mxu0 %vm1226_vm5, %v11635_v10 }
 0x102   : > { %v11647_v14 = vpop.f32.mrb[10].mxu0 }
 0x103   : > { %v11649_v15 = vpop.f32.mrb[11].mxu0 }
 0x104   : > { %9639 = vmatprep.mubr.msk.f32.mxu0 %vm1226_vm5, %v11649_v15 }
 0x105   : > { %9640 = vmatmul.mubr.msk.f32.gmra.mrb[52].mxu0 %vm1226_vm5, %v11647_v14 }
 0x106   : > { %v11655_v16 = vpop.f32.mrb[12].mxu0 }
 0x107   : > { %v11657_v17 = vpop.f32.mrb[13].mxu0 }
 0x108   : > { %9642 = vmatprep.mubr.msk.f32.mxu0 %vm1226_vm5, %v11657_v17 }
 0x109   : > { %9643 = vmatmul.mubr.msk.f32.gmra.mrb[54].mxu0 %vm1226_vm5, %v11655_v16 }
 0x10a   : > { %v11670_v18 = vpop.f32.mrb[14].mxu0 }
 0x10b   : > { %v11672_v19 = vpop.f32.mrb[15].mxu0 }
 0x10c   : > { %9645 = vmatprep.mubr.msk.f32.mxu0 %vm1226_vm5, %v11672_v19 }
 0x10d   : > { %9646 = vmatmul.mubr.msk.f32.gmra.mrb[56].mxu0 %vm1226_vm5, %v11670_v18 }
 0x10e   : > { %v9480_v24 = vpop.f32.mrb[16].mxu0 }
 0x10f   : > { %v947_v27 = vmul.f32 %v9480_v24, %v9480_v24  ;;  %v1155_v28 = vmul.f32 %v9480_v24, %v443_v21  ;;  %v771_v29 = vpop.f32.mrb[17].mxu0 }
 0x110   : > { %v946_v33 = vmul.f32 %v771_v29, %v771_v29  ;;  %v1154_v34 = vmul.f32 %v771_v29, %v442_v23  ;;  %9648 = vmatprep.mubr.msk.f32.mxu0 %vm1226_vm5, %v771_v29  ;;  %v934_v23 = vmul.f32 %v11613_v3, %v11613_v3  ;;  %v432_v29 = vld [vmem:[%s11666_s19 + $0x30] sm:$0xff] }
 0x111   : > { %v11686_v37 = vadd.f32 %v947_v27, %v931_v25  ;;  %v11688_v38 = vadd.f32 %v1155_v28, %v1139_v26  ;;  %9649 = vmatmul.mubr.msk.f32.gmra.mrb[58].mxu0 %vm1226_vm5, %v9480_v24  ;;  %v1142_v24 = vmul.f32 %v11613_v3, %v430_v54  ;;  %v433_v25 = vld [vmem:[%s11666_s19 + $0x38] sm:$0xff]  ;;  %v11736_v3 = vmul.f32 %v11615_v4, %v469_v62  ;;  %v451_v54 = vld [vmem:[%s11666_s19 + $0xc8] sm:$0xff]  ;;  %v450_v62 = vld [vmem:[%s11666_s19 + $0xc0] sm:$0xff] }
 0x112   : > { %v11692_v40 = vadd.f32 %v946_v33, %v930_v30  ;;  %v11694_v41 = vadd.f32 %v1154_v34, %v1138_v31  ;;  %v9483_v42 = vpop.f32.mrb[18].mxu0  ;;  %v449_v28 = vld [vmem:[%s11666_s19 + $0xb8] sm:$0xff]  ;;  %v448_v31 = vld [vmem:[%s11666_s19 + $0xb0] sm:$0xff]  ;;  %v1144_v50 = vmul.f32 %v11625_v7, %v432_v29 }
 0x113   : > { %v949_v45 = vmul.f32 %v9483_v42, %v9483_v42  ;;  %v1157_v46 = vmul.f32 %v9483_v42, %v445_v35  ;;  %v781_v47 = vpop.f32.mrb[19].mxu0  ;;  %v472_v29 = vld [vmem:[%s11666_s19 + $0x170] sm:$0xff] }
 0x114   : > { %v948_v51 = vmul.f32 %v781_v47, %v781_v47  ;;  %v1156_v52 = vmul.f32 %v781_v47, %v444_v39  ;;  %9651 = vmatprep.mubr.msk.f32.mxu0 %vm1226_vm5, %v781_v47  ;;  %v11747_v39 = vmul.f32 %v11619_v5, %v468_v22 }
 0x115   : > { %v11703_v55 = vadd.f32 %v949_v45, %v933_v43  ;;  %v11705_v56 = vadd.f32 %v1157_v46, %v1141_v44  ;;  %9652 = vmatmul.mubr.msk.f32.gmra.mrb[60].mxu0 %vm1226_vm5, %v9483_v42  ;;  %v471_v42 = vld [vmem:[%s11666_s19 + $0x168] sm:$0xff]  ;;  %v937_v43 = vmul.f32 %v11623_v6, %v11623_v6  ;;  %v1145_v44 = vmul.f32 %v11623_v6, %v433_v25 }
 0x116   : > { %v11709_v58 = vadd.f32 %v948_v51, %v932_v48  ;;  %v11711_v59 = vadd.f32 %v1156_v52, %v1140_v49  ;;  %v9486_v60 = vpop.f32.mrb[20].mxu0  ;;  %v470_v48 = vld [vmem:[%s11666_s19 + $0x160] sm:$0xff]  ;;  %v936_v49 = vmul.f32 %v11625_v7, %v11625_v7  ;;  %v435_v51 = vld [vmem:[%s11666_s19 + $0x48] sm:$0xff]  ;;  %v11772_v7 = vmul.f32 %v11627_v8, %v471_v42  ;;  %v437_v42 = vld [vmem:[%s11666_s19 + $0x58] sm:$0xff] }
 0x117   : > { %v951_v1 = vmul.f32 %v9486_v60, %v9486_v60  ;;  %v1159_v20 = vmul.f32 %v9486_v60, %v447_v53  ;;  %v791_v21 = vpop.f32.mrb[21].mxu0  ;;  %v11783_v22 = vmul.f32 %v11631_v9, %v470_v48  ;;  %v1147_v25 = vmul.f32 %v11635_v10, %v435_v51  ;;  %v452_v48 = vld [vmem:[%s11666_s19 + $0xd0] sm:$0xff] }
 0x118   : > { %v950_v26 = vmul.f32 %v791_v21, %v791_v21  ;;  %v1158_v27 = vmul.f32 %v791_v21, %v446_v57  ;;  %9654 = vmatprep.mubr.msk.f32.mxu0 %vm1226_vm5, %v791_v21  ;;  %v434_v57 = vld [vmem:[%s11666_s19 + $0x40] sm:$0xff]  ;;  %v11780_v21 = vmul.f32 %v11631_v9, %v11631_v9 }
 0x119   : > { %v11725_v30 = vadd.f32 %v951_v1, %v935_v63  ;;  %v11727_v2 = vadd.f32 %v1159_v20, %v1143_v0  ;;  %9655 = vmatmul.mubr.msk.f32.gmra.mrb[62].mxu0 %vm1226_vm5, %v9486_v60  ;;  %v11769_v63 = vmul.f32 %v11627_v8, %v11627_v8  ;;  %v440_v8 = vld [vmem:[%s11666_s19 + $0x70] sm:$0xff] }
 0x11a   : > { %v11738_v33 = vadd.f32 %v950_v26, %v934_v23  ;;  %v11740_v34 = vadd.f32 %v1158_v27, %v1142_v24  ;;  %v9489_v35 = vpop.f32.mrb[22].mxu0  ;;  %v473_v23 = vld [vmem:[%s11666_s19 + $0x178] sm:$0xff]  ;;  %v939_v24 = vmul.f32 %v11635_v10, %v11635_v10 }
 0x11b   : > { %v953_v45 = vmul.f32 %v9489_v35, %v9489_v35  ;;  %v1161_v46 = vmul.f32 %v9489_v35, %v449_v28  ;;  %v801_v47 = vpop.f32.mrb[23].mxu0 }
 0x11c   : > { %v952_v52 = vmul.f32 %v801_v47, %v801_v47  ;;  %v1160_v53 = vmul.f32 %v801_v47, %v448_v31  ;;  %9657 = vmatprep.mubr.msk.f32.mxu0 %vm1226_vm5, %v801_v47  ;;  %v938_v31 = vmul.f32 %v11637_v11, %v11637_v11 }
 0x11d   : > { %v11761_v60 = vadd.f32 %v953_v45, %v937_v43  ;;  %v11763_v6 = vadd.f32 %v1161_v46, %v1145_v44  ;;  %9658 = vmatmul.mubr.msk.f32.gmra.mrb[64].mxu0 %vm1226_vm5, %v9489_v35  ;;  %v1146_v35 = vmul.f32 %v11637_v11, %v434_v57  ;;  %v453_v45 = vld [vmem:[%s11666_s19 + $0xd8] sm:$0xff]  ;;  %v436_v46 = vld [vmem:[%s11666_s19 + $0x50] sm:$0xff]  ;;  %v11808_v11 = vmul.f32 %v11639_v12, %v473_v23  ;;  %v438_v23 = vld [vmem:[%s11666_s19 + $0x60] sm:$0xff] }
 0x11e   : > { %v11774_v0 = vadd.f32 %v952_v52, %v936_v49  ;;  %v11776_v1 = vadd.f32 %v1160_v53, %v1144_v50  ;;  %v9492_v20 = vpop.f32.mrb[24].mxu0  ;;  %v11805_v49 = vmul.f32 %v11639_v12, %v11639_v12  ;;  %v439_v50 = vld [vmem:[%s11666_s19 + $0x68] sm:$0xff]  ;;  %v11820_v57 = vmul.f32 %v11643_v13, %v472_v29 }
 0x11f   : > { %v955_v26 = vmul.f32 %v9492_v20, %v9492_v20  ;;  %v1163_v27 = vmul.f32 %v9492_v20, %v451_v54  ;;  %v811_v28 = vpop.f32.mrb[25].mxu0  ;;  %v11817_v54 = vmul.f32 %v11643_v13, %v11643_v13  ;;  %v942_v12 = vmul.f32 %v11657_v17, %v11657_v17 }
 0x120   : > { %v954_v43 = vmul.f32 %v811_v28, %v811_v28  ;;  %v1162_v44 = vmul.f32 %v811_v28, %v450_v62  ;;  %9660 = vmatprep.mubr.msk.f32.mxu0 %vm1226_vm5, %v811_v28  ;;  %v941_v62 = vmul.f32 %v11647_v14, %v11647_v14  ;;  %v1148_v28 = vmul.f32 %v11649_v15, %v436_v46  ;;  %v441_v46 = vld [vmem:[%s11666_s19 + $0x78] sm:$0xff] }
 0x121   : > { %v11797_v10 = vadd.f32 %v955_v26, %v939_v24  ;;  %v11799_v47 = vadd.f32 %v1163_v27, %v1147_v25  ;;  %9661 = vmatmul.mubr.msk.f32.gmra.mrb[66].mxu0 %vm1226_vm5, %v9492_v20  ;;  %v1149_v20 = vmul.f32 %v11647_v14, %v437_v42  ;;  %v940_v27 = vmul.f32 %v11649_v15, %v11649_v15 }
 0x122   : > { %v11811_v51 = vadd.f32 %v954_v43, %v938_v31  ;;  %v11813_v52 = vadd.f32 %v1162_v44, %v1146_v35  ;;  %v9495_v53 = vpop.f32.mrb[26].mxu0  ;;  %v455_v35 = vld [vmem:[%s11666_s19 + $0xe8] sm:$0xff]  ;;  %v943_v14 = vmul.f32 %v11655_v16, %v11655_v16  ;;  %v1151_v42 = vmul.f32 %v11655_v16, %v439_v50 }
 0x123   : > { %v957_v24 = vmul.f32 %v9495_v53, %v9495_v53  ;;  %v1165_v25 = vmul.f32 %v9495_v53, %v453_v45  ;;  %v821_v26 = vpop.f32.mrb[27].mxu0  ;;  %v454_v45 = vld [vmem:[%s11666_s19 + $0xe0] sm:$0xff]  ;;  %v1150_v15 = vmul.f32 %v11657_v17, %v438_v23 }
 0x124   : > { %v956_v31 = vmul.f32 %v821_v26, %v821_v26  ;;  %v1164_v29 = vmul.f32 %v821_v26, %v452_v48  ;;  %9663 = vmatprep.mubr.msk.f32.mxu0 %vm1226_vm5, %v821_v26 }
 0x125   : > { %v973_v43 = vadd.f32 %v957_v24, %v941_v62  ;;  %v1197_v44 = vadd.f32 %v1165_v25, %v1149_v20  ;;  %9664 = vmatmul.mubr.msk.f32.gmra.mrb[68].mxu0 %vm1226_vm5, %v9495_v53  ;;  %v457_v25 = vld [vmem:[%s11666_s19 + $0xf8] sm:$0xff] }
 0x126   : > { %v972_v48 = vadd.f32 %v956_v31, %v940_v27  ;;  %v1196_v26 = vadd.f32 %v1164_v29, %v1148_v28  ;;  %v9498_v13 = vpop.f32.mrb[28].mxu0  ;;  %v456_v31 = vld [vmem:[%s11666_s19 + $0xf0] sm:$0xff] }
 0x127   : > { %v11842_v61 = vadd.f32 %v11733_v32, %v973_v43  ;;  %v11845_v16 = vadd.f32 %v1197_v44, %v11736_v3  ;;  %v959_v50 = vmul.f32 %v9498_v13, %v9498_v13  ;;  %v1167_v53 = vmul.f32 %v9498_v13, %v455_v35  ;;  %v831_v62 = vpop.f32.mrb[29].mxu0 }
 0x128   : > { %v11848_v20 = vadd.f32 %v11744_v36, %v972_v48  ;;  %v11851_v17 = vadd.f32 %v1196_v26, %v11747_v39  ;;  %v958_v23 = vmul.f32 %v831_v62, %v831_v62  ;;  %v1166_v24 = vmul.f32 %v831_v62, %v454_v45  ;;  %9666 = vmatprep.mubr.msk.f32.mxu0 %vm1226_vm5, %v831_v62 }
 0x129   : > { %v945_v32 = vmul.f32 %v11670_v18, %v11670_v18  ;;  %v1153_v3 = vmul.f32 %v11670_v18, %v441_v46  ;;  %v975_v27 = vadd.f32 %v959_v50, %v943_v14  ;;  %v1199_v28 = vadd.f32 %v1167_v53, %v1151_v42  ;;  %9667 = vmatmul.mubr.msk.f32.gmra.mrb[70].mxu0 %vm1226_vm5, %v9498_v13 }
 0x12a   : > { %v944_v36 = vmul.f32 %v11672_v19, %v11672_v19  ;;  %v1152_v39 = vmul.f32 %v11672_v19, %v440_v8  ;;  %v974_v29 = vadd.f32 %v958_v23, %v942_v12  ;;  %v1198_v35 = vadd.f32 %v1166_v24, %v1150_v15  ;;  %v9501_v43 = vpop.f32.mrb[30].mxu0  ;;  %v459_v19 = vld [vmem:[%s11666_s19 + $0x108] sm:$0xff] }
 0x12b   : > { %v11864_v44 = vadd.f32 %v11769_v63, %v975_v27  ;;  %v11867_v18 = vadd.f32 %v1199_v28, %v11772_v7  ;;  %v961_v14 = vmul.f32 %v9501_v43, %v9501_v43  ;;  %v1169_v42 = vmul.f32 %v9501_v43, %v457_v25  ;;  %v841_v13 = vpop.f32.mrb[31].mxu0  ;;  %v458_v7 = vld [vmem:[%s11666_s19 + $0x100] sm:$0xff]  ;;  %v461_v27 = vld [vmem:[%s11666_s19 + $0x118] sm:$0xff]  ;;  %v460_v28 = vld [vmem:[%s11666_s19 + $0x110] sm:$0xff] }
 0x12c   : > { %v11870_v45 = vadd.f32 %v11780_v21, %v974_v29  ;;  %v11873_v46 = vadd.f32 %v1198_v35, %v11783_v22  ;;  %v960_v8 = vmul.f32 %v841_v13, %v841_v13  ;;  %v1168_v12 = vmul.f32 %v841_v13, %v456_v31  ;;  %9669 = vmatprep.mubr.msk.f32.mxu0 %vm1226_vm5, %v841_v13 }
 0x12d   : > { %v977_v15 = vadd.f32 %v961_v14, %v945_v32  ;;  %v1201_v63 = vadd.f32 %v1169_v42, %v1153_v3  ;;  %9670 = vmatmul.mubr.msk.f32.gmra.mrb[72].mxu0 %vm1226_vm5, %v9501_v43  ;;  %v463_v14 = vld [vmem:[%s11666_s19 + $0x128] sm:$0xff]  ;;  %v462_v42 = vld [vmem:[%s11666_s19 + $0x120] sm:$0xff] }
 0x12e   : > { %v976_v48 = vadd.f32 %v960_v8, %v944_v36  ;;  %v1200_v26 = vadd.f32 %v1168_v12, %v1152_v39  ;;  %v9504_v50 = vpop.f32.mrb[32].mxu0 }
 0x12f   : > { %v11880_v21 = vadd.f32 %v11805_v49, %v977_v15  ;;  %v11883_v22 = vadd.f32 %v1201_v63, %v11808_v11  ;;  %v979_v53 = vmul.f32 %v9504_v50, %v9504_v50  ;;  %v1171_v62 = vmul.f32 %v9504_v50, %v459_v19  ;;  %v851_v23 = vpop.f32.mrb[33].mxu0 }
 0x130   : > { %v11886_v24 = vadd.f32 %v11817_v54, %v976_v48  ;;  %v11889_v25 = vadd.f32 %v1200_v26, %v11820_v57  ;;  %v978_v32 = vmul.f32 %v851_v23, %v851_v23  ;;  %v1170_v3 = vmul.f32 %v851_v23, %v458_v7  ;;  %9672 = vmatprep.mubr.msk.f32.mxu0 %vm1226_vm5, %v851_v23  ;;  %v465_v48 = vld [vmem:[%s11666_s19 + $0x138] sm:$0xff] }
 0x131   : > { %v995_v49 = vadd.f32 %v979_v53, %v11686_v37  ;;  %v11895_v11 = vadd.f32 %v11688_v38, %v1171_v62  ;;  %9673 = vmatmul.mubr.msk.f32.gmra.mrb[74].mxu0 %vm1226_vm5, %v9504_v50  ;;  %v464_v50 = vld [vmem:[%s11666_s19 + $0x130] sm:$0xff] }
 0x132   : > { %v994_v54 = vadd.f32 %v978_v32, %v11692_v40  ;;  %v11901_v57 = vadd.f32 %v11694_v41, %v1170_v3  ;;  %v9507_v31 = vpop.f32.mrb[34].mxu0 }
 0x133   : > { %v11903_v36 = vadd.f32 1e-08, %v995_v49  ;;  %v981_v39 = vmul.f32 %v9507_v31, %v9507_v31  ;;  %v1173_v29 = vmul.f32 %v9507_v31, %v461_v27  ;;  %v861_v35 = vpop.f32.mrb[35].mxu0 }
 0x134   : > { %v11905_v43 = vadd.f32 1e-08, %v994_v54  ;;  %v980_v37 = vmul.f32 %v861_v35, %v861_v35  ;;  %v1172_v38 = vmul.f32 %v861_v35, %v460_v28  ;;  %9675 = vmatprep.mubr.msk.f32.mxu0 %vm1226_vm5, %v861_v35  ;;  %v467_v28 = vld [vmem:[%s11666_s19 + $0x148] sm:$0xff] }
 0x135   : > { %10709 = vrsqrt.f32 %v11903_v36  ;;  %v997_v40 = vadd.f32 %v981_v39, %v11703_v55  ;;  %v11912_v41 = vadd.f32 %v11705_v56, %v1173_v29  ;;  %9676 = vmatmul.mubr.msk.f32.gmra.mrb[76].mxu0 %vm1226_vm5, %v9507_v31  ;;  %v466_v39 = vld [vmem:[%s11666_s19 + $0x140] sm:$0xff]  ;;  %vm1035_vm7 = vcmp.eq.f32.partialorder %v11903_v36, inf }
 0x136   : > { %v996_v13 = vadd.f32 %v980_v37, %v11709_v58  ;;  %v11918_v8 = vadd.f32 %v11711_v59, %v1172_v38  ;;  %v9510_v12 = vpop.f32.mrb[36].mxu0  ;;  %10711 = vrsqrt.f32 %v11905_v43  ;;  %vm1028_vm6 = vcmp.eq.f32.partialorder %v11905_v43, inf }
 0x137   : > { %v983_v19 = vmul.f32 %v9510_v12, %v9510_v12  ;;  %v1175_v15 = vmul.f32 %v9510_v12, %v463_v14  ;;  %v871_v63 = vpop.f32.mrb[37].mxu0  ;;  %v11925_v26 = vadd.f32 1e-08, %v997_v40  ;;  %vm1030_vm8 = vcmp.eq.f32.partialorder %v11905_v43, 0.0 }
 0x138   : > { %v11921_v7 = vadd.f32 1e-08, %v996_v13  ;;  %v982_v55 = vmul.f32 %v871_v63, %v871_v63  ;;  %v1174_v56 = vmul.f32 %v871_v63, %v462_v42  ;;  %9678 = vmatprep.mubr.msk.f32.mxu0 %vm1226_vm5, %v871_v63  ;;  %v1031_v42 = vand.u32 2147483648, %v11905_v43 }
 0x139   : > { %v999_v58 = vadd.f32 %v983_v19, %v11725_v30  ;;  %v11929_v59 = vadd.f32 %v11727_v2, %v1175_v15  ;;  %9679 = vmatmul.mubr.msk.f32.gmra.mrb[78].mxu0 %vm1226_vm5, %v9510_v12  ;;  %v1220_v30 = vld [vmem:[%s15283_s4 + $0x20] sm:$0xff]  ;;  %v1221_v2 = vld [vmem:[%s15283_s4 + $0x28] sm:$0xff]  ;;  %vm1037_vm9 = vcmp.eq.f32.partialorder %v11903_v36, 0.0  ;;  %vm1049_vm13 = vcmp.eq.f32.partialorder %v11925_v26, inf }
 0x13a   : > { %v998_v53 = vadd.f32 %v982_v55, %v11738_v33  ;;  %v11935_v62 = vadd.f32 %v11740_v34, %v1174_v56  ;;  %v9513_v23 = vpop.f32.mrb[38].mxu0  ;;  %10713 = vrsqrt.f32 %v11921_v7  ;;  %v11955_v29 = vpack.c.bf16 %v1221_v2, %v1220_v30 }
 0x13b   : > { %v985_v32 = vmul.f32 %v9513_v23, %v9513_v23  ;;  %v1177_v3 = vmul.f32 %v9513_v23, %v465_v48  ;;  %v881_v27 = vpop.f32.mrb[39].mxu0  ;;  %10715 = vrsqrt.f32 %v11925_v26  ;;  %v11965_v12 = vadd.f32 1e-08, %v999_v58 }
 0x13c   : > { %v11944_v49 = vadd.f32 1e-08, %v998_v53  ;;  %v984_v33 = vmul.f32 %v881_v27, %v881_v27  ;;  %v1176_v34 = vmul.f32 %v881_v27, %v464_v50  ;;  %9681 = vmatprep.mubr.msk.f32.mxu0 %vm1226_vm5, %v881_v27  ;;  %v12008_v2 = vadd.f32 1e-08, %v11842_v61 }
 0x13d   : > { %v1001_v54 = vadd.f32 %v985_v32, %v11761_v60  ;;  %v11950_v31 = vadd.f32 %v11763_v6, %v1177_v3  ;;  %9682 = vmatmul.mubr.msk.f32.gmra.mrb[80].mxu0 %vm1226_vm5, %v9513_v23  ;;  %vm1042_vm10 = vcmp.eq.f32.partialorder %v11921_v7, inf  ;;  %v15415_v32 = vld [vmem:[#allocation2_spill] sm:$0xff]  ;;  %vm1044_vm12 = vcmp.eq.f32.partialorder %v11921_v7, 0.0 }
 0x13e   : > { %v1000_v35 = vadd.f32 %v984_v33, %v11774_v0  ;;  %v11959_v37 = vadd.f32 %v11776_v1, %v1176_v34  ;;  %v9516_v38 = vpop.f32.mrb[40].mxu0  ;;  %10717 = vrsqrt.f32 %v11944_v49  ;;  %v12021_v61 = vadd.f32 1e-08, %v11870_v45  ;;  %v1618_v33 = vld [vmem:[%s15283_s4 + $0x50] sm:$0xff]  ;;  %v15416_v45 = vld [vmem:[#allocation3_spill] sm:$0xff] }
 0x13f   : > { %v10710_v60 = vpop.eup %10709  ;;  %v987_v6 = vmul.f32 %v9516_v38, %v9516_v38  ;;  %v1179_v14 = vmul.f32 %v9516_v38, %v467_v28  ;;  %v891_v40 = vpop.f32.mrb[41].mxu0  ;;  %v11977_v48 = vadd.f32 1e-08, %v1001_v54  ;;  %10719 = vrsqrt.f32 %v11965_v12 }
 0x140   : > { %v10712_v13 = vpop.eup %10711  ;;  %v986_v0 = vmul.f32 %v891_v40, %v891_v40  ;;  %v1178_v19 = vmul.f32 %v891_v40, %v466_v39  ;;  %9684 = vmatprep.mubr.msk.f32.mxu0 %vm1226_vm5, %v891_v40  ;;  %v1034_v1 = vmul.f32 %v10710_v60, %v11903_v36  ;;  %v11969_v15 = vadd.f32 1e-08, %v1000_v35  ;;  %v1222_v39 = vld [vmem:[%s15283_s4 + $0x30] sm:$0xff] }
 0x141   : > { %v1003_v63 = vadd.f32 %v987_v6, %v11797_v10  ;;  %v11973_v55 = vadd.f32 %v11799_v47, %v1179_v14  ;;  %9685 = vmatmul.mubr.msk.f32.gmra.mrb[82].mxu0 %vm1226_vm5, %v9516_v38  ;;  %v1027_v56 = vmul.f32 %v10712_v13, %v11905_v43  ;;  %v11989_v47 = vadd.f32 1e-08, %v11848_v20  ;;  %v15421_v13 = vld [vmem:[#allocation4_spill] sm:$0xff] }
 0x142   : > { %v1002_v58 = vadd.f32 %v986_v0, %v11811_v51  ;;  %v11981_v50 = vadd.f32 %v11813_v52, %v1178_v19  ;;  %9687 = vmatprep.mubr.msk.f32.mxu0 %vm1226_vm5, %v11619_v5  ;;  %v1036_v10 = vsel %vm1035_vm7, %v11903_v36, %v1034_v1  ;;  %v1038_v51 = vand.u32 2147483648, %v11903_v36 }
 0x143   : > { %v1029_v53 = vsel %vm1028_vm6, %v11905_v43, %v1027_v56  ;;  %v12000_v5 = vadd.f32 1e-08, %v1003_v63  ;;  %10721 = vrsqrt.f32 %v11969_v15  ;;  %v1045_v36 = vand.u32 2147483648, %v11921_v7 }
 0x144   : > { %v10714_v52 = vpop.eup %10713  ;;  %v11996_v23 = vadd.f32 1e-08, %v1002_v58  ;;  %v1032_v30 = vsel %vm1030_vm8, %v1031_v42, %v1029_v53  ;;  %v1039_v20 = vsel %vm1037_vm9, %v1038_v51, %v1036_v10  ;;  %10723 = vrsqrt.f32 %v11977_v48 }
 0x145   : > { %9532 = vmatprep.mubr.msk.f32.mxu1 %vm1226_vm5, %v1032_v30  ;;  %9688 = vmatmul.mubr.msk.f32.gmra.mrb[84].mxu0 %vm1226_vm5, %v11615_v4  ;;  %v1041_v43 = vmul.f32 %v10714_v52, %v11921_v7  ;;  %v10716_v4 = vpop.eup %10715  ;;  %10725 = vrsqrt.f32 %v11989_v47  ;;  %v12033_v28 = vadd.f32 1e-08, %v11864_v44  ;;  %v1052_v54 = vand.u32 2147483648, %v11925_v26  ;;  %v15417_v44 = vld [vmem:[#allocation5_spill] sm:$0xff] }
 0x146   : > { %9533 = vmatmul.mubr.msk.f32.vlgmr.msra.gmra.mrb[6].mxu1 %vm1226_vm5, %v1039_v20  ;;  %9690 = vmatprep.mubr.msk.f32.mxu0 %vm1226_vm5, %v11631_v9  ;;  %v1048_v27 = vmul.f32 %v10716_v4, %v11925_v26  ;;  %10727 = vrsqrt.f32 %v11996_v23  ;;  %vm1051_vm14 = vcmp.eq.f32.partialorder %v11925_v26, 0.0  ;;  %vm1056_vm15 = vcmp.eq.f32.partialorder %v11944_v49, inf }
 0x147   : > { %10324 = vmatpush3.bf16.msra.mxu1 %v15415_v32  ;;  %v1043_v3 = vsel %vm1042_vm10, %v11921_v7, %v1041_v43  ;;  %v1619_v7 = vld [vmem:[%s15283_s4 + $0x58] sm:$0x1]  ;;  %10729 = vrsqrt.f32 %v12000_v5  ;;  %v1059_v6 = vand.u32 2147483648, %v11944_v49  ;;  %v12056_v40 = vadd.f32 1e-08, %v11886_v24 }
 0x148   : > { %v1046_v9 = vsel %vm1044_vm12, %v1045_v36, %v1043_v3  ;;  %10326 = vmatprep.subr.bf16.mxu1 %v11955_v29  ;;  %v10718_v34 = vpop.eup %10717  ;;  %v1050_v35 = vsel %vm1049_vm13, %v11925_v26, %v1048_v27  ;;  %10731 = vrsqrt.f32 %v12008_v2  ;;  %v12053_v14 = vpack.c.bf16 %v1619_v7, %v1618_v33 }
 0x149   : > { %9535 = vmatprep.mubr.msk.f32.mxu1 %vm1226_vm5, %v1046_v9  ;;  %9691 = vmatmul.mubr.msk.f32.gmra.mrb[86].mxu0 %vm1226_vm5, %v15416_v45  ;;  %v1055_v38 = vmul.f32 %v10718_v34, %v11944_v49  ;;  %v1053_v60 = vsel %vm1051_vm14, %v1052_v54, %v1050_v35  ;;  %vm1058_vm0 = vcmp.eq.f32.partialorder %v11944_v49, 0.0  ;;  %10733 = vrsqrt.f32 %v12021_v61  ;;  %v10720_v24 = vpop.eup %10719 }
 0x14a   : > { %9693 = vmatprep.mubr.msk.f32.mxu0 %vm1226_vm5, %v15417_v44  ;;  %9536 = vmatmul.mubr.msk.f32.gmra.mrb[8].mxu1 %vm1226_vm5, %v1053_v60  ;;  %v15418_v42 = vmov 0  ;;  %v12071_v0 = vadd.f32 1e-08, %v11880_v21  ;;  %10735 = vrsqrt.f32 %v12033_v28  ;;  %v1062_v19 = vmul.f32 %v10720_v24, %v11965_v12 }
 0x14b   : > { %10328 = vmatpush3.bf16.msra.mxu1 %v11955_v29  ;;  %v1057_v26 = vsel %vm1056_vm15, %v11944_v49, %v1055_v38  ;;  %v15419_v42 = vsel %vm12064_vm2, 4294967295, %v15418_v42  ;;  %vm1063_vm3 = vcmp.eq.f32.partialorder %v11965_v12, inf  ;;  %vm1065_vm4 = vcmp.eq.f32.partialorder %v11965_v12, 0.0 }
 0x14c   : > { %9564 = vmatprep.subr.mxu1 %v1222_v39  ;;  %15420 = vst [vmem:[#allocation2_spill] sm:$0xff] %v15419_v42  ;;  %v1060_v29 = vsel %vm1058_vm0, %v1059_v6, %v1057_v26  ;;  %v1066_v63 = vand.u32 2147483648, %v11965_v12  ;;  %vm1070_vm6 = vcmp.eq.f32.partialorder %v11969_v15, inf  ;;  %10737 = vrsqrt.f32 %v12056_v40 }
 0x14d   : > { %9694 = vmatmul.mubr.msk.f32.gmra.mrb[88].mxu0 %vm1226_vm5, %v15421_v13  ;;  %9538 = vmatprep.mubr.msk.f32.mxu1 %vm1226_vm5, %v1060_v29  ;;  %v10722_v49 = vpop.eup %10721  ;;  %v1064_v58 = vsel %vm1063_vm3, %v11965_v12, %v1062_v19  ;;  %vm1072_vm7 = vcmp.eq.f32.partialorder %v11969_v15, 0.0  ;;  %v1073_v10 = vand.u32 2147483648, %v11969_v15  ;;  %vm1077_vm8 = vcmp.eq.f32.partialorder %v11977_v48, inf }
 0x14e   : > { %v10724_v1 = vpop.eup %10723  ;;  %v1069_v56 = vmul.f32 %v10722_v49, %v11969_v15  ;;  %v1067_v52 = vsel %vm1065_vm4, %v1066_v63, %v1064_v58  ;;  %10739 = vrsqrt.f32 %v12071_v0  ;;  %v1080_v36 = vand.u32 2147483648, %v11977_v48 }
 0x14f   : > { %9565 = vmatpush3.msra.mxu1 %v1222_v39  ;;  %v10726_v21 = vpop.eup %10725  ;;  %v1076_v53 = vmul.f32 %v10724_v1, %v11977_v48  ;;  %vm1084_vm9 = vcmp.eq.f32.partialorder %v11996_v23, inf  ;;  %vm1079_vm10 = vcmp.eq.f32.partialorder %v11977_v48, 0.0  ;;  %vm1086_vm11 = vcmp.eq.f32.partialorder %v11996_v23, 0.0 }
 0x150   : > { %10331 = vmatprep.subr.msk.bf16.mxu1 %vm12064_vm2, %v12053_v14  ;;  %v10728_v51 = vpop.eup %10727  ;;  %v1071_v30 = vsel %vm1070_vm6, %v11969_v15, %v1069_v56  ;;  %9539 = vmatmul.mubr.msk.f32.gmra.mrb[10].mxu1 %vm1226_vm5, %v1067_v52  ;;  %v1087_v15 = vand.u32 2147483648, %v11996_v23  ;;  %v1097_v9 = vmul.f32 %v10726_v21, %v11989_v47  ;;  %vm1091_vm12 = vcmp.eq.f32.partialorder %v12000_v5, inf  ;;  %v363_v52 = vld [vmem:[%s12155_s16 + $0x8] sm:$0xff] }
 0x151   : > { %v10730_v20 = vpop.eup %10729  ;;  %v1074_v43 = vsel %vm1072_vm7, %v1073_v10, %v1071_v30  ;;  %v1078_v12 = vsel %vm1077_vm8, %v11977_v48, %v1076_v53  ;;  %v1083_v4 = vmul.f32 %v10728_v51, %v11996_v23  ;;  %vm1098_vm13 = vcmp.eq.f32.partialorder %v11989_v47, inf  ;;  %v362_v53 = vld [vmem:[%s12155_s16] sm:$0xff]  ;;  %v364_v30 = vld [vmem:[%s12155_s16 + $0x10] sm:$0xff] }
 0x152   : > { %v10732_v32 = vpop.eup %10731  ;;  %9541 = vmatprep.mubr.msk.f32.mxu1 %vm1226_vm5, %v1074_v43  ;;  %v1090_v3 = vmul.f32 %v10730_v20, %v12000_v5  ;;  %v1081_v7 = vsel %vm1079_vm10, %v1080_v36, %v1078_v12  ;;  %v1099_v39 = vsel %vm1098_vm13, %v11989_v47, %v1097_v9  ;;  %vm1093_vm14 = vcmp.eq.f32.partialorder %v12000_v5, 0.0  ;;  %v366_v20 = vld [vmem:[%s12155_s16 + $0x20] sm:$0xff]  ;;  %v367_v43 = vld [vmem:[%s12155_s16 + $0x28] sm:$0xff]  ;;  %v368_v12 = vld [vmem:[%s12155_s16 + $0x30] sm:$0xff] }
 0x153   : > { %v1085_v27 = vsel %vm1084_vm9, %v11996_v23, %v1083_v4  ;;  %v10734_v33 = vpop.eup %10733  ;;  %v1104_v54 = vmul.f32 %v10732_v32, %v12008_v2  ;;  %v1094_v23 = vand.u32 2147483648, %v12000_v5  ;;  %v1101_v44 = vand.u32 2147483648, %v11989_v47  ;;  %v369_v36 = vld [vmem:[%s12155_s16 + $0x38] sm:$0xff]  ;;  %v371_v4 = vld [vmem:[%s12155_s16 + $0x48] sm:$0xff]  ;;  %v372_v32 = vld [vmem:[%s12155_s16 + $0x50] sm:$0xff] }
 0x154   : > { %v1088_v34 = vsel %vm1086_vm11, %v1087_v15, %v1085_v27  ;;  %9542 = vmatmul.mubr.msk.f32.gmra.mrb[12].mxu1 %vm1226_vm5, %v1081_v7  ;;  %v1092_v45 = vsel %vm1091_vm12, %v12000_v5, %v1090_v3  ;;  %v10736_v48 = vpop.eup %10735  ;;  %v1111_v35 = vmul.f32 %v10734_v33, %v12021_v61  ;;  %vm1100_vm15 = vcmp.eq.f32.partialorder %v11989_v47, 0.0  ;;  %v373_v15 = vld [vmem:[%s12155_s16 + $0x58] sm:$0xff]  ;;  %v374_v3 = vld [vmem:[%s12155_s16 + $0x60] sm:$0xff]  ;;  %v375_v9 = vld [vmem:[%s12155_s16 + $0x68] sm:$0xff] }
 0x155   : > { %9544 = vmatprep.mubr.msk.f32.mxu1 %vm1226_vm5, %v1088_v34  ;;  %v1095_v60 = vsel %vm1093_vm14, %v1094_v23, %v1092_v45  ;;  %vm1105_vm0 = vcmp.eq.f32.partialorder %v12008_v2, inf  ;;  %v1102_v6 = vsel %vm1100_vm15, %v1101_v44, %v1099_v39  ;;  %vm1112_vm3 = vcmp.eq.f32.partialorder %v12021_v61, inf  ;;  %v376_v27 = vld [vmem:[%s12155_s16 + $0x70] sm:$0xff]  ;;  %v377_v33 = vld [vmem:[%s12155_s16 + $0x78] sm:$0xff] }
 0x156   : > { %v10738_v38 = vpop.eup %10737  ;;  %v1106_v26 = vsel %vm1105_vm0, %v12008_v2, %v1104_v54  ;;  %v1118_v29 = vmul.f32 %v10736_v48, %v12033_v28  ;;  %v1108_v47 = vand.u32 2147483648, %v12008_v2  ;;  %v1113_v13 = vsel %vm1112_vm3, %v12021_v61, %v1111_v35 }
 0x157   : > { %v1125_v24 = vmul.f32 %v10738_v38, %v12056_v40  ;;  %vm1107_vm4 = vcmp.eq.f32.partialorder %v12008_v2, 0.0  ;;  %v1115_v49 = vand.u32 2147483648, %v12021_v61  ;;  %vm1114_vm6 = vcmp.eq.f32.partialorder %v12021_v61, 0.0 }
 0x158   : > { %9545 = vmatmul.mubr.msk.f32.gmra.mrb[14].mxu1 %vm1226_vm5, %v1095_v60  ;;  %v10740_v5 = vpop.eup %10739  ;;  %v1109_v19 = vsel %vm1107_vm4, %v1108_v47, %v1106_v26  ;;  %vm1119_vm7 = vcmp.eq.f32.partialorder %v12033_v28, inf  ;;  %vm1126_vm8 = vcmp.eq.f32.partialorder %v12056_v40, inf  ;;  %v1122_v2 = vand.u32 2147483648, %v12033_v28  ;;  %v2422_v26 = vld [vmem:[%s15283_s4 + $0x80] sm:$0xff] }
 0x159   : > { %9547 = vmatprep.mubr.msk.f32.mxu1 %vm1226_vm5, %v1102_v6  ;;  %v1116_v1 = vsel %vm1114_vm6, %v1115_v49, %v1113_v13  ;;  %v1120_v63 = vsel %vm1119_vm7, %v12033_v28, %v1118_v29  ;;  %v1132_v56 = vmul.f32 %v10740_v5, %v12071_v0  ;;  %v1127_v21 = vsel %vm1126_vm8, %v12056_v40, %v1125_v24  ;;  %v2423_v29 = vld [vmem:[%s15283_s4 + $0x88] sm:$0xff] }
 0x15a   : > { %vm1121_vm9 = vcmp.eq.f32.partialorder %v12033_v28, 0.0  ;;  %v1129_v61 = vand.u32 2147483648, %v12056_v40  ;;  %vm1128_vm10 = vcmp.eq.f32.partialorder %v12056_v40, 0.0  ;;  %vm1133_vm11 = vcmp.eq.f32.partialorder %v12071_v0, inf }
 0x15b   : > { %v1123_v58 = vsel %vm1121_vm9, %v1122_v2, %v1120_v63  ;;  %v1134_v10 = vsel %vm1133_vm11, %v12071_v0, %v1132_v56  ;;  %v1136_v40 = vand.u32 2147483648, %v12071_v0  ;;  %vm1135_vm12 = vcmp.eq.f32.partialorder %v12071_v0, 0.0  ;;  %v365_v0 = vld [vmem:[%s12155_s16 + $0x18] sm:$0xff] }
 0x15c   : > { %9548 = vmatmul.mubr.msk.f32.gmra.mrb[16].mxu1 %vm1226_vm5, %v1109_v19  ;;  %v1130_v28 = vsel %vm1128_vm10, %v1129_v61, %v1127_v21  ;;  %vm1424_vm13 = vcmask 326656   ;;  %v10339_v47 = vpack.c.bf16 %v2423_v29, %v2422_v26  ;;  %vm2429_vm14 = vcmask 130048  }
 0x15d   : > { %9550 = vmatprep.mubr.msk.f32.mxu1 %vm1226_vm5, %v1116_v1  ;;  %v1137_v51 = vsel %vm1135_vm12, %v1136_v40, %v1134_v10  ;;  %vm2913_vm15 = vcmask 1043456   ;;  %vm3563_vm0 = vcmask 1044480   ;;  %vm3514_vm4 = vcmask 105472  }
 0x15e   : > { %vm12501_vm3 = vmpackc.low %vm3563_vm0, %vm11389_vm1  ;;  %vm2768_vm1 = vcmask 31744  }
 0x160   : > { %9551 = vmatmul.mubr.msk.f32.gmra.mrb[18].mxu1 %vm1226_vm5, %v1123_v58 }
 0x161   : > { %9553 = vmatprep.mubr.msk.f32.mxu1 %vm1226_vm5, %v1130_v28 }
 0x164   : > { %9554 = vmatmul.mubr.msk.f32.gmra.mrb[20].mxu1 %vm1226_vm5, %v1137_v51  ;;  %vm1620_vm5 = vcmask 72704  }
 0x165   : > { %9566 = vmatprep.mubr.msk.f32.mxu1 %vm1424_vm13, %v362_v53 }
 0x168   : > { %9567 = vmatmul.mubr.msk.f32.vlgmr.msra.gmra.mrb[6].mxu1 %vm1424_vm13, %v363_v52 }
 0x169   : > { %10334 = vmatpush3.bf16.msk.msra.mxu1 %vm12064_vm2, %v12053_v14  ;;  %9569 = vmatprep.mubr.msk.f32.mxu1 %vm1424_vm13, %v364_v30  ;;  %v370_v14 = vld [vmem:[%s12155_s16 + $0x40] sm:$0xff] }
 0x16a   : > { %10340 = vmatprep.subr.bf16.mxu1 %v10339_v47 }
 0x16c   : > { %9570 = vmatmul.mubr.msk.f32.gmra.mrb[8].mxu1 %vm1424_vm13, %v365_v0 }
 0x16d   : > { %9572 = vmatprep.mubr.msk.f32.mxu1 %vm1424_vm13, %v366_v20  ;;  %v12335_v20 = vld [vmem:[%s15283_s4 + $0x60] ss:$0 sm:$0xff] }
 0x170   : > { %9573 = vmatmul.mubr.msk.f32.gmra.mrb[10].mxu1 %vm1424_vm13, %v367_v43 }
 0x171   : > { %9575 = vmatprep.mubr.msk.f32.mxu1 %vm1424_vm13, %v368_v12 }
 0x174   : > { %9576 = vmatmul.mubr.msk.f32.gmra.mrb[12].mxu1 %vm1424_vm13, %v369_v36 }
 0x175   : > { %9578 = vmatprep.mubr.msk.f32.mxu1 %vm1424_vm13, %v370_v14 }
 0x178   : > { %9579 = vmatmul.mubr.msk.f32.gmra.mrb[14].mxu1 %vm1424_vm13, %v371_v4 }
 0x179   : > { %9581 = vmatprep.mubr.msk.f32.mxu1 %vm1424_vm13, %v372_v32 }
 0x17c   : > { %9582 = vmatmul.mubr.msk.f32.gmra.mrb[16].mxu1 %vm1424_vm13, %v373_v15 }
 0x17d   : > { %9584 = vmatprep.mubr.msk.f32.mxu1 %vm1424_vm13, %v374_v3 }
 0x180   : > { %9585 = vmatmul.mubr.msk.f32.gmra.mrb[18].mxu1 %vm1424_vm13, %v375_v9 }
 0x181   : > { %9587 = vmatprep.mubr.msk.f32.mxu1 %vm1424_vm13, %v376_v27 }
 0x184   : > { %9588 = vmatmul.mubr.msk.f32.gmra.mrb[20].mxu1 %vm1424_vm13, %v377_v33 }
 0x185   : > { %9594 = vmatprep.mubr.msk.f32.mxu1 %vm1620_vm5, %v11901_v57 }
 0x188   : > { %9595 = vmatmul.mubr.msk.f32.vlgmr.msra.gmra.mrb[6].mxu1 %vm1620_vm5, %v11895_v11 }
 0x189   : > { %9597 = vmatprep.mubr.msk.f32.mxu1 %vm1620_vm5, %v11918_v8  ;;  %10342 = vmatpush3.bf16.msra.mxu1 %v10339_v47 }
 0x18c   : > { %9598 = vmatmul.mubr.msk.f32.gmra.mrb[8].mxu1 %vm1620_vm5, %v11912_v41 }
 0x18d   : > { %9600 = vmatprep.mubr.msk.f32.mxu1 %vm1620_vm5, %v11935_v62 }
 0x190   : > { %9601 = vmatmul.mubr.msk.f32.gmra.mrb[10].mxu1 %vm1620_vm5, %v11929_v59 }
 0x191   : > { %9603 = vmatprep.mubr.msk.f32.mxu1 %vm1620_vm5, %v11959_v37 }
 0x194   : > { %9604 = vmatmul.mubr.msk.f32.gmra.mrb[12].mxu1 %vm1620_vm5, %v11950_v31 }
 0x195   : > { %9606 = vmatprep.mubr.msk.f32.mxu1 %vm1620_vm5, %v11981_v50 }
 0x198   : > { %9607 = vmatmul.mubr.msk.f32.gmra.mrb[14].mxu1 %vm1620_vm5, %v11973_v55 }
 0x199   : > { %9609 = vmatprep.mubr.msk.f32.mxu1 %vm1620_vm5, %v11851_v17 }
 0x19c   : > { %9610 = vmatmul.mubr.msk.f32.gmra.mrb[16].mxu1 %vm1620_vm5, %v11845_v16 }
 0x19d   : > { %9612 = vmatprep.mubr.msk.f32.mxu1 %vm1620_vm5, %v11873_v46 }
 0x1a0   : > { %9613 = vmatmul.mubr.msk.f32.gmra.mrb[18].mxu1 %vm1620_vm5, %v11867_v18 }
 0x1a1   : > { %9615 = vmatprep.mubr.msk.f32.mxu1 %vm1620_vm5, %v11889_v25 }
 0x1a4   : > { %9616 = vmatmul.mubr.msk.f32.gmra.mrb[20].mxu1 %vm1620_vm5, %v11883_v22 }
 0x1c4   : > { %v12230_v11 = vpop.f32.mrb[42].mxu0 }
 0x1c5   : > { %v12232_v57 = vpop.f32.mrb[43].mxu0 }
 0x1c8   : > { %v12234_v17 = vpop.f32.mrb[44].mxu0 }
 0x1c9   : > { %v12236_v41 = vpop.f32.mrb[45].mxu0 }
 0x1cc   : > { %v12238_v16 = vpop.f32.mrb[46].mxu0 }
 0x1cd   : > { %v12240_v46 = vpop.f32.mrb[47].mxu0 }
 0x1d0   : > { %v12242_v8 = vpop.f32.mrb[48].mxu0 }
 0x1d1   : > { %v12244_v18 = vpop.f32.mrb[49].mxu0 }
 0x1d4   : > { %v12246_v25 = vpop.f32.mrb[50].mxu0 }
 0x1d5   : > { %v12248_v59 = vpop.f32.mrb[51].mxu0 }
 0x1d8   : > { %v12250_v22 = vpop.f32.mrb[52].mxu0 }
 0x1d9   : > { %v12252_v62 = vpop.f32.mrb[53].mxu0 }
 0x1da   : > { %15423 = vst [vmem:[#allocation3_spill] sm:$0xff] %v12252_v62 }
 0x1dc   : > { %v12254_v31 = vpop.f32.mrb[54].mxu0 }
 0x1dd   : > { %15424 = vst [vmem:[#allocation5_spill] sm:$0xff] %v12254_v31  ;;  %v12256_v37 = vpop.f32.mrb[55].mxu0 }
 0x1de   : > { %15425 = vst [vmem:[#allocation4_spill] sm:$0xff] %v12256_v37 }
 0x1e0   : > { %v12258_v55 = vpop.f32.mrb[56].mxu0 }
 0x1e1   : > { %15426 = vst [vmem:[#allocation6_spill] sm:$0xff] %v12258_v55  ;;  %v12260_v50 = vpop.f32.mrb[57].mxu0 }
 0x1e2   : > { %15427 = vst [vmem:[#allocation7_spill] sm:$0xff] %v12260_v50 }
 0x1e4   : > { %v12262_v7 = vpop.f32.mrb[58].mxu0 }
 0x1e5   : > { %v12264_v34 = vpop.f32.mrb[59].mxu0 }
 0x1e8   : > { %v12266_v45 = vpop.f32.mrb[60].mxu0 }
 0x1e9   : > { %v12268_v54 = vpop.f32.mrb[61].mxu0 }
 0x1ec   : > { %v12270_v48 = vpop.f32.mrb[62].mxu0 }
 0x1ed   : > { %v12272_v23 = vpop.f32.mrb[63].mxu0 }
 0x1f0   : > { %v12274_v39 = vpop.f32.mrb[64].mxu0 }
 0x1f1   : > { %v12276_v35 = vpop.f32.mrb[65].mxu0 }
 0x1f4   : > { %v12278_v44 = vpop.f32.mrb[66].mxu0 }
 0x1f5   : > { %v12280_v38 = vpop.f32.mrb[67].mxu0 }
 0x1f8   : > { %v12282_v60 = vpop.f32.mrb[68].mxu0 }
 0x1f9   : > { %v12284_v6 = vpop.f32.mrb[69].mxu0 }
 0x1fa   : > { %15428 = vst [vmem:[#allocation8_spill] sm:$0xff] %v12284_v6 }
 0x1fc   : > { %v12292_v5 = vpop.f32.mrb[70].mxu0 }
 0x1fd   : > { %15429 = vst [vmem:[#allocation9_spill] sm:$0xff] %v12292_v5  ;;  %v12294_v13 = vpop.f32.mrb[71].mxu0 }
 0x1fe   : > { %15430 = vst [vmem:[#allocation10_spill] sm:$0xff] %v12294_v13 }
 0x200   : > { %v12296_v24 = vpop.f32.mrb[72].mxu0 }
 0x201   : > { %15431 = vst [vmem:[#allocation11_spill] sm:$0xff] %v12296_v24  ;;  %v12298_v49 = vpop.f32.mrb[73].mxu0 }
 0x202   : > { %15432 = vst [vmem:[#allocation12_spill] sm:$0xff] %v12298_v49 }
 0x204   : > { %v12300_v19 = vpop.f32.mrb[74].mxu0 }
 0x205   : > { %v12302_v1 = vpop.f32.mrb[75].mxu0 }
 0x208   : > { %v12304_v63 = vpop.f32.mrb[76].mxu0 }
 0x209   : > { %v12306_v56 = vpop.f32.mrb[77].mxu0 }
 0x20c   : > { %v12308_v2 = vpop.f32.mrb[78].mxu0 }
 0x20d   : > { %v12310_v21 = vpop.f32.mrb[79].mxu0 }
 0x210   : > { %v12312_v61 = vpop.f32.mrb[80].mxu0 }
 0x211   : > { %v12314_v58 = vpop.f32.mrb[81].mxu0 }
 0x214   : > { %v12316_v28 = vpop.f32.mrb[82].mxu0 }
 0x215   : > { %v12318_v10 = vpop.f32.mrb[83].mxu0 }
 0x218   : > { %v12320_v40 = vpop.f32.mrb[84].mxu0 }
 0x219   : > { %v12322_v53 = vpop.f32.mrb[85].mxu0 }
 0x21a   : > { %15433 = vst [vmem:[#allocation13_spill] sm:$0xff] %v12322_v53 }
 0x21c   : > { %v12324_v51 = vpop.f32.mrb[86].mxu0 }
 0x21d   : > { %15434 = vst [vmem:[#allocation14_spill] sm:$0xff] %v12324_v51  ;;  %v12326_v52 = vpop.f32.mrb[87].mxu0 }
 0x21e   : > { %15435 = vst [vmem:[#allocation15_spill] sm:$0xff] %v12326_v52 }
 0x220   : > { %v12328_v30 = vpop.f32.mrb[88].mxu0 }
 0x221   : > { %15436 = vst [vmem:[#allocation16_spill] sm:$0xff] %v12328_v30  ;;  %v12330_v0 = vpop.f32.mrb[89].mxu0 }
 0x222   : > { %15437 = vst [vmem:[#allocation17_spill] sm:$0xff] %v12330_v0 }
 0x25b   : > { %v9596_v43 = vpop.f32.mrb[6].mxu1 }
 0x25c   : > { %v12338_v12 = vadd.f32 %v9596_v43, %v12335_v20  ;;  %v1739_v36 = vpop.f32.mrb[7].mxu1 }
 0x25d   : > { %v12341_v14 = vadd.f32 %v12335_v20, %v1739_v36 }
 0x25e   : > { %v8349_v4 = vmul.f32 -1.442695, %v12338_v12 }
 0x25f   : > { %v8348_v32 = vmul.f32 -1.442695, %v12341_v14  ;;  %v9599_v15 = vpop.f32.mrb[8].mxu1 }
 0x260   : > { %10741 = vpow2.f32 %v8349_v4  ;;  %v12346_v3 = vadd.f32 %v9599_v15, %v12335_v20  ;;  %v1749_v9 = vpop.f32.mrb[9].mxu1 }
 0x261   : > { %10743 = vpow2.f32 %v8348_v32  ;;  %v12349_v27 = vadd.f32 %v12335_v20, %v1749_v9 }
 0x262   : > { %v8351_v33 = vmul.f32 -1.442695, %v12346_v3 }
 0x263   : > { %v8350_v26 = vmul.f32 -1.442695, %v12349_v27  ;;  %v9602_v29 = vpop.f32.mrb[10].mxu1 }
 0x264   : > { %10745 = vpow2.f32 %v8351_v33  ;;  %v12354_v47 = vadd.f32 %v9602_v29, %v12335_v20  ;;  %v1759_v43 = vpop.f32.mrb[11].mxu1 }
 0x265   : > { %10747 = vpow2.f32 %v8350_v26  ;;  %v12357_v36 = vadd.f32 %v12335_v20, %v1759_v43 }
 0x266   : > { %v8353_v4 = vmul.f32 -1.442695, %v12354_v47 }
 0x267   : > { %v8352_v32 = vmul.f32 -1.442695, %v12357_v36  ;;  %v9605_v15 = vpop.f32.mrb[12].mxu1 }
 0x268   : > { %10749 = vpow2.f32 %v8353_v4  ;;  %v12362_v9 = vadd.f32 %v9605_v15, %v12335_v20  ;;  %v1769_v42 = vpop.f32.mrb[13].mxu1 }
 0x269   : > { %10751 = vpow2.f32 %v8352_v32  ;;  %v12365_v33 = vadd.f32 %v12335_v20, %v1769_v42 }
 0x26a   : > { %v10742_v29 = vpop.eup %10741  ;;  %v8355_v26 = vmul.f32 -1.442695, %v12362_v9 }
 0x26b   : > { %v10744_v0 = vpop.eup %10743  ;;  %v1904_v43 = vadd.f32 1.0, %v10742_v29  ;;  %v8354_v49 = vmul.f32 -1.442695, %v12365_v33  ;;  %v9608_v50 = vpop.f32.mrb[14].mxu1 }
 0x26c   : > { %v1903_v30 = vadd.f32 1.0, %v10744_v0  ;;  %10753 = vpow2.f32 %v8355_v26  ;;  %v12370_v4 = vadd.f32 %v9608_v50, %v12335_v20  ;;  %v1779_v15 = vpop.f32.mrb[15].mxu1 }
 0x26d   : > { %10755 = vrcp.f32 %v1904_v43  ;;  %v12373_v32 = vadd.f32 %v12335_v20, %v1779_v15 }
 0x26e   : > { %v10746_v42 = vpop.eup %10745  ;;  %10757 = vrcp.f32 %v1903_v30  ;;  %v8357_v24 = vmul.f32 -1.442695, %v12370_v4 }
 0x26f   : > { %v10748_v55 = vpop.eup %10747  ;;  %v1906_v52 = vadd.f32 1.0, %v10746_v42  ;;  %10759 = vpow2.f32 %v8354_v49  ;;  %v8356_v29 = vmul.f32 -1.442695, %v12373_v32  ;;  %v9611_v13 = vpop.f32.mrb[16].mxu1 }
 0x270   : > { %v1905_v0 = vadd.f32 1.0, %v10748_v55  ;;  %10761 = vpow2.f32 %v8357_v24  ;;  %v12378_v50 = vadd.f32 %v9611_v13, %v12335_v20  ;;  %v1789_v26 = vpop.f32.mrb[17].mxu1 }
 0x271   : > { %10763 = vrcp.f32 %v1906_v52  ;;  %v12381_v43 = vadd.f32 %v12335_v20, %v1789_v26 }
 0x272   : > { %v10750_v15 = vpop.eup %10749  ;;  %10765 = vrcp.f32 %v1905_v0  ;;  %v8359_v30 = vmul.f32 -1.442695, %v12378_v50 }
 0x273   : > { %v10752_v37 = vpop.eup %10751  ;;  %v1908_v42 = vadd.f32 1.0, %v10750_v15  ;;  %10767 = vpow2.f32 %v8356_v29  ;;  %v8358_v49 = vmul.f32 -1.442695, %v12381_v43  ;;  %v9614_v51 = vpop.f32.mrb[18].mxu1 }
 0x274   : > { %v1907_v55 = vadd.f32 1.0, %v10752_v37  ;;  %10769 = vpow2.f32 %v8359_v30  ;;  %v12386_v13 = vadd.f32 %v9614_v51, %v12335_v20  ;;  %v1799_v24 = vpop.f32.mrb[19].mxu1 }
 0x275   : > { %10771 = vrcp.f32 %v1908_v42  ;;  %v12389_v52 = vadd.f32 %v12335_v20, %v1799_v24 }
 0x276   : > { %v10754_v26 = vpop.eup %10753  ;;  %10773 = vrcp.f32 %v1907_v55  ;;  %v8361_v0 = vmul.f32 -1.442695, %v12386_v13 }
 0x277   : > { %v10756_v5 = vpop.eup %10755  ;;  %v1910_v15 = vadd.f32 1.0, %v10754_v26  ;;  %10775 = vpow2.f32 %v8358_v49  ;;  %v8360_v29 = vmul.f32 -1.442695, %v12389_v52  ;;  %v9617_v31 = vpop.f32.mrb[20].mxu1 }
 0x278   : > { %v10758_v37 = vpop.eup %10757  ;;  %10777 = vpow2.f32 %v8361_v0  ;;  %v12394_v51 = vadd.f32 %v9617_v31, %v12335_v20  ;;  %v1809_v30 = vpop.f32.mrb[21].mxu1  ;;  %v12403_v49 = vmul.f32 %v10756_v5, %v12338_v12 }
 0x279   : > { %v10760_v42 = vpop.eup %10759  ;;  %v12397_v24 = vmul.f32 %v10758_v37, %v12341_v14  ;;  %v12400_v55 = vadd.f32 %v12335_v20, %v1809_v30  ;;  %10779 = vpow2.f32 %v8360_v29 }
 0x27a   : > { %v10762_v53 = vpop.eup %10761  ;;  %15439 = vst [vmem:[#allocation19_spill] sm:$0xff] %v12403_v49  ;;  %v1909_v26 = vadd.f32 1.0, %v10760_v42  ;;  %v8363_v0 = vmul.f32 -1.442695, %v12394_v51  ;;  %10781 = vrcp.f32 %v1910_v15 }
 0x27b   : > { %15438 = vst [vmem:[#allocation18_spill] sm:$0xff] %v12397_v24  ;;  %v10764_v6 = vpop.eup %10763  ;;  %v1912_v31 = vadd.f32 1.0, %v10762_v53  ;;  %v8362_v62 = vmul.f32 -1.442695, %v12400_v55  ;;  %9700 = vmatprep.mubr.msk.f32.mxu1 %vm2429_vm14, %v12397_v24 }
 0x27c   : > { %v10766_v14 = vpop.eup %10765  ;;  %10783 = vrcp.f32 %v1909_v26  ;;  %9701 = vmatmul.mubr.msk.f32.vlgmr.msra.gmra.mrb[22].mxu1 %vm2429_vm14, %v12403_v49  ;;  %v12415_v29 = vmul.f32 %v10764_v6, %v12346_v3 }
 0x27d   : > { %v10768_v20 = vpop.eup %10767  ;;  %v12412_v5 = vmul.f32 %v10766_v14, %v12349_v27  ;;  %10785 = vrcp.f32 %v1912_v31 }
 0x27e   : > { %v10770_v12 = vpop.eup %10769  ;;  %15441 = vst [vmem:[#allocation21_spill] sm:$0xff] %v12415_v29  ;;  %v1911_v53 = vadd.f32 1.0, %v10768_v20  ;;  %10787 = vpow2.f32 %v8363_v0 }
 0x27f   : > { %15440 = vst [vmem:[#allocation20_spill] sm:$0xff] %v12412_v5  ;;  %v10772_v15 = vpop.eup %10771  ;;  %v1914_v37 = vadd.f32 1.0, %v10770_v12  ;;  %10789 = vpow2.f32 %v8362_v62  ;;  %9703 = vmatprep.mubr.msk.f32.mxu1 %vm2429_vm14, %v12412_v5 }
 0x280   : > { %v10774_v30 = vpop.eup %10773  ;;  %10791 = vrcp.f32 %v1911_v53  ;;  %9704 = vmatmul.mubr.msk.f32.gmra.mrb[24].mxu1 %vm2429_vm14, %v12415_v29  ;;  %v12425_v6 = vmul.f32 %v10772_v15, %v12354_v47 }
 0x281   : > { %v10776_v27 = vpop.eup %10775  ;;  %v12422_v42 = vmul.f32 %v10774_v30, %v12357_v36  ;;  %10793 = vrcp.f32 %v1914_v37 }
 0x282   : > { %v10778_v26 = vpop.eup %10777  ;;  %15443 = vst [vmem:[#allocation23_spill] sm:$0xff] %v12425_v6  ;;  %v1913_v3 = vadd.f32 1.0, %v10776_v27 }
 0x283   : > { %15442 = vst [vmem:[#allocation22_spill] sm:$0xff] %v12422_v42  ;;  %v1916_v0 = vadd.f32 1.0, %v10778_v26  ;;  %9706 = vmatprep.mubr.msk.f32.mxu1 %vm2429_vm14, %v12422_v42  ;;  %v10780_v62 = vpop.eup %10779 }
 0x284   : > { %10795 = vrcp.f32 %v1913_v3  ;;  %9707 = vmatmul.mubr.msk.f32.gmra.mrb[26].mxu1 %vm2429_vm14, %v12425_v6  ;;  %v10782_v31 = vpop.eup %10781  ;;  %v1915_v14 = vadd.f32 1.0, %v10780_v62 }
 0x285   : > { %10797 = vrcp.f32 %v1916_v0  ;;  %v12435_v53 = vmul.f32 %v10782_v31, %v12362_v9 }
 0x286   : > { %v10784_v20 = vpop.eup %10783  ;;  %10799 = vrcp.f32 %v1915_v14 }
 0x287   : > { %v10786_v36 = vpop.eup %10785  ;;  %v12432_v12 = vmul.f32 %v10784_v20, %v12365_v33  ;;  %15445 = vst [vmem:[#allocation25_spill] sm:$0xff] %v12435_v53 }
 0x288   : > { %v10788_v47 = vpop.eup %10787  ;;  %v12445_v33 = vmul.f32 %v10786_v36, %v12370_v4  ;;  %v3512_v36 = vld [vmem:[%s15283_s4 + $0xb0] sm:$0xff] }
 0x289   : > { %15444 = vst [vmem:[#allocation24_spill] sm:$0xff] %v12432_v12  ;;  %v10790_v15 = vpop.eup %10789  ;;  %v1918_v37 = vadd.f32 1.0, %v10788_v47  ;;  %9709 = vmatprep.mubr.msk.f32.mxu1 %vm2429_vm14, %v12432_v12  ;;  %v3513_v47 = vld [vmem:[%s15283_s4 + $0xb8] sm:$0x1f] }
 0x28a   : > { %v10792_v30 = vpop.eup %10791  ;;  %v1917_v27 = vadd.f32 1.0, %v10790_v15  ;;  %9710 = vmatmul.mubr.msk.f32.gmra.mrb[28].mxu1 %vm2429_vm14, %v12435_v53  ;;  %15447 = vst [vmem:[#allocation27_spill] sm:$0xff] %v12445_v33  ;;  %v4204_v15 = vld [vmem:[%s15283_s4 + $0xd8] sm:$0xff] }
 0x28b   : > { %v12442_v26 = vmul.f32 %v10792_v30, %v12373_v32  ;;  %10801 = vrcp.f32 %v1918_v37  ;;  %v10794_v9 = vpop.eup %10793 }
 0x28c   : > { %10803 = vrcp.f32 %v1917_v27  ;;  %v12455_v32 = vmul.f32 %v10794_v9, %v12378_v50  ;;  %v10343_v9 = vpack.c.bf16 %v3513_v47, %v3512_v36 }
 0x28d   : > { %15446 = vst [vmem:[#allocation26_spill] sm:$0xff] %v12442_v26  ;;  %9712 = vmatprep.mubr.msk.f32.mxu1 %vm2429_vm14, %v12442_v26 }
 0x28e   : > { %v10796_v3 = vpop.eup %10795  ;;  %9713 = vmatmul.mubr.msk.f32.gmra.mrb[30].mxu1 %vm2429_vm14, %v12445_v33  ;;  %15449 = vst [vmem:[#allocation29_spill] sm:$0xff] %v12455_v32  ;;  %10345 = vmatprep.subr.msk.bf16.mxu0 %vm12501_vm3, %v10343_v9 }
 0x28f   : > { %v12452_v0 = vmul.f32 %v10796_v3, %v12381_v43  ;;  %v10798_v62 = vpop.eup %10797  ;;  %v4205_v3 = vld [vmem:[%s15283_s4 + $0xe0] sm:$0x1f]  ;;  %10348 = vmatpush3.bf16.msk.msra.mxu0 %vm12501_vm3, %v10343_v9 }
 0x290   : > { %v10800_v31 = vpop.eup %10799  ;;  %v12465_v14 = vmul.f32 %v10798_v62, %v12386_v13  ;;  %v2767_v13 = vld [vmem:[%s15283_s4 + $0x98] sm:$0xf] }
 0x291   : > { %15448 = vst [vmem:[#allocation28_spill] sm:$0xff] %v12452_v0  ;;  %9715 = vmatprep.mubr.msk.f32.mxu1 %vm2429_vm14, %v12452_v0  ;;  %v12460_v4 = vmul.f32 %v10800_v31, %v12389_v52  ;;  %9724 = vmatprep.subr.msk.mxu1 %vm2913_vm15, %v2767_v13  ;;  %v12510_v31 = vpack.c.bf16 %v4205_v3, %v4204_v15 }
 0x292   : > { %9716 = vmatmul.mubr.msk.f32.gmra.mrb[32].mxu1 %vm2429_vm14, %v12455_v32  ;;  %15451 = vst [vmem:[#allocation31_spill] sm:$0xff] %v12465_v14 }
 0x293   : > { %15450 = vst [vmem:[#allocation30_spill] sm:$0xff] %v12460_v4  ;;  %9718 = vmatprep.mubr.msk.f32.mxu1 %vm2429_vm14, %v12460_v4  ;;  %9725 = vmatpush3.msk.msra.mxu1 %vm2913_vm15, %v2767_v13 }
 0x294   : > { %10361 = vmatprep.subr.msk.bf16.mxu1 %vm12501_vm3, %v12510_v31 }
 0x295   : > { %v10802_v43 = vpop.eup %10801 }
 0x296   : > { %v10804_v20 = vpop.eup %10803  ;;  %9719 = vmatmul.mubr.msk.f32.gmra.mrb[34].mxu1 %vm2429_vm14, %v12465_v14  ;;  %v12475_v52 = vmul.f32 %v10802_v43, %v12394_v51  ;;  %v12489_v51 = vld [vmem:[%s15283_s4 + $0x90] ss:$0 sm:$0xff] }
 0x297   : > { %v12472_v50 = vmul.f32 %v10804_v20, %v12400_v55 }
 0x298   : > { %15453 = vst [vmem:[#allocation33_spill] sm:$0xff] %v12475_v52 }
 0x299   : > { %15452 = vst [vmem:[#allocation32_spill] sm:$0xff] %v12472_v50  ;;  %9721 = vmatprep.mubr.msk.f32.mxu1 %vm2429_vm14, %v12472_v50 }
 0x29a   : > { %9722 = vmatmul.mubr.msk.f32.gmra.mrb[36].mxu1 %vm2429_vm14, %v12475_v52 }
 0x34f   : > { %v9702_v55 = vpop.f32.mrb[22].mxu1 }
 0x350   : > { %v2550_v30 = vadd.f32 %v9702_v55, %v12489_v51  ;;  %v2544_v27 = vpop.f32.mrb[23].mxu1 }
 0x351   : > { %v2545_v62 = vadd.f32 %v12489_v51, %v2544_v27 }
 0x352   : > { %v8431_v43 = vmul.f32 -1.442695, %v2550_v30 }
 0x353   : > { %v8430_v20 = vmul.f32 -1.442695, %v2545_v62  ;;  %v9705_v13 = vpop.f32.mrb[24].mxu1 }
 0x354   : > { %10805 = vpow2.f32 %v8431_v43  ;;  %v2560_v55 = vadd.f32 %v9705_v13, %v12489_v51  ;;  %v2554_v36 = vpop.f32.mrb[25].mxu1 }
 0x355   : > { %10807 = vpow2.f32 %v8430_v20  ;;  %v2555_v47 = vadd.f32 %v12489_v51, %v2554_v36 }
 0x356   : > { %v8433_v15 = vmul.f32 -1.442695, %v2560_v55 }
 0x357   : > { %v8432_v30 = vmul.f32 -1.442695, %v2555_v47  ;;  %v9708_v27 = vpop.f32.mrb[26].mxu1 }
 0x358   : > { %10809 = vpow2.f32 %v8433_v15  ;;  %v2570_v3 = vadd.f32 %v9708_v27, %v12489_v51  ;;  %v2564_v62 = vpop.f32.mrb[27].mxu1 }
 0x359   : > { %10811 = vpow2.f32 %v8432_v30  ;;  %v2565_v9 = vadd.f32 %v12489_v51, %v2564_v62 }
 0x35a   : > { %v8435_v52 = vmul.f32 -1.442695, %v2570_v3 }
 0x35b   : > { %v8434_v50 = vmul.f32 -1.442695, %v2565_v9 }
 0x35c   : > { %10813 = vpow2.f32 %v8435_v52 }
 0x35d   : > { %10815 = vpow2.f32 %v8434_v50  ;;  %v9711_v43 = vpop.f32.mrb[28].mxu1 }
 0x35e   : > { %v10806_v13 = vpop.eup %10805  ;;  %v2580_v20 = vadd.f32 %v9711_v43, %v12489_v51  ;;  %v2574_v14 = vpop.f32.mrb[29].mxu1 }
 0x35f   : > { %v10808_v36 = vpop.eup %10807  ;;  %v2672_v55 = vadd.f32 1.0, %v10806_v13  ;;  %v2575_v47 = vadd.f32 %v12489_v51, %v2574_v14 }
 0x360   : > { %v2671_v15 = vadd.f32 1.0, %v10808_v36  ;;  %v8437_v4 = vmul.f32 -1.442695, %v2580_v20 }
 0x361   : > { %10817 = vrcp.f32 %v2672_v55  ;;  %v8436_v27 = vmul.f32 -1.442695, %v2575_v47  ;;  %v9714_v30 = vpop.f32.mrb[30].mxu1 }
 0x362   : > { %v10810_v32 = vpop.eup %10809  ;;  %10819 = vrcp.f32 %v2671_v15  ;;  %v2590_v3 = vadd.f32 %v9714_v30, %v12489_v51  ;;  %v2584_v52 = vpop.f32.mrb[31].mxu1 }
 0x363   : > { %v10812_v50 = vpop.eup %10811  ;;  %v2674_v62 = vadd.f32 1.0, %v10810_v32  ;;  %10821 = vpow2.f32 %v8437_v4  ;;  %v2585_v9 = vadd.f32 %v12489_v51, %v2584_v52 }
 0x364   : > { %v2673_v43 = vadd.f32 1.0, %v10812_v50  ;;  %10823 = vpow2.f32 %v8436_v27  ;;  %v8439_v13 = vmul.f32 -1.442695, %v2590_v3 }
 0x365   : > { %10825 = vrcp.f32 %v2674_v62  ;;  %v8438_v14 = vmul.f32 -1.442695, %v2585_v9  ;;  %v9717_v36 = vpop.f32.mrb[32].mxu1 }
 0x366   : > { %v10814_v20 = vpop.eup %10813  ;;  %10827 = vrcp.f32 %v2673_v43  ;;  %v2600_v55 = vadd.f32 %v9717_v36, %v12489_v51  ;;  %v2594_v47 = vpop.f32.mrb[33].mxu1 }
 0x367   : > { %v10816_v15 = vpop.eup %10815  ;;  %v2676_v0 = vadd.f32 1.0, %v10814_v20  ;;  %10829 = vpow2.f32 %v8439_v13  ;;  %v2595_v30 = vadd.f32 %v12489_v51, %v2594_v47 }
 0x368   : > { %v2675_v32 = vadd.f32 1.0, %v10816_v15  ;;  %10831 = vpow2.f32 %v8438_v14  ;;  %v8441_v4 = vmul.f32 -1.442695, %v2600_v55 }
 0x369   : > { %10833 = vrcp.f32 %v2676_v0  ;;  %v8440_v52 = vmul.f32 -1.442695, %v2595_v30  ;;  %v9720_v27 = vpop.f32.mrb[34].mxu1 }
 0x36a   : > { %10835 = vrcp.f32 %v2675_v32  ;;  %v2610_v3 = vadd.f32 %v9720_v27, %v12489_v51  ;;  %v2604_v50 = vpop.f32.mrb[35].mxu1 }
 0x36b   : > { %v10818_v62 = vpop.eup %10817  ;;  %10837 = vpow2.f32 %v8441_v4  ;;  %v2605_v9 = vadd.f32 %v12489_v51, %v2604_v50 }
 0x36c   : > { %v10820_v43 = vpop.eup %10819  ;;  %10839 = vpow2.f32 %v8440_v52  ;;  %v8443_v13 = vmul.f32 -1.442695, %v2610_v3  ;;  %v12532_v36 = vmul.f32 %v10818_v62, %v12230_v11  ;;  %v12535_v14 = vmul.f32 %v10818_v62, %v12262_v7 }
 0x36d   : > { %v10822_v0 = vpop.eup %10821  ;;  %v8442_v20 = vmul.f32 -1.442695, %v2605_v9  ;;  %v9723_v55 = vpop.f32.mrb[36].mxu1  ;;  %v12538_v47 = vmul.f32 %v10820_v43, %v12232_v57  ;;  %v12541_v15 = vmul.f32 %v10820_v43, %v12264_v34  ;;  %v12544_v30 = vmul.f32 %v10820_v43, %v12302_v1 }
 0x36e   : > { %15456 = vst [vmem:[#allocation34_spill] sm:$0xff] %v12535_v14  ;;  %v10824_v32 = vpop.eup %10823  ;;  %v2678_v4 = vadd.f32 1.0, %v10822_v0  ;;  %10841 = vpow2.f32 %v8443_v13  ;;  %v2620_v11 = vadd.f32 %v9723_v55, %v12489_v51  ;;  %v2614_v52 = vpop.f32.mrb[37].mxu1  ;;  %v12548_v7 = vmul.f32 %v10818_v62, %v12300_v19 }
 0x36f   : > { %15457 = vst [vmem:[#allocation35_spill] sm:$0xff] %v12541_v15  ;;  %15458 = vst [vmem:[#allocation36_spill] sm:$0xff] %v12544_v30  ;;  %v10826_v27 = vpop.eup %10825  ;;  %v2677_v3 = vadd.f32 1.0, %v10824_v32  ;;  %10843 = vpow2.f32 %v8442_v20  ;;  %v2615_v57 = vadd.f32 %v12489_v51, %v2614_v52  ;;  %9726 = vmatprep.mubr.msk.f32.mxu1 %vm2768_vm1, %v12538_v47 }
 0x370   : > { %15459 = vst [vmem:[#allocation37_spill] sm:$0xff] %v12548_v7  ;;  %v10828_v34 = vpop.eup %10827  ;;  %10845 = vrcp.f32 %v2678_v4  ;;  %v8445_v1 = vmul.f32 -1.442695, %v2620_v11  ;;  %9727 = vmatmul.mubr.msk.f32.vlgmr.msra.gmra.mrb[38].mxu1 %vm2768_vm1, %v12532_v36  ;;  %v12556_v50 = vmul.f32 %v10826_v27, %v12234_v17  ;;  %v12559_v19 = vmul.f32 %v10826_v27, %v12266_v45 }
 0x371   : > { %v10830_v62 = vpop.eup %10829  ;;  %10847 = vrcp.f32 %v2677_v3  ;;  %v8444_v9 = vmul.f32 -1.442695, %v2615_v57  ;;  %v12562_v51 = vmul.f32 %v10828_v34, %v12236_v41  ;;  %v12565_v43 = vmul.f32 %v10828_v34, %v12268_v54  ;;  %10364 = vmatpush3.bf16.msk.msra.mxu1 %vm12501_vm3, %v12510_v31 }
 0x372   : > { %15460 = vst [vmem:[#allocation38_spill] sm:$0xff] %v12556_v50  ;;  %15461 = vst [vmem:[#allocation39_spill] sm:$0xff] %v12559_v19  ;;  %v10832_v13 = vpop.eup %10831  ;;  %v2680_v0 = vadd.f32 1.0, %v10830_v62  ;;  %10849 = vpow2.f32 %v8445_v1  ;;  %v12571_v17 = vmul.f32 %v10828_v34, %v12306_v56  ;;  %v12574_v45 = vmul.f32 %v10826_v27, %v12304_v63 }
 0x373   : > { %15462 = vst [vmem:[#allocation40_spill] sm:$0xff] %v12562_v51  ;;  %15463 = vst [vmem:[#allocation41_spill] sm:$0xff] %v12565_v43  ;;  %v10834_v20 = vpop.eup %10833  ;;  %v2679_v55 = vadd.f32 1.0, %v10832_v13  ;;  %10851 = vpow2.f32 %v8444_v9  ;;  %9729 = vmatprep.mubr.msk.f32.mxu1 %vm2768_vm1, %v12562_v51 }
 0x374   : > { %15464 = vst [vmem:[#allocation42_spill] sm:$0xff] %v12571_v17  ;;  %15465 = vst [vmem:[#allocation43_spill] sm:$0xff] %v12574_v45  ;;  %v10836_v41 = vpop.eup %10835  ;;  %10853 = vrcp.f32 %v2680_v0  ;;  %9730 = vmatmul.mubr.msk.f32.gmra.mrb[40].mxu1 %vm2768_vm1, %v12556_v50  ;;  %v12581_v54 = vmul.f32 %v10834_v20, %v12238_v16  ;;  %v12584_v56 = vmul.f32 %v10834_v20, %v12270_v48 }
 0x375   : > { %v12587_v63 = vmul.f32 %v10834_v20, %v12308_v2  ;;  %v10838_v31 = vpop.eup %10837  ;;  %10855 = vrcp.f32 %v2679_v55  ;;  %v12590_v32 = vmul.f32 %v10836_v41, %v12240_v46  ;;  %v12593_v4 = vmul.f32 %v10836_v41, %v12272_v23 }
 0x376   : > { %15466 = vst [vmem:[#allocation44_spill] sm:$0xff] %v12581_v54  ;;  %15467 = vst [vmem:[#allocation45_spill] sm:$0xff] %v12584_v56  ;;  %v12596_v11 = vmul.f32 %v10836_v41, %v12310_v21  ;;  %v10840_v52 = vpop.eup %10839  ;;  %v2682_v16 = vadd.f32 1.0, %v10838_v31 }
 0x377   : > { %15468 = vst [vmem:[#allocation46_spill] sm:$0xff] %v12587_v63  ;;  %15469 = vst [vmem:[#allocation47_spill] sm:$0xff] %v12590_v32  ;;  %v2681_v27 = vadd.f32 1.0, %v10840_v52  ;;  %9732 = vmatprep.mubr.msk.f32.mxu1 %vm2768_vm1, %v12590_v32 }
 0x378   : > { %15470 = vst [vmem:[#allocation48_spill] sm:$0xff] %v12593_v4  ;;  %15471 = vst [vmem:[#allocation49_spill] sm:$0xff] %v12596_v11  ;;  %v10842_v48 = vpop.eup %10841  ;;  %10857 = vrcp.f32 %v2682_v16  ;;  %9733 = vmatmul.mubr.msk.f32.gmra.mrb[42].mxu1 %vm2768_vm1, %v12581_v54 }
 0x379   : > { %v10844_v2 = vpop.eup %10843  ;;  %10859 = vrcp.f32 %v2681_v27  ;;  %v2684_v46 = vadd.f32 1.0, %v10842_v48  ;;  %v15489_v27 = vld [vmem:[#allocation8_spill] sm:$0xff] }
 0x37a   : > { %v10846_v3 = vpop.eup %10845  ;;  %v2683_v23 = vadd.f32 1.0, %v10844_v2  ;;  %v15491_v2 = vld [vmem:[#allocation13_spill] sm:$0xff] }
 0x37b   : > { %v10848_v57 = vpop.eup %10847  ;;  %10861 = vrcp.f32 %v2684_v46  ;;  %v12603_v21 = vmul.f32 %v10846_v3, %v12242_v8  ;;  %v12606_v34 = vmul.f32 %v10846_v3, %v12274_v39  ;;  %v12609_v1 = vmul.f32 %v10846_v3, %v12312_v61 }
 0x37c   : > { %v10850_v62 = vpop.eup %10849  ;;  %10863 = vrcp.f32 %v2683_v23  ;;  %v12612_v9 = vmul.f32 %v10848_v57, %v12244_v18  ;;  %v12615_v13 = vmul.f32 %v10848_v57, %v12276_v35  ;;  %v12618_v0 = vmul.f32 %v10848_v57, %v12314_v58  ;;  %v15495_v57 = vld [vmem:[#allocation9_spill] sm:$0xff] }
 0x37d   : > { %15472 = vst [vmem:[#allocation50_spill] sm:$0xff] %v12603_v21  ;;  %15473 = vst [vmem:[#allocation51_spill] sm:$0xff] %v12606_v34  ;;  %v10852_v20 = vpop.eup %10851  ;;  %v2686_v8 = vadd.f32 1.0, %v10850_v62  ;;  %v15497_v62 = vld [vmem:[#allocation14_spill] sm:$0xff] }
 0x37e   : > { %15474 = vst [vmem:[#allocation52_spill] sm:$0xff] %v12609_v1  ;;  %15475 = vst [vmem:[#allocation53_spill] sm:$0xff] %v12612_v9  ;;  %v10854_v55 = vpop.eup %10853  ;;  %v2685_v41 = vadd.f32 1.0, %v10852_v20  ;;  %9735 = vmatprep.mubr.msk.f32.mxu1 %vm2768_vm1, %v12612_v9 }
 0x37f   : > { %15476 = vst [vmem:[#allocation54_spill] sm:$0xff] %v12615_v13  ;;  %15477 = vst [vmem:[#allocation55_spill] sm:$0xff] %v12618_v0  ;;  %v10856_v39 = vpop.eup %10855  ;;  %10865 = vrcp.f32 %v2686_v8  ;;  %9736 = vmatmul.mubr.msk.f32.gmra.mrb[44].mxu1 %vm2768_vm1, %v12603_v21  ;;  %v12625_v18 = vmul.f32 %v10854_v55, %v12246_v25  ;;  %v12628_v35 = vmul.f32 %v10854_v55, %v12278_v44  ;;  %v15499_v8 = vld [vmem:[#allocation4_spill] sm:$0xff] }
 0x380   : > { %v12631_v61 = vmul.f32 %v10854_v55, %v12316_v28  ;;  %10867 = vrcp.f32 %v2685_v41  ;;  %v12634_v58 = vmul.f32 %v10856_v39, %v12248_v59  ;;  %v12637_v31 = vmul.f32 %v10856_v39, %v12280_v38  ;;  %v15487_v28 = vld [vmem:[#allocation3_spill] sm:$0xff]  ;;  %v15501_v41 = vld [vmem:[#allocation10_spill] sm:$0xff] }
 0x381   : > { %15478 = vst [vmem:[#allocation56_spill] sm:$0xff] %v12625_v18  ;;  %15479 = vst [vmem:[#allocation57_spill] sm:$0xff] %v12628_v35  ;;  %v12640_v52 = vmul.f32 %v10856_v39, %v12318_v10 }
 0x382   : > { %15480 = vst [vmem:[#allocation58_spill] sm:$0xff] %v12631_v61  ;;  %15481 = vst [vmem:[#allocation59_spill] sm:$0xff] %v12634_v58  ;;  %v10858_v16 = vpop.eup %10857  ;;  %9738 = vmatprep.mubr.msk.f32.mxu1 %vm2768_vm1, %v12634_v58 }
 0x383   : > { %15482 = vst [vmem:[#allocation60_spill] sm:$0xff] %v12637_v31  ;;  %15483 = vst [vmem:[#allocation61_spill] sm:$0xff] %v12640_v52  ;;  %v10860_v25 = vpop.eup %10859  ;;  %9739 = vmatmul.mubr.msk.f32.gmra.mrb[46].mxu1 %vm2768_vm1, %v12625_v18  ;;  %v12647_v44 = vmul.f32 %v10858_v16, %v12250_v22  ;;  %v12650_v59 = vmul.f32 %v10858_v16, %v12282_v60  ;;  %v12653_v38 = vmul.f32 %v10858_v16, %v12320_v40  ;;  %v15493_v22 = vld [vmem:[#allocation5_spill] sm:$0xff]  ;;  %v15503_v16 = vld [vmem:[#allocation15_spill] sm:$0xff] }
 0x384   : > { %v12656_v10 = vmul.f32 %v10860_v25, %v15487_v28  ;;  %v12659_v48 = vmul.f32 %v10860_v25, %v15489_v27  ;;  %v12662_v46 = vmul.f32 %v10860_v25, %v15491_v2  ;;  %v15505_v2 = vld [vmem:[#allocation6_spill] sm:$0xff] }
 0x385   : > { %15484 = vst [vmem:[#allocation62_spill] sm:$0xff] %v12647_v44  ;;  %15485 = vst [vmem:[#allocation63_spill] sm:$0xff] %v12650_v59  ;;  %v10862_v3 = vpop.eup %10861 }
 0x386   : > { %15486 = vst [vmem:[#allocation64_spill] sm:$0xff] %v12653_v38  ;;  %15488 = vst [vmem:[#allocation3_spill] sm:$0xff] %v12656_v10  ;;  %v10864_v23 = vpop.eup %10863  ;;  %9741 = vmatprep.mubr.msk.f32.mxu1 %vm2768_vm1, %v12656_v10  ;;  %v12667_v60 = vmul.f32 %v10862_v3, %v15493_v22  ;;  %v12670_v40 = vmul.f32 %v10862_v3, %v15495_v57  ;;  %v12673_v20 = vmul.f32 %v10862_v3, %v15497_v62  ;;  %v15507_v22 = vld [vmem:[#allocation11_spill] sm:$0xff]  ;;  %v15509_v62 = vld [vmem:[#allocation16_spill] sm:$0xff] }
 0x387   : > { %15490 = vst [vmem:[#allocation8_spill] sm:$0xff] %v12659_v48  ;;  %15492 = vst [vmem:[#allocation13_spill] sm:$0xff] %v12662_v46  ;;  %9742 = vmatmul.mubr.msk.f32.gmra.mrb[48].mxu1 %vm2768_vm1, %v12647_v44  ;;  %v12678_v55 = vmul.f32 %v10864_v23, %v15499_v8  ;;  %v12681_v39 = vmul.f32 %v10864_v23, %v15501_v41  ;;  %v12684_v25 = vmul.f32 %v10864_v23, %v15503_v16  ;;  %v15511_v41 = vld [vmem:[#allocation7_spill] sm:$0xff]  ;;  %v15513_v16 = vld [vmem:[#allocation12_spill] sm:$0xff] }
 0x388   : > { %15494 = vst [vmem:[#allocation5_spill] sm:$0xff] %v12667_v60  ;;  %15496 = vst [vmem:[#allocation9_spill] sm:$0xff] %v12670_v40 }
 0x389   : > { %15498 = vst [vmem:[#allocation14_spill] sm:$0xff] %v12673_v20  ;;  %15500 = vst [vmem:[#allocation4_spill] sm:$0xff] %v12678_v55  ;;  %v10866_v28 = vpop.eup %10865  ;;  %9744 = vmatprep.mubr.msk.f32.mxu1 %vm2768_vm1, %v12678_v55  ;;  %v15515_v55 = vld [vmem:[#allocation17_spill] sm:$0xff] }
 0x38a   : > { %15502 = vst [vmem:[#allocation10_spill] sm:$0xff] %v12681_v39  ;;  %15504 = vst [vmem:[#allocation15_spill] sm:$0xff] %v12684_v25  ;;  %v10868_v27 = vpop.eup %10867  ;;  %v12689_v3 = vmul.f32 %v10866_v28, %v15505_v2  ;;  %v12692_v57 = vmul.f32 %v10866_v28, %v15507_v22  ;;  %v12695_v8 = vmul.f32 %v10866_v28, %v15509_v62  ;;  %v3511_v28 = vld [vmem:[%s15283_s4 + $0xa8] sm:$0xff] }
 0x38b   : > { %9745 = vmatmul.mubr.msk.f32.gmra.mrb[50].mxu1 %vm2768_vm1, %v12667_v60  ;;  %v12700_v23 = vmul.f32 %v10868_v27, %v15511_v41  ;;  %v12703_v44 = vmul.f32 %v10868_v27, %v15513_v16  ;;  %v12706_v10 = vmul.f32 %v10868_v27, %v15515_v55  ;;  %v3510_v55 = vld [vmem:[%s15283_s4 + $0xa0] sm:$0xff] }
 0x38c   : > { %15506 = vst [vmem:[#allocation6_spill] sm:$0xff] %v12689_v3  ;;  %15508 = vst [vmem:[#allocation11_spill] sm:$0xff] %v12692_v57  ;;  %v12782_v27 = vpack.c.bf16 %v3511_v28, %v3510_v55 }
 0x38d   : > { %15510 = vst [vmem:[#allocation16_spill] sm:$0xff] %v12695_v8  ;;  %15512 = vst [vmem:[#allocation7_spill] sm:$0xff] %v12700_v23  ;;  %9747 = vmatprep.mubr.msk.f32.mxu1 %vm2768_vm1, %v12700_v23 }
 0x38e   : > { %15514 = vst [vmem:[#allocation12_spill] sm:$0xff] %v12703_v44  ;;  %15516 = vst [vmem:[#allocation17_spill] sm:$0xff] %v12706_v10  ;;  %10350 = vmatprep.subr.bf16.mxu0 %v12782_v27 }
 0x38f   : > { %9748 = vmatmul.mubr.msk.f32.gmra.mrb[52].mxu1 %vm2768_vm1, %v12689_v3 }
 0x390   : > { %9750 = vmatprep.mubr.msk.f32.mxu1 %vm2768_vm1, %v12541_v15 }
 0x393   : > { %9751 = vmatmul.mubr.msk.f32.gmra.mrb[54].mxu1 %vm2768_vm1, %v12535_v14 }
 0x394   : > { %9753 = vmatprep.mubr.msk.f32.mxu1 %vm2768_vm1, %v12565_v43 }
 0x397   : > { %9754 = vmatmul.mubr.msk.f32.gmra.mrb[56].mxu1 %vm2768_vm1, %v12559_v19  ;;  %v11260_v19 = vld [vmem:[%s11666_s19 + $0x90] sm:$0xff] }
 0x398   : > { %9756 = vmatprep.mubr.msk.f32.mxu1 %vm2768_vm1, %v12593_v4 }
 0x39b   : > { %9757 = vmatmul.mubr.msk.f32.gmra.mrb[58].mxu1 %vm2768_vm1, %v12584_v56 }
 0x39c   : > { %9759 = vmatprep.mubr.msk.f32.mxu1 %vm2768_vm1, %v12615_v13 }
 0x39f   : > { %9760 = vmatmul.mubr.msk.f32.gmra.mrb[60].mxu1 %vm2768_vm1, %v12606_v34 }
 0x3a0   : > { %9762 = vmatprep.mubr.msk.f32.mxu1 %vm2768_vm1, %v12637_v31 }
 0x3a3   : > { %9763 = vmatmul.mubr.msk.f32.gmra.mrb[62].mxu1 %vm2768_vm1, %v12628_v35 }
 0x3a4   : > { %9765 = vmatprep.mubr.msk.f32.mxu1 %vm2768_vm1, %v12659_v48  ;;  %v11256_v48 = vld [vmem:[%s11666_s19 + $0x80] sm:$0xff] }
 0x3a7   : > { %9766 = vmatmul.mubr.msk.f32.gmra.mrb[64].mxu1 %vm2768_vm1, %v12650_v59 }
 0x3a8   : > { %9768 = vmatprep.mubr.msk.f32.mxu1 %vm2768_vm1, %v12681_v39 }
 0x3ab   : > { %9769 = vmatmul.mubr.msk.f32.gmra.mrb[66].mxu1 %vm2768_vm1, %v12670_v40  ;;  %v11255_v40 = vld [vmem:[%s11666_s19] sm:$0xff] }
 0x3ac   : > { %9771 = vmatprep.mubr.msk.f32.mxu1 %vm2768_vm1, %v12703_v44 }
 0x3af   : > { %9772 = vmatmul.mubr.msk.f32.gmra.mrb[68].mxu1 %vm2768_vm1, %v12692_v57 }
 0x3b0   : > { %9774 = vmatprep.mubr.msk.f32.mxu1 %vm2768_vm1, %v12544_v30 }
 0x3b3   : > { %9775 = vmatmul.mubr.msk.f32.gmra.mrb[70].mxu1 %vm2768_vm1, %v12548_v7  ;;  %v11254_v7 = vld [vmem:[%s11666_s19 + $0x88] sm:$0xff] }
 0x3b4   : > { %9777 = vmatprep.mubr.msk.f32.mxu1 %vm2768_vm1, %v12571_v17 }
 0x3b7   : > { %9778 = vmatmul.mubr.msk.f32.gmra.mrb[72].mxu1 %vm2768_vm1, %v12574_v45 }
 0x3b8   : > { %9780 = vmatprep.mubr.msk.f32.mxu1 %vm2768_vm1, %v12596_v11  ;;  %v11253_v11 = vld [vmem:[%s11666_s19 + $0x8] sm:$0xff] }
 0x3bb   : > { %9781 = vmatmul.mubr.msk.f32.gmra.mrb[74].mxu1 %vm2768_vm1, %v12587_v63 }
 0x3bc   : > { %9783 = vmatprep.mubr.msk.f32.mxu1 %vm2768_vm1, %v12618_v0 }
 0x3bf   : > { %9784 = vmatmul.mubr.msk.f32.gmra.mrb[76].mxu1 %vm2768_vm1, %v12609_v1 }
 0x3c0   : > { %9786 = vmatprep.mubr.msk.f32.mxu1 %vm2768_vm1, %v12640_v52 }
 0x3c3   : > { %9787 = vmatmul.mubr.msk.f32.gmra.mrb[78].mxu1 %vm2768_vm1, %v12631_v61 }
 0x3c4   : > { %9789 = vmatprep.mubr.msk.f32.mxu1 %vm2768_vm1, %v12662_v46 }
 0x3c7   : > { %9790 = vmatmul.mubr.msk.f32.gmra.mrb[80].mxu1 %vm2768_vm1, %v12653_v38 }
 0x3c8   : > { %9792 = vmatprep.mubr.msk.f32.mxu1 %vm2768_vm1, %v12684_v25 }
 0x3cb   : > { %9793 = vmatmul.mubr.msk.f32.gmra.mrb[82].mxu1 %vm2768_vm1, %v12673_v20 }
 0x3cc   : > { %9795 = vmatprep.mubr.msk.f32.mxu1 %vm2768_vm1, %v12706_v10 }
 0x3cf   : > { %9796 = vmatmul.mubr.msk.f32.gmra.mrb[84].mxu1 %vm2768_vm1, %v12695_v8 }
 0x443   : > { %v9728_v2 = vpop.f32.mrb[38].mxu1 }
 0x444   : > { %v2983_v22 = vpop.f32.mrb[39].mxu1  ;;  %v3223_v63 = vmul.f32 %v9728_v2, %v9728_v2  ;;  %v3431_v45 = vmul.f32 %v11253_v11, %v9728_v2 }
 0x445   : > { %9886 = vmatprep.mubr.msk.f32.mxu1 %vm3514_vm4, %v2983_v22  ;;  %v3222_v44 = vmul.f32 %v2983_v22, %v2983_v22  ;;  %v3430_v39 = vmul.f32 %v11255_v40, %v2983_v22  ;;  %v11257_v40 = vld [vmem:[%s11666_s19 + $0x18] sm:$0xff] }
 0x446   : > { %9887 = vmatmul.mubr.msk.f32.vlgmr.msra.gmra.mrb[86].mxu1 %vm3514_vm4, %v9728_v2 }
 0x447   : > { %v9731_v62 = vpop.f32.mrb[40].mxu1 }
 0x448   : > { %v2993_v41 = vpop.f32.mrb[41].mxu1  ;;  %v3225_v13 = vmul.f32 %v9731_v62, %v9731_v62  ;;  %v3433_v22 = vmul.f32 %v11257_v40, %v9731_v62  ;;  %v11261_v40 = vld [vmem:[%s11666_s19 + $0x28] sm:$0xff] }
 0x449   : > { %9889 = vmatprep.mubr.msk.f32.mxu1 %vm3514_vm4, %v2993_v41 }
 0x44a   : > { %9890 = vmatmul.mubr.msk.f32.gmra.mrb[88].mxu1 %vm3514_vm4, %v9731_v62 }
 0x44b   : > { %v12789_v16 = vpop.f32.mrb[42].mxu1 }
 0x44c   : > { %v12791_v8 = vpop.f32.mrb[43].mxu1 }
 0x44d   : > { %9892 = vmatprep.mubr.msk.f32.mxu1 %vm3514_vm4, %v12791_v8 }
 0x44e   : > { %9893 = vmatmul.mubr.msk.f32.gmra.mrb[90].mxu1 %vm3514_vm4, %v12789_v16 }
 0x452   : > { %v12797_v55 = vpop.f32.mrb[44].mxu1 }
 0x453   : > { %v12799_v28 = vpop.f32.mrb[45].mxu1 }
 0x454   : > { %9895 = vmatprep.mubr.msk.f32.mxu1 %vm3514_vm4, %v12799_v28 }
 0x455   : > { %9896 = vmatmul.mubr.msk.f32.gmra.mrb[92].mxu1 %vm3514_vm4, %v12797_v55 }
 0x456   : > { %v12805_v10 = vpop.f32.mrb[46].mxu1 }
 0x457   : > { %v12807_v20 = vpop.f32.mrb[47].mxu1 }
 0x458   : > { %9898 = vmatprep.mubr.msk.f32.mxu1 %vm3514_vm4, %v12807_v20 }
 0x459   : > { %9899 = vmatmul.mubr.msk.f32.gmra.mrb[94].mxu1 %vm3514_vm4, %v12805_v10 }
 0x45a   : > { %v12813_v25 = vpop.f32.mrb[48].mxu1 }
 0x45b   : > { %v12815_v38 = vpop.f32.mrb[49].mxu1 }
 0x45c   : > { %9901 = vmatprep.mubr.msk.f32.mxu1 %vm3514_vm4, %v12815_v38 }
 0x45d   : > { %9902 = vmatmul.mubr.msk.f32.gmra.mrb[96].mxu1 %vm3514_vm4, %v12813_v25 }
 0x45e   : > { %v12821_v46 = vpop.f32.mrb[50].mxu1 }
 0x45f   : > { %v12823_v61 = vpop.f32.mrb[51].mxu1 }
 0x460   : > { %9904 = vmatprep.mubr.msk.f32.mxu1 %vm3514_vm4, %v12823_v61 }
 0x461   : > { %9905 = vmatmul.mubr.msk.f32.gmra.mrb[98].mxu1 %vm3514_vm4, %v12821_v46 }
 0x462   : > { %v12829_v52 = vpop.f32.mrb[52].mxu1 }
 0x463   : > { %v12831_v1 = vpop.f32.mrb[53].mxu1 }
 0x464   : > { %9907 = vmatprep.mubr.msk.f32.mxu1 %vm3514_vm4, %v12831_v1 }
 0x465   : > { %9908 = vmatmul.mubr.msk.f32.gmra.mrb[100].mxu1 %vm3514_vm4, %v12829_v52 }
 0x466   : > { %v9752_v0 = vpop.f32.mrb[54].mxu1 }
 0x467   : > { %v3239_v17 = vmul.f32 %v9752_v0, %v9752_v0  ;;  %v3447_v30 = vmul.f32 %v11254_v7, %v9752_v0  ;;  %v3063_v57 = vpop.f32.mrb[55].mxu1 }
 0x468   : > { %v3238_v59 = vmul.f32 %v3063_v57, %v3063_v57  ;;  %v3446_v35 = vmul.f32 %v11256_v48, %v3063_v57  ;;  %9910 = vmatprep.mubr.msk.f32.mxu1 %vm3514_vm4, %v3063_v57  ;;  %v11258_v48 = vld [vmem:[%s11666_s19 + $0x98] sm:$0xff] }
 0x469   : > { %v12842_v31 = vadd.f32 %v3239_v17, %v3223_v63  ;;  %v12844_v34 = vadd.f32 %v3447_v30, %v3431_v45  ;;  %9911 = vmatmul.mubr.msk.f32.gmra.mrb[102].mxu1 %vm3514_vm4, %v9752_v0  ;;  %v3224_v17 = vmul.f32 %v2993_v41, %v2993_v41  ;;  %v11259_v63 = vld [vmem:[%s11666_s19 + $0x10] sm:$0xff] }
 0x46a   : > { %v12847_v7 = vadd.f32 %v3238_v59, %v3222_v44  ;;  %v12849_v11 = vadd.f32 %v3446_v35, %v3430_v39  ;;  %v9755_v2 = vpop.f32.mrb[56].mxu1  ;;  %v3432_v30 = vmul.f32 %v11259_v63, %v2993_v41  ;;  %v3227_v41 = vmul.f32 %v12789_v16, %v12789_v16  ;;  %v11264_v63 = vld [vmem:[%s11666_s19 + $0xa0] sm:$0xff] }
 0x46b   : > { %v3241_v56 = vmul.f32 %v9755_v2, %v9755_v2  ;;  %v3449_v4 = vmul.f32 %v11258_v48, %v9755_v2  ;;  %v3073_v57 = vpop.f32.mrb[57].mxu1 }
 0x46c   : > { %v3240_v45 = vmul.f32 %v3073_v57, %v3073_v57  ;;  %v3448_v0 = vmul.f32 %v11260_v19, %v3073_v57  ;;  %9913 = vmatprep.mubr.msk.f32.mxu1 %vm3514_vm4, %v3073_v57  ;;  %v3435_v19 = vmul.f32 %v11261_v40, %v12789_v16  ;;  %v11262_v57 = vld [vmem:[%s11666_s19 + $0xa8] sm:$0xff] }
 0x46d   : > { %v12856_v35 = vadd.f32 %v3241_v56, %v3225_v13  ;;  %v12858_v44 = vadd.f32 %v3449_v4, %v3433_v22  ;;  %9914 = vmatmul.mubr.msk.f32.gmra.mrb[104].mxu1 %vm3514_vm4, %v9755_v2  ;;  %v3226_v13 = vmul.f32 %v12791_v8, %v12791_v8  ;;  %v11263_v2 = vld [vmem:[%s11666_s19 + $0x20] sm:$0xff] }
 0x46e   : > { %v12861_v59 = vadd.f32 %v3240_v45, %v3224_v17  ;;  %v12863_v39 = vadd.f32 %v3448_v0, %v3432_v30  ;;  %v9758_v62 = vpop.f32.mrb[58].mxu1  ;;  %v3434_v22 = vmul.f32 %v11263_v2, %v12791_v8  ;;  %v3229_v8 = vmul.f32 %v12797_v55, %v12797_v55  ;;  %v11265_v2 = vld [vmem:[%s11666_s19 + $0x38] sm:$0xff] }
 0x46f   : > { %v3243_v48 = vmul.f32 %v9758_v62, %v9758_v62  ;;  %v3451_v56 = vmul.f32 %v11262_v57, %v9758_v62  ;;  %v3083_v4 = vpop.f32.mrb[59].mxu1 }
 0x470   : > { %v3242_v17 = vmul.f32 %v3083_v4, %v3083_v4  ;;  %v3450_v30 = vmul.f32 %v11264_v63, %v3083_v4  ;;  %9916 = vmatprep.mubr.msk.f32.mxu1 %vm3514_vm4, %v3083_v4  ;;  %v3437_v63 = vmul.f32 %v11265_v2, %v12797_v55  ;;  %v11266_v4 = vld [vmem:[%s11666_s19 + $0xb8] sm:$0xff] }
 0x471   : > { %v12876_v45 = vadd.f32 %v3243_v48, %v3227_v41  ;;  %v12878_v16 = vadd.f32 %v3451_v56, %v3435_v19  ;;  %9917 = vmatmul.mubr.msk.f32.gmra.mrb[106].mxu1 %vm3514_vm4, %v9758_v62  ;;  %v3228_v48 = vmul.f32 %v12799_v28, %v12799_v28  ;;  %v11267_v62 = vld [vmem:[%s11666_s19 + $0x30] sm:$0xff] }
 0x472   : > { %v12881_v0 = vadd.f32 %v3242_v17, %v3226_v13  ;;  %v12883_v40 = vadd.f32 %v3450_v30, %v3434_v22  ;;  %v9761_v57 = vpop.f32.mrb[60].mxu1  ;;  %v3436_v56 = vmul.f32 %v11267_v62, %v12799_v28  ;;  %v11268_v22 = vld [vmem:[%s11666_s19 + $0xb0] sm:$0xff]  ;;  %v3231_v28 = vmul.f32 %v12805_v10, %v12805_v10  ;;  %v11269_v62 = vld [vmem:[%s11666_s19 + $0x48] sm:$0xff] }
 0x473   : > { %v3245_v43 = vmul.f32 %v9761_v57, %v9761_v57  ;;  %v3453_v41 = vmul.f32 %v11266_v4, %v9761_v57  ;;  %v3093_v19 = vpop.f32.mrb[61].mxu1 }
 0x474   : > { %v3244_v13 = vmul.f32 %v3093_v19, %v3093_v19  ;;  %v3452_v17 = vmul.f32 %v11268_v22, %v3093_v19  ;;  %9919 = vmatprep.mubr.msk.f32.mxu1 %vm3514_vm4, %v3093_v19  ;;  %v3439_v22 = vmul.f32 %v11269_v62, %v12805_v10  ;;  %v11270_v19 = vld [vmem:[%s11666_s19 + $0xc8] sm:$0xff] }
 0x475   : > { %v12896_v30 = vadd.f32 %v3245_v43, %v3229_v8  ;;  %v12898_v55 = vadd.f32 %v3453_v41, %v3437_v63  ;;  %9920 = vmatmul.mubr.msk.f32.gmra.mrb[108].mxu1 %vm3514_vm4, %v9761_v57  ;;  %v3230_v63 = vmul.f32 %v12807_v20, %v12807_v20  ;;  %v11271_v57 = vld [vmem:[%s11666_s19 + $0x40] sm:$0xff] }
 0x476   : > { %v12901_v2 = vadd.f32 %v3244_v13, %v3228_v48  ;;  %v12903_v4 = vadd.f32 %v3452_v17, %v3436_v56  ;;  %v9764_v14 = vpop.f32.mrb[62].mxu1  ;;  %v3438_v41 = vmul.f32 %v11271_v57, %v12807_v20  ;;  %v11272_v56 = vld [vmem:[%s11666_s19 + $0xc0] sm:$0xff]  ;;  %v3233_v20 = vmul.f32 %v12813_v25, %v12813_v25  ;;  %v11273_v57 = vld [vmem:[%s11666_s19 + $0x58] sm:$0xff] }
 0x477   : > { %v3247_v15 = vmul.f32 %v9764_v14, %v9764_v14  ;;  %v3455_v43 = vmul.f32 %v11270_v19, %v9764_v14  ;;  %v3103_v8 = vpop.f32.mrb[63].mxu1 }
 0x478   : > { %v3246_v48 = vmul.f32 %v3103_v8, %v3103_v8  ;;  %v3454_v13 = vmul.f32 %v11272_v56, %v3103_v8  ;;  %9922 = vmatprep.mubr.msk.f32.mxu1 %vm3514_vm4, %v3103_v8  ;;  %v3441_v56 = vmul.f32 %v11273_v57, %v12813_v25  ;;  %v11274_v8 = vld [vmem:[%s11666_s19 + $0xd8] sm:$0xff] }
 0x479   : > { %v12916_v17 = vadd.f32 %v3247_v15, %v3231_v28  ;;  %v12918_v10 = vadd.f32 %v3455_v43, %v3439_v22  ;;  %9923 = vmatmul.mubr.msk.f32.gmra.mrb[110].mxu1 %vm3514_vm4, %v9764_v14  ;;  %v3232_v22 = vmul.f32 %v12815_v38, %v12815_v38  ;;  %v11275_v14 = vld [vmem:[%s11666_s19 + $0x50] sm:$0xff] }
 0x47a   : > { %v12921_v62 = vadd.f32 %v3246_v48, %v3230_v63  ;;  %v12923_v19 = vadd.f32 %v3454_v13, %v3438_v41  ;;  %v9767_v3 = vpop.f32.mrb[64].mxu1  ;;  %v3440_v43 = vmul.f32 %v11275_v14, %v12815_v38  ;;  %v11276_v41 = vld [vmem:[%s11666_s19 + $0xd0] sm:$0xff]  ;;  %v3235_v38 = vmul.f32 %v12821_v46, %v12821_v46  ;;  %v11277_v14 = vld [vmem:[%s11666_s19 + $0x68] sm:$0xff] }
 0x47b   : > { %v3249_v23 = vmul.f32 %v9767_v3, %v9767_v3  ;;  %v3457_v15 = vmul.f32 %v11274_v8, %v9767_v3  ;;  %v3113_v28 = vpop.f32.mrb[65].mxu1 }
 0x47c   : > { %v3248_v63 = vmul.f32 %v3113_v28, %v3113_v28  ;;  %v3456_v48 = vmul.f32 %v11276_v41, %v3113_v28  ;;  %9925 = vmatprep.mubr.msk.f32.mxu1 %vm3514_vm4, %v3113_v28  ;;  %v3443_v41 = vmul.f32 %v11277_v14, %v12821_v46  ;;  %v11278_v28 = vld [vmem:[%s11666_s19 + $0xe8] sm:$0xff] }
 0x47d   : > { %v12936_v13 = vadd.f32 %v3249_v23, %v3233_v20  ;;  %v12938_v25 = vadd.f32 %v3457_v15, %v3441_v56  ;;  %9926 = vmatmul.mubr.msk.f32.gmra.mrb[112].mxu1 %vm3514_vm4, %v9767_v3  ;;  %v3234_v56 = vmul.f32 %v12823_v61, %v12823_v61  ;;  %v11279_v3 = vld [vmem:[%s11666_s19 + $0x60] sm:$0xff] }
 0x47e   : > { %v12941_v57 = vadd.f32 %v3248_v63, %v3232_v22  ;;  %v12943_v8 = vadd.f32 %v3456_v48, %v3440_v43  ;;  %v9770_v60 = vpop.f32.mrb[66].mxu1  ;;  %v3442_v15 = vmul.f32 %v11279_v3, %v12823_v61  ;;  %v11280_v43 = vld [vmem:[%s11666_s19 + $0xe0] sm:$0xff]  ;;  %v3237_v61 = vmul.f32 %v12829_v52, %v12829_v52  ;;  %v11281_v3 = vld [vmem:[%s11666_s19 + $0x78] sm:$0xff] }
 0x47f   : > { %v3251_v18 = vmul.f32 %v9770_v60, %v9770_v60  ;;  %v3459_v23 = vmul.f32 %v11278_v28, %v9770_v60  ;;  %v3123_v20 = vpop.f32.mrb[67].mxu1 }
 0x480   : > { %v3250_v22 = vmul.f32 %v3123_v20, %v3123_v20  ;;  %v3458_v63 = vmul.f32 %v11280_v43, %v3123_v20  ;;  %9928 = vmatprep.mubr.msk.f32.mxu1 %vm3514_vm4, %v3123_v20  ;;  %v3445_v43 = vmul.f32 %v11281_v3, %v12829_v52  ;;  %v11282_v20 = vld [vmem:[%s11666_s19 + $0xf8] sm:$0xff] }
 0x481   : > { %v12956_v48 = vadd.f32 %v3251_v18, %v3235_v38  ;;  %v12958_v46 = vadd.f32 %v3459_v23, %v3443_v41  ;;  %9929 = vmatmul.mubr.msk.f32.gmra.mrb[114].mxu1 %vm3514_vm4, %v9770_v60  ;;  %v3236_v41 = vmul.f32 %v12831_v1, %v12831_v1  ;;  %v11283_v60 = vld [vmem:[%s11666_s19 + $0x70] sm:$0xff] }
 0x482   : > { %v12961_v14 = vadd.f32 %v3250_v22, %v3234_v56  ;;  %v12963_v28 = vadd.f32 %v3458_v63, %v3442_v15  ;;  %v9773_v58 = vpop.f32.mrb[68].mxu1  ;;  %v3444_v23 = vmul.f32 %v11283_v60, %v12831_v1  ;;  %v11284_v15 = vld [vmem:[%s11666_s19 + $0xf0] sm:$0xff]  ;;  %v11285_v1 = vld [vmem:[%s11666_s19 + $0x108] sm:$0xff] }
 0x483   : > { %v3253_v21 = vmul.f32 %v9773_v58, %v9773_v58  ;;  %v3461_v18 = vmul.f32 %v11282_v20, %v9773_v58  ;;  %v3133_v38 = vpop.f32.mrb[69].mxu1 }
 0x484   : > { %v3252_v56 = vmul.f32 %v3133_v38, %v3133_v38  ;;  %v3460_v22 = vmul.f32 %v11284_v15, %v3133_v38  ;;  %9931 = vmatprep.mubr.msk.f32.mxu1 %vm3514_vm4, %v3133_v38  ;;  %v11286_v15 = vld [vmem:[%s11666_s19 + $0x100] sm:$0xff] }
 0x485   : > { %v12976_v63 = vadd.f32 %v3253_v21, %v3237_v61  ;;  %v12978_v52 = vadd.f32 %v3461_v18, %v3445_v43  ;;  %9932 = vmatmul.mubr.msk.f32.gmra.mrb[116].mxu1 %vm3514_vm4, %v9773_v58 }
 0x486   : > { %v12981_v3 = vadd.f32 %v3252_v56, %v3236_v41  ;;  %v12983_v20 = vadd.f32 %v3460_v22, %v3444_v23  ;;  %v9776_v9 = vpop.f32.mrb[70].mxu1  ;;  %v11287_v56 = vld [vmem:[%s11666_s19 + $0x118] sm:$0xff] }
 0x487   : > { %v3271_v54 = vmul.f32 %v9776_v9, %v9776_v9  ;;  %v3463_v60 = vmul.f32 %v11285_v1, %v9776_v9  ;;  %v3143_v32 = vpop.f32.mrb[71].mxu1 }
 0x488   : > { %v3270_v50 = vmul.f32 %v3143_v32, %v3143_v32  ;;  %v3462_v38 = vmul.f32 %v11286_v15, %v3143_v32  ;;  %9934 = vmatprep.mubr.msk.f32.mxu1 %vm3514_vm4, %v3143_v32 }
 0x489   : > { %v3287_v21 = vadd.f32 %v3271_v54, %v12842_v31  ;;  %v12990_v58 = vadd.f32 %v12844_v34, %v3463_v60  ;;  %9935 = vmatmul.mubr.msk.f32.gmra.mrb[118].mxu1 %vm3514_vm4, %v9776_v9  ;;  %v11288_v34 = vld [vmem:[%s11666_s19 + $0x110] sm:$0xff] }
 0x48a   : > { %v3286_v61 = vadd.f32 %v3270_v50, %v12847_v7  ;;  %v12995_v43 = vadd.f32 %v12849_v11, %v3462_v38  ;;  %v9779_v18 = vpop.f32.mrb[72].mxu1  ;;  %v11289_v38 = vld [vmem:[%s11666_s19 + $0x128] sm:$0xff] }
 0x48b   : > { %v12997_v41 = vadd.f32 1e-08, %v3287_v21  ;;  %v3273_v23 = vmul.f32 %v9779_v18, %v9779_v18  ;;  %v3465_v22 = vmul.f32 %v11287_v56, %v9779_v18  ;;  %v3153_v32 = vpop.f32.mrb[73].mxu1 }
 0x48c   : > { %v13000_v1 = vadd.f32 1e-08, %v3286_v61  ;;  %v3272_v54 = vmul.f32 %v3153_v32, %v3153_v32  ;;  %v3464_v31 = vmul.f32 %v11288_v34, %v3153_v32  ;;  %9937 = vmatprep.mubr.msk.f32.mxu1 %vm3514_vm4, %v3153_v32 }
 0x48d   : > { %10869 = vrsqrt.f32 %v12997_v41  ;;  %v3289_v50 = vadd.f32 %v3273_v23, %v12856_v35  ;;  %v13007_v9 = vadd.f32 %v12858_v44, %v3465_v22  ;;  %9938 = vmatmul.mubr.msk.f32.gmra.mrb[120].mxu1 %vm3514_vm4, %v9779_v18  ;;  %v3857_v35 = vld [vmem:[%s15283_s4 + $0xc0] sm:$0xff]  ;;  %v3858_v44 = vld [vmem:[%s15283_s4 + $0xc8] sm:$0x1]  ;;  %vm3327_vm7 = vcmp.eq.f32.partialorder %v12997_v41, inf }
 0x48e   : > { %v3288_v7 = vadd.f32 %v3272_v54, %v12861_v59  ;;  %v13012_v11 = vadd.f32 %v12863_v39, %v3464_v31  ;;  %v9782_v60 = vpop.f32.mrb[74].mxu1  ;;  %10871 = vrsqrt.f32 %v13000_v1  ;;  %v11290_v18 = vld [vmem:[%s11666_s19 + $0x120] sm:$0xff]  ;;  %vm3320_vm6 = vcmp.eq.f32.partialorder %v13000_v1, inf }
 0x48f   : > { %v3275_v15 = vmul.f32 %v9782_v60, %v9782_v60  ;;  %v3467_v21 = vmul.f32 %v11289_v38, %v9782_v60  ;;  %v3163_v61 = vpop.f32.mrb[75].mxu1  ;;  %v13026_v56 = vadd.f32 1e-08, %v3289_v50  ;;  %v11291_v38 = vld [vmem:[%s11666_s19 + $0x138] sm:$0xff]  ;;  %vm3322_vm8 = vcmp.eq.f32.partialorder %v13000_v1, 0.0 }
 0x490   : > { %v13022_v59 = vadd.f32 1e-08, %v3288_v7  ;;  %v3274_v39 = vmul.f32 %v3163_v61, %v3163_v61  ;;  %v3466_v23 = vmul.f32 %v11290_v18, %v3163_v61  ;;  %9940 = vmatprep.mubr.msk.f32.mxu1 %vm3514_vm4, %v3163_v61  ;;  %v13038_v7 = vpack.c.bf16 %v3858_v44, %v3857_v35 }
 0x491   : > { %v3291_v22 = vadd.f32 %v3275_v15, %v12876_v45  ;;  %v13030_v32 = vadd.f32 %v12878_v16, %v3467_v21  ;;  %9941 = vmatmul.mubr.msk.f32.gmra.mrb[122].mxu1 %vm3514_vm4, %v9782_v60  ;;  %v3323_v35 = vand.u32 2147483648, %v13000_v1  ;;  %vm3329_vm9 = vcmp.eq.f32.partialorder %v12997_v41, 0.0 }
 0x492   : > { %v3290_v54 = vadd.f32 %v3274_v39, %v12881_v0  ;;  %v13035_v34 = vadd.f32 %v12883_v40, %v3466_v23  ;;  %v9785_v31 = vpop.f32.mrb[76].mxu1  ;;  %10873 = vrsqrt.f32 %v13022_v59  ;;  %v11292_v0 = vld [vmem:[%s11666_s19 + $0x130] sm:$0xff]  ;;  %vm3334_vm10 = vcmp.eq.f32.partialorder %v13022_v59, inf }
 0x493   : > { %v3277_v50 = vmul.f32 %v9785_v31, %v9785_v31  ;;  %v3469_v61 = vmul.f32 %v11291_v38, %v9785_v31  ;;  %v3173_v45 = vpop.f32.mrb[77].mxu1  ;;  %10875 = vrsqrt.f32 %v13026_v56  ;;  %vm3336_vm11 = vcmp.eq.f32.partialorder %v13022_v59, 0.0 }
 0x494   : > { %v13043_v16 = vadd.f32 1e-08, %v3290_v54  ;;  %v3276_v60 = vmul.f32 %v3173_v45, %v3173_v45  ;;  %v3468_v40 = vmul.f32 %v11292_v0, %v3173_v45  ;;  %9943 = vmatprep.mubr.msk.f32.mxu1 %vm3514_vm4, %v3173_v45  ;;  %v11293_v54 = vld [vmem:[%s11666_s19 + $0x148] sm:$0xff]  ;;  %vm3341_vm12 = vcmp.eq.f32.partialorder %v13026_v56, inf }
 0x495   : > { %v3293_v15 = vadd.f32 %v3277_v50, %v12896_v30  ;;  %v13050_v21 = vadd.f32 %v12898_v55, %v3469_v61  ;;  %9944 = vmatmul.mubr.msk.f32.gmra.mrb[124].mxu1 %vm3514_vm4, %v9785_v31  ;;  %v3330_v30 = vand.u32 2147483648, %v12997_v41  ;;  %v13064_v61 = vadd.f32 1e-08, %v3291_v22 }
 0x496   : > { %v3292_v44 = vadd.f32 %v3276_v60, %v12901_v2  ;;  %v13057_v39 = vadd.f32 %v12903_v4, %v3468_v40  ;;  %v9788_v18 = vpop.f32.mrb[78].mxu1  ;;  %10877 = vrsqrt.f32 %v13043_v16  ;;  %v11294_v4 = vld [vmem:[%s11666_s19 + $0x140] sm:$0xff]  ;;  %vm3343_vm13 = vcmp.eq.f32.partialorder %v13026_v56, 0.0 }
 0x497   : > { %v10870_v23 = vpop.eup %10869  ;;  %v3279_v55 = vmul.f32 %v9788_v18, %v9788_v18  ;;  %v3471_v50 = vmul.f32 %v11293_v54, %v9788_v18  ;;  %v3183_v31 = vpop.f32.mrb[79].mxu1  ;;  %10879 = vrsqrt.f32 %v13064_v61  ;;  %vm3348_vm0 = vcmp.eq.f32.partialorder %v13043_v16, inf }
 0x498   : > { %v10872_v38 = vpop.eup %10871  ;;  %v3278_v2 = vmul.f32 %v3183_v31, %v3183_v31  ;;  %v3470_v45 = vmul.f32 %v11294_v4, %v3183_v31  ;;  %9946 = vmatprep.mubr.msk.f32.mxu1 %vm3514_vm4, %v3183_v31  ;;  %v3326_v60 = vmul.f32 %v10870_v23, %v12997_v41 }
 0x499   : > { %v3295_v0 = vadd.f32 %v3279_v55, %v12916_v17  ;;  %v13071_v40 = vadd.f32 %v12918_v10, %v3471_v50  ;;  %9947 = vmatmul.mubr.msk.f32.gmra.mrb[126].mxu1 %vm3514_vm4, %v9788_v18  ;;  %v3319_v54 = vmul.f32 %v10872_v38, %v13000_v1  ;;  %v3337_v10 = vand.u32 2147483648, %v13022_v59  ;;  %v11295_v18 = vld [vmem:[%s11666_s19 + $0x158] sm:$0xff] }
 0x49a   : > { %v13077_v22 = vadd.f32 %v3278_v2, %v12921_v62  ;;  %v13080_v4 = vadd.f32 %v12923_v19, %v3470_v45  ;;  %v9791_v31 = vpop.f32.mrb[80].mxu1  ;;  %v3328_v17 = vsel %vm3327_vm7, %v12997_v41, %v3326_v60  ;;  %v11296_v2 = vld [vmem:[%s11666_s19 + $0x150] sm:$0xff]  ;;  %v13116_v41 = vadd.f32 1e-08, %v3292_v44 }
 0x49b   : > { %v3281_v23 = vmul.f32 %v9791_v31, %v9791_v31  ;;  %v3473_v55 = vmul.f32 %v11295_v18, %v9791_v31  ;;  %v3193_v50 = vpop.f32.mrb[81].mxu1  ;;  %v3321_v38 = vsel %vm3320_vm6, %v13000_v1, %v3319_v54  ;;  %v3331_v54 = vsel %vm3329_vm9, %v3330_v30, %v3328_v17  ;;  %v11297_v17 = vld [vmem:[%s11666_s19 + $0x168] sm:$0xff] }
 0x49c   : > { %v10874_v62 = vpop.eup %10873  ;;  %v3280_v19 = vmul.f32 %v3193_v50, %v3193_v50  ;;  %v3472_v45 = vmul.f32 %v11296_v2, %v3193_v50  ;;  %9949 = vmatprep.mubr.msk.f32.mxu1 %vm3514_vm4, %v3193_v50  ;;  %v3324_v60 = vsel %vm3322_vm8, %v3323_v35, %v3321_v38  ;;  %v3344_v50 = vand.u32 2147483648, %v13026_v56  ;;  %v11298_v38 = vld [vmem:[%s11666_s19 + $0x160] sm:$0xff] }
 0x49d   : > { %v13097_v18 = vadd.f32 %v3281_v23, %v12936_v13  ;;  %v13100_v51 = vadd.f32 %v12938_v25, %v3473_v55  ;;  %9802 = vmatprep.mubr.msk.f32.mxu0 %vm3514_vm4, %v3324_v60  ;;  %9950 = vmatmul.mubr.msk.f32.gmra.mrb[128].mxu1 %vm3514_vm4, %v9791_v31  ;;  %v3333_v25 = vmul.f32 %v10874_v62, %v13022_v59  ;;  %v10876_v23 = vpop.eup %10875  ;;  %v13114_v31 = vadd.f32 1e-08, %v3293_v15 }
 0x49e   : > { %v3296_v1 = vadd.f32 %v3280_v19, %v12941_v57  ;;  %v13109_v35 = vadd.f32 %v12943_v8, %v3472_v45  ;;  %v9794_v13 = vpop.f32.mrb[82].mxu1  ;;  %9803 = vmatmul.mubr.msk.f32.vlgmr.msra.gmra.mrb[90].mxu0 %vm3514_vm4, %v3331_v54  ;;  %v3340_v60 = vmul.f32 %v10876_v23, %v13026_v56  ;;  %vm3350_vm6 = vcmp.eq.f32.partialorder %v13043_v16, 0.0 }
 0x49f   : > { %v3283_v30 = vmul.f32 %v9794_v13, %v9794_v13  ;;  %v3475_v55 = vmul.f32 %v11297_v17, %v9794_v13  ;;  %10352 = vmatpush3.bf16.msra.mxu0 %v12782_v27  ;;  %v3203_v57 = vpop.f32.mrb[83].mxu1  ;;  %v3335_v62 = vsel %vm3334_vm10, %v13022_v59, %v3333_v25  ;;  %10881 = vrsqrt.f32 %v13116_v41 }
 0x4a0   : > { %v3282_v8 = vmul.f32 %v3203_v57, %v3203_v57  ;;  %v3474_v19 = vmul.f32 %v11298_v38, %v3203_v57  ;;  %9952 = vmatprep.mubr.msk.f32.mxu1 %vm3514_vm4, %v3203_v57  ;;  %10355 = vmatprep.subr.msk.bf16.mxu0 %vm12064_vm2, %v13038_v7  ;;  %v10878_v44 = vpop.eup %10877  ;;  %v3338_v45 = vsel %vm3336_vm11, %v3337_v10, %v3335_v62  ;;  %v11299_v10 = vld [vmem:[%s11666_s19 + $0x178] sm:$0xff]  ;;  %10883 = vrsqrt.f32 %v13114_v31 }
 0x4a1   : > { %v3299_v27 = vadd.f32 %v3283_v30, %v12956_v48  ;;  %v13131_v2 = vadd.f32 %v12958_v46, %v3475_v55  ;;  %9953 = vmatmul.mubr.msk.f32.gmra.mrb[130].mxu1 %vm3514_vm4, %v9794_v13  ;;  %9805 = vmatprep.mubr.msk.f32.mxu0 %vm3514_vm4, %v3338_v45  ;;  %v3347_v48 = vmul.f32 %v10878_v44, %v13043_v16  ;;  %v13144_v46 = vadd.f32 1e-08, %v3295_v0  ;;  %v11300_v55 = vld [vmem:[%s11666_s19 + $0x170] sm:$0xff] }
 0x4a2   : > { %v3298_v54 = vadd.f32 %v3282_v8, %v12961_v14  ;;  %v13139_v25 = vadd.f32 %v12963_v28, %v3474_v19  ;;  %v9797_v17 = vpop.f32.mrb[84].mxu1  ;;  %v3342_v23 = vsel %vm3341_vm12, %v13026_v56, %v3340_v60  ;;  %v3351_v8 = vand.u32 2147483648, %v13043_v16 }
 0x4a3   : > { %v3285_v59 = vmul.f32 %v9797_v17, %v9797_v17  ;;  %v3477_v13 = vmul.f32 %v11299_v10, %v9797_v17  ;;  %v3213_v14 = vpop.f32.mrb[85].mxu1  ;;  %v3345_v28 = vsel %vm3343_vm13, %v3344_v50, %v3342_v23  ;;  %v13156_v0 = vadd.f32 1e-08, %v13077_v22 }
 0x4a4   : > { %v3284_v30 = vmul.f32 %v3213_v14, %v3213_v14  ;;  %v3476_v57 = vmul.f32 %v11300_v55, %v3213_v14  ;;  %9955 = vmatprep.mubr.msk.f32.mxu1 %vm3514_vm4, %v3213_v14  ;;  %9806 = vmatmul.mubr.msk.f32.gmra.mrb[92].mxu0 %vm3514_vm4, %v3345_v28  ;;  %v3349_v56 = vsel %vm3348_vm0, %v13043_v16, %v3347_v48  ;;  %v13179_v44 = vadd.f32 1e-08, %v13097_v18 }
 0x4a5   : > { %v3301_v38 = vadd.f32 %v3285_v59, %v12976_v63  ;;  %v13160_v19 = vadd.f32 %v12978_v52, %v3477_v13  ;;  %9956 = vmatmul.mubr.msk.f32.gmra.mrb[132].mxu1 %vm3514_vm4, %v9797_v17  ;;  %v3352_v22 = vsel %vm3350_vm6, %v3351_v8, %v3349_v56  ;;  %v13174_v63 = vadd.f32 1e-08, %v3296_v1  ;;  %v10880_v52 = vpop.eup %10879 }
 0x4a6   : > { %v3300_v50 = vadd.f32 %v3284_v30, %v12981_v3  ;;  %v13169_v62 = vadd.f32 %v12983_v20, %v3476_v57  ;;  %9808 = vmatprep.mubr.msk.f32.mxu0 %vm3514_vm4, %v3352_v22  ;;  %v3354_v3 = vmul.f32 %v10880_v52, %v13064_v61  ;;  %10885 = vrsqrt.f32 %v13156_v0 }
 0x4a7   : > { %v13183_v20 = vadd.f32 1e-08, %v3298_v54  ;;  %vm3355_vm7 = vcmp.eq.f32.partialorder %v13064_v61, inf  ;;  %v3358_v16 = vand.u32 2147483648, %v13064_v61  ;;  %10887 = vrsqrt.f32 %v13144_v46 }
 0x4a8   : > { %v13188_v1 = vadd.f32 1e-08, %v3299_v27  ;;  %v3356_v45 = vsel %vm3355_vm7, %v13064_v61, %v3354_v3  ;;  %vm3357_vm8 = vcmp.eq.f32.partialorder %v13064_v61, 0.0  ;;  %10889 = vrsqrt.f32 %v13174_v63 }
 0x4a9   : > { %v13193_v18 = vadd.f32 1e-08, %v3300_v50  ;;  %v3359_v60 = vsel %vm3357_vm8, %v3358_v16, %v3356_v45  ;;  %10891 = vrsqrt.f32 %v13179_v44  ;;  %v13197_v54 = vadd.f32 1e-08, %v3301_v38  ;;  %v10882_v27 = vpop.eup %10881 }
 0x4aa   : > { %9809 = vmatmul.mubr.msk.f32.gmra.mrb[94].mxu0 %vm3514_vm4, %v3359_v60  ;;  %10893 = vrsqrt.f32 %v13183_v20  ;;  %v3361_v61 = vmul.f32 %v10882_v27, %v13116_v41  ;;  %v10884_v17 = vpop.eup %10883  ;;  %vm3362_vm9 = vcmp.eq.f32.partialorder %v13116_v41, inf  ;;  %vm3364_vm10 = vcmp.eq.f32.partialorder %v13116_v41, 0.0 }
 0x4ab   : > { %10895 = vrsqrt.f32 %v13188_v1  ;;  %v3365_v48 = vand.u32 2147483648, %v13116_v41  ;;  %v3368_v13 = vmul.f32 %v10884_v17, %v13114_v31  ;;  %vm3369_vm11 = vcmp.eq.f32.partialorder %v13114_v31, inf }
 0x4ac   : > { %10897 = vrsqrt.f32 %v13193_v18  ;;  %v3363_v10 = vsel %vm3362_vm9, %v13116_v41, %v3361_v61  ;;  %vm3371_vm12 = vcmp.eq.f32.partialorder %v13114_v31, 0.0  ;;  %v3372_v28 = vand.u32 2147483648, %v13114_v31 }
 0x4ad   : > { %10899 = vrsqrt.f32 %v13197_v54  ;;  %v3366_v14 = vsel %vm3364_vm10, %v3365_v48, %v3363_v10  ;;  %vm3376_vm13 = vcmp.eq.f32.partialorder %v13156_v0, inf  ;;  %v3370_v57 = vsel %vm3369_vm11, %v13114_v31, %v3368_v13 }
 0x4ae   : > { %9811 = vmatprep.mubr.msk.f32.mxu0 %vm3514_vm4, %v3366_v14  ;;  %vm3378_vm0 = vcmp.eq.f32.partialorder %v13156_v0, 0.0  ;;  %v3379_v41 = vand.u32 2147483648, %v13156_v0  ;;  %v3373_v38 = vsel %vm3371_vm12, %v3372_v28, %v3370_v57  ;;  %vm3383_vm6 = vcmp.eq.f32.partialorder %v13144_v46, inf }
 0x4af   : > { %9812 = vmatmul.mubr.msk.f32.gmra.mrb[96].mxu0 %vm3514_vm4, %v3373_v38  ;;  %vm3390_vm7 = vcmp.eq.f32.partialorder %v13174_v63, inf  ;;  %v3393_v31 = vand.u32 2147483648, %v13174_v63  ;;  %v3386_v45 = vand.u32 2147483648, %v13144_v46  ;;  %vm3392_vm8 = vcmp.eq.f32.partialorder %v13174_v63, 0.0 }
 0x4b0   : > { %v10886_v59 = vpop.eup %10885  ;;  %vm3385_vm9 = vcmp.eq.f32.partialorder %v13144_v46, 0.0  ;;  %vm3397_vm10 = vcmp.eq.f32.partialorder %v13179_v44, inf  ;;  %vm3404_vm11 = vcmp.eq.f32.partialorder %v13183_v20, inf  ;;  %v3407_v10 = vand.u32 2147483648, %v13183_v20 }
 0x4b1   : > { %v10888_v23 = vpop.eup %10887  ;;  %v3375_v30 = vmul.f32 %v10886_v59, %v13156_v0  ;;  %v3400_v28 = vand.u32 2147483648, %v13179_v44  ;;  %vm3406_vm12 = vcmp.eq.f32.partialorder %v13183_v20, 0.0 }
 0x4b2   : > { %v10890_v55 = vpop.eup %10889  ;;  %v3382_v8 = vmul.f32 %v10888_v23, %v13144_v46 }
 0x4b3   : > { %v3377_v56 = vsel %vm3376_vm13, %v13156_v0, %v3375_v30  ;;  %v3389_v50 = vmul.f32 %v10890_v55, %v13174_v63  ;;  %v10892_v22 = vpop.eup %10891  ;;  %vm3399_vm13 = vcmp.eq.f32.partialorder %v13179_v44, 0.0 }
 0x4b4   : > { %v3380_v52 = vsel %vm3378_vm0, %v3379_v41, %v3377_v56  ;;  %v3384_v3 = vsel %vm3383_vm6, %v13144_v46, %v3382_v8  ;;  %v10894_v16 = vpop.eup %10893  ;;  %v3396_v60 = vmul.f32 %v10892_v22, %v13179_v44  ;;  %vm3418_vm0 = vcmp.eq.f32.partialorder %v13193_v18, inf }
 0x4b5   : > { %9814 = vmatprep.mubr.msk.f32.mxu0 %vm3514_vm4, %v3380_v52  ;;  %v3391_v0 = vsel %vm3390_vm7, %v13174_v63, %v3389_v50  ;;  %v10896_v27 = vpop.eup %10895  ;;  %v3403_v17 = vmul.f32 %v10894_v16, %v13183_v20  ;;  %v3387_v59 = vsel %vm3385_vm9, %v3386_v45, %v3384_v3  ;;  %vm3411_vm6 = vcmp.eq.f32.partialorder %v13188_v1, inf  ;;  %v15522_v3 = vld [vmem:[#allocation32_spill] sm:$0xff] }
 0x4b6   : > { %v3394_v61 = vsel %vm3392_vm8, %v3393_v31, %v3391_v0  ;;  %v10898_v48 = vpop.eup %10897  ;;  %9815 = vmatmul.mubr.msk.f32.gmra.mrb[98].mxu0 %vm3514_vm4, %v3387_v59  ;;  %v3398_v63 = vsel %vm3397_vm10, %v13179_v44, %v3396_v60  ;;  %v3410_v23 = vmul.f32 %v10896_v27, %v13188_v1  ;;  %v3421_v8 = vand.u32 2147483648, %v13193_v18  ;;  %v15523_v31 = vld [vmem:[#allocation33_spill] sm:$0xff] }
 0x4b7   : > { %v3405_v13 = vsel %vm3404_vm11, %v13183_v20, %v3403_v17  ;;  %v3417_v46 = vmul.f32 %v10898_v48, %v13193_v18  ;;  %v10900_v14 = vpop.eup %10899  ;;  %9817 = vmatprep.mubr.msk.f32.mxu0 %vm3514_vm4, %v3394_v61  ;;  %v3401_v55 = vsel %vm3399_vm13, %v3400_v28, %v3398_v63  ;;  %v3414_v44 = vand.u32 2147483648, %v13188_v1 }
 0x4b8   : > { %v3408_v30 = vsel %vm3406_vm12, %v3407_v10, %v3405_v13  ;;  %v3412_v41 = vsel %vm3411_vm6, %v13188_v1, %v3410_v23  ;;  %v3424_v38 = vmul.f32 %v10900_v14, %v13197_v54  ;;  %vm3420_vm7 = vcmp.eq.f32.partialorder %v13193_v18, 0.0 }
 0x4b9   : > { %v3419_v57 = vsel %vm3418_vm0, %v13193_v18, %v3417_v46  ;;  %vm3413_vm8 = vcmp.eq.f32.partialorder %v13188_v1, 0.0  ;;  %vm3425_vm9 = vcmp.eq.f32.partialorder %v13197_v54, inf  ;;  %v3428_v22 = vand.u32 2147483648, %v13197_v54  ;;  %v15519_v1 = vld [vmem:[#allocation29_spill] sm:$0xff]  ;;  %v15520_v18 = vld [vmem:[#allocation30_spill] sm:$0xff] }
 0x4ba   : > { %9818 = vmatmul.mubr.msk.f32.gmra.mrb[100].mxu0 %vm3514_vm4, %v3401_v55  ;;  %v3422_v20 = vsel %vm3420_vm7, %v3421_v8, %v3419_v57  ;;  %v3415_v56 = vsel %vm3413_vm8, %v3414_v44, %v3412_v41  ;;  %v3426_v50 = vsel %vm3425_vm9, %v13197_v54, %v3424_v38  ;;  %vm3427_vm10 = vcmp.eq.f32.partialorder %v13197_v54, 0.0  ;;  %v15521_v54 = vld [vmem:[#allocation31_spill] sm:$0xff]  ;;  %v4659_v41 = vld [vmem:[%s15283_s4 + $0xf0] sm:$0xff] }
 0x4bb   : > { %9820 = vmatprep.mubr.msk.f32.mxu0 %vm3514_vm4, %v3408_v30  ;;  %v3429_v52 = vsel %vm3427_vm10, %v3428_v22, %v3426_v50  ;;  %v4658_v57 = vld [vmem:[%s15283_s4 + $0xe8] sm:$0xff] }
 0x4bc   : > { %v10365_v8 = vpack.c.bf16 %v4659_v41, %v4658_v57 }
 0x4be   : > { %9821 = vmatmul.mubr.msk.f32.gmra.mrb[102].mxu0 %vm3514_vm4, %v3415_v56 }
 0x4bf   : > { %9823 = vmatprep.mubr.msk.f32.mxu0 %vm3514_vm4, %v3422_v20 }
 0x4c2   : > { %9824 = vmatmul.mubr.msk.f32.gmra.mrb[104].mxu0 %vm3514_vm4, %v3429_v52 }
 0x4c3   : > { %9830 = vmatprep.mubr.msk.f32.mxu0 %vm2429_vm14, %v12397_v24 }
 0x4c6   : > { %9831 = vmatmul.mubr.msk.f32.vlgmr.msra.gmra.mrb[90].mxu0 %vm2429_vm14, %v12403_v49 }
 0x4c7   : > { %10358 = vmatpush3.bf16.msk.msra.mxu0 %vm12064_vm2, %v13038_v7  ;;  %9833 = vmatprep.mubr.msk.f32.mxu0 %vm2429_vm14, %v12412_v5  ;;  %v15518_v7 = vld [vmem:[#allocation28_spill] sm:$0xff] }
 0x4c8   : > { %10366 = vmatprep.subr.bf16.mxu0 %v10365_v8 }
 0x4ca   : > { %9834 = vmatmul.mubr.msk.f32.gmra.mrb[92].mxu0 %vm2429_vm14, %v12415_v29 }
 0x4cb   : > { %9836 = vmatprep.mubr.msk.f32.mxu0 %vm2429_vm14, %v12422_v42 }
 0x4ce   : > { %9837 = vmatmul.mubr.msk.f32.gmra.mrb[94].mxu0 %vm2429_vm14, %v12425_v6 }
 0x4cf   : > { %9839 = vmatprep.mubr.msk.f32.mxu0 %vm2429_vm14, %v12432_v12 }
 0x4d2   : > { %9840 = vmatmul.mubr.msk.f32.gmra.mrb[96].mxu0 %vm2429_vm14, %v12435_v53 }
 0x4d3   : > { %9842 = vmatprep.mubr.msk.f32.mxu0 %vm2429_vm14, %v12442_v26 }
 0x4d6   : > { %9843 = vmatmul.mubr.msk.f32.gmra.mrb[98].mxu0 %vm2429_vm14, %v12445_v33 }
 0x4d7   : > { %9845 = vmatprep.mubr.msk.f32.mxu0 %vm2429_vm14, %v15518_v7 }
 0x4da   : > { %9846 = vmatmul.mubr.msk.f32.gmra.mrb[100].mxu0 %vm2429_vm14, %v15519_v1  ;;  %v13435_v1 = vld [vmem:[%s15283_s4 + $0xd0] ss:$0 sm:$0xff] }
 0x4db   : > { %9848 = vmatprep.mubr.msk.f32.mxu0 %vm2429_vm14, %v15520_v18 }
 0x4de   : > { %9849 = vmatmul.mubr.msk.f32.gmra.mrb[102].mxu0 %vm2429_vm14, %v15521_v54 }
 0x4df   : > { %9851 = vmatprep.mubr.msk.f32.mxu0 %vm2429_vm14, %v15522_v3 }
 0x4e2   : > { %9852 = vmatmul.mubr.msk.f32.gmra.mrb[104].mxu0 %vm2429_vm14, %v15523_v31 }
 0x4e3   : > { %9858 = vmatprep.mubr.msk.f32.mxu0 %vm1620_vm5, %v12995_v43 }
 0x4e6   : > { %9859 = vmatmul.mubr.msk.f32.vlgmr.msra.gmra.mrb[90].mxu0 %vm1620_vm5, %v12990_v58 }
 0x4e7   : > { %9861 = vmatprep.mubr.msk.f32.mxu0 %vm1620_vm5, %v13012_v11  ;;  %10368 = vmatpush3.bf16.msra.mxu0 %v10365_v8 }
 0x4ea   : > { %9862 = vmatmul.mubr.msk.f32.gmra.mrb[92].mxu0 %vm1620_vm5, %v13007_v9 }
 0x4eb   : > { %9864 = vmatprep.mubr.msk.f32.mxu0 %vm1620_vm5, %v13035_v34 }
 0x4ee   : > { %9865 = vmatmul.mubr.msk.f32.gmra.mrb[94].mxu0 %vm1620_vm5, %v13030_v32 }
 0x4ef   : > { %9867 = vmatprep.mubr.msk.f32.mxu0 %vm1620_vm5, %v13057_v39 }
 0x4f2   : > { %9868 = vmatmul.mubr.msk.f32.gmra.mrb[96].mxu0 %vm1620_vm5, %v13050_v21 }
 0x4f3   : > { %9870 = vmatprep.mubr.msk.f32.mxu0 %vm1620_vm5, %v13080_v4 }
 0x4f6   : > { %9871 = vmatmul.mubr.msk.f32.gmra.mrb[98].mxu0 %vm1620_vm5, %v13071_v40 }
 0x4f7   : > { %9873 = vmatprep.mubr.msk.f32.mxu0 %vm1620_vm5, %v13109_v35 }
 0x4fa   : > { %9874 = vmatmul.mubr.msk.f32.gmra.mrb[100].mxu0 %vm1620_vm5, %v13100_v51 }
 0x4fb   : > { %9876 = vmatprep.mubr.msk.f32.mxu0 %vm1620_vm5, %v13139_v25 }
 0x4fe   : > { %9877 = vmatmul.mubr.msk.f32.gmra.mrb[102].mxu0 %vm1620_vm5, %v13131_v2 }
 0x4ff   : > { %9879 = vmatprep.mubr.msk.f32.mxu0 %vm1620_vm5, %v13169_v62 }
 0x502   : > { %9880 = vmatmul.mubr.msk.f32.gmra.mrb[104].mxu0 %vm1620_vm5, %v13160_v19 }
 0x519   : > { %v13330_v58 = vpop.f32.mrb[86].mxu1 }
 0x51a   : > { %v13332_v43 = vpop.f32.mrb[87].mxu1 }
 0x51d   : > { %v13334_v9 = vpop.f32.mrb[88].mxu1 }
 0x51e   : > { %v13336_v11 = vpop.f32.mrb[89].mxu1 }
 0x521   : > { %v13338_v51 = vpop.f32.mrb[90].mxu1 }
 0x522   : > { %v13340_v32 = vpop.f32.mrb[91].mxu1 }
 0x528   : > { %v13342_v34 = vpop.f32.mrb[92].mxu1 }
 0x529   : > { %v13344_v21 = vpop.f32.mrb[93].mxu1 }
 0x52c   : > { %v13346_v39 = vpop.f32.mrb[94].mxu1 }
 0x52d   : > { %v13348_v40 = vpop.f32.mrb[95].mxu1 }
 0x530   : > { %v13350_v4 = vpop.f32.mrb[96].mxu1 }
 0x531   : > { %15524 = vst [vmem:[#allocation65_spill] sm:$0xff] %v13350_v4  ;;  %v13352_v35 = vpop.f32.mrb[97].mxu1 }
 0x532   : > { %15525 = vst [vmem:[#allocation66_spill] sm:$0xff] %v13352_v35 }
 0x534   : > { %v13354_v2 = vpop.f32.mrb[98].mxu1 }
 0x535   : > { %15526 = vst [vmem:[#allocation67_spill] sm:$0xff] %v13354_v2  ;;  %v13356_v25 = vpop.f32.mrb[99].mxu1 }
 0x536   : > { %15527 = vst [vmem:[#allocation68_spill] sm:$0xff] %v13356_v25 }
 0x538   : > { %v13358_v19 = vpop.f32.mrb[100].mxu1 }
 0x539   : > { %15528 = vst [vmem:[#allocation69_spill] sm:$0xff] %v13358_v19  ;;  %v13360_v62 = vpop.f32.mrb[101].mxu1 }
 0x53a   : > { %15529 = vst [vmem:[#allocation70_spill] sm:$0xff] %v13360_v62 }
 0x53c   : > { %v13362_v16 = vpop.f32.mrb[102].mxu1 }
 0x53d   : > { %v13364_v45 = vpop.f32.mrb[103].mxu1 }
 0x540   : > { %v13366_v0 = vpop.f32.mrb[104].mxu1 }
 0x541   : > { %v13368_v60 = vpop.f32.mrb[105].mxu1 }
 0x544   : > { %v13370_v27 = vpop.f32.mrb[106].mxu1 }
 0x545   : > { %v13372_v61 = vpop.f32.mrb[107].mxu1 }
 0x548   : > { %v13374_v17 = vpop.f32.mrb[108].mxu1 }
 0x549   : > { %v13376_v48 = vpop.f32.mrb[109].mxu1 }
 0x54c   : > { %v13378_v59 = vpop.f32.mrb[110].mxu1 }
 0x54d   : > { %v13380_v10 = vpop.f32.mrb[111].mxu1 }
 0x550   : > { %v13382_v63 = vpop.f32.mrb[112].mxu1 }
 0x551   : > { %15530 = vst [vmem:[#allocation71_spill] sm:$0xff] %v13382_v63  ;;  %v13384_v13 = vpop.f32.mrb[113].mxu1 }
 0x552   : > { %15531 = vst [vmem:[#allocation72_spill] sm:$0xff] %v13384_v13 }
 0x554   : > { %v13386_v23 = vpop.f32.mrb[114].mxu1 }
 0x555   : > { %15532 = vst [vmem:[#allocation73_spill] sm:$0xff] %v13386_v23  ;;  %v13388_v46 = vpop.f32.mrb[115].mxu1 }
 0x556   : > { %15533 = vst [vmem:[#allocation74_spill] sm:$0xff] %v13388_v46 }
 0x558   : > { %v13390_v14 = vpop.f32.mrb[116].mxu1 }
 0x559   : > { %15534 = vst [vmem:[#allocation75_spill] sm:$0xff] %v13390_v14  ;;  %v13392_v28 = vpop.f32.mrb[117].mxu1 }
 0x55a   : > { %15535 = vst [vmem:[#allocation76_spill] sm:$0xff] %v13392_v28 }
 0x55c   : > { %v13394_v30 = vpop.f32.mrb[118].mxu1 }
 0x55d   : > { %v13396_v55 = vpop.f32.mrb[119].mxu1 }
 0x560   : > { %v13404_v38 = vpop.f32.mrb[120].mxu1 }
 0x561   : > { %v13406_v44 = vpop.f32.mrb[121].mxu1 }
 0x564   : > { %v13408_v20 = vpop.f32.mrb[122].mxu1 }
 0x565   : > { %v13410_v56 = vpop.f32.mrb[123].mxu1 }
 0x568   : > { %v13412_v50 = vpop.f32.mrb[124].mxu1 }
 0x569   : > { %v13414_v22 = vpop.f32.mrb[125].mxu1 }
 0x56c   : > { %v13416_v52 = vpop.f32.mrb[126].mxu1 }
 0x56d   : > { %v13418_v31 = vpop.f32.mrb[127].mxu1 }
 0x570   : > { %v13420_v3 = vpop.f32.mrb[128].mxu1 }
 0x571   : > { %15536 = vst [vmem:[#allocation77_spill] sm:$0xff] %v13420_v3  ;;  %v13422_v57 = vpop.f32.mrb[129].mxu1 }
 0x572   : > { %15537 = vst [vmem:[#allocation78_spill] sm:$0xff] %v13422_v57 }
 0x574   : > { %v13424_v41 = vpop.f32.mrb[130].mxu1 }
 0x575   : > { %15538 = vst [vmem:[#allocation79_spill] sm:$0xff] %v13424_v41  ;;  %v13426_v54 = vpop.f32.mrb[131].mxu1 }
 0x576   : > { %15539 = vst [vmem:[#allocation80_spill] sm:$0xff] %v13426_v54 }
 0x578   : > { %v13428_v8 = vpop.f32.mrb[132].mxu1 }
 0x579   : > { %15540 = vst [vmem:[#allocation81_spill] sm:$0xff] %v13428_v8  ;;  %v13430_v18 = vpop.f32.mrb[133].mxu1 }
 0x57a   : > { %15541 = vst [vmem:[#allocation82_spill] sm:$0xff] %v13430_v18 }
 0x5b9   : > { %v9860_v7 = vpop.f32.mrb[90].mxu0 }
 0x5ba   : > { %v13438_v33 = vadd.f32 %v9860_v7, %v13435_v1  ;;  %v3976_v26 = vpop.f32.mrb[91].mxu0 }
 0x5bb   : > { %v13441_v53 = vadd.f32 %v13435_v1, %v3976_v26 }
 0x5bc   : > { %v8547_v12 = vmul.f32 -1.442695, %v13438_v33 }
 0x5bd   : > { %v8546_v6 = vmul.f32 -1.442695, %v13441_v53  ;;  %v9863_v42 = vpop.f32.mrb[92].mxu0 }
 0x5be   : > { %10901 = vpow2.f32 %v8547_v12  ;;  %v13446_v29 = vadd.f32 %v9863_v42, %v13435_v1  ;;  %v3986_v5 = vpop.f32.mrb[93].mxu0 }
 0x5bf   : > { %10903 = vpow2.f32 %v8546_v6  ;;  %v13449_v49 = vadd.f32 %v13435_v1, %v3986_v5 }
 0x5c0   : > { %v8549_v7 = vmul.f32 -1.442695, %v13446_v29 }
 0x5c1   : > { %v8548_v24 = vmul.f32 -1.442695, %v13449_v49  ;;  %v9866_v26 = vpop.f32.mrb[94].mxu0 }
 0x5c2   : > { %10905 = vpow2.f32 %v8549_v7  ;;  %v13454_v15 = vadd.f32 %v9866_v26, %v13435_v1  ;;  %v3996_v18 = vpop.f32.mrb[95].mxu0 }
 0x5c3   : > { %10907 = vpow2.f32 %v8548_v24  ;;  %v13457_v12 = vadd.f32 %v13435_v1, %v3996_v18 }
 0x5c4   : > { %v8551_v42 = vmul.f32 -1.442695, %v13454_v15 }
 0x5c5   : > { %v8550_v6 = vmul.f32 -1.442695, %v13457_v12  ;;  %v9869_v5 = vpop.f32.mrb[96].mxu0 }
 0x5c6   : > { %10909 = vpow2.f32 %v8551_v42  ;;  %v13462_v28 = vadd.f32 %v9869_v5, %v13435_v1  ;;  %v4006_v62 = vpop.f32.mrb[97].mxu0 }
 0x5c7   : > { %10911 = vpow2.f32 %v8550_v6  ;;  %v13465_v7 = vadd.f32 %v13435_v1, %v4006_v62 }
 0x5c8   : > { %v10902_v26 = vpop.eup %10901  ;;  %v8553_v24 = vmul.f32 -1.442695, %v13462_v28 }
 0x5c9   : > { %v10904_v8 = vpop.eup %10903  ;;  %v4141_v18 = vadd.f32 1.0, %v10902_v26  ;;  %v8552_v14 = vmul.f32 -1.442695, %v13465_v7  ;;  %v9872_v19 = vpop.f32.mrb[98].mxu0 }
 0x5ca   : > { %v4140_v41 = vadd.f32 1.0, %v10904_v8  ;;  %10913 = vpow2.f32 %v8553_v24  ;;  %v13470_v42 = vadd.f32 %v9872_v19, %v13435_v1  ;;  %v4016_v5 = vpop.f32.mrb[99].mxu0 }
 0x5cb   : > { %10915 = vrcp.f32 %v4141_v18  ;;  %v13473_v6 = vadd.f32 %v13435_v1, %v4016_v5 }
 0x5cc   : > { %v10906_v62 = vpop.eup %10905  ;;  %10917 = vrcp.f32 %v4140_v41  ;;  %v8555_v54 = vmul.f32 -1.442695, %v13470_v42 }
 0x5cd   : > { %v10908_v46 = vpop.eup %10907  ;;  %v4143_v25 = vadd.f32 1.0, %v10906_v62  ;;  %10919 = vpow2.f32 %v8552_v14  ;;  %v8554_v26 = vmul.f32 -1.442695, %v13473_v6  ;;  %v9875_v23 = vpop.f32.mrb[100].mxu0 }
 0x5ce   : > { %v4142_v8 = vadd.f32 1.0, %v10908_v46  ;;  %10921 = vpow2.f32 %v8555_v54  ;;  %v13478_v19 = vadd.f32 %v9875_v23, %v13435_v1  ;;  %v4026_v24 = vpop.f32.mrb[101].mxu0 }
 0x5cf   : > { %10923 = vrcp.f32 %v4143_v25  ;;  %v13481_v18 = vadd.f32 %v13435_v1, %v4026_v24 }
 0x5d0   : > { %v10910_v5 = vpop.eup %10909  ;;  %10925 = vrcp.f32 %v4142_v8  ;;  %v8557_v41 = vmul.f32 -1.442695, %v13478_v19 }
 0x5d1   : > { %v10912_v2 = vpop.eup %10911  ;;  %v4145_v62 = vadd.f32 1.0, %v10910_v5  ;;  %10927 = vpow2.f32 %v8554_v26  ;;  %v8556_v14 = vmul.f32 -1.442695, %v13481_v18  ;;  %v9878_v57 = vpop.f32.mrb[102].mxu0 }
 0x5d2   : > { %v4144_v46 = vadd.f32 1.0, %v10912_v2  ;;  %10929 = vpow2.f32 %v8557_v41  ;;  %v13486_v54 = vadd.f32 %v9878_v57, %v13435_v1  ;;  %v4036_v23 = vpop.f32.mrb[103].mxu0 }
 0x5d3   : > { %10931 = vrcp.f32 %v4145_v62  ;;  %v13489_v25 = vadd.f32 %v13435_v1, %v4036_v23 }
 0x5d4   : > { %v10914_v24 = vpop.eup %10913  ;;  %10933 = vrcp.f32 %v4144_v46  ;;  %v8559_v8 = vmul.f32 -1.442695, %v13486_v54 }
 0x5d5   : > { %v10916_v13 = vpop.eup %10915  ;;  %v4147_v5 = vadd.f32 1.0, %v10914_v24  ;;  %10935 = vpow2.f32 %v8556_v14  ;;  %v8558_v26 = vmul.f32 -1.442695, %v13489_v25  ;;  %v9881_v35 = vpop.f32.mrb[104].mxu0 }
 0x5d6   : > { %v10918_v2 = vpop.eup %10917  ;;  %10937 = vpow2.f32 %v8559_v8  ;;  %v13494_v57 = vadd.f32 %v9881_v35, %v13435_v1  ;;  %v4046_v41 = vpop.f32.mrb[105].mxu0  ;;  %v13503_v24 = vmul.f32 %v10916_v13, %v13438_v33 }
 0x5d7   : > { %v10920_v62 = vpop.eup %10919  ;;  %v13497_v23 = vmul.f32 %v10918_v2, %v13441_v53  ;;  %v13500_v46 = vadd.f32 %v13435_v1, %v4046_v41  ;;  %10939 = vpow2.f32 %v8558_v26 }
 0x5d8   : > { %v10922_v3 = vpop.eup %10921  ;;  %v4146_v14 = vadd.f32 1.0, %v10920_v62  ;;  %v8561_v63 = vmul.f32 -1.442695, %v13494_v57  ;;  %10941 = vrcp.f32 %v4147_v5 }
 0x5d9   : > { %v10924_v8 = vpop.eup %10923  ;;  %v4149_v35 = vadd.f32 1.0, %v10922_v3  ;;  %v8560_v4 = vmul.f32 -1.442695, %v13500_v46  ;;  %9962 = vmatprep.mubr.msk.f32.mxu0 %vm2429_vm14, %v13497_v23 }
 0x5da   : > { %v10926_v53 = vpop.eup %10925  ;;  %10943 = vrcp.f32 %v4146_v14  ;;  %9963 = vmatmul.mubr.msk.f32.vlgmr.msra.gmra.mrb[106].mxu0 %vm2429_vm14, %v13503_v24  ;;  %v13515_v26 = vmul.f32 %v10924_v8, %v13446_v29 }
 0x5db   : > { %v10928_v1 = vpop.eup %10927  ;;  %v13512_v33 = vmul.f32 %v10926_v53, %v13449_v49  ;;  %10945 = vrcp.f32 %v4149_v35 }
 0x5dc   : > { %v10930_v13 = vpop.eup %10929  ;;  %v4148_v3 = vadd.f32 1.0, %v10928_v1  ;;  %10947 = vpow2.f32 %v8561_v63 }
 0x5dd   : > { %v10932_v5 = vpop.eup %10931  ;;  %v4151_v2 = vadd.f32 1.0, %v10930_v13  ;;  %10949 = vpow2.f32 %v8560_v4  ;;  %9965 = vmatprep.mubr.msk.f32.mxu0 %vm2429_vm14, %v13512_v33 }
 0x5de   : > { %v10934_v41 = vpop.eup %10933  ;;  %10951 = vrcp.f32 %v4148_v3  ;;  %9966 = vmatmul.mubr.msk.f32.gmra.mrb[108].mxu0 %vm2429_vm14, %v13515_v26  ;;  %v13525_v29 = vmul.f32 %v10932_v5, %v13454_v15 }
 0x5df   : > { %v10936_v49 = vpop.eup %10935  ;;  %v13522_v62 = vmul.f32 %v10934_v41, %v13457_v12  ;;  %10953 = vrcp.f32 %v4151_v2 }
 0x5e0   : > { %v10938_v14 = vpop.eup %10937  ;;  %v4150_v63 = vadd.f32 1.0, %v10936_v49 }
 0x5e1   : > { %v4153_v8 = vadd.f32 1.0, %v10938_v14  ;;  %9968 = vmatprep.mubr.msk.f32.mxu0 %vm2429_vm14, %v13522_v62  ;;  %v10940_v4 = vpop.eup %10939 }
 0x5e2   : > { %10955 = vrcp.f32 %v4150_v63  ;;  %9969 = vmatmul.mubr.msk.f32.gmra.mrb[110].mxu0 %vm2429_vm14, %v13525_v29  ;;  %v10942_v35 = vpop.eup %10941  ;;  %v4152_v53 = vadd.f32 1.0, %v10940_v4 }
 0x5e3   : > { %10957 = vrcp.f32 %v4153_v8  ;;  %v13535_v3 = vmul.f32 %v10942_v35, %v13462_v28 }
 0x5e4   : > { %v10944_v1 = vpop.eup %10943  ;;  %10959 = vrcp.f32 %v4152_v53 }
 0x5e5   : > { %v10946_v12 = vpop.eup %10945  ;;  %v13532_v13 = vmul.f32 %v10944_v1, %v13465_v7 }
 0x5e6   : > { %v10948_v15 = vpop.eup %10947  ;;  %v13545_v7 = vmul.f32 %v10946_v12, %v13470_v42 }
 0x5e7   : > { %v10950_v5 = vpop.eup %10949  ;;  %v4155_v2 = vadd.f32 1.0, %v10948_v15  ;;  %9971 = vmatprep.mubr.msk.f32.mxu0 %vm2429_vm14, %v13532_v13 }
 0x5e8   : > { %v10952_v41 = vpop.eup %10951  ;;  %v4154_v49 = vadd.f32 1.0, %v10950_v5  ;;  %9972 = vmatmul.mubr.msk.f32.gmra.mrb[112].mxu0 %vm2429_vm14, %v13535_v3 }
 0x5e9   : > { %v13542_v14 = vmul.f32 %v10952_v41, %v13473_v6  ;;  %10961 = vrcp.f32 %v4155_v2  ;;  %v10954_v28 = vpop.eup %10953  ;;  %v5809_v2 = vld [vmem:[%s15283_s4 + $0x118] sm:$0xff]  ;;  %v5810_v41 = vld [vmem:[%s15283_s4 + $0x120] sm:$0x1f] }
 0x5ea   : > { %10963 = vrcp.f32 %v4154_v49  ;;  %v13555_v6 = vmul.f32 %v10954_v28, %v13478_v19  ;;  %v6547_v49 = vld [vmem:[%s15283_s4 + $0x140] sm:$0xff] }
 0x5eb   : > { %9974 = vmatprep.mubr.msk.f32.mxu0 %vm2429_vm14, %v13542_v14 }
 0x5ec   : > { %v10956_v63 = vpop.eup %10955  ;;  %9975 = vmatmul.mubr.msk.f32.gmra.mrb[114].mxu0 %vm2429_vm14, %v13545_v7  ;;  %15542 = vst [vmem:[#allocation83_spill] sm:$0xff] %v13555_v6 }
 0x5ed   : > { %v13552_v8 = vmul.f32 %v10956_v63, %v13481_v18  ;;  %v10958_v4 = vpop.eup %10957  ;;  %v10369_v63 = vpack.c.bf16 %v5810_v41, %v5809_v2 }
 0x5ee   : > { %v10960_v35 = vpop.eup %10959  ;;  %v13565_v53 = vmul.f32 %v10958_v4, %v13486_v54  ;;  %v5066_v54 = vld [vmem:[%s15283_s4 + $0x100] sm:$0xf]  ;;  %v6548_v4 = vld [vmem:[%s15283_s4 + $0x148] sm:$0x1f] }
 0x5ef   : > { %9977 = vmatprep.mubr.msk.f32.mxu0 %vm2429_vm14, %v13552_v8  ;;  %v13560_v42 = vmul.f32 %v10960_v35, %v13489_v25  ;;  %9986 = vmatprep.subr.msk.mxu0 %vm2913_vm15, %v5066_v54 }
 0x5f0   : > { %9978 = vmatmul.mubr.msk.f32.gmra.mrb[116].mxu0 %vm2429_vm14, %v13555_v6  ;;  %15544 = vst [vmem:[#allocation85_spill] sm:$0xff] %v13565_v53  ;;  %10371 = vmatprep.subr.msk.bf16.mxu1 %vm12501_vm3, %v10369_v63 }
 0x5f1   : > { %15543 = vst [vmem:[#allocation84_spill] sm:$0xff] %v13560_v42  ;;  %9980 = vmatprep.mubr.msk.f32.mxu0 %vm2429_vm14, %v13560_v42  ;;  %9987 = vmatpush3.msk.msra.mxu0 %vm2913_vm15, %v5066_v54 }
 0x5f2   : > { %10374 = vmatpush3.bf16.msk.msra.mxu1 %vm12501_vm3, %v10369_v63 }
 0x5f3   : > { %v10962_v18 = vpop.eup %10961 }
 0x5f4   : > { %v10964_v1 = vpop.eup %10963  ;;  %9981 = vmatmul.mubr.msk.f32.gmra.mrb[118].mxu0 %vm2429_vm14, %v13565_v53  ;;  %v13575_v25 = vmul.f32 %v10962_v18, %v13494_v57 }
 0x5f5   : > { %v13572_v19 = vmul.f32 %v10964_v1, %v13500_v46  ;;  %v13589_v46 = vld [vmem:[%s15283_s4 + $0xf8] ss:$0 sm:$0xff]  ;;  %v13605_v1 = vpack.c.bf16 %v6548_v4, %v6547_v49 }
 0x5f6   : > { %15546 = vst [vmem:[#allocation87_spill] sm:$0xff] %v13575_v25 }
 0x5f7   : > { %15545 = vst [vmem:[#allocation86_spill] sm:$0xff] %v13572_v19  ;;  %9983 = vmatprep.mubr.msk.f32.mxu0 %vm2429_vm14, %v13572_v19  ;;  %10387 = vmatprep.subr.msk.bf16.mxu0 %vm12501_vm3, %v13605_v1 }
 0x5f8   : > { %9984 = vmatmul.mubr.msk.f32.gmra.mrb[120].mxu0 %vm2429_vm14, %v13575_v25 }
 0x6ad   : > { %v9964_v57 = vpop.f32.mrb[106].mxu0 }
 0x6ae   : > { %v4785_v12 = vadd.f32 %v9964_v57, %v13589_v46  ;;  %v4779_v15 = vpop.f32.mrb[107].mxu0 }
 0x6af   : > { %v4780_v5 = vadd.f32 %v13589_v46, %v4779_v15 }
 0x6b0   : > { %v8629_v28 = vmul.f32 -1.442695, %v4785_v12 }
 0x6b1   : > { %v8628_v35 = vmul.f32 -1.442695, %v4780_v5  ;;  %v9967_v18 = vpop.f32.mrb[108].mxu0 }
 0x6b2   : > { %10965 = vpow2.f32 %v8629_v28  ;;  %v4795_v54 = vadd.f32 %v9967_v18, %v13589_v46  ;;  %v4789_v57 = vpop.f32.mrb[109].mxu0 }
 0x6b3   : > { %10967 = vpow2.f32 %v8628_v35  ;;  %v4790_v15 = vadd.f32 %v13589_v46, %v4789_v57 }
 0x6b4   : > { %v8631_v12 = vmul.f32 -1.442695, %v4795_v54 }
 0x6b5   : > { %v8630_v5 = vmul.f32 -1.442695, %v4790_v15  ;;  %v9970_v2 = vpop.f32.mrb[110].mxu0 }
 0x6b6   : > { %10969 = vpow2.f32 %v8631_v12  ;;  %v4805_v41 = vadd.f32 %v9970_v2, %v13589_v46  ;;  %v4799_v49 = vpop.f32.mrb[111].mxu0 }
 0x6b7   : > { %10971 = vpow2.f32 %v8630_v5  ;;  %v4800_v28 = vadd.f32 %v13589_v46, %v4799_v49 }
 0x6b8   : > { %v8633_v4 = vmul.f32 -1.442695, %v4805_v41 }
 0x6b9   : > { %v8632_v35 = vmul.f32 -1.442695, %v4800_v28 }
 0x6ba   : > { %10973 = vpow2.f32 %v8633_v4 }
 0x6bb   : > { %10975 = vpow2.f32 %v8632_v35  ;;  %v9973_v18 = vpop.f32.mrb[112].mxu0 }
 0x6bc   : > { %v10966_v63 = vpop.eup %10965  ;;  %v4815_v57 = vadd.f32 %v9973_v18, %v13589_v46  ;;  %v4809_v25 = vpop.f32.mrb[113].mxu0 }
 0x6bd   : > { %v10968_v19 = vpop.eup %10967  ;;  %v4907_v54 = vadd.f32 1.0, %v10966_v63  ;;  %v4810_v15 = vadd.f32 %v13589_v46, %v4809_v25 }
 0x6be   : > { %v4906_v12 = vadd.f32 1.0, %v10968_v19  ;;  %v8635_v53 = vmul.f32 -1.442695, %v4815_v57 }
 0x6bf   : > { %10977 = vrcp.f32 %v4907_v54  ;;  %v8634_v2 = vmul.f32 -1.442695, %v4810_v15  ;;  %v9976_v5 = vpop.f32.mrb[114].mxu0 }
 0x6c0   : > { %v10970_v42 = vpop.eup %10969  ;;  %10979 = vrcp.f32 %v4906_v12  ;;  %v4825_v41 = vadd.f32 %v9976_v5, %v13589_v46  ;;  %v4819_v49 = vpop.f32.mrb[115].mxu0 }
 0x6c1   : > { %v10972_v28 = vpop.eup %10971  ;;  %v4909_v4 = vadd.f32 1.0, %v10970_v42  ;;  %10981 = vpow2.f32 %v8635_v53  ;;  %v4820_v35 = vadd.f32 %v13589_v46, %v4819_v49 }
 0x6c2   : > { %v4908_v18 = vadd.f32 1.0, %v10972_v28  ;;  %10983 = vpow2.f32 %v8634_v2  ;;  %v8637_v63 = vmul.f32 -1.442695, %v4825_v41 }
 0x6c3   : > { %10985 = vrcp.f32 %v4909_v4  ;;  %v8636_v25 = vmul.f32 -1.442695, %v4820_v35  ;;  %v9979_v19 = vpop.f32.mrb[116].mxu0 }
 0x6c4   : > { %v10974_v57 = vpop.eup %10973  ;;  %10987 = vrcp.f32 %v4908_v18  ;;  %v4835_v54 = vadd.f32 %v9979_v19, %v13589_v46  ;;  %v4829_v15 = vpop.f32.mrb[117].mxu0 }
 0x6c5   : > { %v10976_v12 = vpop.eup %10975  ;;  %v4911_v6 = vadd.f32 1.0, %v10974_v57  ;;  %10989 = vpow2.f32 %v8637_v63  ;;  %v4830_v5 = vadd.f32 %v13589_v46, %v4829_v15 }
 0x6c6   : > { %v4910_v42 = vadd.f32 1.0, %v10976_v12  ;;  %10991 = vpow2.f32 %v8636_v25  ;;  %v8639_v53 = vmul.f32 -1.442695, %v4835_v54 }
 0x6c7   : > { %10993 = vrcp.f32 %v4911_v6  ;;  %v8638_v49 = vmul.f32 -1.442695, %v4830_v5  ;;  %v9982_v2 = vpop.f32.mrb[118].mxu0 }
 0x6c8   : > { %10995 = vrcp.f32 %v4910_v42  ;;  %v4845_v41 = vadd.f32 %v9982_v2, %v13589_v46  ;;  %v4839_v28 = vpop.f32.mrb[119].mxu0 }
 0x6c9   : > { %v10978_v4 = vpop.eup %10977  ;;  %10997 = vpow2.f32 %v8639_v53  ;;  %v4840_v35 = vadd.f32 %v13589_v46, %v4839_v28 }
 0x6ca   : > { %v10980_v18 = vpop.eup %10979  ;;  %10999 = vpow2.f32 %v8638_v49  ;;  %v8641_v19 = vmul.f32 -1.442695, %v4845_v41  ;;  %v4955_v63 = vmul.f32 %v10978_v4, %v13330_v58  ;;  %v13628_v57 = vmul.f32 %v10978_v4, %v13362_v16 }
 0x6cb   : > { %v10982_v25 = vpop.eup %10981  ;;  %v8640_v6 = vmul.f32 -1.442695, %v4840_v35  ;;  %v9985_v54 = vpop.f32.mrb[120].mxu0  ;;  %v4954_v15 = vmul.f32 %v10980_v18, %v13332_v43  ;;  %v13632_v12 = vmul.f32 %v10980_v18, %v13364_v45  ;;  %v13635_v5 = vmul.f32 %v10980_v18, %v13396_v55 }
 0x6cc   : > { %v10984_v42 = vpop.eup %10983  ;;  %v4913_v53 = vadd.f32 1.0, %v10982_v25  ;;  %11001 = vpow2.f32 %v8641_v19  ;;  %v4855_v49 = vadd.f32 %v9985_v54, %v13589_v46  ;;  %v4849_v58 = vpop.f32.mrb[121].mxu0  ;;  %v13643_v55 = vadd.f32 %v4955_v63, %v12532_v36 }
 0x6cd   : > { %v10986_v2 = vpop.eup %10985  ;;  %v4912_v16 = vadd.f32 1.0, %v10984_v42  ;;  %11003 = vpow2.f32 %v8640_v6  ;;  %v4850_v41 = vadd.f32 %v13589_v46, %v4849_v58  ;;  %v13640_v28 = vadd.f32 %v4954_v15, %v12538_v47  ;;  %v15551_v42 = vld [vmem:[#allocation38_spill] sm:$0xff] }
 0x6ce   : > { %v10988_v43 = vpop.eup %10987  ;;  %11005 = vrcp.f32 %v4913_v53  ;;  %v8643_v45 = vmul.f32 -1.442695, %v4855_v49  ;;  %15548 = vst [vmem:[#allocation89_spill] sm:$0xff] %v13643_v55  ;;  %v4957_v35 = vmul.f32 %v10986_v2, %v13334_v9  ;;  %v15549_v9 = vld [vmem:[#allocation40_spill] sm:$0xff]  ;;  %v13658_v15 = vmul.f32 %v10986_v2, %v13366_v0 }
 0x6cf   : > { %15547 = vst [vmem:[#allocation88_spill] sm:$0xff] %v13640_v28  ;;  %v10990_v18 = vpop.eup %10989  ;;  %11007 = vrcp.f32 %v4912_v16  ;;  %v8642_v19 = vmul.f32 -1.442695, %v4850_v41  ;;  %9988 = vmatprep.mubr.msk.f32.mxu0 %vm2768_vm1, %v13640_v28  ;;  %v4956_v25 = vmul.f32 %v10988_v43, %v13336_v11  ;;  %v13652_v47 = vmul.f32 %v10988_v43, %v13368_v60 }
 0x6d0   : > { %v10992_v46 = vpop.eup %10991  ;;  %v4915_v6 = vadd.f32 1.0, %v10990_v18  ;;  %11009 = vpow2.f32 %v8643_v45  ;;  %9989 = vmatmul.mubr.msk.f32.vlgmr.msra.gmra.mrb[122].mxu0 %vm2768_vm1, %v13643_v55  ;;  %v13664_v53 = vadd.f32 %v4957_v35, %v15551_v42  ;;  %v13685_v18 = vmul.f32 %v10978_v4, %v13394_v30 }
 0x6d1   : > { %v10994_v36 = vpop.eup %10993  ;;  %v4914_v63 = vadd.f32 1.0, %v10992_v46  ;;  %11011 = vpow2.f32 %v8642_v19  ;;  %v13655_v54 = vadd.f32 %v4956_v25, %v15549_v9  ;;  %10390 = vmatpush3.bf16.msk.msra.mxu0 %vm12501_vm3, %v13605_v1 }
 0x6d2   : > { %v10996_v11 = vpop.eup %10995  ;;  %11013 = vrcp.f32 %v4915_v6  ;;  %15552 = vst [vmem:[#allocation38_spill] sm:$0xff] %v13664_v53  ;;  %v4959_v60 = vmul.f32 %v10994_v36, %v13338_v51  ;;  %v13668_v49 = vmul.f32 %v10994_v36, %v13370_v27  ;;  %v15553_v51 = vld [vmem:[#allocation47_spill] sm:$0xff]  ;;  %v15555_v27 = vld [vmem:[#allocation44_spill] sm:$0xff]  ;;  %v13699_v30 = vmul.f32 %v10994_v36, %v13408_v20 }
 0x6d3   : > { %15550 = vst [vmem:[#allocation40_spill] sm:$0xff] %v13655_v54  ;;  %v10998_v58 = vpop.eup %10997  ;;  %11015 = vrcp.f32 %v4914_v63  ;;  %9991 = vmatprep.mubr.msk.f32.mxu0 %vm2768_vm1, %v13655_v54  ;;  %v4958_v0 = vmul.f32 %v10996_v11, %v13340_v32  ;;  %v13674_v37 = vmul.f32 %v10996_v11, %v13372_v61  ;;  %v13688_v32 = vmul.f32 %v10988_v43, %v13406_v44 }
 0x6d4   : > { %v11000_v1 = vpop.eup %10999  ;;  %v4917_v16 = vadd.f32 1.0, %v10998_v58  ;;  %9992 = vmatmul.mubr.msk.f32.gmra.mrb[124].mxu0 %vm2768_vm1, %v13664_v53  ;;  %v13682_v35 = vadd.f32 %v4959_v60, %v15555_v27  ;;  %v13691_v61 = vmul.f32 %v10986_v2, %v13404_v38  ;;  %v13694_v25 = vmul.f32 %v10996_v11, %v13410_v56  ;;  %v15557_v58 = vld [vmem:[#allocation53_spill] sm:$0xff] }
 0x6d5   : > { %v4916_v41 = vadd.f32 1.0, %v11000_v1  ;;  %v13679_v45 = vadd.f32 %v4958_v0, %v15553_v51  ;;  %v15559_v1 = vld [vmem:[#allocation50_spill] sm:$0xff] }
 0x6d6   : > { %15556 = vst [vmem:[#allocation44_spill] sm:$0xff] %v13682_v35  ;;  %v11002_v19 = vpop.eup %11001  ;;  %11017 = vrcp.f32 %v4917_v16 }
 0x6d7   : > { %15554 = vst [vmem:[#allocation47_spill] sm:$0xff] %v13679_v45  ;;  %v11004_v46 = vpop.eup %11003  ;;  %11019 = vrcp.f32 %v4916_v41  ;;  %v4919_v6 = vadd.f32 1.0, %v11002_v19  ;;  %9994 = vmatprep.mubr.msk.f32.mxu0 %vm2768_vm1, %v13679_v45 }
 0x6d8   : > { %v11006_v4 = vpop.eup %11005  ;;  %v4918_v63 = vadd.f32 1.0, %v11004_v46  ;;  %9995 = vmatmul.mubr.msk.f32.gmra.mrb[126].mxu0 %vm2768_vm1, %v13682_v35  ;;  %v15563_v46 = vld [vmem:[#allocation56_spill] sm:$0xff] }
 0x6d9   : > { %v11008_v44 = vpop.eup %11007  ;;  %11021 = vrcp.f32 %v4919_v6  ;;  %v4961_v38 = vmul.f32 %v11006_v4, %v13342_v34  ;;  %v13705_v56 = vmul.f32 %v11006_v4, %v13374_v17  ;;  %v13715_v42 = vmul.f32 %v11006_v4, %v13412_v50 }
 0x6da   : > { %v11010_v2 = vpop.eup %11009  ;;  %11023 = vrcp.f32 %v4918_v63  ;;  %v4960_v43 = vmul.f32 %v11008_v44, %v13344_v21  ;;  %v13709_v9 = vmul.f32 %v11008_v44, %v13376_v48  ;;  %v13712_v20 = vmul.f32 %v11008_v44, %v13414_v22 }
 0x6db   : > { %v11012_v36 = vpop.eup %11011  ;;  %v4921_v11 = vadd.f32 1.0, %v11010_v2  ;;  %v13721_v21 = vadd.f32 %v4961_v38, %v15559_v1  ;;  %v15569_v2 = vld [vmem:[#allocation72_spill] sm:$0xff]  ;;  %v15573_v1 = vld [vmem:[#allocation67_spill] sm:$0xff] }
 0x6dc   : > { %v11014_v60 = vpop.eup %11013  ;;  %v4920_v34 = vadd.f32 1.0, %v11012_v36  ;;  %v13718_v17 = vadd.f32 %v4960_v43, %v15557_v58  ;;  %v15570_v36 = vld [vmem:[#allocation78_spill] sm:$0xff]  ;;  %v15571_v58 = vld [vmem:[#allocation3_spill] sm:$0xff] }
 0x6dd   : > { %v11016_v0 = vpop.eup %11015  ;;  %11025 = vrcp.f32 %v4921_v11  ;;  %15560 = vst [vmem:[#allocation50_spill] sm:$0xff] %v13721_v21  ;;  %v4963_v48 = vmul.f32 %v11014_v60, %v13346_v39  ;;  %v13725_v22 = vmul.f32 %v11014_v60, %v13378_v59  ;;  %v13737_v51 = vmul.f32 %v11014_v60, %v13416_v52  ;;  %v15561_v59 = vld [vmem:[#allocation59_spill] sm:$0xff]  ;;  %v15568_v52 = vld [vmem:[#allocation66_spill] sm:$0xff] }
 0x6de   : > { %15558 = vst [vmem:[#allocation53_spill] sm:$0xff] %v13718_v17  ;;  %11027 = vrcp.f32 %v4920_v34  ;;  %9997 = vmatprep.mubr.msk.f32.mxu0 %vm2768_vm1, %v13718_v17  ;;  %v4962_v50 = vmul.f32 %v11016_v0, %v13348_v40  ;;  %v4978_v16 = vmul.f32 %v11016_v0, %v13380_v10  ;;  %v13732_v41 = vmul.f32 %v11016_v0, %v13418_v31  ;;  %v15565_v40 = vld [vmem:[#allocation65_spill] sm:$0xff]  ;;  %v15566_v10 = vld [vmem:[#allocation71_spill] sm:$0xff]  ;;  %v11308_v17 = vld [vmem:[%s11666_s19 + $0x90] sm:$0xff] }
 0x6df   : > { %9998 = vmatmul.mubr.msk.f32.gmra.mrb[128].mxu0 %vm2768_vm1, %v13721_v21  ;;  %v13743_v6 = vadd.f32 %v4963_v48, %v15563_v46  ;;  %v15567_v31 = vld [vmem:[#allocation77_spill] sm:$0xff] }
 0x6e0   : > { %v11018_v39 = vpop.eup %11017  ;;  %v13740_v27 = vadd.f32 %v4962_v50, %v15561_v59  ;;  %v15574_v50 = vld [vmem:[#allocation73_spill] sm:$0xff]  ;;  %v15575_v59 = vld [vmem:[#allocation62_spill] sm:$0xff] }
 0x6e1   : > { %v11020_v19 = vpop.eup %11019  ;;  %15564 = vst [vmem:[#allocation56_spill] sm:$0xff] %v13743_v6  ;;  %v4965_v4 = vmul.f32 %v11018_v39, %v15565_v40  ;;  %v4981_v63 = vmul.f32 %v11018_v39, %v15566_v10  ;;  %v13748_v44 = vmul.f32 %v11018_v39, %v15567_v31  ;;  %v15577_v40 = vld [vmem:[#allocation68_spill] sm:$0xff]  ;;  %v15578_v31 = vld [vmem:[#allocation74_spill] sm:$0xff] }
 0x6e2   : > { %15562 = vst [vmem:[#allocation59_spill] sm:$0xff] %v13740_v27  ;;  %10000 = vmatprep.mubr.msk.f32.mxu0 %vm2768_vm1, %v13740_v27  ;;  %v4964_v38 = vmul.f32 %v11020_v19, %v15568_v52  ;;  %v4980_v43 = vmul.f32 %v11020_v19, %v15569_v2  ;;  %v13755_v11 = vmul.f32 %v11020_v19, %v15570_v36  ;;  %v15579_v52 = vld [vmem:[#allocation80_spill] sm:$0xff]  ;;  %v15580_v36 = vld [vmem:[#allocation79_spill] sm:$0xff] }
 0x6e3   : > { %v11022_v60 = vpop.eup %11021  ;;  %10001 = vmatmul.mubr.msk.f32.gmra.mrb[130].mxu0 %vm2768_vm1, %v13743_v6  ;;  %v13765_v46 = vadd.f32 %v4965_v4, %v15575_v59  ;;  %v15583_v59 = vld [vmem:[#allocation69_spill] sm:$0xff] }
 0x6e4   : > { %v11024_v34 = vpop.eup %11023  ;;  %v13760_v0 = vadd.f32 %v4964_v38, %v15571_v58  ;;  %v4967_v48 = vmul.f32 %v11022_v60, %v15573_v1  ;;  %v4983_v39 = vmul.f32 %v11022_v60, %v15574_v50  ;;  %v13775_v38 = vmul.f32 %v11022_v60, %v15580_v36  ;;  %v15581_v1 = vld [vmem:[#allocation4_spill] sm:$0xff]  ;;  %v15586_v60 = vld [vmem:[#allocation5_spill] sm:$0xff] }
 0x6e5   : > { %15576 = vst [vmem:[#allocation71_spill] sm:$0xff] %v13765_v46  ;;  %v4966_v10 = vmul.f32 %v11024_v34, %v15577_v40  ;;  %v4982_v19 = vmul.f32 %v11024_v34, %v15578_v31  ;;  %v13770_v2 = vmul.f32 %v11024_v34, %v15579_v52  ;;  %v15584_v31 = vld [vmem:[#allocation75_spill] sm:$0xff]  ;;  %v15585_v34 = vld [vmem:[#allocation81_spill] sm:$0xff] }
 0x6e6   : > { %15572 = vst [vmem:[#allocation65_spill] sm:$0xff] %v13760_v0  ;;  %10003 = vmatprep.mubr.msk.f32.mxu0 %vm2768_vm1, %v13760_v0  ;;  %v13790_v36 = vadd.f32 %v4967_v48, %v15586_v60  ;;  %v15588_v0 = vld [vmem:[#allocation70_spill] sm:$0xff]  ;;  %v15595_v48 = vld [vmem:[#allocation35_spill] sm:$0xff] }
 0x6e7   : > { %v11026_v58 = vpop.eup %11025  ;;  %10004 = vmatmul.mubr.msk.f32.gmra.mrb[132].mxu0 %vm2768_vm1, %v13765_v46  ;;  %v13780_v4 = vadd.f32 %v4966_v10, %v15581_v1  ;;  %v15589_v46 = vld [vmem:[#allocation76_spill] sm:$0xff]  ;;  %v15590_v10 = vld [vmem:[#allocation82_spill] sm:$0xff] }
 0x6e8   : > { %v11028_v50 = vpop.eup %11027  ;;  %v4969_v40 = vmul.f32 %v11026_v58, %v15583_v59  ;;  %v4985_v6 = vmul.f32 %v11026_v58, %v15584_v31  ;;  %v13785_v52 = vmul.f32 %v11026_v58, %v15585_v34  ;;  %15587 = vst [vmem:[#allocation66_spill] sm:$0xff] %v13790_v36  ;;  %v15591_v59 = vld [vmem:[#allocation7_spill] sm:$0xff]  ;;  %v15593_v58 = vld [vmem:[#allocation6_spill] sm:$0xff] }
 0x6e9   : > { %15582 = vst [vmem:[#allocation77_spill] sm:$0xff] %v13780_v4  ;;  %10006 = vmatprep.mubr.msk.f32.mxu0 %vm2768_vm1, %v13780_v4  ;;  %v4968_v27 = vmul.f32 %v11028_v50, %v15588_v0  ;;  %v4984_v21 = vmul.f32 %v11028_v50, %v15589_v46  ;;  %v13795_v1 = vmul.f32 %v11028_v50, %v15590_v10  ;;  %v15597_v46 = vld [vmem:[#allocation34_spill] sm:$0xff]  ;;  %v15599_v50 = vld [vmem:[#allocation41_spill] sm:$0xff]  ;;  %v15603_v10 = vld [vmem:[#allocation48_spill] sm:$0xff] }
 0x6ea   : > { %v13805_v34 = vadd.f32 %v4969_v40, %v15593_v58  ;;  %v13809_v0 = vadd.f32 %v13632_v12, %v15595_v48  ;;  %v13821_v60 = vadd.f32 %v13652_v47, %v15599_v50  ;;  %v15601_v12 = vld [vmem:[#allocation39_spill] sm:$0xff]  ;;  %v15607_v58 = vld [vmem:[#allocation54_spill] sm:$0xff] }
 0x6eb   : > { %10007 = vmatmul.mubr.msk.f32.gmra.mrb[134].mxu0 %vm2768_vm1, %v13790_v36  ;;  %v13800_v31 = vadd.f32 %v4968_v27, %v15591_v59  ;;  %v13817_v27 = vadd.f32 %v13628_v57, %v15597_v46  ;;  %v13829_v40 = vadd.f32 %v13658_v15, %v15601_v12  ;;  %v13833_v59 = vadd.f32 %v13674_v37, %v15603_v10  ;;  %v15605_v57 = vld [vmem:[#allocation45_spill] sm:$0xff]  ;;  %v15609_v15 = vld [vmem:[#allocation51_spill] sm:$0xff]  ;;  %v15611_v46 = vld [vmem:[#allocation60_spill] sm:$0xff] }
 0x6ec   : > { %15594 = vst [vmem:[#allocation78_spill] sm:$0xff] %v13805_v34  ;;  %15596 = vst [vmem:[#allocation3_spill] sm:$0xff] %v13809_v0  ;;  %v13841_v47 = vadd.f32 %v13668_v49, %v15605_v57  ;;  %v13845_v48 = vadd.f32 %v13709_v9, %v15607_v58  ;;  %v13853_v37 = vadd.f32 %v13705_v56, %v15609_v15  ;;  %v15613_v49 = vld [vmem:[#allocation57_spill] sm:$0xff]  ;;  %v15615_v12 = vld [vmem:[#allocation8_spill] sm:$0xff] }
 0x6ed   : > { %15592 = vst [vmem:[#allocation72_spill] sm:$0xff] %v13800_v31  ;;  %10009 = vmatprep.mubr.msk.f32.mxu0 %vm2768_vm1, %v13800_v31  ;;  %15598 = vst [vmem:[#allocation67_spill] sm:$0xff] %v13817_v27  ;;  %v13856_v50 = vadd.f32 %v4978_v16, %v15611_v46  ;;  %v13864_v9 = vadd.f32 %v13725_v22, %v15613_v49  ;;  %v13867_v10 = vadd.f32 %v4980_v43, %v15615_v12  ;;  %v15617_v56 = vld [vmem:[#allocation63_spill] sm:$0xff]  ;;  %v15619_v57 = vld [vmem:[#allocation10_spill] sm:$0xff] }
 0x6ee   : > { %15600 = vst [vmem:[#allocation73_spill] sm:$0xff] %v13821_v60  ;;  %15602 = vst [vmem:[#allocation62_spill] sm:$0xff] %v13829_v40  ;;  %v13874_v16 = vadd.f32 %v4981_v63, %v15617_v56  ;;  %v13877_v58 = vadd.f32 %v4982_v19, %v15619_v57  ;;  %v15621_v22 = vld [vmem:[#allocation9_spill] sm:$0xff]  ;;  %v15623_v15 = vld [vmem:[#allocation12_spill] sm:$0xff] }
 0x6ef   : > { %10010 = vmatmul.mubr.msk.f32.gmra.mrb[136].mxu0 %vm2768_vm1, %v13805_v34  ;;  %15604 = vst [vmem:[#allocation68_spill] sm:$0xff] %v13833_v59  ;;  %15606 = vst [vmem:[#allocation74_spill] sm:$0xff] %v13841_v47  ;;  %v13884_v43 = vadd.f32 %v4983_v39, %v15621_v22  ;;  %v13887_v46 = vadd.f32 %v4984_v21, %v15623_v15  ;;  %v15625_v63 = vld [vmem:[#allocation11_spill] sm:$0xff]  ;;  %v15627_v49 = vld [vmem:[#allocation36_spill] sm:$0xff] }
 0x6f0   : > { %10012 = vmatprep.mubr.msk.f32.mxu0 %vm2768_vm1, %v13809_v0  ;;  %15608 = vst [vmem:[#allocation80_spill] sm:$0xff] %v13845_v48  ;;  %15610 = vst [vmem:[#allocation79_spill] sm:$0xff] %v13853_v37  ;;  %v13894_v19 = vadd.f32 %v4985_v6, %v15625_v63  ;;  %v13898_v12 = vadd.f32 %v13635_v5, %v15627_v49  ;;  %v15628_v21 = vld [vmem:[#allocation37_spill] sm:$0xff]  ;;  %v15629_v56 = vld [vmem:[#allocation42_spill] sm:$0xff] }
 0x6f1   : > { %15612 = vst [vmem:[#allocation4_spill] sm:$0xff] %v13856_v50  ;;  %15614 = vst [vmem:[#allocation69_spill] sm:$0xff] %v13864_v9  ;;  %v13906_v39 = vadd.f32 %v13685_v18, %v15628_v21  ;;  %v13910_v57 = vadd.f32 %v13688_v32, %v15629_v56  ;;  %v15631_v5 = vld [vmem:[#allocation43_spill] sm:$0xff]  ;;  %v15633_v22 = vld [vmem:[#allocation49_spill] sm:$0xff] }
 0x6f2   : > { %15616 = vst [vmem:[#allocation75_spill] sm:$0xff] %v13867_v10  ;;  %15618 = vst [vmem:[#allocation81_spill] sm:$0xff] %v13874_v16  ;;  %v13918_v6 = vadd.f32 %v13691_v61, %v15631_v5  ;;  %v13922_v15 = vadd.f32 %v13694_v25, %v15633_v22  ;;  %v15635_v18 = vld [vmem:[#allocation46_spill] sm:$0xff]  ;;  %v15637_v63 = vld [vmem:[#allocation55_spill] sm:$0xff] }
 0x6f3   : > { %10013 = vmatmul.mubr.msk.f32.gmra.mrb[138].mxu0 %vm2768_vm1, %v13817_v27  ;;  %15620 = vst [vmem:[#allocation5_spill] sm:$0xff] %v13877_v58  ;;  %15622 = vst [vmem:[#allocation70_spill] sm:$0xff] %v13884_v43  ;;  %v13930_v32 = vadd.f32 %v13699_v30, %v15635_v18  ;;  %v13934_v49 = vadd.f32 %v13712_v20, %v15637_v63  ;;  %v15639_v61 = vld [vmem:[#allocation52_spill] sm:$0xff]  ;;  %v15641_v21 = vld [vmem:[#allocation61_spill] sm:$0xff] }
 0x6f4   : > { %10015 = vmatprep.mubr.msk.f32.mxu0 %vm2768_vm1, %v13821_v60  ;;  %15624 = vst [vmem:[#allocation76_spill] sm:$0xff] %v13887_v46  ;;  %15626 = vst [vmem:[#allocation82_spill] sm:$0xff] %v13894_v19  ;;  %v13942_v25 = vadd.f32 %v13715_v42, %v15639_v61  ;;  %v13946_v56 = vadd.f32 %v13732_v41, %v15641_v21  ;;  %v15643_v30 = vld [vmem:[#allocation58_spill] sm:$0xff]  ;;  %v15645_v5 = vld [vmem:[#allocation13_spill] sm:$0xff] }
 0x6f5   : > { %15630 = vst [vmem:[#allocation7_spill] sm:$0xff] %v13910_v57  ;;  %15632 = vst [vmem:[#allocation6_spill] sm:$0xff] %v13918_v6  ;;  %v13954_v20 = vadd.f32 %v13737_v51, %v15643_v30  ;;  %v13958_v22 = vadd.f32 %v13755_v11, %v15645_v5  ;;  %v15647_v42 = vld [vmem:[#allocation64_spill] sm:$0xff]  ;;  %v15649_v18 = vld [vmem:[#allocation15_spill] sm:$0xff] }
 0x6f6   : > { %15634 = vst [vmem:[#allocation35_spill] sm:$0xff] %v13922_v15  ;;  %15636 = vst [vmem:[#allocation34_spill] sm:$0xff] %v13930_v32  ;;  %v13966_v41 = vadd.f32 %v13748_v44, %v15647_v42  ;;  %v13970_v63 = vadd.f32 %v13770_v2, %v15649_v18  ;;  %v15651_v51 = vld [vmem:[#allocation14_spill] sm:$0xff]  ;;  %v15653_v61 = vld [vmem:[#allocation17_spill] sm:$0xff] }
 0x6f7   : > { %10016 = vmatmul.mubr.msk.f32.gmra.mrb[140].mxu0 %vm2768_vm1, %v13829_v40  ;;  %15638 = vst [vmem:[#allocation41_spill] sm:$0xff] %v13934_v49  ;;  %15640 = vst [vmem:[#allocation39_spill] sm:$0xff] %v13942_v25  ;;  %v13978_v11 = vadd.f32 %v13775_v38, %v15651_v51  ;;  %v13982_v21 = vadd.f32 %v13795_v1, %v15653_v61  ;;  %v15655_v44 = vld [vmem:[#allocation16_spill] sm:$0xff]  ;;  %v5807_v38 = vld [vmem:[%s15283_s4 + $0x108] sm:$0xff] }
 0x6f8   : > { %10018 = vmatprep.mubr.msk.f32.mxu0 %vm2768_vm1, %v13833_v59  ;;  %15642 = vst [vmem:[#allocation48_spill] sm:$0xff] %v13946_v56  ;;  %15644 = vst [vmem:[#allocation45_spill] sm:$0xff] %v13954_v20  ;;  %v13990_v2 = vadd.f32 %v13785_v52, %v15655_v44  ;;  %v5808_v1 = vld [vmem:[%s15283_s4 + $0x110] sm:$0xff]  ;;  %v11301_v4 = vld [vmem:[%s11666_s19 + $0x8] sm:$0xff] }
 0x6f9   : > { %15646 = vst [vmem:[#allocation54_spill] sm:$0xff] %v13958_v22  ;;  %15648 = vst [vmem:[#allocation51_spill] sm:$0xff] %v13966_v41  ;;  %v14000_v30 = vpack.c.bf16 %v5808_v1, %v5807_v38 }
 0x6fa   : > { %15650 = vst [vmem:[#allocation60_spill] sm:$0xff] %v13970_v63  ;;  %15652 = vst [vmem:[#allocation57_spill] sm:$0xff] %v13978_v11 }
 0x6fb   : > { %10019 = vmatmul.mubr.msk.f32.gmra.mrb[142].mxu0 %vm2768_vm1, %v13841_v47  ;;  %15654 = vst [vmem:[#allocation8_spill] sm:$0xff] %v13982_v21  ;;  %15656 = vst [vmem:[#allocation63_spill] sm:$0xff] %v13990_v2  ;;  %10376 = vmatprep.subr.bf16.mxu1 %v14000_v30 }
 0x6fc   : > { %10021 = vmatprep.mubr.msk.f32.mxu0 %vm2768_vm1, %v13845_v48 }
 0x6ff   : > { %10022 = vmatmul.mubr.msk.f32.gmra.mrb[144].mxu0 %vm2768_vm1, %v13853_v37 }
 0x700   : > { %10024 = vmatprep.mubr.msk.f32.mxu0 %vm2768_vm1, %v13856_v50  ;;  %v11304_v50 = vld [vmem:[%s11666_s19 + $0x80] sm:$0xff] }
 0x703   : > { %10025 = vmatmul.mubr.msk.f32.gmra.mrb[146].mxu0 %vm2768_vm1, %v13864_v9 }
 0x704   : > { %10027 = vmatprep.mubr.msk.f32.mxu0 %vm2768_vm1, %v13867_v10 }
 0x707   : > { %10028 = vmatmul.mubr.msk.f32.gmra.mrb[148].mxu0 %vm2768_vm1, %v13874_v16  ;;  %v11302_v16 = vld [vmem:[%s11666_s19 + $0x88] sm:$0xff] }
 0x708   : > { %10030 = vmatprep.mubr.msk.f32.mxu0 %vm2768_vm1, %v13877_v58 }
 0x70b   : > { %10031 = vmatmul.mubr.msk.f32.gmra.mrb[150].mxu0 %vm2768_vm1, %v13884_v43 }
 0x70c   : > { %10033 = vmatprep.mubr.msk.f32.mxu0 %vm2768_vm1, %v13887_v46 }
 0x70f   : > { %10034 = vmatmul.mubr.msk.f32.gmra.mrb[152].mxu0 %vm2768_vm1, %v13894_v19 }
 0x710   : > { %10036 = vmatprep.mubr.msk.f32.mxu0 %vm2768_vm1, %v13898_v12 }
 0x713   : > { %10037 = vmatmul.mubr.msk.f32.gmra.mrb[154].mxu0 %vm2768_vm1, %v13906_v39 }
 0x714   : > { %10039 = vmatprep.mubr.msk.f32.mxu0 %vm2768_vm1, %v13910_v57 }
 0x717   : > { %10040 = vmatmul.mubr.msk.f32.gmra.mrb[156].mxu0 %vm2768_vm1, %v13918_v6 }
 0x718   : > { %10042 = vmatprep.mubr.msk.f32.mxu0 %vm2768_vm1, %v13922_v15 }
 0x71b   : > { %10043 = vmatmul.mubr.msk.f32.gmra.mrb[158].mxu0 %vm2768_vm1, %v13930_v32 }
 0x71c   : > { %10045 = vmatprep.mubr.msk.f32.mxu0 %vm2768_vm1, %v13934_v49 }
 0x71f   : > { %10046 = vmatmul.mubr.msk.f32.gmra.mrb[160].mxu0 %vm2768_vm1, %v13942_v25 }
 0x720   : > { %10048 = vmatprep.mubr.msk.f32.mxu0 %vm2768_vm1, %v13946_v56 }
 0x723   : > { %10049 = vmatmul.mubr.msk.f32.gmra.mrb[162].mxu0 %vm2768_vm1, %v13954_v20  ;;  %v11303_v20 = vld [vmem:[%s11666_s19] sm:$0xff] }
 0x724   : > { %10051 = vmatprep.mubr.msk.f32.mxu0 %vm2768_vm1, %v13958_v22 }
 0x727   : > { %10052 = vmatmul.mubr.msk.f32.gmra.mrb[164].mxu0 %vm2768_vm1, %v13966_v41 }
 0x728   : > { %10054 = vmatprep.mubr.msk.f32.mxu0 %vm2768_vm1, %v13970_v63 }
 0x72b   : > { %10055 = vmatmul.mubr.msk.f32.gmra.mrb[166].mxu0 %vm2768_vm1, %v13978_v11 }
 0x72c   : > { %10057 = vmatprep.mubr.msk.f32.mxu0 %vm2768_vm1, %v13982_v21 }
 0x72f   : > { %10058 = vmatmul.mubr.msk.f32.gmra.mrb[168].mxu0 %vm2768_vm1, %v13990_v2 }
 0x7a3   : > { %v9990_v5 = vpop.f32.mrb[122].mxu0 }
 0x7a4   : > { %v5280_v42 = vpop.f32.mrb[123].mxu0  ;;  %v5520_v36 = vmul.f32 %v9990_v5, %v9990_v5  ;;  %v5728_v43 = vmul.f32 %v11301_v4, %v9990_v5 }
 0x7a5   : > { %10148 = vmatprep.mubr.msk.f32.mxu0 %vm3514_vm4, %v5280_v42  ;;  %v5519_v22 = vmul.f32 %v5280_v42, %v5280_v42  ;;  %v5727_v56 = vmul.f32 %v11303_v20, %v5280_v42  ;;  %v11305_v20 = vld [vmem:[%s11666_s19 + $0x18] sm:$0xff] }
 0x7a6   : > { %10149 = vmatmul.mubr.msk.f32.vlgmr.msra.gmra.mrb[170].mxu0 %vm3514_vm4, %v9990_v5 }
 0x7a7   : > { %v9993_v52 = vpop.f32.mrb[124].mxu0 }
 0x7a8   : > { %v5290_v18 = vpop.f32.mrb[125].mxu0  ;;  %v5522_v49 = vmul.f32 %v9993_v52, %v9993_v52  ;;  %v5730_v42 = vmul.f32 %v11305_v20, %v9993_v52  ;;  %v11309_v20 = vld [vmem:[%s11666_s19 + $0x28] sm:$0xff] }
 0x7a9   : > { %10151 = vmatprep.mubr.msk.f32.mxu0 %vm3514_vm4, %v5290_v18 }
 0x7aa   : > { %10152 = vmatmul.mubr.msk.f32.gmra.mrb[172].mxu0 %vm3514_vm4, %v9993_v52 }
 0x7ab   : > { %v14007_v51 = vpop.f32.mrb[126].mxu0 }
 0x7ac   : > { %v14009_v61 = vpop.f32.mrb[127].mxu0 }
 0x7ad   : > { %10154 = vmatprep.mubr.msk.f32.mxu0 %vm3514_vm4, %v14009_v61 }
 0x7ae   : > { %10155 = vmatmul.mubr.msk.f32.gmra.mrb[174].mxu0 %vm3514_vm4, %v14007_v51 }
 0x7b2   : > { %v14015_v44 = vpop.f32.mrb[128].mxu0 }
 0x7b3   : > { %v14017_v38 = vpop.f32.mrb[129].mxu0 }
 0x7b4   : > { %10157 = vmatprep.mubr.msk.f32.mxu0 %vm3514_vm4, %v14017_v38 }
 0x7b5   : > { %10158 = vmatmul.mubr.msk.f32.gmra.mrb[176].mxu0 %vm3514_vm4, %v14015_v44 }
 0x7b6   : > { %v14023_v1 = vpop.f32.mrb[130].mxu0 }
 0x7b7   : > { %v14025_v2 = vpop.f32.mrb[131].mxu0 }
 0x7b8   : > { %10160 = vmatprep.mubr.msk.f32.mxu0 %vm3514_vm4, %v14025_v2 }
 0x7b9   : > { %10161 = vmatmul.mubr.msk.f32.gmra.mrb[178].mxu0 %vm3514_vm4, %v14023_v1 }
 0x7ba   : > { %v14031_v21 = vpop.f32.mrb[132].mxu0 }
 0x7bb   : > { %v14033_v19 = vpop.f32.mrb[133].mxu0 }
 0x7bc   : > { %10163 = vmatprep.mubr.msk.f32.mxu0 %vm3514_vm4, %v14033_v19 }
 0x7bd   : > { %10164 = vmatmul.mubr.msk.f32.gmra.mrb[180].mxu0 %vm3514_vm4, %v14031_v21 }
 0x7be   : > { %v14039_v46 = vpop.f32.mrb[134].mxu0 }
 0x7bf   : > { %v14041_v34 = vpop.f32.mrb[135].mxu0 }
 0x7c0   : > { %10166 = vmatprep.mubr.msk.f32.mxu0 %vm3514_vm4, %v14041_v34 }
 0x7c1   : > { %10167 = vmatmul.mubr.msk.f32.gmra.mrb[182].mxu0 %vm3514_vm4, %v14039_v46 }
 0x7c2   : > { %v14047_v31 = vpop.f32.mrb[136].mxu0 }
 0x7c3   : > { %v14049_v11 = vpop.f32.mrb[137].mxu0 }
 0x7c4   : > { %10169 = vmatprep.mubr.msk.f32.mxu0 %vm3514_vm4, %v14049_v11 }
 0x7c5   : > { %10170 = vmatmul.mubr.msk.f32.gmra.mrb[184].mxu0 %vm3514_vm4, %v14047_v31 }
 0x7c6   : > { %v10014_v63 = vpop.f32.mrb[138].mxu0 }
 0x7c7   : > { %v5536_v58 = vmul.f32 %v10014_v63, %v10014_v63  ;;  %v5744_v10 = vmul.f32 %v11302_v16, %v10014_v63  ;;  %v5360_v41 = vpop.f32.mrb[139].mxu0 }
 0x7c8   : > { %v5535_v9 = vmul.f32 %v5360_v41, %v5360_v41  ;;  %v5743_v37 = vmul.f32 %v11304_v50, %v5360_v41  ;;  %10172 = vmatprep.mubr.msk.f32.mxu0 %vm3514_vm4, %v5360_v41  ;;  %v11306_v50 = vld [vmem:[%s11666_s19 + $0x98] sm:$0xff] }
 0x7c9   : > { %v14060_v48 = vadd.f32 %v5536_v58, %v5520_v36  ;;  %v14062_v25 = vadd.f32 %v5744_v10, %v5728_v43  ;;  %10173 = vmatmul.mubr.msk.f32.gmra.mrb[186].mxu0 %vm3514_vm4, %v10014_v63  ;;  %v5521_v36 = vmul.f32 %v5290_v18, %v5290_v18  ;;  %v11307_v58 = vld [vmem:[%s11666_s19 + $0x10] sm:$0xff] }
 0x7ca   : > { %v14065_v4 = vadd.f32 %v5535_v9, %v5519_v22  ;;  %v14067_v16 = vadd.f32 %v5743_v37, %v5727_v56  ;;  %v10017_v5 = vpop.f32.mrb[140].mxu0  ;;  %v5729_v10 = vmul.f32 %v11307_v58, %v5290_v18  ;;  %v5524_v18 = vmul.f32 %v14007_v51, %v14007_v51  ;;  %v11312_v58 = vld [vmem:[%s11666_s19 + $0xa0] sm:$0xff] }
 0x7cb   : > { %v5538_v32 = vmul.f32 %v10017_v5, %v10017_v5  ;;  %v5746_v15 = vmul.f32 %v11306_v50, %v10017_v5  ;;  %v5370_v41 = vpop.f32.mrb[141].mxu0 }
 0x7cc   : > { %v5537_v43 = vmul.f32 %v5370_v41, %v5370_v41  ;;  %v5745_v63 = vmul.f32 %v11308_v17, %v5370_v41  ;;  %10175 = vmatprep.mubr.msk.f32.mxu0 %vm3514_vm4, %v5370_v41  ;;  %v5732_v17 = vmul.f32 %v11309_v20, %v14007_v51  ;;  %v11310_v41 = vld [vmem:[%s11666_s19 + $0xa8] sm:$0xff] }
 0x7cd   : > { %v14074_v37 = vadd.f32 %v5538_v32, %v5522_v49  ;;  %v14076_v9 = vadd.f32 %v5746_v15, %v5730_v42  ;;  %10176 = vmatmul.mubr.msk.f32.gmra.mrb[188].mxu0 %vm3514_vm4, %v10017_v5  ;;  %v5523_v49 = vmul.f32 %v14009_v61, %v14009_v61  ;;  %v11311_v5 = vld [vmem:[%s11666_s19 + $0x20] sm:$0xff] }
 0x7ce   : > { %v14079_v56 = vadd.f32 %v5537_v43, %v5521_v36  ;;  %v14081_v22 = vadd.f32 %v5745_v63, %v5729_v10  ;;  %v10020_v52 = vpop.f32.mrb[142].mxu0  ;;  %v5731_v42 = vmul.f32 %v11311_v5, %v14009_v61  ;;  %v5526_v61 = vmul.f32 %v14015_v44, %v14015_v44  ;;  %v11313_v5 = vld [vmem:[%s11666_s19 + $0x38] sm:$0xff] }
 0x7cf   : > { %v5540_v50 = vmul.f32 %v10020_v52, %v10020_v52  ;;  %v5748_v32 = vmul.f32 %v11310_v41, %v10020_v52  ;;  %v5380_v15 = vpop.f32.mrb[143].mxu0 }
 0x7d0   : > { %v5539_v36 = vmul.f32 %v5380_v15, %v5380_v15  ;;  %v5747_v10 = vmul.f32 %v11312_v58, %v5380_v15  ;;  %10178 = vmatprep.mubr.msk.f32.mxu0 %vm3514_vm4, %v5380_v15  ;;  %v5734_v58 = vmul.f32 %v11313_v5, %v14015_v44  ;;  %v11314_v15 = vld [vmem:[%s11666_s19 + $0xb8] sm:$0xff] }
 0x7d1   : > { %v14094_v43 = vadd.f32 %v5540_v50, %v5524_v18  ;;  %v14096_v51 = vadd.f32 %v5748_v32, %v5732_v17  ;;  %10179 = vmatmul.mubr.msk.f32.gmra.mrb[190].mxu0 %vm3514_vm4, %v10020_v52  ;;  %v5525_v50 = vmul.f32 %v14017_v38, %v14017_v38  ;;  %v11315_v52 = vld [vmem:[%s11666_s19 + $0x30] sm:$0xff] }
 0x7d2   : > { %v14099_v63 = vadd.f32 %v5539_v36, %v5523_v49  ;;  %v14101_v20 = vadd.f32 %v5747_v10, %v5731_v42  ;;  %v10023_v41 = vpop.f32.mrb[144].mxu0  ;;  %v5733_v32 = vmul.f32 %v11315_v52, %v14017_v38  ;;  %v11316_v42 = vld [vmem:[%s11666_s19 + $0xb0] sm:$0xff]  ;;  %v5528_v38 = vmul.f32 %v14023_v1, %v14023_v1  ;;  %v11317_v52 = vld [vmem:[%s11666_s19 + $0x48] sm:$0xff] }
 0x7d3   : > { %v5542_v35 = vmul.f32 %v10023_v41, %v10023_v41  ;;  %v5750_v18 = vmul.f32 %v11314_v15, %v10023_v41  ;;  %v5390_v17 = vpop.f32.mrb[145].mxu0 }
 0x7d4   : > { %v5541_v49 = vmul.f32 %v5390_v17, %v5390_v17  ;;  %v5749_v36 = vmul.f32 %v11316_v42, %v5390_v17  ;;  %10181 = vmatprep.mubr.msk.f32.mxu0 %vm3514_vm4, %v5390_v17  ;;  %v5736_v42 = vmul.f32 %v11317_v52, %v14023_v1  ;;  %v11318_v17 = vld [vmem:[%s11666_s19 + $0xc8] sm:$0xff] }
 0x7d5   : > { %v14114_v10 = vadd.f32 %v5542_v35, %v5526_v61  ;;  %v14116_v44 = vadd.f32 %v5750_v18, %v5734_v58  ;;  %10182 = vmatmul.mubr.msk.f32.gmra.mrb[192].mxu0 %vm3514_vm4, %v10023_v41  ;;  %v5527_v58 = vmul.f32 %v14025_v2, %v14025_v2  ;;  %v11319_v41 = vld [vmem:[%s11666_s19 + $0x40] sm:$0xff] }
 0x7d6   : > { %v14119_v5 = vadd.f32 %v5541_v49, %v5525_v50  ;;  %v14121_v15 = vadd.f32 %v5749_v36, %v5733_v32  ;;  %v10026_v45 = vpop.f32.mrb[146].mxu0  ;;  %v5735_v18 = vmul.f32 %v11319_v41, %v14025_v2  ;;  %v11320_v32 = vld [vmem:[%s11666_s19 + $0xc0] sm:$0xff]  ;;  %v5530_v2 = vmul.f32 %v14031_v21, %v14031_v21  ;;  %v11321_v41 = vld [vmem:[%s11666_s19 + $0x58] sm:$0xff] }
 0x7d7   : > { %v5544_v47 = vmul.f32 %v10026_v45, %v10026_v45  ;;  %v5752_v35 = vmul.f32 %v11318_v17, %v10026_v45  ;;  %v5400_v61 = vpop.f32.mrb[147].mxu0 }
 0x7d8   : > { %v5543_v50 = vmul.f32 %v5400_v61, %v5400_v61  ;;  %v5751_v49 = vmul.f32 %v11320_v32, %v5400_v61  ;;  %10184 = vmatprep.mubr.msk.f32.mxu0 %vm3514_vm4, %v5400_v61  ;;  %v5738_v32 = vmul.f32 %v11321_v41, %v14031_v21  ;;  %v11322_v61 = vld [vmem:[%s11666_s19 + $0xd8] sm:$0xff] }
 0x7d9   : > { %v14134_v36 = vadd.f32 %v5544_v47, %v5528_v38  ;;  %v14136_v1 = vadd.f32 %v5752_v35, %v5736_v42  ;;  %10185 = vmatmul.mubr.msk.f32.gmra.mrb[194].mxu0 %vm3514_vm4, %v10026_v45  ;;  %v5529_v42 = vmul.f32 %v14033_v19, %v14033_v19  ;;  %v11323_v45 = vld [vmem:[%s11666_s19 + $0x50] sm:$0xff] }
 0x7da   : > { %v14139_v52 = vadd.f32 %v5543_v50, %v5527_v58  ;;  %v14141_v17 = vadd.f32 %v5751_v49, %v5735_v18  ;;  %v10029_v59 = vpop.f32.mrb[148].mxu0  ;;  %v5737_v35 = vmul.f32 %v11323_v45, %v14033_v19  ;;  %v11324_v18 = vld [vmem:[%s11666_s19 + $0xd0] sm:$0xff]  ;;  %v5532_v19 = vmul.f32 %v14039_v46, %v14039_v46  ;;  %v11325_v45 = vld [vmem:[%s11666_s19 + $0x68] sm:$0xff] }
 0x7db   : > { %v5546_v40 = vmul.f32 %v10029_v59, %v10029_v59  ;;  %v5754_v47 = vmul.f32 %v11322_v61, %v10029_v59  ;;  %v5410_v38 = vpop.f32.mrb[149].mxu0 }
 0x7dc   : > { %v5545_v58 = vmul.f32 %v5410_v38, %v5410_v38  ;;  %v5753_v50 = vmul.f32 %v11324_v18, %v5410_v38  ;;  %10187 = vmatprep.mubr.msk.f32.mxu0 %vm3514_vm4, %v5410_v38  ;;  %v5740_v18 = vmul.f32 %v11325_v45, %v14039_v46  ;;  %v11326_v38 = vld [vmem:[%s11666_s19 + $0xe8] sm:$0xff] }
 0x7dd   : > { %v14154_v49 = vadd.f32 %v5546_v40, %v5530_v2  ;;  %v14156_v21 = vadd.f32 %v5754_v47, %v5738_v32  ;;  %10188 = vmatmul.mubr.msk.f32.gmra.mrb[196].mxu0 %vm3514_vm4, %v10029_v59  ;;  %v5531_v32 = vmul.f32 %v14041_v34, %v14041_v34  ;;  %v11327_v59 = vld [vmem:[%s11666_s19 + $0x60] sm:$0xff] }
 0x7de   : > { %v14159_v41 = vadd.f32 %v5545_v58, %v5529_v42  ;;  %v14161_v61 = vadd.f32 %v5753_v50, %v5737_v35  ;;  %v10032_v60 = vpop.f32.mrb[150].mxu0  ;;  %v5739_v47 = vmul.f32 %v11327_v59, %v14041_v34  ;;  %v11328_v35 = vld [vmem:[%s11666_s19 + $0xe0] sm:$0xff]  ;;  %v5534_v34 = vmul.f32 %v14047_v31, %v14047_v31  ;;  %v11329_v59 = vld [vmem:[%s11666_s19 + $0x78] sm:$0xff] }
 0x7df   : > { %v5548_v6 = vmul.f32 %v10032_v60, %v10032_v60  ;;  %v5756_v40 = vmul.f32 %v11326_v38, %v10032_v60  ;;  %v5420_v2 = vpop.f32.mrb[151].mxu0 }
 0x7e0   : > { %v5547_v42 = vmul.f32 %v5420_v2, %v5420_v2  ;;  %v5755_v58 = vmul.f32 %v11328_v35, %v5420_v2  ;;  %10190 = vmatprep.mubr.msk.f32.mxu0 %vm3514_vm4, %v5420_v2  ;;  %v5742_v35 = vmul.f32 %v11329_v59, %v14047_v31  ;;  %v11330_v2 = vld [vmem:[%s11666_s19 + $0xf8] sm:$0xff] }
 0x7e1   : > { %v14174_v50 = vadd.f32 %v5548_v6, %v5532_v19  ;;  %v14176_v46 = vadd.f32 %v5756_v40, %v5740_v18  ;;  %10191 = vmatmul.mubr.msk.f32.gmra.mrb[198].mxu0 %vm3514_vm4, %v10032_v60  ;;  %v5533_v18 = vmul.f32 %v14049_v11, %v14049_v11  ;;  %v11331_v60 = vld [vmem:[%s11666_s19 + $0x70] sm:$0xff] }
 0x7e2   : > { %v14179_v45 = vadd.f32 %v5547_v42, %v5531_v32  ;;  %v14181_v38 = vadd.f32 %v5755_v58, %v5739_v47  ;;  %v10035_v57 = vpop.f32.mrb[152].mxu0  ;;  %v5741_v40 = vmul.f32 %v11331_v60, %v14049_v11  ;;  %v11332_v47 = vld [vmem:[%s11666_s19 + $0xf0] sm:$0xff]  ;;  %v11333_v11 = vld [vmem:[%s11666_s19 + $0x108] sm:$0xff] }
 0x7e3   : > { %v5550_v27 = vmul.f32 %v10035_v57, %v10035_v57  ;;  %v5758_v6 = vmul.f32 %v11330_v2, %v10035_v57  ;;  %v5430_v19 = vpop.f32.mrb[153].mxu0 }
 0x7e4   : > { %v5549_v32 = vmul.f32 %v5430_v19, %v5430_v19  ;;  %v5757_v42 = vmul.f32 %v11332_v47, %v5430_v19  ;;  %10193 = vmatprep.mubr.msk.f32.mxu0 %vm3514_vm4, %v5430_v19  ;;  %v11334_v47 = vld [vmem:[%s11666_s19 + $0x100] sm:$0xff] }
 0x7e5   : > { %v14194_v58 = vadd.f32 %v5550_v27, %v5534_v34  ;;  %v14196_v31 = vadd.f32 %v5758_v6, %v5742_v35  ;;  %10194 = vmatmul.mubr.msk.f32.gmra.mrb[200].mxu0 %vm3514_vm4, %v10035_v57 }
 0x7e6   : > { %v14199_v59 = vadd.f32 %v5549_v32, %v5533_v18  ;;  %v14201_v2 = vadd.f32 %v5757_v42, %v5741_v40  ;;  %v10038_v0 = vpop.f32.mrb[154].mxu0  ;;  %v11335_v32 = vld [vmem:[%s11666_s19 + $0x118] sm:$0xff] }
 0x7e7   : > { %v5568_v53 = vmul.f32 %v10038_v0, %v10038_v0  ;;  %v5760_v60 = vmul.f32 %v11333_v11, %v10038_v0  ;;  %v5440_v54 = vpop.f32.mrb[155].mxu0 }
 0x7e8   : > { %v5567_v55 = vmul.f32 %v5440_v54, %v5440_v54  ;;  %v5759_v19 = vmul.f32 %v11334_v47, %v5440_v54  ;;  %10196 = vmatprep.mubr.msk.f32.mxu0 %vm3514_vm4, %v5440_v54 }
 0x7e9   : > { %v5584_v27 = vadd.f32 %v5568_v53, %v14060_v48  ;;  %v14208_v57 = vadd.f32 %v14062_v25, %v5760_v60  ;;  %10197 = vmatmul.mubr.msk.f32.gmra.mrb[202].mxu0 %vm3514_vm4, %v10038_v0  ;;  %v11336_v48 = vld [vmem:[%s11666_s19 + $0x110] sm:$0xff] }
 0x7ea   : > { %v5583_v34 = vadd.f32 %v5567_v55, %v14065_v4  ;;  %v14213_v35 = vadd.f32 %v14067_v16, %v5759_v19  ;;  %v10041_v6 = vpop.f32.mrb[156].mxu0  ;;  %v11337_v19 = vld [vmem:[%s11666_s19 + $0x128] sm:$0xff] }
 0x7eb   : > { %v14215_v18 = vadd.f32 1e-08, %v5584_v27  ;;  %v5570_v40 = vmul.f32 %v10041_v6, %v10041_v6  ;;  %v5762_v42 = vmul.f32 %v11335_v32, %v10041_v6  ;;  %v5450_v54 = vpop.f32.mrb[157].mxu0 }
 0x7ec   : > { %v14218_v11 = vadd.f32 1e-08, %v5583_v34  ;;  %v5569_v53 = vmul.f32 %v5450_v54, %v5450_v54  ;;  %v5761_v25 = vmul.f32 %v11336_v48, %v5450_v54  ;;  %10199 = vmatprep.mubr.msk.f32.mxu0 %vm3514_vm4, %v5450_v54 }
 0x7ed   : > { %11029 = vrsqrt.f32 %v14215_v18  ;;  %v5586_v55 = vadd.f32 %v5570_v40, %v14074_v37  ;;  %v14225_v0 = vadd.f32 %v14076_v9, %v5762_v42  ;;  %10200 = vmatmul.mubr.msk.f32.gmra.mrb[204].mxu0 %vm3514_vm4, %v10041_v6  ;;  %v6200_v37 = vld [vmem:[%s15283_s4 + $0x128] sm:$0xff]  ;;  %v6201_v9 = vld [vmem:[%s15283_s4 + $0x130] sm:$0x1]  ;;  %v11338_v6 = vld [vmem:[%s11666_s19 + $0x120] sm:$0xff]  ;;  %vm5624_vm3 = vcmp.eq.f32.partialorder %v14215_v18, inf }
 0x7ee   : > { %v5585_v4 = vadd.f32 %v5569_v53, %v14079_v56  ;;  %v14230_v16 = vadd.f32 %v14081_v22, %v5761_v25  ;;  %v10044_v60 = vpop.f32.mrb[158].mxu0  ;;  %11031 = vrsqrt.f32 %v14218_v11  ;;  %vm5617_vm15 = vcmp.eq.f32.partialorder %v14218_v11, inf }
 0x7ef   : > { %v5572_v47 = vmul.f32 %v10044_v60, %v10044_v60  ;;  %v5764_v27 = vmul.f32 %v11337_v19, %v10044_v60  ;;  %v5460_v34 = vpop.f32.mrb[159].mxu0  ;;  %v14244_v32 = vadd.f32 1e-08, %v5586_v55  ;;  %v11339_v19 = vld [vmem:[%s11666_s19 + $0x138] sm:$0xff]  ;;  %vm5619_vm1 = vcmp.eq.f32.partialorder %v14218_v11, 0.0 }
 0x7f0   : > { %v14240_v56 = vadd.f32 1e-08, %v5585_v4  ;;  %v5571_v22 = vmul.f32 %v5460_v34, %v5460_v34  ;;  %v5763_v40 = vmul.f32 %v11338_v6, %v5460_v34  ;;  %10202 = vmatprep.mubr.msk.f32.mxu0 %vm3514_vm4, %v5460_v34  ;;  %v14256_v4 = vpack.c.bf16 %v6201_v9, %v6200_v37 }
 0x7f1   : > { %v5588_v42 = vadd.f32 %v5572_v47, %v14094_v43  ;;  %v14248_v54 = vadd.f32 %v14096_v51, %v5764_v27  ;;  %10203 = vmatmul.mubr.msk.f32.gmra.mrb[206].mxu0 %vm3514_vm4, %v10044_v60  ;;  %v5620_v37 = vand.u32 2147483648, %v14218_v11  ;;  %vm5626_vm11 = vcmp.eq.f32.partialorder %v14215_v18, 0.0 }
 0x7f2   : > { %v5587_v53 = vadd.f32 %v5571_v22, %v14099_v63  ;;  %v14253_v48 = vadd.f32 %v14101_v20, %v5763_v40  ;;  %v10047_v25 = vpop.f32.mrb[160].mxu0  ;;  %11033 = vrsqrt.f32 %v14240_v56  ;;  %v11340_v63 = vld [vmem:[%s11666_s19 + $0x130] sm:$0xff]  ;;  %vm5631_vm12 = vcmp.eq.f32.partialorder %v14240_v56, inf }
 0x7f3   : > { %v5574_v55 = vmul.f32 %v10047_v25, %v10047_v25  ;;  %v5766_v34 = vmul.f32 %v11339_v19, %v10047_v25  ;;  %v5470_v43 = vpop.f32.mrb[161].mxu0  ;;  %11035 = vrsqrt.f32 %v14244_v32  ;;  %vm5633_vm13 = vcmp.eq.f32.partialorder %v14240_v56, 0.0 }
 0x7f4   : > { %v14261_v51 = vadd.f32 1e-08, %v5587_v53  ;;  %v5573_v60 = vmul.f32 %v5470_v43, %v5470_v43  ;;  %v5765_v20 = vmul.f32 %v11340_v63, %v5470_v43  ;;  %10205 = vmatprep.mubr.msk.f32.mxu0 %vm3514_vm4, %v5470_v43  ;;  %v11341_v53 = vld [vmem:[%s11666_s19 + $0x148] sm:$0xff]  ;;  %vm5638_vm0 = vcmp.eq.f32.partialorder %v14244_v32, inf }
 0x7f5   : > { %v5590_v47 = vadd.f32 %v5574_v55, %v14114_v10  ;;  %v14268_v27 = vadd.f32 %v14116_v44, %v5766_v34  ;;  %10206 = vmatmul.mubr.msk.f32.gmra.mrb[208].mxu0 %vm3514_vm4, %v10047_v25  ;;  %v5627_v10 = vand.u32 2147483648, %v14215_v18  ;;  %v14282_v34 = vadd.f32 1e-08, %v5588_v42 }
 0x7f6   : > { %v5589_v9 = vadd.f32 %v5573_v60, %v14119_v5  ;;  %v14275_v22 = vadd.f32 %v14121_v15, %v5765_v20  ;;  %v10050_v6 = vpop.f32.mrb[162].mxu0  ;;  %11037 = vrsqrt.f32 %v14261_v51  ;;  %v11342_v15 = vld [vmem:[%s11666_s19 + $0x140] sm:$0xff]  ;;  %vm5640_vm6 = vcmp.eq.f32.partialorder %v14244_v32, 0.0 }
 0x7f7   : > { %v11030_v40 = vpop.eup %11029  ;;  %v5576_v44 = vmul.f32 %v10050_v6, %v10050_v6  ;;  %v5768_v55 = vmul.f32 %v11341_v53, %v10050_v6  ;;  %v5480_v25 = vpop.f32.mrb[163].mxu0  ;;  %11039 = vrsqrt.f32 %v14282_v34  ;;  %vm5645_vm7 = vcmp.eq.f32.partialorder %v14261_v51, inf }
 0x7f8   : > { %v11032_v19 = vpop.eup %11031  ;;  %v5575_v5 = vmul.f32 %v5480_v25, %v5480_v25  ;;  %v5767_v43 = vmul.f32 %v11342_v15, %v5480_v25  ;;  %10208 = vmatprep.mubr.msk.f32.mxu0 %vm3514_vm4, %v5480_v25  ;;  %v5623_v60 = vmul.f32 %v11030_v40, %v14215_v18  ;;  %vm5647_vm8 = vcmp.eq.f32.partialorder %v14261_v51, 0.0 }
 0x7f9   : > { %v5592_v63 = vadd.f32 %v5576_v44, %v14134_v36  ;;  %v14289_v20 = vadd.f32 %v14136_v1, %v5768_v55  ;;  %10209 = vmatmul.mubr.msk.f32.gmra.mrb[210].mxu0 %vm3514_vm4, %v10050_v6  ;;  %v5616_v53 = vmul.f32 %v11032_v19, %v14218_v11  ;;  %v5634_v1 = vand.u32 2147483648, %v14240_v56  ;;  %v11343_v6 = vld [vmem:[%s11666_s19 + $0x158] sm:$0xff] }
 0x7fa   : > { %v14295_v42 = vadd.f32 %v5575_v5, %v14139_v52  ;;  %v14298_v15 = vadd.f32 %v14141_v17, %v5767_v43  ;;  %v10053_v25 = vpop.f32.mrb[164].mxu0  ;;  %v5625_v36 = vsel %vm5624_vm3, %v14215_v18, %v5623_v60  ;;  %v11344_v5 = vld [vmem:[%s11666_s19 + $0x150] sm:$0xff]  ;;  %v14334_v18 = vadd.f32 1e-08, %v5589_v9 }
 0x7fb   : > { %v5578_v40 = vmul.f32 %v10053_v25, %v10053_v25  ;;  %v5770_v44 = vmul.f32 %v11343_v6, %v10053_v25  ;;  %v5490_v55 = vpop.f32.mrb[165].mxu0  ;;  %v5618_v19 = vsel %vm5617_vm15, %v14218_v11, %v5616_v53  ;;  %v5628_v53 = vsel %vm5626_vm11, %v5627_v10, %v5625_v36  ;;  %v11345_v36 = vld [vmem:[%s11666_s19 + $0x168] sm:$0xff] }
 0x7fc   : > { %v11034_v52 = vpop.eup %11033  ;;  %v5577_v17 = vmul.f32 %v5490_v55, %v5490_v55  ;;  %v5769_v43 = vmul.f32 %v11344_v5, %v5490_v55  ;;  %10211 = vmatprep.mubr.msk.f32.mxu0 %vm3514_vm4, %v5490_v55  ;;  %v5621_v60 = vsel %vm5619_vm1, %v5620_v37, %v5618_v19  ;;  %v5641_v55 = vand.u32 2147483648, %v14244_v32  ;;  %v11346_v19 = vld [vmem:[%s11666_s19 + $0x160] sm:$0xff] }
 0x7fd   : > { %v14315_v6 = vadd.f32 %v5578_v40, %v14154_v49  ;;  %v14318_v28 = vadd.f32 %v14156_v21, %v5770_v44  ;;  %10064 = vmatprep.mubr.msk.f32.mxu1 %vm3514_vm4, %v5621_v60  ;;  %10212 = vmatmul.mubr.msk.f32.gmra.mrb[212].mxu0 %vm3514_vm4, %v10053_v25  ;;  %v5630_v21 = vmul.f32 %v11034_v52, %v14240_v56  ;;  %v11036_v40 = vpop.eup %11035  ;;  %v14332_v25 = vadd.f32 1e-08, %v5590_v47  ;;  %v15664_v47 = vld [vmem:[#allocation24_spill] sm:$0xff] }
 0x7fe   : > { %v5593_v11 = vadd.f32 %v5577_v17, %v14159_v41  ;;  %v14327_v37 = vadd.f32 %v14161_v61, %v5769_v43  ;;  %v10056_v49 = vpop.f32.mrb[166].mxu0  ;;  %10065 = vmatmul.mubr.msk.f32.vlgmr.msra.gmra.mrb[134].mxu1 %vm3514_vm4, %v5628_v53  ;;  %v5637_v60 = vmul.f32 %v11036_v40, %v14244_v32  ;;  %11041 = vrsqrt.f32 %v14334_v18 }
 0x7ff   : > { %v5580_v10 = vmul.f32 %v10056_v49, %v10056_v49  ;;  %v5772_v44 = vmul.f32 %v11345_v36, %v10056_v49  ;;  %10378 = vmatpush3.bf16.msra.mxu1 %v14000_v30  ;;  %v5500_v41 = vpop.f32.mrb[167].mxu0  ;;  %v5632_v52 = vsel %vm5631_vm12, %v14240_v56, %v5630_v21  ;;  %11043 = vrsqrt.f32 %v14332_v25 }
 0x800   : > { %v5579_v61 = vmul.f32 %v5500_v41, %v5500_v41  ;;  %v5771_v17 = vmul.f32 %v11346_v19, %v5500_v41  ;;  %10214 = vmatprep.mubr.msk.f32.mxu0 %vm3514_vm4, %v5500_v41  ;;  %10381 = vmatprep.subr.msk.bf16.mxu1 %vm12064_vm2, %v14256_v4  ;;  %v11038_v9 = vpop.eup %11037  ;;  %v5635_v43 = vsel %vm5633_vm13, %v5634_v1, %v5632_v52  ;;  %v11347_v1 = vld [vmem:[%s11666_s19 + $0x178] sm:$0xff]  ;;  %vm5652_vm9 = vcmp.eq.f32.partialorder %v14282_v34, inf }
 0x801   : > { %v5596_v30 = vadd.f32 %v5580_v10, %v14174_v50  ;;  %v14349_v5 = vadd.f32 %v14176_v46, %v5772_v44  ;;  %10215 = vmatmul.mubr.msk.f32.gmra.mrb[214].mxu0 %vm3514_vm4, %v10056_v49  ;;  %10067 = vmatprep.mubr.msk.f32.mxu1 %vm3514_vm4, %v5635_v43  ;;  %v5644_v50 = vmul.f32 %v11038_v9, %v14261_v51  ;;  %v14362_v46 = vadd.f32 1e-08, %v5592_v63  ;;  %v11348_v44 = vld [vmem:[%s11666_s19 + $0x170] sm:$0xff] }
 0x802   : > { %v5595_v53 = vadd.f32 %v5579_v61, %v14179_v45  ;;  %v14357_v21 = vadd.f32 %v14181_v38, %v5771_v17  ;;  %v10059_v36 = vpop.f32.mrb[168].mxu0  ;;  %v5639_v40 = vsel %vm5638_vm0, %v14244_v32, %v5637_v60  ;;  %v5648_v61 = vand.u32 2147483648, %v14261_v51 }
 0x803   : > { %v5582_v56 = vmul.f32 %v10059_v36, %v10059_v36  ;;  %v5774_v49 = vmul.f32 %v11347_v1, %v10059_v36  ;;  %v5510_v45 = vpop.f32.mrb[169].mxu0  ;;  %v5642_v38 = vsel %vm5640_vm6, %v5641_v55, %v5639_v40  ;;  %v14374_v63 = vadd.f32 1e-08, %v14295_v42 }
 0x804   : > { %v5581_v10 = vmul.f32 %v5510_v45, %v5510_v45  ;;  %v5773_v41 = vmul.f32 %v11348_v44, %v5510_v45  ;;  %10217 = vmatprep.mubr.msk.f32.mxu0 %vm3514_vm4, %v5510_v45  ;;  %10068 = vmatmul.mubr.msk.f32.gmra.mrb[136].mxu1 %vm3514_vm4, %v5642_v38  ;;  %v5646_v32 = vsel %vm5645_vm7, %v14261_v51, %v5644_v50  ;;  %v14397_v9 = vadd.f32 1e-08, %v14315_v6 }
 0x805   : > { %v5598_v19 = vadd.f32 %v5582_v56, %v14194_v58  ;;  %v14378_v17 = vadd.f32 %v14196_v31, %v5774_v49  ;;  %10218 = vmatmul.mubr.msk.f32.gmra.mrb[216].mxu0 %vm3514_vm4, %v10059_v36  ;;  %v5649_v42 = vsel %vm5647_vm8, %v5648_v61, %v5646_v32  ;;  %v14392_v58 = vadd.f32 1e-08, %v5593_v11  ;;  %v11040_v31 = vpop.eup %11039 }
 0x806   : > { %v5597_v55 = vadd.f32 %v5581_v10, %v14199_v59  ;;  %v14387_v52 = vadd.f32 %v14201_v2, %v5773_v41  ;;  %10070 = vmatprep.mubr.msk.f32.mxu1 %vm3514_vm4, %v5649_v42  ;;  %v5651_v59 = vmul.f32 %v11040_v31, %v14282_v34  ;;  %11045 = vrsqrt.f32 %v14374_v63 }
 0x807   : > { %v14401_v2 = vadd.f32 1e-08, %v5595_v53  ;;  %v5655_v51 = vand.u32 2147483648, %v14282_v34  ;;  %11047 = vrsqrt.f32 %v14362_v46  ;;  %v14406_v11 = vadd.f32 1e-08, %v5596_v30 }
 0x808   : > { %v5653_v43 = vsel %vm5652_vm9, %v14282_v34, %v5651_v59  ;;  %vm5654_vm10 = vcmp.eq.f32.partialorder %v14282_v34, 0.0  ;;  %11049 = vrsqrt.f32 %v14392_v58  ;;  %v14411_v6 = vadd.f32 1e-08, %v5597_v55  ;;  %v11042_v30 = vpop.eup %11041 }
 0x809   : > { %v5656_v60 = vsel %vm5654_vm10, %v5655_v51, %v5653_v43  ;;  %11051 = vrsqrt.f32 %v14397_v9  ;;  %v14415_v53 = vadd.f32 1e-08, %v5598_v19  ;;  %v5658_v34 = vmul.f32 %v11042_v30, %v14334_v18  ;;  %v11044_v36 = vpop.eup %11043 }
 0x80a   : > { %10071 = vmatmul.mubr.msk.f32.gmra.mrb[138].mxu1 %vm3514_vm4, %v5656_v60  ;;  %11053 = vrsqrt.f32 %v14401_v2  ;;  %vm5659_vm15 = vcmp.eq.f32.partialorder %v14334_v18, inf  ;;  %vm5661_vm3 = vcmp.eq.f32.partialorder %v14334_v18, 0.0  ;;  %v5662_v50 = vand.u32 2147483648, %v14334_v18 }
 0x80b   : > { %11055 = vrsqrt.f32 %v14406_v11  ;;  %v5660_v1 = vsel %vm5659_vm15, %v14334_v18, %v5658_v34  ;;  %v5665_v49 = vmul.f32 %v11044_v36, %v14332_v25  ;;  %vm5666_vm1 = vcmp.eq.f32.partialorder %v14332_v25, inf }
 0x80c   : > { %11057 = vrsqrt.f32 %v14411_v6  ;;  %vm5668_vm11 = vcmp.eq.f32.partialorder %v14332_v25, 0.0  ;;  %v5663_v45 = vsel %vm5661_vm3, %v5662_v50, %v5660_v1  ;;  %v5669_v38 = vand.u32 2147483648, %v14332_v25 }
 0x80d   : > { %11059 = vrsqrt.f32 %v14415_v53  ;;  %vm5673_vm12 = vcmp.eq.f32.partialorder %v14374_v63, inf  ;;  %10073 = vmatprep.mubr.msk.f32.mxu1 %vm3514_vm4, %v5663_v45  ;;  %v5667_v41 = vsel %vm5666_vm1, %v14332_v25, %v5665_v49  ;;  %vm5675_vm13 = vcmp.eq.f32.partialorder %v14374_v63, 0.0 }
 0x80e   : > { %v5676_v18 = vand.u32 2147483648, %v14374_v63  ;;  %v5670_v19 = vsel %vm5668_vm11, %v5669_v38, %v5667_v41  ;;  %vm5680_vm0 = vcmp.eq.f32.partialorder %v14362_v46, inf  ;;  %vm5687_vm6 = vcmp.eq.f32.partialorder %v14392_v58, inf }
 0x80f   : > { %10074 = vmatmul.mubr.msk.f32.gmra.mrb[140].mxu1 %vm3514_vm4, %v5670_v19  ;;  %v5690_v25 = vand.u32 2147483648, %v14392_v58  ;;  %v5683_v43 = vand.u32 2147483648, %v14362_v46  ;;  %vm5689_vm7 = vcmp.eq.f32.partialorder %v14392_v58, 0.0  ;;  %vm5682_vm8 = vcmp.eq.f32.partialorder %v14362_v46, 0.0 }
 0x810   : > { %v11046_v56 = vpop.eup %11045  ;;  %vm5694_vm9 = vcmp.eq.f32.partialorder %v14397_v9, inf  ;;  %vm5701_vm10 = vcmp.eq.f32.partialorder %v14401_v2, inf  ;;  %v5704_v1 = vand.u32 2147483648, %v14401_v2  ;;  %v5697_v38 = vand.u32 2147483648, %v14397_v9 }
 0x811   : > { %v11048_v40 = vpop.eup %11047  ;;  %v5672_v10 = vmul.f32 %v11046_v56, %v14374_v63  ;;  %vm5703_vm15 = vcmp.eq.f32.partialorder %v14401_v2, 0.0  ;;  %vm5696_vm3 = vcmp.eq.f32.partialorder %v14397_v9, 0.0  ;;  %vm5715_vm1 = vcmp.eq.f32.partialorder %v14411_v6, inf }
 0x812   : > { %v11050_v44 = vpop.eup %11049  ;;  %v5679_v61 = vmul.f32 %v11048_v40, %v14362_v46  ;;  %vm5708_vm11 = vcmp.eq.f32.partialorder %v14406_v11, inf }
 0x813   : > { %v5674_v32 = vsel %vm5673_vm12, %v14374_v63, %v5672_v10  ;;  %v5686_v55 = vmul.f32 %v11050_v44, %v14392_v58  ;;  %v11052_v42 = vpop.eup %11051  ;;  %vm5717_vm12 = vcmp.eq.f32.partialorder %v14411_v6, 0.0 }
 0x814   : > { %v5677_v31 = vsel %vm5675_vm13, %v5676_v18, %v5674_v32  ;;  %v5681_v59 = vsel %vm5680_vm0, %v14362_v46, %v5679_v61  ;;  %v11054_v51 = vpop.eup %11053  ;;  %v5693_v60 = vmul.f32 %v11052_v42, %v14397_v9  ;;  %v5718_v61 = vand.u32 2147483648, %v14411_v6 }
 0x815   : > { %10076 = vmatprep.mubr.msk.f32.mxu1 %vm3514_vm4, %v5677_v31  ;;  %v5688_v63 = vsel %vm5687_vm6, %v14392_v58, %v5686_v55  ;;  %v11056_v30 = vpop.eup %11055  ;;  %v5700_v36 = vmul.f32 %v11054_v51, %v14401_v2  ;;  %v5684_v56 = vsel %vm5682_vm8, %v5683_v43, %v5681_v59  ;;  %vm5710_vm13 = vcmp.eq.f32.partialorder %v14406_v11, 0.0  ;;  %v15658_v31 = vld [vmem:[#allocation18_spill] sm:$0xff]  ;;  %v15660_v51 = vld [vmem:[#allocation20_spill] sm:$0xff] }
 0x816   : > { %v5691_v34 = vsel %vm5689_vm7, %v5690_v25, %v5688_v63  ;;  %v11058_v50 = vpop.eup %11057  ;;  %10077 = vmatmul.mubr.msk.f32.gmra.mrb[142].mxu1 %vm3514_vm4, %v5684_v56  ;;  %v5695_v58 = vsel %vm5694_vm9, %v14397_v9, %v5693_v60  ;;  %v5707_v40 = vmul.f32 %v11056_v30, %v14406_v11  ;;  %v5711_v9 = vand.u32 2147483648, %v14406_v11  ;;  %v15666_v30 = vld [vmem:[#allocation26_spill] sm:$0xff] }
 0x817   : > { %v5702_v49 = vsel %vm5701_vm10, %v14401_v2, %v5700_v36  ;;  %v5714_v46 = vmul.f32 %v11058_v50, %v14411_v6  ;;  %v11060_v45 = vpop.eup %11059  ;;  %10079 = vmatprep.mubr.msk.f32.mxu1 %vm3514_vm4, %v5691_v34  ;;  %v5698_v44 = vsel %vm5696_vm3, %v5697_v38, %v5695_v58  ;;  %vm5722_vm0 = vcmp.eq.f32.partialorder %v14415_v53, inf  ;;  %v15668_v36 = vld [vmem:[#allocation28_spill] sm:$0xff] }
 0x818   : > { %v5705_v10 = vsel %vm5703_vm15, %v5704_v1, %v5702_v49  ;;  %v5709_v18 = vsel %vm5708_vm11, %v14406_v11, %v5707_v40  ;;  %v5721_v19 = vmul.f32 %v11060_v45, %v14415_v53  ;;  %v5725_v42 = vand.u32 2147483648, %v14415_v53  ;;  %v15659_v11 = vld [vmem:[#allocation19_spill] sm:$0xff]  ;;  %v15671_v1 = vld [vmem:[#allocation30_spill] sm:$0xff]  ;;  %v15672_v58 = vld [vmem:[#allocation84_spill] sm:$0xff] }
 0x819   : > { %v5716_v41 = vsel %vm5715_vm1, %v14411_v6, %v5714_v46  ;;  %v5712_v32 = vsel %vm5710_vm13, %v5711_v9, %v5709_v18  ;;  %vm5724_vm6 = vcmp.eq.f32.partialorder %v14415_v53, 0.0  ;;  %v14482_v59 = vadd.f32 %v13497_v23, %v15658_v31  ;;  %v15661_v23 = vld [vmem:[#allocation21_spill] sm:$0xff]  ;;  %v15675_v46 = vld [vmem:[#allocation32_spill] sm:$0xff]  ;;  %v15676_v45 = vld [vmem:[#allocation86_spill] sm:$0xff] }
 0x81a   : > { %10080 = vmatmul.mubr.msk.f32.gmra.mrb[144].mxu1 %vm3514_vm4, %v5698_v44  ;;  %v5719_v2 = vsel %vm5717_vm12, %v5718_v61, %v5716_v41  ;;  %v5723_v55 = vsel %vm5722_vm0, %v14415_v53, %v5721_v19  ;;  %v14489_v25 = vadd.f32 %v13503_v24, %v15659_v11  ;;  %v14493_v43 = vadd.f32 %v13512_v33, %v15660_v51  ;;  %v15662_v24 = vld [vmem:[#allocation22_spill] sm:$0xff]  ;;  %v15663_v33 = vld [vmem:[#allocation23_spill] sm:$0xff] }
 0x81b   : > { %10082 = vmatprep.mubr.msk.f32.mxu1 %vm3514_vm4, %v5705_v10  ;;  %v5726_v6 = vsel %vm5724_vm6, %v5725_v42, %v5723_v55  ;;  %v14504_v53 = vadd.f32 %v13515_v26, %v15661_v23  ;;  %v14508_v63 = vadd.f32 %v13522_v62, %v15662_v24  ;;  %v14520_v60 = vadd.f32 %v13532_v13, %v15664_v47  ;;  %v15665_v26 = vld [vmem:[#allocation25_spill] sm:$0xff]  ;;  %v15678_v44 = vld [vmem:[#allocation87_spill] sm:$0xff] }
 0x81c   : > { %v14528_v62 = vadd.f32 %v13535_v3, %v15665_v26  ;;  %v14532_v34 = vadd.f32 %v13542_v14, %v15666_v30  ;;  %v14544_v50 = vadd.f32 %v13552_v8, %v15668_v36  ;;  %v15669_v3 = vld [vmem:[#allocation29_spill] sm:$0xff]  ;;  %v15670_v14 = vld [vmem:[#allocation83_spill] sm:$0xff]  ;;  %v14556_v49 = vadd.f32 %v15672_v58, %v15671_v1  ;;  %v7001_v26 = vld [vmem:[%s15283_s4 + $0x150] sm:$0xff] }
 0x81d   : > { %v14552_v56 = vadd.f32 %v15670_v14, %v15669_v3  ;;  %v15674_v8 = vld [vmem:[#allocation85_spill] sm:$0xff]  ;;  %v14568_v38 = vadd.f32 %v15676_v45, %v15675_v46 }
 0x81e   : > { %10083 = vmatmul.mubr.msk.f32.gmra.mrb[146].mxu1 %vm3514_vm4, %v5712_v32  ;;  %v15677_v10 = vld [vmem:[#allocation33_spill] sm:$0xff] }
 0x81f   : > { %10085 = vmatprep.mubr.msk.f32.mxu1 %vm3514_vm4, %v5719_v2  ;;  %v14576_v41 = vadd.f32 %v15678_v44, %v15677_v10  ;;  %v7002_v30 = vld [vmem:[%s15283_s4 + $0x158] sm:$0xff] }
 0x820   : > { %v10391_v36 = vpack.c.bf16 %v7002_v30, %v7001_v26 }
 0x822   : > { %10086 = vmatmul.mubr.msk.f32.gmra.mrb[148].mxu1 %vm3514_vm4, %v5726_v6  ;;  %vm7963_vm4 = vcmask 228352  }
 0x823   : > { %10092 = vmatprep.mubr.msk.f32.mxu1 %vm2429_vm14, %v14482_v59  ;;  %vm15153_vm7 = vmpackc.low %vm7963_vm4, %vm7963_vm4 }
 0x826   : > { %10093 = vmatmul.mubr.msk.f32.vlgmr.msra.gmra.mrb[134].mxu1 %vm2429_vm14, %v14489_v25 }
 0x827   : > { %10384 = vmatpush3.bf16.msk.msra.mxu1 %vm12064_vm2, %v14256_v4  ;;  %10095 = vmatprep.mubr.msk.f32.mxu1 %vm2429_vm14, %v14493_v43  ;;  %v14516_v4 = vadd.f32 %v13525_v29, %v15663_v33  ;;  %v15667_v29 = vld [vmem:[#allocation27_spill] sm:$0xff]  ;;  %vm7929_vm2 = vcmask 162816  }
 0x828   : > { %v14540_v13 = vadd.f32 %v13545_v7, %v15667_v29  ;;  %v15673_v7 = vld [vmem:[#allocation31_spill] sm:$0xff]  ;;  %10392 = vmatprep.subr.bf16.mxu1 %v10391_v36 }
 0x829   : > { %v14564_v40 = vadd.f32 %v15674_v8, %v15673_v7 }
 0x82a   : > { %10096 = vmatmul.mubr.msk.f32.gmra.mrb[136].mxu1 %vm2429_vm14, %v14504_v53 }
 0x82b   : > { %10098 = vmatprep.mubr.msk.f32.mxu1 %vm2429_vm14, %v14508_v63 }
 0x82e   : > { %10099 = vmatmul.mubr.msk.f32.gmra.mrb[138].mxu1 %vm2429_vm14, %v14516_v4 }
 0x82f   : > { %10101 = vmatprep.mubr.msk.f32.mxu1 %vm2429_vm14, %v14520_v60 }
 0x832   : > { %10102 = vmatmul.mubr.msk.f32.gmra.mrb[140].mxu1 %vm2429_vm14, %v14528_v62 }
 0x833   : > { %10104 = vmatprep.mubr.msk.f32.mxu1 %vm2429_vm14, %v14532_v34 }
 0x836   : > { %10105 = vmatmul.mubr.msk.f32.gmra.mrb[142].mxu1 %vm2429_vm14, %v14540_v13 }
 0x837   : > { %10107 = vmatprep.mubr.msk.f32.mxu1 %vm2429_vm14, %v14544_v50 }
 0x83a   : > { %10108 = vmatmul.mubr.msk.f32.gmra.mrb[144].mxu1 %vm2429_vm14, %v14552_v56 }
 0x83b   : > { %10110 = vmatprep.mubr.msk.f32.mxu1 %vm2429_vm14, %v14556_v49 }
 0x83e   : > { %10111 = vmatmul.mubr.msk.f32.gmra.mrb[146].mxu1 %vm2429_vm14, %v14564_v40 }
 0x83f   : > { %10113 = vmatprep.mubr.msk.f32.mxu1 %vm2429_vm14, %v14568_v38 }
 0x842   : > { %10114 = vmatmul.mubr.msk.f32.gmra.mrb[148].mxu1 %vm2429_vm14, %v14576_v41 }
 0x843   : > { %10120 = vmatprep.mubr.msk.f32.mxu1 %vm1620_vm5, %v14213_v35 }
 0x846   : > { %10121 = vmatmul.mubr.msk.f32.vlgmr.msra.gmra.mrb[134].mxu1 %vm1620_vm5, %v14208_v57 }
 0x847   : > { %10123 = vmatprep.mubr.msk.f32.mxu1 %vm1620_vm5, %v14230_v16  ;;  %10394 = vmatpush3.bf16.msra.mxu1 %v10391_v36 }
 0x84a   : > { %10124 = vmatmul.mubr.msk.f32.gmra.mrb[136].mxu1 %vm1620_vm5, %v14225_v0 }
 0x84b   : > { %10126 = vmatprep.mubr.msk.f32.mxu1 %vm1620_vm5, %v14253_v48 }
 0x84e   : > { %10127 = vmatmul.mubr.msk.f32.gmra.mrb[138].mxu1 %vm1620_vm5, %v14248_v54 }
 0x84f   : > { %10129 = vmatprep.mubr.msk.f32.mxu1 %vm1620_vm5, %v14275_v22 }
 0x852   : > { %10130 = vmatmul.mubr.msk.f32.gmra.mrb[140].mxu1 %vm1620_vm5, %v14268_v27 }
 0x853   : > { %10132 = vmatprep.mubr.msk.f32.mxu1 %vm1620_vm5, %v14298_v15 }
 0x856   : > { %10133 = vmatmul.mubr.msk.f32.gmra.mrb[142].mxu1 %vm1620_vm5, %v14289_v20 }
 0x857   : > { %10135 = vmatprep.mubr.msk.f32.mxu1 %vm1620_vm5, %v14327_v37 }
 0x85a   : > { %10136 = vmatmul.mubr.msk.f32.gmra.mrb[144].mxu1 %vm1620_vm5, %v14318_v28 }
 0x85b   : > { %10138 = vmatprep.mubr.msk.f32.mxu1 %vm1620_vm5, %v14357_v21 }
 0x85e   : > { %10139 = vmatmul.mubr.msk.f32.gmra.mrb[146].mxu1 %vm1620_vm5, %v14349_v5 }
 0x85f   : > { %10141 = vmatprep.mubr.msk.f32.mxu1 %vm1620_vm5, %v14387_v52 }
 0x862   : > { %10142 = vmatmul.mubr.msk.f32.gmra.mrb[148].mxu1 %vm1620_vm5, %v14378_v17  ;;  %vm7946_vm5 = vcmask 195584  }
 0x879   : > { %v14612_v57 = vpop.f32.mrb[170].mxu0 }
 0x87a   : > { %v14614_v35 = vpop.f32.mrb[171].mxu0 }
 0x87d   : > { %v14616_v0 = vpop.f32.mrb[172].mxu0 }
 0x87e   : > { %v14618_v16 = vpop.f32.mrb[173].mxu0 }
 0x881   : > { %v14620_v28 = vpop.f32.mrb[174].mxu0 }
 0x882   : > { %15679 = vst [vmem:[#allocation10_spill] sm:$0xff] %v14620_v28  ;;  %v14622_v54 = vpop.f32.mrb[175].mxu0 }
 0x883   : > { %15680 = vst [vmem:[#allocation9_spill] sm:$0xff] %v14622_v54 }
 0x888   : > { %v14624_v48 = vpop.f32.mrb[176].mxu0 }
 0x889   : > { %15681 = vst [vmem:[#allocation12_spill] sm:$0xff] %v14624_v48  ;;  %v14626_v27 = vpop.f32.mrb[177].mxu0 }
 0x88a   : > { %15682 = vst [vmem:[#allocation11_spill] sm:$0xff] %v14626_v27 }
 0x88c   : > { %v14628_v22 = vpop.f32.mrb[178].mxu0 }
 0x88d   : > { %15683 = vst [vmem:[#allocation36_spill] sm:$0xff] %v14628_v22  ;;  %v14630_v20 = vpop.f32.mrb[179].mxu0 }
 0x88e   : > { %15684 = vst [vmem:[#allocation37_spill] sm:$0xff] %v14630_v20 }
 0x890   : > { %v14632_v15 = vpop.f32.mrb[180].mxu0 }
 0x891   : > { %15685 = vst [vmem:[#allocation42_spill] sm:$0xff] %v14632_v15  ;;  %v14634_v37 = vpop.f32.mrb[181].mxu0 }
 0x892   : > { %15686 = vst [vmem:[#allocation43_spill] sm:$0xff] %v14634_v37 }
 0x894   : > { %v14636_v5 = vpop.f32.mrb[182].mxu0 }
 0x895   : > { %15687 = vst [vmem:[#allocation49_spill] sm:$0xff] %v14636_v5  ;;  %v14638_v21 = vpop.f32.mrb[183].mxu0 }
 0x896   : > { %15688 = vst [vmem:[#allocation46_spill] sm:$0xff] %v14638_v21 }
 0x898   : > { %v14640_v17 = vpop.f32.mrb[184].mxu0 }
 0x899   : > { %15689 = vst [vmem:[#allocation55_spill] sm:$0xff] %v14640_v17  ;;  %v14642_v52 = vpop.f32.mrb[185].mxu0  ;;  %v7409_v17 = vld [vmem:[%s15283_s4 + $0x168] sm:$0xff] }
 0x89a   : > { %15690 = vst [vmem:[#allocation52_spill] sm:$0xff] %v14642_v52  ;;  %v7410_v52 = vld [vmem:[%s15283_s4 + $0x170] sm:$0xff] }
 0x89b   : > { %v14720_v5 = vpack.c.bf16 %v7410_v52, %v7409_v17 }
 0x89c   : > { %v14644_v18 = vpop.f32.mrb[186].mxu0 }
 0x89d   : > { %v14646_v61 = vpop.f32.mrb[187].mxu0  ;;  %10396 = vmatprep.subr.bf16.mxu1 %v14720_v5 }
 0x8a0   : > { %v14648_v19 = vpop.f32.mrb[188].mxu0 }
 0x8a1   : > { %v14650_v9 = vpop.f32.mrb[189].mxu0 }
 0x8a4   : > { %v14652_v2 = vpop.f32.mrb[190].mxu0 }
 0x8a5   : > { %v14654_v32 = vpop.f32.mrb[191].mxu0 }
 0x8a8   : > { %v14656_v55 = vpop.f32.mrb[192].mxu0 }
 0x8a9   : > { %15691 = vst [vmem:[#allocation61_spill] sm:$0xff] %v14656_v55  ;;  %v14658_v42 = vpop.f32.mrb[193].mxu0 }
 0x8aa   : > { %15692 = vst [vmem:[#allocation58_spill] sm:$0xff] %v14658_v42 }
 0x8ac   : > { %v14660_v31 = vpop.f32.mrb[194].mxu0 }
 0x8ad   : > { %15693 = vst [vmem:[#allocation13_spill] sm:$0xff] %v14660_v31  ;;  %v14662_v6 = vpop.f32.mrb[195].mxu0 }
 0x8ae   : > { %15694 = vst [vmem:[#allocation64_spill] sm:$0xff] %v14662_v6 }
 0x8b0   : > { %v14664_v11 = vpop.f32.mrb[196].mxu0 }
 0x8b1   : > { %15695 = vst [vmem:[#allocation15_spill] sm:$0xff] %v14664_v11  ;;  %v14666_v51 = vpop.f32.mrb[197].mxu0 }
 0x8b2   : > { %15696 = vst [vmem:[#allocation14_spill] sm:$0xff] %v14666_v51 }
 0x8b4   : > { %v14668_v23 = vpop.f32.mrb[198].mxu0 }
 0x8b5   : > { %15697 = vst [vmem:[#allocation17_spill] sm:$0xff] %v14668_v23  ;;  %v14670_v24 = vpop.f32.mrb[199].mxu0 }
 0x8b6   : > { %15698 = vst [vmem:[#allocation16_spill] sm:$0xff] %v14670_v24 }
 0x8b8   : > { %v14672_v33 = vpop.f32.mrb[200].mxu0 }
 0x8b9   : > { %15699 = vst [vmem:[#allocation2_spill] sm:$0xff] %v14672_v33  ;;  %v14674_v47 = vpop.f32.mrb[201].mxu0 }
 0x8ba   : > { %15700 = vst [vmem:[#allocation18_spill] sm:$0xff] %v14674_v47 }
 0x8bc   : > { %v14682_v29 = vpop.f32.mrb[202].mxu0 }
 0x8bd   : > { %v14684_v3 = vpop.f32.mrb[203].mxu0 }
 0x8c0   : > { %v14686_v14 = vpop.f32.mrb[204].mxu0 }
 0x8c1   : > { %v14688_v1 = vpop.f32.mrb[205].mxu0 }
 0x8c4   : > { %v14690_v58 = vpop.f32.mrb[206].mxu0 }
 0x8c5   : > { %15701 = vst [vmem:[#allocation19_spill] sm:$0xff] %v14690_v58  ;;  %v14692_v7 = vpop.f32.mrb[207].mxu0 }
 0x8c6   : > { %15702 = vst [vmem:[#allocation20_spill] sm:$0xff] %v14692_v7 }
 0x8c8   : > { %v14694_v8 = vpop.f32.mrb[208].mxu0 }
 0x8c9   : > { %15703 = vst [vmem:[#allocation21_spill] sm:$0xff] %v14694_v8  ;;  %v14696_v46 = vpop.f32.mrb[209].mxu0 }
 0x8ca   : > { %15704 = vst [vmem:[#allocation22_spill] sm:$0xff] %v14696_v46 }
 0x8cc   : > { %v14698_v45 = vpop.f32.mrb[210].mxu0 }
 0x8cd   : > { %15705 = vst [vmem:[#allocation23_spill] sm:$0xff] %v14698_v45  ;;  %v14700_v10 = vpop.f32.mrb[211].mxu0 }
 0x8ce   : > { %15706 = vst [vmem:[#allocation24_spill] sm:$0xff] %v14700_v10 }
 0x8d0   : > { %v14702_v44 = vpop.f32.mrb[212].mxu0 }
 0x8d1   : > { %15707 = vst [vmem:[#allocation25_spill] sm:$0xff] %v14702_v44  ;;  %v14704_v26 = vpop.f32.mrb[213].mxu0 }
 0x8d2   : > { %15708 = vst [vmem:[#allocation26_spill] sm:$0xff] %v14704_v26 }
 0x8d4   : > { %v14706_v30 = vpop.f32.mrb[214].mxu0 }
 0x8d5   : > { %15709 = vst [vmem:[#allocation27_spill] sm:$0xff] %v14706_v30  ;;  %v14708_v36 = vpop.f32.mrb[215].mxu0  ;;  %v14726_v30 = vld [vmem:[%s15283_s4 + $0x138] ss:$0 sm:$0xff] }
 0x8d6   : > { %15710 = vst [vmem:[#allocation28_spill] sm:$0xff] %v14708_v36 }
 0x8d8   : > { %v14710_v33 = vpop.f32.mrb[216].mxu0 }
 0x8d9   : > { %15711 = vst [vmem:[#allocation29_spill] sm:$0xff] %v14710_v33  ;;  %v14712_v47 = vpop.f32.mrb[217].mxu0 }
 0x8da   : > { %15712 = vst [vmem:[#allocation83_spill] sm:$0xff] %v14712_v47 }
 0x919   : > { %v10122_v33 = vpop.f32.mrb[134].mxu1 }
 0x91a   : > { %v14729_v47 = vadd.f32 %v10122_v33, %v14726_v30  ;;  %v6319_v36 = vpop.f32.mrb[135].mxu1 }
 0x91b   : > { %v14732_v21 = vadd.f32 %v14726_v30, %v6319_v36 }
 0x91c   : > { %v8745_v23 = vmul.f32 -1.442695, %v14729_v47 }
 0x91d   : > { %v8744_v17 = vmul.f32 -1.442695, %v14732_v21  ;;  %v10125_v52 = vpop.f32.mrb[136].mxu1 }
 0x91e   : > { %11061 = vpow2.f32 %v8745_v23  ;;  %v14737_v24 = vadd.f32 %v10125_v52, %v14726_v30  ;;  %v6329_v11 = vpop.f32.mrb[137].mxu1 }
 0x91f   : > { %11063 = vpow2.f32 %v8744_v17  ;;  %v14740_v51 = vadd.f32 %v14726_v30, %v6329_v11 }
 0x920   : > { %v8747_v33 = vmul.f32 -1.442695, %v14737_v24 }
 0x921   : > { %v8746_v44 = vmul.f32 -1.442695, %v14740_v51  ;;  %v10128_v36 = vpop.f32.mrb[138].mxu1 }
 0x922   : > { %11065 = vpow2.f32 %v8747_v33  ;;  %v14745_v26 = vadd.f32 %v10128_v36, %v14726_v30  ;;  %v6339_v45 = vpop.f32.mrb[139].mxu1 }
 0x923   : > { %11067 = vpow2.f32 %v8746_v44  ;;  %v14748_v23 = vadd.f32 %v14726_v30, %v6339_v45 }
 0x924   : > { %v8749_v52 = vmul.f32 -1.442695, %v14745_v26 }
 0x925   : > { %v8748_v17 = vmul.f32 -1.442695, %v14748_v23  ;;  %v10131_v11 = vpop.f32.mrb[140].mxu1 }
 0x926   : > { %11069 = vpow2.f32 %v8749_v52  ;;  %v14753_v10 = vadd.f32 %v10131_v11, %v14726_v30  ;;  %v6349_v15 = vpop.f32.mrb[141].mxu1 }
 0x927   : > { %11071 = vpow2.f32 %v8748_v17  ;;  %v14756_v33 = vadd.f32 %v14726_v30, %v6349_v15 }
 0x928   : > { %v11062_v36 = vpop.eup %11061  ;;  %v8751_v44 = vmul.f32 -1.442695, %v14753_v10 }
 0x929   : > { %v11064_v37 = vpop.eup %11063  ;;  %v6484_v45 = vadd.f32 1.0, %v11062_v36  ;;  %v8750_v22 = vmul.f32 -1.442695, %v14756_v33  ;;  %v10134_v20 = vpop.f32.mrb[142].mxu1 }
 0x92a   : > { %v6483_v31 = vadd.f32 1.0, %v11064_v37  ;;  %11073 = vpow2.f32 %v8751_v44  ;;  %v14761_v52 = vadd.f32 %v10134_v20, %v14726_v30  ;;  %v6359_v11 = vpop.f32.mrb[143].mxu1 }
 0x92b   : > { %11075 = vrcp.f32 %v6484_v45  ;;  %v14764_v17 = vadd.f32 %v14726_v30, %v6359_v11 }
 0x92c   : > { %v11066_v15 = vpop.eup %11065  ;;  %11077 = vrcp.f32 %v6483_v31  ;;  %v8753_v6 = vmul.f32 -1.442695, %v14761_v52 }
 0x92d   : > { %v11068_v55 = vpop.eup %11067  ;;  %v6486_v42 = vadd.f32 1.0, %v11066_v15  ;;  %11079 = vpow2.f32 %v8750_v22  ;;  %v8752_v36 = vmul.f32 -1.442695, %v14764_v17  ;;  %v10137_v8 = vpop.f32.mrb[144].mxu1 }
 0x92e   : > { %v6485_v37 = vadd.f32 1.0, %v11068_v55  ;;  %11081 = vpow2.f32 %v8753_v6  ;;  %v14769_v20 = vadd.f32 %v10137_v8, %v14726_v30  ;;  %v6369_v44 = vpop.f32.mrb[145].mxu1 }
 0x92f   : > { %11083 = vrcp.f32 %v6486_v42  ;;  %v14772_v45 = vadd.f32 %v14726_v30, %v6369_v44 }
 0x930   : > { %v11070_v11 = vpop.eup %11069  ;;  %11085 = vrcp.f32 %v6485_v37  ;;  %v8755_v31 = vmul.f32 -1.442695, %v14769_v20 }
 0x931   : > { %v11072_v46 = vpop.eup %11071  ;;  %v6488_v15 = vadd.f32 1.0, %v11070_v11  ;;  %11087 = vpow2.f32 %v8752_v36  ;;  %v8754_v22 = vmul.f32 -1.442695, %v14772_v45  ;;  %v10140_v58 = vpop.f32.mrb[146].mxu1 }
 0x932   : > { %v6487_v55 = vadd.f32 1.0, %v11072_v46  ;;  %11089 = vpow2.f32 %v8755_v31  ;;  %v14777_v6 = vadd.f32 %v10140_v58, %v14726_v30  ;;  %v6379_v8 = vpop.f32.mrb[147].mxu1 }
 0x933   : > { %11091 = vrcp.f32 %v6488_v15  ;;  %v14780_v42 = vadd.f32 %v14726_v30, %v6379_v8 }
 0x934   : > { %v11074_v44 = vpop.eup %11073  ;;  %11093 = vrcp.f32 %v6487_v55  ;;  %v8757_v37 = vmul.f32 -1.442695, %v14777_v6 }
 0x935   : > { %v11076_v7 = vpop.eup %11075  ;;  %v6490_v11 = vadd.f32 1.0, %v11074_v44  ;;  %11095 = vpow2.f32 %v8754_v22  ;;  %v8756_v36 = vmul.f32 -1.442695, %v14780_v42  ;;  %v10143_v48 = vpop.f32.mrb[148].mxu1 }
 0x936   : > { %v11078_v46 = vpop.eup %11077  ;;  %11097 = vpow2.f32 %v8757_v37  ;;  %v14785_v58 = vadd.f32 %v10143_v48, %v14726_v30  ;;  %v6389_v31 = vpop.f32.mrb[149].mxu1  ;;  %v14794_v44 = vmul.f32 %v11076_v7, %v14729_v47 }
 0x937   : > { %v11080_v15 = vpop.eup %11079  ;;  %v14788_v8 = vmul.f32 %v11078_v46, %v14732_v21  ;;  %v14791_v55 = vadd.f32 %v14726_v30, %v6389_v31  ;;  %11099 = vpow2.f32 %v8756_v36 }
 0x938   : > { %v11082_v27 = vpop.eup %11081  ;;  %v6489_v22 = vadd.f32 1.0, %v11080_v15  ;;  %v8759_v28 = vmul.f32 -1.442695, %v14785_v58  ;;  %11101 = vrcp.f32 %v6490_v11 }
 0x939   : > { %v11084_v37 = vpop.eup %11083  ;;  %v6492_v48 = vadd.f32 1.0, %v11082_v27  ;;  %v8758_v54 = vmul.f32 -1.442695, %v14791_v55  ;;  %10224 = vmatprep.mubr.msk.f32.mxu1 %vm2429_vm14, %v14788_v8 }
 0x93a   : > { %v11086_v21 = vpop.eup %11085  ;;  %11103 = vrcp.f32 %v6489_v22  ;;  %10225 = vmatmul.mubr.msk.f32.vlgmr.msra.gmra.mrb[150].mxu1 %vm2429_vm14, %v14794_v44  ;;  %v14807_v27 = vmul.f32 %v11084_v37, %v14737_v24 }
 0x93b   : > { %v11088_v30 = vpop.eup %11087  ;;  %v14803_v47 = vmul.f32 %v11086_v21, %v14740_v51  ;;  %11105 = vrcp.f32 %v6492_v48  ;;  %10398 = vmatpush3.bf16.msra.mxu1 %v14720_v5 }
 0x93c   : > { %v11090_v7 = vpop.eup %11089  ;;  %v6491_v11 = vadd.f32 1.0, %v11088_v30  ;;  %11107 = vpow2.f32 %v8759_v28 }
 0x93d   : > { %v11092_v36 = vpop.eup %11091  ;;  %v6494_v46 = vadd.f32 1.0, %v11090_v7  ;;  %11109 = vpow2.f32 %v8758_v54  ;;  %10227 = vmatprep.mubr.msk.f32.mxu1 %vm2429_vm14, %v14803_v47 }
 0x93e   : > { %v11094_v31 = vpop.eup %11093  ;;  %11111 = vrcp.f32 %v6491_v11  ;;  %10228 = vmatmul.mubr.msk.f32.gmra.mrb[152].mxu1 %vm2429_vm14, %v14807_v27  ;;  %v6536_v24 = vmul.f32 %v11092_v36, %v14745_v26 }
 0x93f   : > { %v11096_v51 = vpop.eup %11095  ;;  %v6535_v5 = vmul.f32 %v11094_v31, %v14748_v23  ;;  %11113 = vrcp.f32 %v6494_v46 }
 0x940   : > { %v11098_v15 = vpop.eup %11097  ;;  %v6493_v22 = vadd.f32 1.0, %v11096_v51 }
 0x941   : > { %v6496_v28 = vadd.f32 1.0, %v11098_v15  ;;  %10230 = vmatprep.mubr.msk.f32.mxu1 %vm2429_vm14, %v6535_v5  ;;  %v11100_v54 = vpop.eup %11099 }
 0x942   : > { %11115 = vrcp.f32 %v6493_v22  ;;  %10231 = vmatmul.mubr.msk.f32.gmra.mrb[154].mxu1 %vm2429_vm14, %v6536_v24  ;;  %v11102_v37 = vpop.eup %11101  ;;  %v6495_v48 = vadd.f32 1.0, %v11100_v54 }
 0x943   : > { %11117 = vrcp.f32 %v6496_v28  ;;  %v6538_v26 = vmul.f32 %v11102_v37, %v14753_v10 }
 0x944   : > { %v11104_v21 = vpop.eup %11103  ;;  %11119 = vrcp.f32 %v6495_v48 }
 0x945   : > { %v11106_v30 = vpop.eup %11105  ;;  %v6537_v7 = vmul.f32 %v11104_v21, %v14756_v33 }
 0x946   : > { %v11108_v23 = vpop.eup %11107  ;;  %v6540_v15 = vmul.f32 %v11106_v30, %v14761_v52 }
 0x947   : > { %v11110_v11 = vpop.eup %11109  ;;  %v6498_v36 = vadd.f32 1.0, %v11108_v23  ;;  %10233 = vmatprep.mubr.msk.f32.mxu1 %vm2429_vm14, %v6537_v7 }
 0x948   : > { %v11112_v46 = vpop.eup %11111  ;;  %v6497_v31 = vadd.f32 1.0, %v11110_v11  ;;  %10234 = vmatmul.mubr.msk.f32.gmra.mrb[156].mxu1 %vm2429_vm14, %v6538_v26 }
 0x949   : > { %v6539_v51 = vmul.f32 %v11112_v46, %v14764_v17  ;;  %11121 = vrcp.f32 %v6498_v36  ;;  %v11114_v22 = vpop.eup %11113 }
 0x94a   : > { %11123 = vrcp.f32 %v6497_v31  ;;  %v6542_v54 = vmul.f32 %v11114_v22, %v14769_v20  ;;  %v14837_v20 = vadd.f32 %v14788_v8, %v14482_v59  ;;  %v14857_v59 = vadd.f32 %v14807_v27, %v14504_v53 }
 0x94b   : > { %10236 = vmatprep.mubr.msk.f32.mxu1 %vm2429_vm14, %v6539_v51  ;;  %v14877_v53 = vadd.f32 %v6538_v26, %v14528_v62 }
 0x94c   : > { %v11116_v33 = vpop.eup %11115  ;;  %10237 = vmatmul.mubr.msk.f32.gmra.mrb[158].mxu1 %vm2429_vm14, %v6540_v15  ;;  %v14897_v62 = vadd.f32 %v6542_v54, %v14552_v56 }
 0x94d   : > { %v6541_v10 = vmul.f32 %v11116_v33, %v14772_v45  ;;  %v11118_v28 = vpop.eup %11117 }
 0x94e   : > { %v11120_v37 = vpop.eup %11119  ;;  %v6544_v52 = vmul.f32 %v11118_v28, %v14777_v6  ;;  %v14845_v6 = vadd.f32 %v14794_v44, %v14489_v25  ;;  %v14867_v25 = vadd.f32 %v6536_v24, %v14516_v4  ;;  %v14887_v4 = vadd.f32 %v6540_v15, %v14540_v13 }
 0x94f   : > { %10239 = vmatprep.mubr.msk.f32.mxu1 %vm2429_vm14, %v6541_v10  ;;  %v6543_v17 = vmul.f32 %v11120_v37, %v14780_v42  ;;  %v14849_v42 = vadd.f32 %v14803_v47, %v14493_v43  ;;  %v14870_v43 = vadd.f32 %v6537_v7, %v14520_v60  ;;  %v14890_v60 = vadd.f32 %v6541_v10, %v14544_v50 }
 0x950   : > { %10240 = vmatmul.mubr.msk.f32.gmra.mrb[160].mxu1 %vm2429_vm14, %v6542_v54  ;;  %v14907_v13 = vadd.f32 %v6544_v52, %v14564_v40 }
 0x951   : > { %10242 = vmatprep.mubr.msk.f32.mxu1 %vm2429_vm14, %v6543_v17 }
 0x953   : > { %v11122_v48 = vpop.eup %11121 }
 0x954   : > { %v11124_v21 = vpop.eup %11123  ;;  %10243 = vmatmul.mubr.msk.f32.gmra.mrb[162].mxu1 %vm2429_vm14, %v6544_v52  ;;  %v6546_v30 = vmul.f32 %v11122_v48, %v14785_v58  ;;  %v14860_v58 = vadd.f32 %v6535_v5, %v14508_v63  ;;  %v14880_v63 = vadd.f32 %v6539_v51, %v14532_v34  ;;  %v14900_v34 = vadd.f32 %v6543_v17, %v14556_v49  ;;  %v14924_v49 = vld [vmem:[%s15283_s4 + $0x160] ss:$0 sm:$0xff] }
 0x955   : > { %v6545_v45 = vmul.f32 %v11124_v21, %v14791_v55 }
 0x956   : > { %v14917_v56 = vadd.f32 %v6546_v30, %v14576_v41 }
 0x957   : > { %10245 = vmatprep.mubr.msk.f32.mxu1 %vm2429_vm14, %v6545_v45  ;;  %v14910_v50 = vadd.f32 %v6545_v45, %v14568_v38 }
 0x958   : > { %10246 = vmatmul.mubr.msk.f32.gmra.mrb[164].mxu1 %vm2429_vm14, %v6546_v30 }
 0x959   : > { %10252 = vmatprep.mubr.msk.f32.mxu1 %vm2429_vm14, %v14837_v20 }
 0x95c   : > { %10253 = vmatmul.mubr.msk.f32.vlgmr.msra.gmra.mrb[166].mxu1 %vm2429_vm14, %v14845_v6 }
 0x95d   : > { %10255 = vmatprep.mubr.msk.f32.mxu1 %vm2429_vm14, %v14849_v42 }
 0x960   : > { %10256 = vmatmul.mubr.msk.f32.gmra.mrb[168].mxu1 %vm2429_vm14, %v14857_v59 }
 0x961   : > { %10258 = vmatprep.mubr.msk.f32.mxu1 %vm2429_vm14, %v14860_v58 }
 0x964   : > { %10259 = vmatmul.mubr.msk.f32.gmra.mrb[170].mxu1 %vm2429_vm14, %v14867_v25 }
 0x965   : > { %10261 = vmatprep.mubr.msk.f32.mxu1 %vm2429_vm14, %v14870_v43 }
 0x968   : > { %10262 = vmatmul.mubr.msk.f32.gmra.mrb[172].mxu1 %vm2429_vm14, %v14877_v53 }
 0x969   : > { %10264 = vmatprep.mubr.msk.f32.mxu1 %vm2429_vm14, %v14880_v63 }
 0x96c   : > { %10265 = vmatmul.mubr.msk.f32.gmra.mrb[174].mxu1 %vm2429_vm14, %v14887_v4 }
 0x96d   : > { %10267 = vmatprep.mubr.msk.f32.mxu1 %vm2429_vm14, %v14890_v60 }
 0x970   : > { %10268 = vmatmul.mubr.msk.f32.gmra.mrb[176].mxu1 %vm2429_vm14, %v14897_v62 }
 0x971   : > { %10270 = vmatprep.mubr.msk.f32.mxu1 %vm2429_vm14, %v14900_v34 }
 0x974   : > { %10271 = vmatmul.mubr.msk.f32.gmra.mrb[178].mxu1 %vm2429_vm14, %v14907_v13 }
 0x975   : > { %10273 = vmatprep.mubr.msk.f32.mxu1 %vm2429_vm14, %v14910_v50 }
 0x978   : > { %10274 = vmatmul.mubr.msk.f32.gmra.mrb[180].mxu1 %vm2429_vm14, %v14917_v56 }
 0xa0d   : > { %v10226_v40 = vpop.f32.mrb[150].mxu1 }
 0xa0e   : > { %v7128_v38 = vadd.f32 %v10226_v40, %v14924_v49  ;;  %v7122_v8 = vpop.f32.mrb[151].mxu1 }
 0xa0f   : > { %v7123_v55 = vadd.f32 %v14924_v49, %v7122_v8 }
 0xa10   : > { %v8827_v44 = vmul.f32 -1.442695, %v7128_v38 }
 0xa11   : > { %v8826_v47 = vmul.f32 -1.442695, %v7123_v55  ;;  %v10229_v27 = vpop.f32.mrb[152].mxu1 }
 0xa12   : > { %11125 = vpow2.f32 %v8827_v44  ;;  %v7138_v41 = vadd.f32 %v10229_v27, %v14924_v49  ;;  %v7132_v5 = vpop.f32.mrb[153].mxu1 }
 0xa13   : > { %11127 = vpow2.f32 %v8826_v47  ;;  %v7133_v24 = vadd.f32 %v14924_v49, %v7132_v5 }
 0xa14   : > { %v8829_v7 = vmul.f32 -1.442695, %v7138_v41 }
 0xa15   : > { %v8828_v23 = vmul.f32 -1.442695, %v7133_v24  ;;  %v10232_v26 = vpop.f32.mrb[154].mxu1 }
 0xa16   : > { %11129 = vpow2.f32 %v8829_v7  ;;  %v7148_v11 = vadd.f32 %v10232_v26, %v14924_v49  ;;  %v7142_v36 = vpop.f32.mrb[155].mxu1 }
 0xa17   : > { %11131 = vpow2.f32 %v8828_v23  ;;  %v7143_v46 = vadd.f32 %v14924_v49, %v7142_v36 }
 0xa18   : > { %v8831_v51 = vmul.f32 -1.442695, %v7148_v11 }
 0xa19   : > { %v8830_v31 = vmul.f32 -1.442695, %v7143_v46 }
 0xa1b   : > { %v10235_v15 = vpop.f32.mrb[156].mxu1  ;;  %11133 = vpow2.f32 %v8830_v31 }
 0xa1c   : > { %v11126_v22 = vpop.eup %11125  ;;  %v7158_v33 = vadd.f32 %v10235_v15, %v14924_v49  ;;  %v7152_v10 = vpop.f32.mrb[157].mxu1  ;;  %11135 = vpow2.f32 %v8831_v51 }
 0xa1d   : > { %v11128_v28 = vpop.eup %11127  ;;  %v7250_v54 = vadd.f32 1.0, %v11126_v22  ;;  %v7153_v37 = vadd.f32 %v14924_v49, %v7152_v10 }
 0xa1e   : > { %v7249_v17 = vadd.f32 1.0, %v11128_v28  ;;  %v8833_v52 = vmul.f32 -1.442695, %v7158_v33 }
 0xa1f   : > { %11137 = vrcp.f32 %v7250_v54  ;;  %v8832_v48 = vmul.f32 -1.442695, %v7153_v37  ;;  %v10238_v21 = vpop.f32.mrb[158].mxu1 }
 0xa20   : > { %v11130_v45 = vpop.eup %11129  ;;  %11139 = vrcp.f32 %v7249_v17  ;;  %v7162_v30 = vpop.f32.mrb[159].mxu1  ;;  %v7168_v47 = vadd.f32 %v10238_v21, %v14924_v49 }
 0xa21   : > { %v11132_v40 = vpop.eup %11131  ;;  %v7252_v38 = vadd.f32 1.0, %v11130_v45  ;;  %11141 = vpow2.f32 %v8833_v52  ;;  %v7163_v41 = vadd.f32 %v14924_v49, %v7162_v30 }
 0xa22   : > { %v7251_v8 = vadd.f32 1.0, %v11132_v40  ;;  %11143 = vpow2.f32 %v8832_v48  ;;  %v8835_v11 = vmul.f32 -1.442695, %v7168_v47  ;;  %v15713_v40 = vld [vmem:[#allocation88_spill] sm:$0xff] }
 0xa23   : > { %11145 = vrcp.f32 %v7252_v38  ;;  %v10241_v55 = vpop.f32.mrb[160].mxu1  ;;  %v8834_v46 = vmul.f32 -1.442695, %v7163_v41 }
 0xa24   : > { %11147 = vrcp.f32 %v7251_v8  ;;  %v7172_v44 = vpop.f32.mrb[161].mxu1  ;;  %v7178_v31 = vadd.f32 %v10241_v55, %v14924_v49  ;;  %v15714_v8 = vld [vmem:[#allocation89_spill] sm:$0xff] }
 0xa25   : > { %v11134_v27 = vpop.eup %11133  ;;  %v7173_v33 = vadd.f32 %v14924_v49, %v7172_v44 }
 0xa26   : > { %v11136_v24 = vpop.eup %11135  ;;  %v7253_v26 = vadd.f32 1.0, %v11134_v27  ;;  %v8837_v30 = vmul.f32 -1.442695, %v7178_v31  ;;  %v15716_v31 = vld [vmem:[#allocation38_spill] sm:$0xff] }
 0xa27   : > { %v10244_v5 = vpop.f32.mrb[162].mxu1  ;;  %v7254_v52 = vadd.f32 1.0, %v11136_v24 }
 0xa28   : > { %v7182_v7 = vpop.f32.mrb[163].mxu1  ;;  %11149 = vrcp.f32 %v7253_v26  ;;  %v7188_v24 = vadd.f32 %v10244_v5, %v14924_v49  ;;  %v15715_v26 = vld [vmem:[#allocation40_spill] sm:$0xff]  ;;  %v15718_v5 = vld [vmem:[#allocation67_spill] sm:$0xff] }
 0xa29   : > { %v11138_v23 = vpop.eup %11137  ;;  %11151 = vpow2.f32 %v8834_v46 }
 0xa2a   : > { %v11140_v36 = vpop.eup %11139  ;;  %v7330_v51 = vmul.f32 %v11138_v23, %v14682_v29  ;;  %v7298_v15 = vmul.f32 %v11138_v23, %v14612_v57  ;;  %11153 = vpow2.f32 %v8835_v11 }
 0xa2b   : > { %v11142_v22 = vpop.eup %11141  ;;  %v10247_v10 = vpop.f32.mrb[164].mxu1  ;;  %v7329_v28 = vmul.f32 %v11140_v36, %v14684_v3  ;;  %v7297_v54 = vmul.f32 %v11140_v36, %v14614_v35  ;;  %v7313_v37 = vmul.f32 %v11140_v36, %v14646_v61  ;;  %v8836_v35 = vmul.f32 -1.442695, %v7173_v33 }
 0xa2c   : > { %v11144_v17 = vpop.eup %11143  ;;  %v7192_v48 = vpop.f32.mrb[165].mxu1  ;;  %v7394_v21 = vadd.f32 %v7330_v51, %v13906_v39  ;;  %v7362_v3 = vadd.f32 %v7298_v15, %v15714_v8  ;;  %11155 = vrcp.f32 %v7254_v52  ;;  %v7183_v36 = vadd.f32 %v14924_v49, %v7182_v7  ;;  %v15717_v15 = vld [vmem:[#allocation3_spill] sm:$0xff]  ;;  %v15720_v8 = vld [vmem:[#allocation6_spill] sm:$0xff] }
 0xa2d   : > { %v11146_v45 = vpop.eup %11145  ;;  %v7393_v29 = vadd.f32 %v7329_v28, %v13898_v12  ;;  %v7361_v38 = vadd.f32 %v7297_v54, %v15713_v40  ;;  %v7255_v39 = vadd.f32 1.0, %v11144_v17  ;;  %v7256_v12 = vadd.f32 1.0, %v11142_v22  ;;  %v15719_v40 = vld [vmem:[#allocation7_spill] sm:$0xff] }
 0xa2e   : > { %v11148_v57 = vpop.eup %11147  ;;  %v7300_v41 = vmul.f32 %v11146_v45, %v14616_v0  ;;  %11157 = vpow2.f32 %v8837_v30  ;;  %v7377_v22 = vadd.f32 %v7313_v37, %v15717_v15  ;;  %v7198_v28 = vadd.f32 %v10247_v10, %v14924_v49  ;;  %v15724_v15 = vld [vmem:[#allocation9_spill] sm:$0xff] }
 0xa2f   : > { %v14947_v55 = vpop.f32.mrb[166].mxu1  ;;  %v10599_v61 = vpack.i.bf16 %v7394_v21, %v7393_v29  ;;  %v7299_v44 = vmul.f32 %v11148_v57, %v14618_v16  ;;  %v10589_v27 = vpack.i.bf16 %v7362_v3, %v7361_v38  ;;  %v7314_v16 = vmul.f32 %v11138_v23, %v14644_v18 }
 0xa30   : > { %v14950_v47 = vpop.f32.mrb[167].mxu1  ;;  %11159 = vpow2.f32 %v8836_v35  ;;  %v7364_v51 = vadd.f32 %v7300_v41, %v15716_v31  ;;  %v8839_v17 = vmul.f32 -1.442695, %v7188_v24  ;;  %v7193_v18 = vadd.f32 %v14924_v49, %v7192_v48 }
 0xa31   : > { %10600 = vrot.lane.b32.xlu1 %v10599_v61, %s11390_s25  ;;  %10590 = vrot.lane.b32.xlu0 %v10589_v27, %s11391_s26  ;;  %v7363_v11 = vadd.f32 %v7299_v44, %v15715_v26  ;;  %11161 = vrcp.f32 %v7255_v39  ;;  %v7378_v33 = vadd.f32 %v7314_v16, %v15718_v5  ;;  %v7331_v7 = vmul.f32 %v11148_v57, %v14688_v1  ;;  %v15721_v26 = vld [vmem:[#allocation73_spill] sm:$0xff]  ;;  %v15722_v16 = vld [vmem:[#allocation62_spill] sm:$0xff] }
 0xa32   : > { %11163 = vrcp.f32 %v7256_v12  ;;  %v11150_v52 = vpop.eup %11149  ;;  %v8838_v21 = vmul.f32 -1.442695, %v7183_v36  ;;  %v7332_v29 = vmul.f32 %v11146_v45, %v14686_v14  ;;  %v8841_v48 = vmul.f32 -1.442695, %v7198_v28  ;;  %v15725_v28 = vld [vmem:[#allocation74_spill] sm:$0xff] }
 0xa33   : > { %v14959_v46 = vpop.f32.mrb[168].mxu1  ;;  %v10604_v54 = vpack.i.bf16 %v7364_v51, %v7363_v11  ;;  %v10594_v23 = vpack.i.bf16 %v7378_v33, %v7377_v22  ;;  %v11152_v30 = vpop.eup %11151  ;;  %v7395_v38 = vadd.f32 %v7331_v7, %v15719_v40  ;;  %v7315_v3 = vmul.f32 %v11148_v57, %v14650_v9  ;;  %v15723_v57 = vld [vmem:[#allocation68_spill] sm:$0xff] }
 0xa34   : > { %v14963_v0 = vpop.f32.mrb[169].mxu1  ;;  %v11154_v49 = vpop.eup %11153  ;;  %v7396_v1 = vadd.f32 %v7332_v29, %v15720_v8  ;;  %11165 = vpow2.f32 %v8839_v17  ;;  %v8840_v61 = vmul.f32 -1.442695, %v7193_v18  ;;  %v7316_v44 = vmul.f32 %v11146_v45, %v14648_v19  ;;  %v15726_v17 = vld [vmem:[#allocation10_spill] sm:$0xff]  ;;  %v15728_v29 = vld [vmem:[#allocation11_spill] sm:$0xff]  ;;  %v15730_v8 = vld [vmem:[#allocation12_spill] sm:$0xff] }
 0xa35   : > { %10605 = vrot.lane.b32.xlu1 %v10604_v54, %s11391_s26  ;;  %10595 = vrot.lane.b32.xlu0 %v10594_v23, %s11392_s27  ;;  %v7317_v14 = vmul.f32 %v11150_v52, %v14654_v32  ;;  %v7257_v39 = vadd.f32 1.0, %v11152_v30  ;;  %11167 = vpow2.f32 %v8838_v21  ;;  %v7258_v24 = vadd.f32 1.0, %v11154_v49  ;;  %v15727_v23 = vld [vmem:[#allocation47_spill] sm:$0xff]  ;;  %v15729_v49 = vld [vmem:[#allocation44_spill] sm:$0xff] }
 0xa36   : > { %v11156_v35 = vpop.eup %11155  ;;  %v10614_v27 = vpack.i.bf16 %v7396_v1, %v7395_v38  ;;  %v7379_v11 = vadd.f32 %v7315_v3, %v15721_v26  ;;  %v7380_v36 = vadd.f32 %v7316_v44, %v15722_v16  ;;  %11169 = vpow2.f32 %v8841_v48 }
 0xa37   : > { %v14970_v37 = vpop.f32.mrb[170].mxu1  ;;  %v7318_v19 = vmul.f32 %v11156_v35, %v14652_v2  ;;  %11171 = vpow2.f32 %v8840_v61  ;;  %v7381_v51 = vadd.f32 %v7317_v14, %v15723_v57  ;;  %v7301_v22 = vmul.f32 %v11150_v52, %v15724_v15  ;;  %v15731_v14 = vld [vmem:[#allocation53_spill] sm:$0xff] }
 0xa38   : > { %v14974_v10 = vpop.f32.mrb[171].mxu1  ;;  %v11158_v41 = vpop.eup %11157  ;;  %v10609_v45 = vpack.i.bf16 %v7380_v36, %v7379_v11  ;;  %11173 = vrcp.f32 %v7257_v39  ;;  %v7302_v18 = vmul.f32 %v11156_v35, %v15726_v17  ;;  %v15733_v11 = vld [vmem:[#allocation20_spill] sm:$0xff]  ;;  %v15734_v36 = vld [vmem:[#allocation19_spill] sm:$0xff] }
 0xa39   : > { %10615 = vrot.lane.b32.xlu1 %v10614_v27, %s11390_s25  ;;  %11175 = vrcp.f32 %v7258_v24  ;;  %v7382_v54 = vadd.f32 %v7318_v19, %v15725_v28  ;;  %v7365_v2 = vadd.f32 %v7301_v22, %v15727_v23  ;;  %v7260_v21 = vadd.f32 1.0, %v11158_v41  ;;  %v15732_v27 = vld [vmem:[#allocation50_spill] sm:$0xff] }
 0xa3a   : > { %v11160_v9 = vpop.eup %11159  ;;  %10610 = vrot.lane.b32.xlu0 %v10609_v45, %s11392_s27  ;;  %v7366_v48 = vadd.f32 %v7302_v18, %v15729_v49  ;;  %v7333_v16 = vmul.f32 %v11150_v52, %v15733_v11  ;;  %v15736_v22 = vld [vmem:[#allocation34_spill] sm:$0xff]  ;;  %v15744_v11 = vld [vmem:[#allocation79_spill] sm:$0xff] }
 0xa3b   : > { %v14981_v12 = vpop.f32.mrb[172].mxu1  ;;  %v11162_v32 = vpop.eup %11161  ;;  %v7259_v40 = vadd.f32 1.0, %v11160_v9  ;;  %v10624_v38 = vpack.i.bf16 %v7382_v54, %v7381_v51  ;;  %11177 = vrcp.f32 %v7260_v21  ;;  %v7334_v9 = vmul.f32 %v11156_v35, %v15734_v36  ;;  %v15735_v51 = vld [vmem:[#allocation35_spill] sm:$0xff]  ;;  %v15737_v23 = vld [vmem:[#allocation22_spill] sm:$0xff]  ;;  %v15745_v36 = vld [vmem:[#allocation64_spill] sm:$0xff] }
 0xa3c   : > { %v14985_v31 = vpop.f32.mrb[173].mxu1  ;;  %v11164_v5 = vpop.eup %11163  ;;  %v7303_v30 = vmul.f32 %v11162_v32, %v15728_v29  ;;  %v10619_v44 = vpack.i.bf16 %v7366_v48, %v7365_v2  ;;  %v7397_v15 = vadd.f32 %v7333_v16, %v15735_v51  ;;  %v7335_v52 = vmul.f32 %v11162_v32, %v15737_v23  ;;  %v15738_v29 = vld [vmem:[#allocation21_spill] sm:$0xff]  ;;  %v15748_v23 = vld [vmem:[#allocation4_spill] sm:$0xff] }
 0xa3d   : > { %v7304_v1 = vmul.f32 %v11164_v5, %v15730_v8  ;;  %10625 = vrot.lane.b32.xlu1 %v10624_v38, %s11392_s27  ;;  %11179 = vrcp.f32 %v7259_v40  ;;  %v7398_v28 = vadd.f32 %v7334_v9, %v15736_v22  ;;  %v15739_v40 = vld [vmem:[#allocation58_spill] sm:$0xff]  ;;  %v15740_v48 = vld [vmem:[#allocation41_spill] sm:$0xff] }
 0xa3e   : > { %v11166_v61 = vpop.eup %11165  ;;  %v7367_v39 = vadd.f32 %v7303_v30, %v15731_v14  ;;  %10620 = vrot.lane.b32.xlu0 %v10619_v44, %s11391_s26  ;;  %v7336_v30 = vmul.f32 %v11164_v5, %v15738_v29  ;;  %v7319_v38 = vmul.f32 %v11162_v32, %v15739_v40  ;;  %v7399_v8 = vadd.f32 %v7335_v52, %v15740_v48  ;;  %v15742_v44 = vld [vmem:[#allocation39_spill] sm:$0xff]  ;;  %v15750_v29 = vld [vmem:[#allocation36_spill] sm:$0xff] }
 0xa3f   : > { %v14991_v33 = vpop.f32.mrb[174].mxu1  ;;  %v7368_v24 = vadd.f32 %v7304_v1, %v15732_v27  ;;  %v11168_v41 = vpop.eup %11167  ;;  %v7262_v57 = vadd.f32 1.0, %v11166_v61  ;;  %v10629_v21 = vpack.i.bf16 %v7398_v28, %v7397_v15  ;;  %v15741_v1 = vld [vmem:[#allocation61_spill] sm:$0xff] }
 0xa40   : > { %v14997_v7 = vpop.f32.mrb[175].mxu1  ;;  %v11170_v45 = vpop.eup %11169  ;;  %v7261_v18 = vadd.f32 1.0, %v11168_v41  ;;  %v7320_v61 = vmul.f32 %v11164_v5, %v15741_v1  ;;  %v7400_v14 = vadd.f32 %v7336_v30, %v15742_v44  ;;  %v15746_v5 = vld [vmem:[#allocation13_spill] sm:$0xff]  ;;  %v15753_v44 = vld [vmem:[#allocation43_spill] sm:$0xff] }
 0xa41   : > { %v10634_v19 = vpack.i.bf16 %v7368_v24, %v7367_v39  ;;  %v11172_v17 = vpop.eup %11171  ;;  %11181 = vrcp.f32 %v7262_v57  ;;  %v15743_v39 = vld [vmem:[#allocation80_spill] sm:$0xff]  ;;  %v15747_v15 = vld [vmem:[#allocation37_spill] sm:$0xff] }
 0xa42   : > { %v11174_v35 = vpop.eup %11173  ;;  %10630 = vrot.lane.b32.xlu0 %v10629_v21, %s11390_s25  ;;  %v7383_v27 = vadd.f32 %v7319_v38, %v15743_v39  ;;  %11183 = vrcp.f32 %v7261_v18  ;;  %v7263_v41 = vadd.f32 1.0, %v11172_v17  ;;  %v7384_v16 = vadd.f32 %v7320_v61, %v15744_v11  ;;  %v15749_v18 = vld [vmem:[#allocation69_spill] sm:$0xff]  ;;  %v15754_v39 = vld [vmem:[#allocation42_spill] sm:$0xff]  ;;  %v15755_v11 = vld [vmem:[#allocation24_spill] sm:$0xff] }
 0xa43   : > { %v15002_v3 = vpop.f32.mrb[176].mxu1  ;;  %10635 = vrot.lane.b32.xlu1 %v10634_v19, %s11391_s26  ;;  %v11176_v49 = vpop.eup %11175  ;;  %v7321_v32 = vmul.f32 %v11174_v35, %v15745_v36  ;;  %v7264_v19 = vadd.f32 1.0, %v11170_v45  ;;  %v10644_v51 = vpack.i.bf16 %v7400_v14, %v7399_v8  ;;  %v7305_v22 = vmul.f32 %v11174_v35, %v15747_v15  ;;  %v15751_v45 = vld [vmem:[#allocation59_spill] sm:$0xff]  ;;  %v15752_v8 = vld [vmem:[#allocation56_spill] sm:$0xff] }
 0xa44   : > { %v15007_v26 = vpop.f32.mrb[177].mxu1  ;;  %v7322_v57 = vmul.f32 %v11176_v49, %v15746_v5  ;;  %v10639_v28 = vpack.i.bf16 %v7384_v16, %v7383_v27  ;;  %v7306_v30 = vmul.f32 %v11176_v49, %v15750_v29  ;;  %11185 = vrcp.f32 %v7263_v41  ;;  %v15756_v36 = vld [vmem:[#allocation23_spill] sm:$0xff]  ;;  %v15757_v41 = vld [vmem:[#allocation26_spill] sm:$0xff] }
 0xa45   : > { %v7385_v52 = vadd.f32 %v7321_v32, %v15748_v23  ;;  %v11178_v21 = vpop.eup %11177  ;;  %v7369_v38 = vadd.f32 %v7305_v22, %v15751_v45  ;;  %11187 = vrcp.f32 %v7264_v19  ;;  %v7337_v16 = vmul.f32 %v11174_v35, %v15755_v11  ;;  %v15758_v19 = vld [vmem:[#allocation65_spill] sm:$0xff]  ;;  %v15759_v15 = vld [vmem:[#allocation71_spill] sm:$0xff]  ;;  %v15760_v23 = vld [vmem:[#allocation48_spill] sm:$0xff] }
 0xa46   : > { %v7386_v17 = vadd.f32 %v7322_v57, %v15749_v18  ;;  %10640 = vrot.lane.b32.xlu0 %v10639_v28, %s11392_s27  ;;  %v7370_v1 = vadd.f32 %v7306_v30, %v15752_v8  ;;  %v7308_v27 = vmul.f32 %v11178_v21, %v15754_v39  ;;  %v7338_v32 = vmul.f32 %v11176_v49, %v15756_v36  ;;  %v15761_v18 = vld [vmem:[#allocation45_spill] sm:$0xff]  ;;  %v15763_v35 = vld [vmem:[#allocation54_spill] sm:$0xff]  ;;  %v15767_v39 = vld [vmem:[#allocation16_spill] sm:$0xff] }
 0xa47   : > { %v15014_v54 = vpop.f32.mrb[178].mxu1  ;;  %10645 = vrot.lane.b32.xlu1 %v10644_v51, %s11390_s25  ;;  %v11180_v40 = vpop.eup %11179  ;;  %v15762_v30 = vld [vmem:[#allocation25_spill] sm:$0xff]  ;;  %v15769_v36 = vld [vmem:[#allocation46_spill] sm:$0xff] }
 0xa48   : > { %v15018_v2 = vpop.f32.mrb[179].mxu1  ;;  %v10654_v48 = vpack.i.bf16 %v7386_v17, %v7385_v52  ;;  %v10649_v61 = vpack.i.bf16 %v7370_v1, %v7369_v38  ;;  %v7307_v14 = vmul.f32 %v11180_v40, %v15753_v44  ;;  %v7339_v51 = vmul.f32 %v11180_v40, %v15757_v41  ;;  %v15765_v1 = vld [vmem:[#allocation15_spill] sm:$0xff]  ;;  %v15768_v11 = vld [vmem:[#allocation17_spill] sm:$0xff] }
 0xa49   : > { %v7372_v22 = vadd.f32 %v7308_v27, %v15759_v15  ;;  %v7401_v52 = vadd.f32 %v7337_v16, %v15760_v23  ;;  %v7402_v17 = vadd.f32 %v7338_v32, %v15761_v18  ;;  %v7340_v45 = vmul.f32 %v11178_v21, %v15762_v30  ;;  %v15775_v30 = vld [vmem:[#allocation77_spill] sm:$0xff] }
 0xa4a   : > { %10650 = vrot.lane.b32.xlu0 %v10649_v61, %s11391_s26  ;;  %v7371_v57 = vadd.f32 %v7307_v14, %v15758_v19  ;;  %v7403_v38 = vadd.f32 %v7339_v51, %v15763_v35  ;;  %v7324_v44 = vmul.f32 %v11178_v21, %v15765_v1  ;;  %v15766_v61 = vld [vmem:[#allocation51_spill] sm:$0xff] }
 0xa4b   : > { %v15027_v24 = vpop.f32.mrb[180].mxu1  ;;  %10655 = vrot.lane.b32.xlu1 %v10654_v48, %s11392_s27  ;;  %v11182_v5 = vpop.eup %11181  ;;  %v10659_v49 = vpack.i.bf16 %v7402_v17, %v7401_v52  ;;  %v15764_v48 = vld [vmem:[#allocation14_spill] sm:$0xff]  ;;  %v7404_v14 = vadd.f32 %v7340_v45, %v15766_v61  ;;  %v15770_v19 = vld [vmem:[#allocation75_spill] sm:$0xff]  ;;  %v15773_v52 = vld [vmem:[#allocation5_spill] sm:$0xff] }
 0xa4c   : > { %v15031_v9 = vpop.f32.mrb[181].mxu1  ;;  %v11184_v28 = vpop.eup %11183  ;;  %v10664_v29 = vpack.i.bf16 %v7372_v22, %v7371_v57  ;;  %v7323_v8 = vmul.f32 %v11180_v40, %v15764_v48  ;;  %v7326_v16 = vmul.f32 %v11182_v5, %v15768_v11  ;;  %v15771_v57 = vld [vmem:[#allocation81_spill] sm:$0xff]  ;;  %v15774_v17 = vld [vmem:[#allocation70_spill] sm:$0xff]  ;;  %v15777_v61 = vld [vmem:[#allocation28_spill] sm:$0xff] }
 0xa4d   : > { %v7325_v27 = vmul.f32 %v11184_v28, %v15767_v39  ;;  %v7309_v32 = vmul.f32 %v11184_v28, %v15769_v36  ;;  %v7388_v15 = vadd.f32 %v7324_v44, %v15771_v57  ;;  %v15772_v40 = vld [vmem:[#allocation49_spill] sm:$0xff]  ;;  %v10674_v23 = vpack.i.bf16 %v7404_v14, %v7403_v38  ;;  %v15776_v48 = vld [vmem:[#allocation66_spill] sm:$0xff]  ;;  %v15779_v11 = vld [vmem:[#allocation52_spill] sm:$0xff] }
 0xa4e   : > { %v11186_v41 = vpop.eup %11185  ;;  %10660 = vrot.lane.b32.xlu0 %v10659_v49, %s11390_s25  ;;  %v7387_v51 = vadd.f32 %v7323_v8, %v15770_v19  ;;  %v7310_v22 = vmul.f32 %v11182_v5, %v15772_v40  ;;  %v7341_v39 = vmul.f32 %v11184_v28, %v15777_v61  ;;  %v15778_v8 = vld [vmem:[#allocation27_spill] sm:$0xff]  ;;  %v15780_v14 = vld [vmem:[#allocation60_spill] sm:$0xff]  ;;  %v15783_v57 = vld [vmem:[#allocation57_spill] sm:$0xff] }
 0xa4f   : > { %10665 = vrot.lane.b32.xlu1 %v10664_v29, %s11391_s26  ;;  %v11188_v21 = vpop.eup %11187  ;;  %v7389_v18 = vadd.f32 %v7325_v27, %v15773_v52  ;;  %v7390_v29 = vadd.f32 %v7326_v16, %v15774_v17  ;;  %v7373_v45 = vadd.f32 %v7309_v32, %v15775_v30  ;;  %v7342_v44 = vmul.f32 %v11182_v5, %v15778_v8  ;;  %v15781_v16 = vld [vmem:[#allocation55_spill] sm:$0xff]  ;;  %v15782_v32 = vld [vmem:[#allocation18_spill] sm:$0xff]  ;;  %v15784_v40 = vld [vmem:[#allocation72_spill] sm:$0xff] }
 0xa50   : > { %v10669_v35 = vpack.i.bf16 %v7388_v15, %v7387_v51  ;;  %v7374_v1 = vadd.f32 %v7310_v22, %v15776_v48  ;;  %v7311_v36 = vmul.f32 %v11186_v41, %v15779_v11  ;;  %v7405_v27 = vadd.f32 %v7341_v39, %v15780_v14  ;;  %v15785_v22 = vld [vmem:[#allocation2_spill] sm:$0xff]  ;;  %v15787_v5 = vld [vmem:[#allocation76_spill] sm:$0xff] }
 0xa51   : > { %v10684_v49 = vpack.i.bf16 %v7390_v29, %v7389_v18  ;;  %v7312_v19 = vmul.f32 %v11188_v21, %v15781_v16  ;;  %v7327_v51 = vmul.f32 %v11186_v41, %v15782_v32  ;;  %v7406_v15 = vadd.f32 %v7342_v44, %v15783_v57  ;;  %v15786_v52 = vld [vmem:[#allocation78_spill] sm:$0xff]  ;;  %v15788_v29 = vld [vmem:[#allocation83_spill] sm:$0xff]  ;;  %v15791_v8 = vld [vmem:[#allocation8_spill] sm:$0xff] }
 0xa52   : > { %10670 = vrot.lane.b32.xlu0 %v10669_v35, %s11392_s27  ;;  %v10679_v38 = vpack.i.bf16 %v7374_v1, %v7373_v45  ;;  %v7375_v28 = vadd.f32 %v7311_v36, %v15784_v40  ;;  %v7343_v30 = vmul.f32 %v11186_v41, %v15788_v29  ;;  %v15789_v35 = vld [vmem:[#allocation82_spill] sm:$0xff]  ;;  %v15790_v1 = vld [vmem:[#allocation29_spill] sm:$0xff]  ;;  %v15792_v36 = vld [vmem:[#allocation63_spill] sm:$0xff] }
 0xa53   : > { %10675 = vrot.lane.b32.xlu1 %v10674_v23, %s11390_s25  ;;  %v7328_v23 = vmul.f32 %v11188_v21, %v15785_v22  ;;  %v7376_v18 = vadd.f32 %v7312_v19, %v15786_v52  ;;  %v7391_v17 = vadd.f32 %v7327_v51, %v15787_v5  ;;  %v10689_v45 = vpack.i.bf16 %v7406_v15, %v7405_v27  ;;  %v15097_v41 = vld [vmem:[%s15283_s4 + $0x178] ss:$0 sm:$0xff]  ;;  %v7981_v32 = vld [vmem:[%s15104_s6 + $0x8] sm:$0xff] }
 0xa54   : > { %v7344_v61 = vmul.f32 %v11188_v21, %v15790_v1  ;;  %v7407_v44 = vadd.f32 %v7343_v30, %v15791_v8  ;;  %v7536_v21 = vadd.f32 %v14947_v55, %v15097_v41  ;;  %v7546_v51 = vadd.f32 %v14959_v46, %v15097_v41  ;;  %v7982_v55 = vld [vmem:[%s15104_s6 + $0x10] sm:$0xff] }
 0xa55   : > { %v7392_v48 = vadd.f32 %v7328_v23, %v15789_v35  ;;  %v10694_v39 = vpack.i.bf16 %v7376_v18, %v7375_v28  ;;  %v7541_v57 = vadd.f32 %v15097_v41, %v14963_v0  ;;  %v7983_v28 = vld [vmem:[%s15104_s6 + $0x18] sm:$0xff]  ;;  %v7551_v22 = vadd.f32 %v15097_v41, %v14974_v10  ;;  %v7984_v0 = vld [vmem:[%s15104_s6 + $0x20] sm:$0xff] }
 0xa56   : > { %10680 = vrot.lane.b32.xlu0 %v10679_v38, %s11391_s26  ;;  %v7408_v14 = vadd.f32 %v7344_v61, %v15792_v36  ;;  %v7980_v38 = vld [vmem:[%s15104_s6] sm:$0xff]  ;;  %v8860_v27 = vmul.f32 -1.442695, %v7536_v21  ;;  %v8862_v15 = vmul.f32 -1.442695, %v7546_v51  ;;  %v7566_v29 = vadd.f32 %v14981_v12, %v15097_v41 }
 0xa57   : > { %10685 = vrot.lane.b32.xlu1 %v10684_v49, %s11392_s27  ;;  %v10699_v11 = vpack.i.bf16 %v7392_v48, %v7391_v17  ;;  %v7531_v49 = vadd.f32 %v15097_v41, %v14950_v47  ;;  %v8861_v40 = vmul.f32 -1.442695, %v7541_v57  ;;  %v7556_v47 = vadd.f32 %v14970_v37, %v15097_v41  ;;  %v7985_v37 = vld [vmem:[%s15104_s6 + $0x28] sm:$0xff] }
 0xa58   : > { %v10704_v16 = vpack.i.bf16 %v7408_v14, %v7407_v44  ;;  %11189 = vpow2.f32 %v8860_v27  ;;  %v8863_v18 = vmul.f32 -1.442695, %v7551_v22  ;;  %v7561_v10 = vadd.f32 %v15097_v41, %v14985_v31  ;;  %v7987_v44 = vld [vmem:[%s15104_s6 + $0x38] sm:$0xff] }
 0xa59   : > { %v8859_v19 = vmul.f32 -1.442695, %v7531_v49  ;;  %v8864_v46 = vmul.f32 -1.442695, %v7556_v47  ;;  %v8866_v48 = vmul.f32 -1.442695, %v7566_v29  ;;  %v7576_v61 = vadd.f32 %v14991_v33, %v15097_v41 }
 0xa5a   : > { %10690 = vrot.lane.b32.xlu0 %v10689_v45, %s11390_s25  ;;  %v7986_v45 = vld [vmem:[%s15104_s6 + $0x30] sm:$0xff]  ;;  %v8865_v1 = vmul.f32 -1.442695, %v7561_v10  ;;  %v7571_v12 = vadd.f32 %v15097_v41, %v14997_v7  ;;  %v7581_v7 = vadd.f32 %v15097_v41, %v15007_v26  ;;  %v7988_v49 = vld [vmem:[%s15104_s6 + $0x40] sm:$0xff]  ;;  %v7586_v57 = vadd.f32 %v15002_v3, %v15097_v41 }
 0xa5b   : > { %10695 = vrot.lane.b32.xlu1 %v10694_v39, %s11391_s26  ;;  %11191 = vpow2.f32 %v8859_v19  ;;  %v7596_v47 = vadd.f32 %v15014_v54, %v15097_v41 }
 0xa5c   : > { %11193 = vpow2.f32 %v8862_v15  ;;  %v8867_v14 = vmul.f32 -1.442695, %v7571_v12  ;;  %v7989_v15 = vld [vmem:[%s15104_s6 + $0x48] sm:$0xff] }
 0xa5d   : > { %11195 = vpow2.f32 %v8861_v40 }
 0xa5e   : > { %10700 = vrot.lane.b32.xlu0 %v10699_v11, %s11392_s27  ;;  %11197 = vpow2.f32 %v8864_v46  ;;  %v8868_v11 = vmul.f32 -1.442695, %v7576_v61 }
 0xa5f   : > { %10705 = vrot.lane.b32.xlu1 %v10704_v16, %s11390_s25  ;;  %11199 = vpow2.f32 %v8863_v18 }
 0xa62   : > { %v11190_v23 = vpop.eup %11189 }
 0xa63   : > { %v7658_v5 = vadd.f32 1.0, %v11190_v23 }
 0xa65   : > { %v11192_v52 = vpop.eup %11191  ;;  %11201 = vrcp.f32 %v7658_v5 }
 0xa66   : > { %v7657_v17 = vadd.f32 1.0, %v11192_v52  ;;  %v11194_v30 = vpop.eup %11193 }
 0xa67   : > { %v11196_v35 = vpop.eup %11195  ;;  %v7660_v39 = vadd.f32 1.0, %v11194_v30 }
 0xa68   : > { %11203 = vrcp.f32 %v7657_v17  ;;  %v7659_v8 = vadd.f32 1.0, %v11196_v35  ;;  %v11198_v31 = vpop.eup %11197  ;;  %v7990_v17 = vld [vmem:[%s15104_s6 + $0x50] sm:$0xff] }
 0xa69   : > { %11205 = vpow2.f32 %v8866_v48  ;;  %v11200_v21 = vpop.eup %11199  ;;  %v7662_v33 = vadd.f32 1.0, %v11198_v31  ;;  %v8872_v48 = vmul.f32 -1.442695, %v7596_v47 }
 0xa6a   : > { %11207 = vpow2.f32 %v8865_v1  ;;  %v7661_v51 = vadd.f32 1.0, %v11200_v21  ;;  %v7591_v1 = vadd.f32 %v15097_v41, %v15018_v2 }
 0xa6b   : > { %11209 = vrcp.f32 %v7660_v39 }
 0xa6c   : > { %11211 = vrcp.f32 %v7659_v8 }
 0xa6d   : > { %11213 = vpow2.f32 %v8868_v11 }
 0xa6e   : > { %11215 = vpow2.f32 %v8867_v14 }
 0xa6f   : > { %11217 = vrcp.f32 %v7662_v33 }
 0xa70   : > { %11219 = vrcp.f32 %v7661_v51 }
 0xa7c   : > { %7996 = vxpose.xlu0.b32.start [1/16] (narrow) %v7980_v38, 16  ;;  %v11202_v38 = vpop.eup %11201 }
 0xa7d   : > { %v11204_v27 = vpop.eup %11203 }
 0xa7e   : > { %v7705_v26 = vmul.f32 %v11204_v27, %v14837_v20  ;;  %v8870_v20 = vmul.f32 -1.442695, %v7586_v57 }
 0xa80   : > { %7997 = vxpose.xlu0.b32.cont [2/16] (narrow) %v7981_v32, 16 }
 0xa84   : > { %7998 = vxpose.xlu0.b32.cont [3/16] (narrow) %v7982_v55, 16  ;;  %v8869_v55 = vmul.f32 -1.442695, %v7581_v7 }
 0xa86   : > { %11221 = vpow2.f32 %v8869_v55  ;;  %v7992_v55 = vld [vmem:[%s15104_s6 + $0x60] sm:$0xff] }
 0xa87   : > { %11223 = vpow2.f32 %v8870_v20 }
 0xa88   : > { %7999 = vxpose.xlu0.b32.cont [4/16] (narrow) %v7983_v28, 16  ;;  %v7706_v28 = vmul.f32 %v11202_v38, %v14845_v6  ;;  %11225 = vpow2.f32 %v8872_v48  ;;  %v8871_v38 = vmul.f32 -1.442695, %v7591_v1 }
 0xa8c   : > { %8000 = vxpose.xlu0.b32.cont [5/16] (narrow) %v7984_v0, 16  ;;  %v11206_v0 = vpop.eup %11205 }
 0xa8d   : > { %v11208_v54 = vpop.eup %11207  ;;  %v7664_v12 = vadd.f32 1.0, %v11206_v0 }
 0xa8e   : > { %v11210_v29 = vpop.eup %11209  ;;  %v7663_v11 = vadd.f32 1.0, %v11208_v54 }
 0xa8f   : > { %v11212_v35 = vpop.eup %11211  ;;  %v7708_v21 = vmul.f32 %v11210_v29, %v14857_v59  ;;  %11227 = vrcp.f32 %v7664_v12 }
 0xa90   : > { %8001 = vxpose.xlu0.b32.cont [6/16] (narrow) %v7985_v37, 16  ;;  %v11214_v31 = vpop.eup %11213  ;;  %11229 = vrcp.f32 %v7663_v11 }
 0xa91   : > { %v11216_v14 = vpop.eup %11215  ;;  %11231 = vpow2.f32 %v8871_v38 }
 0xa94   : > { %8002 = vxpose.xlu0.b32.cont [7/16] (narrow) %v7986_v45, 16 }
 0xa98   : > { %8003 = vxpose.xlu0.b32.cont [8/16] (narrow) %v7987_v44, 16 }
 0xa9c   : > { %8004 = vxpose.xlu0.b32.cont [9/16] (narrow) %v7988_v49, 16  ;;  %v11218_v49 = vpop.eup %11217 }
 0xa9d   : > { %v7710_v54 = vmul.f32 %v11218_v49, %v14867_v25 }
 0xaa0   : > { %8005 = vxpose.xlu0.b32.cont [10/16] (narrow) %v7989_v15, 16  ;;  %v7666_v15 = vadd.f32 1.0, %v11214_v31 }
 0xaa2   : > { %11233 = vrcp.f32 %v7666_v15 }
 0xaa3   : > { %v10601_v36 = vpop.permute.xlu1 %10600  ;;  %v10591_v16 = vpop.permute.xlu0 %10590 }
 0xaa4   : > { %v10593_v19 = vunpack.i.h.bf16 %v10591_v16  ;;  %v10592_v32 = vunpack.i.l.bf16 %v10591_v16  ;;  %v10603_v3 = vunpack.i.h.bf16 %v10601_v36  ;;  %v10602_v52 = vunpack.i.l.bf16 %v10601_v36  ;;  %8006 = vxpose.xlu0.b32.cont [11/16] (narrow) %v7990_v17, 16  ;;  %v7991_v36 = vld [vmem:[%s15104_s6 + $0x58] sm:$0xff] }
 0xaa5   : > { %v7707_v16 = vmul.f32 %v11212_v35, %v14849_v42 }
 0xaa6   : > { %v7913_v18 = vsel %vm2429_vm14, %v7705_v26, %v10592_v32  ;;  %v7914_v5 = vsel %vm2429_vm14, %v7706_v28, %v10593_v19  ;;  %v7606_v32 = vadd.f32 %v15027_v24, %v15097_v41  ;;  %v11220_v28 = vpop.eup %11219 }
 0xaa7   : > { %v10606_v40 = vpop.permute.xlu1 %10605  ;;  %v10596_v22 = vpop.permute.xlu0 %10595 }
 0xaa8   : > { %v10598_v46 = vunpack.i.h.bf16 %v10596_v22  ;;  %v10597_v23 = vunpack.i.l.bf16 %v10596_v22  ;;  %v10608_v8 = vunpack.i.h.bf16 %v10606_v40  ;;  %v10607_v44 = vunpack.i.l.bf16 %v10606_v40  ;;  %8007 = vxpose.xlu0.b32.cont [12/16] (narrow) %v7991_v36, 16 }
 0xaa9   : > { %v7601_v40 = vadd.f32 %v15097_v41, %v15031_v9  ;;  %v7665_v22 = vadd.f32 1.0, %v11216_v14  ;;  %v7709_v41 = vmul.f32 %v11220_v28, %v14860_v58  ;;  %v7994_v58 = vld [vmem:[%s15104_s6 + $0x70] sm:$0xff] }
 0xaaa   : > { %v7930_v6 = vsel %vm7929_vm2, %v7913_v18, %v10597_v23  ;;  %v7931_v37 = vsel %vm7929_vm2, %v7914_v5, %v10598_v46  ;;  %v7915_v42 = vsel %vm2429_vm14, %v7707_v16, %v10607_v44  ;;  %v7916_v59 = vsel %vm2429_vm14, %v7708_v21, %v10608_v8  ;;  %v7993_v18 = vld [vmem:[%s15104_s6 + $0x68] sm:$0xff]  ;;  %v11222_v5 = vpop.eup %11221 }
 0xaab   : > { %v7947_v10 = vsel %vm7946_vm5, %v7930_v6, %v10602_v52  ;;  %v7948_v30 = vsel %vm7946_vm5, %v7931_v37, %v10603_v3  ;;  %v10616_v61 = vpop.permute.xlu1 %10615  ;;  %v8874_v23 = vmul.f32 -1.442695, %v7606_v32  ;;  %v8873_v9 = vmul.f32 -1.442695, %v7601_v40  ;;  %v11224_v20 = vpop.eup %11223 }
 0xaac   : > { %v10399_v39 = vpack.c.bf16 %v7948_v30, %v7947_v10  ;;  %v10618_v2 = vunpack.i.h.bf16 %v10616_v61  ;;  %v10617_v33 = vunpack.i.l.bf16 %v10616_v61  ;;  %v10611_v7 = vpop.permute.xlu0 %10610  ;;  %8008 = vxpose.xlu0.b32.cont [13/16] (narrow) %v7992_v55, 16  ;;  %11235 = vrcp.f32 %v7665_v22  ;;  %v11226_v30 = vpop.eup %11225 }
 0xaad   : > { %v10613_v27 = vunpack.i.h.bf16 %v10611_v7  ;;  %v10612_v19 = vunpack.i.l.bf16 %v10611_v7  ;;  %11237 = vpow2.f32 %v8874_v23  ;;  %v7667_v35 = vadd.f32 1.0, %v11222_v5  ;;  %v11228_v1 = vpop.eup %11227 }
 0xaae   : > { %10401 = vmatprep.subr.msk.bf16.mxu1 %vm15153_vm7, %v10399_v39  ;;  %11239 = vpow2.f32 %v8873_v9  ;;  %v7668_v12 = vadd.f32 1.0, %v11224_v20  ;;  %v7712_v49 = vmul.f32 %v11228_v1, %v14877_v53  ;;  %v7670_v32 = vadd.f32 1.0, %v11226_v30 }
 0xaaf   : > { %10404 = vmatpush3.bf16.msk.msra.mxu1 %vm15153_vm7, %v10399_v39  ;;  %v7932_v51 = vsel %vm7929_vm2, %v7915_v42, %v10612_v19  ;;  %v7933_v57 = vsel %vm7929_vm2, %v7916_v59, %v10613_v27  ;;  %v10626_v47 = vpop.permute.xlu1 %10625  ;;  %v11230_v39 = vpop.eup %11229  ;;  %11241 = vrcp.f32 %v7667_v35 }
 0xab0   : > { %v7949_v26 = vsel %vm7946_vm5, %v7932_v51, %v10617_v33  ;;  %v7950_v24 = vsel %vm7946_vm5, %v7933_v57, %v10618_v2  ;;  %v10621_v0 = vpop.permute.xlu0 %10620  ;;  %v10628_v17 = vunpack.i.h.bf16 %v10626_v47  ;;  %v10627_v6 = vunpack.i.l.bf16 %v10626_v47  ;;  %8009 = vxpose.xlu0.b32.cont [14/16] (narrow) %v7993_v18, 16  ;;  %v11232_v16 = vpop.eup %11231  ;;  %v7995_v33 = vld [vmem:[%s15104_s6 + $0x78] sm:$0xff] }
 0xab1   : > { %v10405_v46 = vpack.c.bf16 %v7950_v24, %v7949_v26  ;;  %v10623_v3 = vunpack.i.h.bf16 %v10621_v0  ;;  %v10622_v52 = vunpack.i.l.bf16 %v10621_v0  ;;  %v7711_v7 = vmul.f32 %v11230_v39, %v14870_v43  ;;  %v11234_v51 = vpop.eup %11233 }
 0xab2   : > { %11243 = vrcp.f32 %v7668_v12  ;;  %v7669_v57 = vadd.f32 1.0, %v11232_v16  ;;  %v7714_v5 = vmul.f32 %v11234_v51, %v14887_v4 }
 0xab3   : > { %10407 = vmatprep.subr.msk.bf16.mxu1 %vm15153_vm7, %v10405_v46  ;;  %v7917_v29 = vsel %vm2429_vm14, %v7709_v41, %v10622_v52  ;;  %v7918_v10 = vsel %vm2429_vm14, %v7710_v54, %v10623_v3  ;;  %11245 = vrcp.f32 %v7670_v32 }
 0xab4   : > { %10410 = vmatpush3.bf16.msk.msra.mxu1 %vm15153_vm7, %v10405_v46  ;;  %v10631_v48 = vpop.permute.xlu0 %10630  ;;  %v7934_v8 = vsel %vm7929_vm2, %v7917_v29, %v10627_v6  ;;  %v7935_v44 = vsel %vm7929_vm2, %v7918_v10, %v10628_v17  ;;  %8010 = vxpose.xlu0.b32.cont [15/16] (narrow) %v7994_v58, 16  ;;  %11247 = vrcp.f32 %v7669_v57 }
 0xab5   : > { %v10636_v37 = vpop.permute.xlu1 %10635  ;;  %v10633_v25 = vunpack.i.h.bf16 %v10631_v48  ;;  %v10632_v61 = vunpack.i.l.bf16 %v10631_v48 }
 0xab6   : > { %v10638_v31 = vunpack.i.h.bf16 %v10636_v37  ;;  %v10637_v11 = vunpack.i.l.bf16 %v10636_v37  ;;  %v11236_v43 = vpop.eup %11235 }
 0xab7   : > { %v7951_v36 = vsel %vm7946_vm5, %v7934_v8, %v10632_v61  ;;  %v7952_v14 = vsel %vm7946_vm5, %v7935_v44, %v10633_v25  ;;  %v11238_v26 = vpop.eup %11237  ;;  %v7713_v18 = vmul.f32 %v11236_v43, %v14880_v63 }
 0xab8   : > { %v10411_v21 = vpack.c.bf16 %v7952_v14, %v7951_v36  ;;  %v10641_v19 = vpop.permute.xlu0 %10640  ;;  %v7919_v55 = vsel %vm2429_vm14, %v7711_v7, %v10637_v11  ;;  %v7920_v15 = vsel %vm2429_vm14, %v7712_v49, %v10638_v31  ;;  %8011 = vxpose.xlu0.b32.end [16/16] (narrow) %v7995_v33, 16  ;;  %v11240_v23 = vpop.eup %11239  ;;  %v7672_v52 = vadd.f32 1.0, %v11238_v26 }
 0xab9   : > { %v10646_v2 = vpop.permute.xlu1 %10645  ;;  %v10643_v42 = vunpack.i.h.bf16 %v10641_v19  ;;  %v10642_v59 = vunpack.i.l.bf16 %v10641_v19  ;;  %v11242_v54 = vpop.eup %11241  ;;  %v7671_v20 = vadd.f32 1.0, %v11240_v23 }
 0xaba   : > { %v10648_v38 = vunpack.i.h.bf16 %v10646_v2  ;;  %v10647_v27 = vunpack.i.l.bf16 %v10646_v2  ;;  %10413 = vmatprep.subr.msk.bf16.mxu1 %vm15153_vm7, %v10411_v21  ;;  %11249 = vrcp.f32 %v7672_v52  ;;  %v7715_v1 = vmul.f32 %v11242_v54, %v14890_v60 }
 0xabb   : > { %10416 = vmatpush3.bf16.msk.msra.mxu1 %vm15153_vm7, %v10411_v21  ;;  %v7936_v53 = vsel %vm7929_vm2, %v7919_v55, %v10642_v59  ;;  %v7937_v40 = vsel %vm7929_vm2, %v7920_v15, %v10643_v42  ;;  %11251 = vrcp.f32 %v7671_v20 }
 0xabc   : > { %v7953_v24 = vsel %vm7946_vm5, %v7936_v53, %v10647_v27  ;;  %v7954_v28 = vsel %vm7946_vm5, %v7937_v40, %v10648_v38  ;;  %v10651_v22 = vpop.permute.xlu0 %10650  ;;  %v11244_v10 = vpop.eup %11243 }
 0xabd   : > { %v10656_v47 = vpop.permute.xlu1 %10655  ;;  %v10417_v46 = vpack.c.bf16 %v7954_v28, %v7953_v24  ;;  %v10653_v0 = vunpack.i.h.bf16 %v10651_v22  ;;  %v10652_v3 = vunpack.i.l.bf16 %v10651_v22  ;;  %v7716_v12 = vmul.f32 %v11244_v10, %v14897_v62  ;;  %v11246_v36 = vpop.eup %11245 }
 0xabe   : > { %v10658_v9 = vunpack.i.h.bf16 %v10656_v47  ;;  %v10657_v41 = vunpack.i.l.bf16 %v10656_v47  ;;  %v11248_v21 = vpop.eup %11247  ;;  %v7718_v38 = vmul.f32 %v11246_v36, %v14907_v13 }
 0xabf   : > { %10419 = vmatprep.subr.msk.bf16.mxu1 %vm15153_vm7, %v10417_v46  ;;  %v7921_v17 = vsel %vm2429_vm14, %v7713_v18, %v10652_v3  ;;  %v7922_v6 = vsel %vm2429_vm14, %v7714_v5, %v10653_v0  ;;  %v7717_v59 = vmul.f32 %v11248_v21, %v14900_v34 }
 0xac0   : > { %10422 = vmatpush3.bf16.msk.msra.mxu1 %vm15153_vm7, %v10417_v46  ;;  %v10661_v29 = vpop.permute.xlu0 %10660  ;;  %v7938_v48 = vsel %vm7929_vm2, %v7921_v17, %v10657_v41  ;;  %v7939_v58 = vsel %vm7929_vm2, %v7922_v6, %v10658_v9 }
 0xac1   : > { %v10666_v37 = vpop.permute.xlu1 %10665  ;;  %v10663_v63 = vunpack.i.h.bf16 %v10661_v29  ;;  %v10662_v4 = vunpack.i.l.bf16 %v10661_v29 }
 0xac2   : > { %v10668_v30 = vunpack.i.h.bf16 %v10666_v37  ;;  %v10667_v35 = vunpack.i.l.bf16 %v10666_v37 }
 0xac3   : > { %v7955_v25 = vsel %vm7946_vm5, %v7938_v48, %v10662_v4  ;;  %v7956_v61 = vsel %vm7946_vm5, %v7939_v58, %v10663_v63 }
 0xac4   : > { %v10423_v8 = vpack.c.bf16 %v7956_v61, %v7955_v25  ;;  %v10671_v11 = vpop.permute.xlu0 %10670  ;;  %v7923_v2 = vsel %vm2429_vm14, %v7715_v1, %v10667_v35  ;;  %v7924_v33 = vsel %vm2429_vm14, %v7716_v12, %v10668_v30  ;;  %v11250_v15 = vpop.eup %11249 }
 0xac5   : > { %v10676_v39 = vpop.permute.xlu1 %10675  ;;  %v10673_v14 = vunpack.i.h.bf16 %v10671_v11  ;;  %v10672_v16 = vunpack.i.l.bf16 %v10671_v11  ;;  %v11252_v47 = vpop.eup %11251  ;;  %v7720_v3 = vmul.f32 %v11250_v15, %v14917_v56 }
 0xac6   : > { %v10678_v44 = vunpack.i.h.bf16 %v10676_v39  ;;  %v10677_v31 = vunpack.i.l.bf16 %v10676_v39  ;;  %10425 = vmatprep.subr.msk.bf16.mxu1 %vm15153_vm7, %v10423_v8  ;;  %v7719_v5 = vmul.f32 %v11252_v47, %v14910_v50 }
 0xac7   : > { %v7940_v60 = vsel %vm7929_vm2, %v7923_v2, %v10672_v16  ;;  %v7941_v7 = vsel %vm7929_vm2, %v7924_v33, %v10673_v14  ;;  %10428 = vmatpush3.bf16.msk.msra.mxu1 %vm15153_vm7, %v10423_v8 }
 0xac8   : > { %v10681_v49 = vpop.permute.xlu0 %10680  ;;  %v7957_v27 = vsel %vm7946_vm5, %v7940_v60, %v10677_v31  ;;  %v7958_v19 = vsel %vm7946_vm5, %v7941_v7, %v10678_v44 }
 0xac9   : > { %v10686_v62 = vpop.permute.xlu1 %10685  ;;  %v10683_v32 = vunpack.i.h.bf16 %v10681_v49  ;;  %v10682_v42 = vunpack.i.l.bf16 %v10681_v49  ;;  %v10429_v51 = vpack.c.bf16 %v7958_v19, %v7957_v27 }
 0xaca   : > { %v10688_v57 = vunpack.i.h.bf16 %v10686_v62  ;;  %v10687_v55 = vunpack.i.l.bf16 %v10686_v62 }
 0xacb   : > { %v7925_v43 = vsel %vm2429_vm14, %v7717_v59, %v10682_v42  ;;  %v7926_v53 = vsel %vm2429_vm14, %v7718_v38, %v10683_v32  ;;  %10431 = vmatprep.subr.msk.bf16.mxu1 %vm15153_vm7, %v10429_v51 }
 0xacc   : > { %v10691_v40 = vpop.permute.xlu0 %10690  ;;  %10434 = vmatpush3.bf16.msk.msra.mxu1 %vm15153_vm7, %v10429_v51  ;;  %v7942_v34 = vsel %vm7929_vm2, %v7925_v43, %v10687_v55  ;;  %v7943_v28 = vsel %vm7929_vm2, %v7926_v53, %v10688_v57 }
 0xacd   : > { %v10696_v13 = vpop.permute.xlu1 %10695  ;;  %v10693_v26 = vunpack.i.h.bf16 %v10691_v40  ;;  %v10692_v24 = vunpack.i.l.bf16 %v10691_v40 }
 0xace   : > { %v10698_v22 = vunpack.i.h.bf16 %v10696_v13  ;;  %v10697_v46 = vunpack.i.l.bf16 %v10696_v13 }
 0xacf   : > { %v7959_v23 = vsel %vm7946_vm5, %v7942_v34, %v10692_v24  ;;  %v7960_v0 = vsel %vm7946_vm5, %v7943_v28, %v10693_v26 }
 0xad0   : > { %v10435_v18 = vpack.c.bf16 %v7960_v0, %v7959_v23  ;;  %v10701_v9 = vpop.permute.xlu0 %10700  ;;  %v7928_v6 = vsel %vm2429_vm14, %v7720_v3, %v10698_v22  ;;  %v7927_v37 = vsel %vm2429_vm14, %v7719_v5, %v10697_v46 }
 0xad1   : > { %v10706_v52 = vpop.permute.xlu1 %10705  ;;  %v10703_v20 = vunpack.i.h.bf16 %v10701_v9  ;;  %v10702_v17 = vunpack.i.l.bf16 %v10701_v9 }
 0xad2   : > { %v10708_v41 = vunpack.i.h.bf16 %v10706_v52  ;;  %v10707_v54 = vunpack.i.l.bf16 %v10706_v52  ;;  %10437 = vmatprep.subr.msk.bf16.mxu1 %vm15153_vm7, %v10435_v18 }
 0xad3   : > { %v7944_v29 = vsel %vm7929_vm2, %v7927_v37, %v10702_v17  ;;  %v7945_v56 = vsel %vm7929_vm2, %v7928_v6, %v10703_v20  ;;  %10440 = vmatpush3.bf16.msk.msra.mxu1 %vm15153_vm7, %v10435_v18 }
 0xad4   : > { %v7961_v50 = vsel %vm7946_vm5, %v7944_v29, %v10707_v54  ;;  %v7962_v10 = vsel %vm7946_vm5, %v7945_v56, %v10708_v41 }
 0xad5   : > { %v10441_v63 = vpack.c.bf16 %v7962_v10, %v7961_v50 }
 0xad7   : > { %10443 = vmatprep.subr.msk.bf16.mxu1 %vm15153_vm7, %v10441_v63 }
 0xad8   : > { %10446 = vmatpush3.bf16.msk.msra.mxu1 %vm15153_vm7, %v10441_v63 }
 0xafc   : > { %v8012_v4 = vpop.trf.xlu0 }
 0xafd   : > { %10308 = vmatprep.mubr.f32.mxu1 %v8012_v4 }
 0xb00   : > { %v8013_v30 = vpop.trf.xlu0 }
 0xb01   : > { %10309 = vmatmul.mubr.f32.vlgmr.msra.gmra.mrb[182].mxu1 %v8013_v30 }
 0xbcf   : > { %8106 = sbr.rel (%p8891_p8) target bundleno = 3031 (0xbd7), region = 44 }
 0xbd4   : > { %v10310_v35 = vpop.f32.mrb[182].mxu1 }
 0xbd5   : > { %v8094_v48 = vpop.f32.mrb[183].mxu1  ;;  %8108 = vst [vmem:[%s11477_s14 + $0x8] sm:$0xff] (!%p8891_p8), %v10310_v35 }
 0xbd6   : > { %8107 = vst [vmem:[%s11477_s14] sm:$0xff] %v8094_v48 }
 0xbd7 PF: > { %p8892_p9 = scmp.eq.s32.totalorder %s11371_s18, 0 }
 0xbd9   : > { %8112 = sbr.rel (%p8892_p9) target bundleno = 3041 (0xbe1), region = 48 }
 0xbdd   : > { %v8113_v45 = vld [vmem:[%s11477_s14] sm:$0xff] (!%p8892_p9)  ;;  %v8114_v58 = vld [vmem:[%s11477_s14 + $0x8] sm:$0xff] (!%p8892_p9) }
 0xbde   : > { %v8115_v1 = vadd.f32 (!%p8892_p9), %v8113_v45, %v8094_v48  ;;  %v8116_v25 = vadd.f32 (!%p8892_p9), %v10310_v35, %v8114_v58 }
 0xbe0   : > { %8117 = vst [vmem:[%s11477_s14] sm:$0xff] %v8115_v1  ;;  %8118 = vst [vmem:[%s11477_s14 + $0x8] sm:$0xff] %v8116_v25 }
 0xbe1 PF: > { %s15_s22 = sadd.s32 1, %s11387_s22   ;;  %s15795_s18 = smov %s11379_s20 }
 0xbe2   : > { %p12_p10 = scmp.ge.s32.totalorder %s15_s22, 6   ;;  %s15796_s19 = smov %s11383_s21 }
 0xbe3   : > { %s15797_s20 = smov %s15800_s23  ;;  %s15798_s21 = smov %s15804_s24 }
 0xbe4   :  { %14 = sbr.rel (!%p12_p10) target bundleno = 3 (0x3), region = 87 }

</bundles_post_ra>
